<compile_context>
chip_gen: v7x
topology: tpu7x:2x2x1
jax: 0.10.0
libtpu: 0.0.40
codegen_flags: <defaults>
</compile_context>

<pallas_src>
import jax
import jax.numpy as jnp
from jax.experimental import pallas as pl
from jax.experimental.pallas import tpu as pltpu

# ---- module hyper-parameters (defaults from FlowPointContrast.__init__) ----
FLOW_THR, COLOR_THR, PROX_THR = 0.8, 0.7, 0.5
FLOW_W, COLOR_W, PROX_W, SAM_W = 1.0, 1.0, 1.0, 1.0
GAMMA, ETA, NU = 5.0, 1.0, 1.0
SIGMA = 0.1
TEMPERATURE = 0.07

INV_SQRT3 = 3.0 ** -0.5
INV_2SIG2 = 1.0 / (2.0 * SIGMA * SIGMA)


def _gram(a, b):
    # a: (n, d), b: (m, d) -> a @ b.T : (n, m)  (MXU, f32 accumulate)
    return jax.lax.dot_general(
        a, b, (((1,), (1,)), ((), ())), preferred_element_type=jnp.float32)


def _fpc_kernel(xr_ref, x_ref, samc_ref, samr_ref,
                w1_ref, b1_ref, w2_ref, b2_ref,
                out_ref, fa_ref, ca_ref, pa_ref, sa_ref, va_ref):
    r = pl.program_id(1)
    n_all = x_ref.shape[1]                      # points per sample (columns)

    @pl.when(r == 0)
    def _init():                                # reset accumulators per sample
        for acc in (fa_ref, ca_ref, pa_ref, sa_ref, va_ref):
            acc[...] = jnp.zeros_like(acc)

    w1 = w1_ref[...]
    b1 = b1_ref[...]
    w2 = w2_ref[...]
    b2 = b2_ref[...]

    # ---- synthetic backbone: 2-layer MLP + L2 normalization ----------------
    # TODO(synk): real `build_model(backbone)` replaced by a fixed 2-layer MLP.
    def features(xin):
        h = jnp.maximum(
            jnp.dot(xin, w1, preferred_element_type=jnp.float32) + b1, 0.0)
        f = jnp.dot(h, w2, preferred_element_type=jnp.float32) + b2
        fsq = jnp.sum(f * f, axis=1, keepdims=True)
        return f / (jnp.sqrt(fsq) + 1e-7)       # exact: only O(n*C) divides

    x_all = x_ref[0]                            # (N, 9)  [coord|color/255|flow]
    x_row = xr_ref[0]                           # (TQ, 9) current row slab

    nf_c = features(x_all)                      # (N, C)
    nf_r = features(x_row)                      # (TQ, C)
    feat_sim = _gram(nf_r, nf_c)                # (TQ, N), shared by all losses

    pts_c, col_c, flw_c = x_all[:, 0:3], x_all[:, 3:6], x_all[:, 6:9]
    pts_r, col_r, flw_r = x_row[:, 0:3], x_row[:, 3:6], x_row[:, 6:9]
    ones3 = jnp.ones((1, 3), jnp.float32)

    def sim_contrastive(sim, tau, acc):
        # g_minus == 1 - g_plus  (sigmoid identity) -> one exp + approx recip
        g_plus = pl.reciprocal(1.0 + jnp.exp(GAMMA * (tau - sim)), approx=True)
        s_plus = feat_sim * g_plus
        s_minus = feat_sim - s_plus
        sp = jnp.sum(jnp.exp(ETA * s_plus), axis=1, keepdims=True)   # (TQ, 1)
        sm = jnp.sum(jnp.exp(-NU * s_minus), axis=1, keepdims=True)
        lpp = (jnp.log(1.0 + sp) * (1.0 / ETA)
               + jnp.log(1.0 + sm) * (1.0 / NU))
        acc[...] += jnp.sum(lpp, axis=0, keepdims=True)              # (1, 1)

    # ---- flow cosine similarity (pre-normalized -> no N^2 divide) ----------
    nflw_c = flw_c * jax.lax.rsqrt(
        jnp.sum(flw_c * flw_c, axis=1, keepdims=True) + 1e-12)
    nflw_r = flw_r * jax.lax.rsqrt(
        jnp.sum(flw_r * flw_r, axis=1, keepdims=True) + 1e-12)
    sim_contrastive(_gram(nflw_r, nflw_c), FLOW_THR, fa_ref)

    # ---- color similarity: 1 - cdist(color/255)/sqrt(3) --------------------
    c_sq_col = jnp.sum(col_r * col_r, axis=1, keepdims=True)         # (TQ, 1)
    c_sq_row = _gram(ones3, col_c * col_c)                           # (1, N)
    c_d2 = jnp.maximum(c_sq_col + c_sq_row - 2.0 * _gram(col_r, col_c), 0.0)
    sim_contrastive(1.0 - jnp.sqrt(c_d2) * INV_SQRT3, COLOR_THR, ca_ref)

    # ---- proximity similarity: exp(-cdist(points) / (2*sigma^2)) -----------
    p_sq_col = jnp.sum(pts_r * pts_r, axis=1, keepdims=True)
    p_sq_row = _gram(ones3, pts_c * pts_c)
    p_d2 = jnp.maximum(p_sq_col + p_sq_row - 2.0 * _gram(pts_r, pts_c), 0.0)
    sim_contrastive(jnp.exp(-jnp.sqrt(p_d2) * INV_2SIG2), PROX_THR, pa_ref)

    # ---- SAM masked contrastive loss (log-domain NLL: no N^2 divide) -------
    logits = feat_sim * (1.0 / TEMPERATURE)
    # float equality is exact for small integer labels (< 2^24)
    pos = (samc_ref[0] == samr_ref[0]).astype(jnp.float32)           # (TQ, N)
    exp_logits = jnp.exp(logits)
    neg_sum = jnp.sum(exp_logits * (1.0 - pos), axis=1, keepdims=True)
    nll = jnp.log(exp_logits + neg_sum) - logits                     # (TQ, N)
    pos_sum = jnp.sum(pos, axis=1, keepdims=True)                    # (TQ, 1)
    w_pos = pos * pl.reciprocal(jnp.maximum(pos_sum, 1e-6), approx=True)
    nll_pt = jnp.sum(nll * w_pos, axis=1, keepdims=True)             # (TQ, 1)
    valid = 1.0 - (pos_sum == 0.0).astype(jnp.float32)
    sa_ref[...] += jnp.sum(nll_pt * valid, axis=0, keepdims=True)
    va_ref[...] += jnp.sum(valid, axis=0, keepdims=True)

    # ---- single packed (1, 1, 4) store of all four per-sample losses -------
    inv_n = 1.0 / n_all
    sam_val = sa_ref[...] / jnp.maximum(va_ref[...], 1e-6)           # (1, 1)
    idx = jax.lax.broadcasted_iota(jnp.int32, (1, 1, 4), 2)
    out_ref[...] = jnp.where(idx == 0, fa_ref[...] * inv_n,
                   jnp.where(idx == 1, ca_ref[...] * inv_n,
                   jnp.where(idx == 2, pa_ref[...] * inv_n, sam_val)))


def _pick_row_tile(n, cap):
    if n <= cap:
        return n
    for cand in (512, 256, 128, 64, 32, 16, 8):
        if cand <= cap and n % cand == 0:
            return cand
    return n


def flow_point_contrast_forward(coord, color, flow, sam, params, row_tile_cap=512):
    """coord/color/flow: (B, N, 3) f32 ; sam: (B, N) int labels ; params = MLP."""
    B, N, _ = coord.shape
    w1, b1, w2, b2 = params
    Din = w1.shape[0]

    # single packed, lane-dense input stream: [coord | color/255 | flow]
    x = jnp.concatenate(
        [coord, color * (1.0 / 255.0), flow], axis=-1).astype(jnp.float32)
    sam_c = sam.astype(jnp.float32)[:, :, None]       # (B, N, 1)
    sam_r = sam.astype(jnp.float32)[:, None, :]       # (B, 1, N)

    tq = _pick_row_tile(N, row_tile_cap)
    n_row_tiles = N // tq

    sample_full = lambda b, r: (b, 0, 0)
    sample_rows = lambda b, r: (b, r, 0)
    shared2d = lambda b, r: (0, 0)

    # scoped-VMEM budget ~ a handful of (tq, N) f32 tiles + small vectors + slack
    vmem_limit = int(min(64 * 1024 * 1024,
                         max(32 * 1024 * 1024, 10 * tq * N * 4 + 4 * 1024 * 1024)))

    out = pl.pallas_call(
        _fpc_kernel,
        out_shape=jax.ShapeDtypeStruct((B, 1, 4), jnp.float32),
        grid_spec=pltpu.PrefetchScalarGridSpec(
            num_scalar_prefetch=0,
            grid=(B, n_row_tiles),
            in_specs=[
                pl.BlockSpec((1, tq, Din), sample_rows),   # row slab of x
                pl.BlockSpec((1, N, Din), sample_full),    # full sample (cols)
                pl.BlockSpec((1, tq, 1), sample_rows),     # sam labels (rows)
                pl.BlockSpec((1, 1, N), sample_full),      # sam labels (cols)
                pl.BlockSpec(w1.shape, shared2d),          # W1
                pl.BlockSpec(b1.shape, shared2d),          # b1
                pl.BlockSpec(w2.shape, shared2d),          # W2
                pl.BlockSpec(b2.shape, shared2d),          # b2
            ],
            out_specs=pl.BlockSpec((1, 1, 4), sample_full),
            scratch_shapes=[pltpu.VMEM((1, 1), jnp.float32) for _ in range(5)],
        ),
        compiler_params=pltpu.CompilerParams(
            dimension_semantics=("parallel", "arbitrary"),
            vmem_limit_bytes=vmem_limit),
    )(x, x, sam_c, sam_r, w1, b1, w2, b2)

    flow_loss = -jnp.mean(out[:, 0, 0])
    color_loss = -jnp.mean(out[:, 0, 1])
    prox_loss = -jnp.mean(out[:, 0, 2])
    sam_loss = jnp.mean(out[:, 0, 3])
    # TODO(synk): torch.distributed all_reduce skipped (world_size == 1).
    loss = (COLOR_W * color_loss + FLOW_W * flow_loss
            + PROX_W * prox_loss + SAM_W * sam_loss)
    return {"loss": loss}


# ------------------------- pure-JAX reference -------------------------------
def _reference_forward(coord, color, flow, sam, params):
    w1, b1, w2, b2 = params
    hp = jax.lax.Precision.HIGHEST
    x = jnp.concatenate([coord, color / 255.0, flow], axis=-1)
    feats = jnp.maximum(jnp.einsum('bnd,dh->bnh', x, w1, precision=hp) + b1, 0.0)
    feats = jnp.einsum('bnh,hc->bnc', feats, w2, precision=hp) + b2

    def per_sample(f, fl, cl, pt, lab):
        nf = f / (jnp.linalg.norm(f, axis=1, keepdims=True) + 1e-7)
        fs = jnp.matmul(nf, nf.T, precision=hp)
        fn = jnp.linalg.norm(fl, axis=-1)
        flow_sim = jnp.matmul(fl, fl.T, precision=hp) / (
            fn[:, None] * fn[None, :] + 1e-8)
        c = cl / 255.0
        cd = jnp.sqrt(jnp.sum((c[:, None, :] - c[None, :, :]) ** 2, -1))
        color_sim = 1.0 - cd / jnp.sqrt(3.0)
        pd = jnp.sqrt(jnp.sum((pt[:, None, :] - pt[None, :, :]) ** 2, -1))
        prox_sim = jnp.exp(-pd / (2 * SIGMA ** 2))

        def sim_loss(sim, tau):
            gp = 1 / (1 + jnp.exp(GAMMA * (tau - sim)))
            gm = 1 / (1 + jnp.exp(GAMMA * (sim - tau)))
            sp = jnp.sum(jnp.exp(ETA * fs * gp), axis=1)
            sm = jnp.sum(jnp.exp(-NU * fs * gm), axis=1)
            return jnp.mean(jnp.log(1 + sp) / ETA + jnp.log(1 + sm) / NU)

        logits = fs / TEMPERATURE
        pos = (lab[:, None] == lab[None, :]).astype(jnp.float32)
        neg = 1 - pos
        e = jnp.exp(logits)
        norm_e = e / (e + jnp.sum(e * neg, axis=1, keepdims=True))
        nll = -jnp.log(norm_e)
        w = pos / jnp.maximum(jnp.sum(pos, axis=1, keepdims=True), 1e-6)
        nll_p = jnp.sum(nll * w, axis=1)
        valid = 1 - (jnp.sum(pos, axis=1) == 0).astype(jnp.float32)
        wv = valid / jnp.maximum(jnp.sum(valid), 1e-6)
        sam_l = jnp.sum(nll_p * wv)
        return (sim_loss(flow_sim, FLOW_THR), sim_loss(color_sim, COLOR_THR),
                sim_loss(prox_sim, PROX_THR), sam_l)

    fls, cls, pls, sls = [], [], [], []
    for b in range(coord.shape[0]):
        a, bb, c_, d = per_sample(feats[b], flow[b], color[b], coord[b], sam[b])
        fls.append(a); cls.append(bb); pls.append(c_); sls.append(d)
    flow_loss = -jnp.mean(jnp.stack(fls))
    color_loss = -jnp.mean(jnp.stack(cls))
    prox_loss = -jnp.mean(jnp.stack(pls))
    sam_loss = jnp.mean(jnp.stack(sls))
    return (COLOR_W * color_loss + FLOW_W * flow_loss
            + PROX_W * prox_loss + SAM_W * sam_loss)


if __name__ == "__main__":
    DIN, HID, CFEAT = 9, 64, 32
    key = jax.random.PRNGKey(0)
    kp, kd1, kd2 = jax.random.split(key, 3)

    def make_inputs(k, B, N):
        ks = jax.random.split(k, 4)
        coord = jax.random.uniform(ks[0], (B, N, 3), jnp.float32, 0.0, 2.0)
        color = jax.random.uniform(ks[1], (B, N, 3), jnp.float32, 0.0, 255.0)
        flw = jax.random.normal(ks[2], (B, N, 3), jnp.float32)
        sam = jax.random.randint(ks[3], (B, N), 0, 5, jnp.int32)
        return coord, color, flw, sam

    # deterministic synthetic backbone parameters (2-layer MLP)
    kw = jax.random.split(kp, 4)
    w1 = 0.3 * jax.random.normal(kw[0], (DIN, HID), jnp.float32)
    b1 = 0.1 * jax.random.normal(kw[1], (1, HID), jnp.float32)
    w2 = 0.3 * jax.random.normal(kw[2], (HID, CFEAT), jnp.float32)
    b2 = 0.1 * jax.random.normal(kw[3], (1, CFEAT), jnp.float32)
    params = (w1, b1, w2, b2)

    # case 1: one row tile per sample (N == tile)
    coord, color, flow, sam = make_inputs(kd1, 2, 128)
    out = flow_point_contrast_forward(coord, color, flow, sam, params)
    loss = jax.block_until_ready(out["loss"])
    ref = jax.block_until_ready(_reference_forward(coord, color, flow, sam, params))
    assert bool(jnp.isfinite(loss)), "non-finite loss"
    assert bool(jnp.allclose(loss, ref, rtol=2e-2, atol=2e-2)), (loss, ref)

    # case 2: exercises flash-style row tiling (N=256 with TQ=128 -> 2 tiles)
    coord, color, flow, sam = make_inputs(kd2, 2, 256)
    out = flow_point_contrast_forward(coord, color, flow, sam, params,
                                      row_tile_cap=128)
    loss2 = jax.block_until_ready(out["loss"])
    ref2 = jax.block_until_ready(_reference_forward(coord, color, flow, sam, params))
    assert bool(jnp.isfinite(loss2)), "non-finite loss (tiled)"
    assert bool(jnp.allclose(loss2, ref2, rtol=2e-2, atol=2e-2)), (loss2, ref2)

    print("KERNEL_OK")
</pallas_src>

<mosaic_0001>
module attributes {stable_mosaic.version = 11 : i64} {
  func.func @_fpc_kernel(%arg0: i32, %arg1: i32, %arg2: memref<1x128x9xf32, #tpu.memory_space<vmem>>, %arg3: memref<1x128x9xf32, #tpu.memory_space<vmem>>, %arg4: memref<1x128x1xf32, #tpu.memory_space<vmem>>, %arg5: memref<1x1x128xf32, #tpu.memory_space<vmem>>, %arg6: memref<9x64xf32, #tpu.memory_space<vmem>>, %arg7: memref<1x64xf32, #tpu.memory_space<vmem>>, %arg8: memref<64x32xf32, #tpu.memory_space<vmem>>, %arg9: memref<1x32xf32, #tpu.memory_space<vmem>>, %arg10: memref<1x1x4xf32, #tpu.memory_space<vmem>>, %arg11: memref<1x1xf32, #tpu.memory_space<vmem>>, %arg12: memref<1x1xf32, #tpu.memory_space<vmem>>, %arg13: memref<1x1xf32, #tpu.memory_space<vmem>>, %arg14: memref<1x1xf32, #tpu.memory_space<vmem>>, %arg15: memref<1x1xf32, #tpu.memory_space<vmem>>) attributes {dimension_semantics = [#tpu.dimension_semantics<parallel>, #tpu.dimension_semantics<arbitrary>], iteration_bounds = array<i64: 2, 1>, scalar_prefetch = 0 : i64, scratch_operands = 5 : i64, tpu.core_type = #tpu.core_type<tc>, window_params = [{transform_indices = @transform_0, window_bounds = array<i64: 1, 128, 9>}, {transform_indices = @transform_1, window_bounds = array<i64: 1, 128, 9>}, {transform_indices = @transform_2, window_bounds = array<i64: 1, 128, 1>}, {transform_indices = @transform_3, window_bounds = array<i64: 1, 1, 128>}, {pipeline_mode = #tpu.pipeline_mode<synchronous>, transform_indices = @transform_4, window_bounds = array<i64: 9, 64>}, {pipeline_mode = #tpu.pipeline_mode<synchronous>, transform_indices = @transform_5, window_bounds = array<i64: 1, 64>}, {pipeline_mode = #tpu.pipeline_mode<synchronous>, transform_indices = @transform_6, window_bounds = array<i64: 64, 32>}, {pipeline_mode = #tpu.pipeline_mode<synchronous>, transform_indices = @transform_7, window_bounds = array<i64: 1, 32>}, {transform_indices = @transform_8, window_bounds = array<i64: 1, 1, 4>}]} {
    %c0_i32 = arith.constant 0 : i32
    %0 = arith.cmpi eq, %arg1, %c0_i32 : i32
    %1 = arith.extui %0 : i1 to i32
    %c0_i32_0 = arith.constant 0 : i32
    %2 = arith.cmpi ne, %1, %c0_i32_0 : i32
    scf.if %2 {
      %cst_134 = arith.constant 0.000000e+00 : f32
      %296 = vector.broadcast %cst_134 : f32 to vector<1x1xf32>
      %c0_135 = arith.constant 0 : index
      %c0_136 = arith.constant 0 : index
      %297 = vector.load %arg11[%c0_135, %c0_136] : memref<1x1xf32, #tpu.memory_space<vmem>>, vector<1x1xf32>
      tpu.vector_store %arg11[%c0_135, %c0_136], %296 {strides = array<i32>} : memref<1x1xf32, #tpu.memory_space<vmem>>, vector<1x1xf32>,
      %cst_137 = arith.constant 0.000000e+00 : f32
      %298 = vector.broadcast %cst_137 : f32 to vector<1x1xf32>
      %c0_138 = arith.constant 0 : index
      %c0_139 = arith.constant 0 : index
      %299 = vector.load %arg12[%c0_138, %c0_139] : memref<1x1xf32, #tpu.memory_space<vmem>>, vector<1x1xf32>
      tpu.vector_store %arg12[%c0_138, %c0_139], %298 {strides = array<i32>} : memref<1x1xf32, #tpu.memory_space<vmem>>, vector<1x1xf32>,
      %cst_140 = arith.constant 0.000000e+00 : f32
      %300 = vector.broadcast %cst_140 : f32 to vector<1x1xf32>
      %c0_141 = arith.constant 0 : index
      %c0_142 = arith.constant 0 : index
      %301 = vector.load %arg13[%c0_141, %c0_142] : memref<1x1xf32, #tpu.memory_space<vmem>>, vector<1x1xf32>
      tpu.vector_store %arg13[%c0_141, %c0_142], %300 {strides = array<i32>} : memref<1x1xf32, #tpu.memory_space<vmem>>, vector<1x1xf32>,
      %cst_143 = arith.constant 0.000000e+00 : f32
      %302 = vector.broadcast %cst_143 : f32 to vector<1x1xf32>
      %c0_144 = arith.constant 0 : index
      %c0_145 = arith.constant 0 : index
      %303 = vector.load %arg14[%c0_144, %c0_145] : memref<1x1xf32, #tpu.memory_space<vmem>>, vector<1x1xf32>
      tpu.vector_store %arg14[%c0_144, %c0_145], %302 {strides = array<i32>} : memref<1x1xf32, #tpu.memory_space<vmem>>, vector<1x1xf32>,
      %cst_146 = arith.constant 0.000000e+00 : f32
      %304 = vector.broadcast %cst_146 : f32 to vector<1x1xf32>
      %c0_147 = arith.constant 0 : index
      %c0_148 = arith.constant 0 : index
      %305 = vector.load %arg15[%c0_147, %c0_148] : memref<1x1xf32, #tpu.memory_space<vmem>>, vector<1x1xf32>
      tpu.vector_store %arg15[%c0_147, %c0_148], %304 {strides = array<i32>} : memref<1x1xf32, #tpu.memory_space<vmem>>, vector<1x1xf32>,
    } else {
    }
    %c0 = arith.constant 0 : index
    %c0_1 = arith.constant 0 : index
    %3 = vector.load %arg6[%c0, %c0_1] : memref<9x64xf32, #tpu.memory_space<vmem>>, vector<9x64xf32>
    %c0_2 = arith.constant 0 : index
    %c0_3 = arith.constant 0 : index
    %4 = vector.load %arg7[%c0_2, %c0_3] : memref<1x64xf32, #tpu.memory_space<vmem>>, vector<1x64xf32>
    %c0_4 = arith.constant 0 : index
    %c0_5 = arith.constant 0 : index
    %5 = vector.load %arg8[%c0_4, %c0_5] : memref<64x32xf32, #tpu.memory_space<vmem>>, vector<64x32xf32>
    %c0_6 = arith.constant 0 : index
    %c0_7 = arith.constant 0 : index
    %6 = vector.load %arg9[%c0_6, %c0_7] : memref<1x32xf32, #tpu.memory_space<vmem>>, vector<1x32xf32>
    %c0_8 = arith.constant 0 : index
    %c0_9 = arith.constant 0 : index
    %c0_10 = arith.constant 0 : index
    %7 = vector.load %arg3[%c0_8, %c0_9, %c0_10] : memref<1x128x9xf32, #tpu.memory_space<vmem>>, vector<1x128x9xf32>
    %8 = vector.shape_cast %7 : vector<1x128x9xf32> to vector<128x9xf32>
    %c0_11 = arith.constant 0 : index
    %c0_12 = arith.constant 0 : index
    %c0_13 = arith.constant 0 : index
    %9 = vector.load %arg2[%c0_11, %c0_12, %c0_13] : memref<1x128x9xf32, #tpu.memory_space<vmem>>, vector<1x128x9xf32>
    %10 = vector.shape_cast %9 : vector<1x128x9xf32> to vector<128x9xf32>
    %cst = arith.constant dense<0.000000e+00> : vector<128x64xf32>
    %11 = tpu.matmul %8, %3, %cst {dimension_numbers = #tpu.dot_dimension_numbers<[1], [0], [0], [1], [0, 0, 1, 1], [], []>} : vector<128x9xf32>, vector<9x64xf32>, vector<128x64xf32> -> vector<128x64xf32>
    %12 = vector.broadcast %4 : vector<1x64xf32> to vector<128x64xf32>
    %13 = arith.addf %11, %12 : vector<128x64xf32>
    %cst_14 = arith.constant 0.000000e+00 : f32
    %14 = vector.broadcast %cst_14 : f32 to vector<128x64xf32>
    %15 = arith.maximumf %13, %14 : vector<128x64xf32>
    %cst_15 = arith.constant dense<0.000000e+00> : vector<128x32xf32>
    %16 = tpu.matmul %15, %5, %cst_15 {dimension_numbers = #tpu.dot_dimension_numbers<[1], [0], [0], [1], [0, 0, 1, 1], [], []>} : vector<128x64xf32>, vector<64x32xf32>, vector<128x32xf32> -> vector<128x32xf32>
    %17 = vector.broadcast %6 : vector<1x32xf32> to vector<128x32xf32>
    %18 = arith.addf %16, %17 : vector<128x32xf32>
    %19 = arith.mulf %18, %18 : vector<128x32xf32>
    %cst_16 = arith.constant dense<0.000000e+00> : vector<128xf32>
    %20 = vector.multi_reduction <add>, %19, %cst_16 [1] : vector<128x32xf32> to vector<128xf32>
    %21 = vector.shape_cast %20 : vector<128xf32> to vector<128x1xf32>
    %22 = math.sqrt %21 : vector<128x1xf32>
    %cst_17 = arith.constant 1.000000e-07 : f32
    %23 = vector.broadcast %cst_17 : f32 to vector<128x1xf32>
    %24 = arith.addf %22, %23 : vector<128x1xf32>
    %25 = vector.broadcast %24 : vector<128x1xf32> to vector<128x32xf32>
    %26 = arith.divf %18, %25 : vector<128x32xf32>
    %cst_18 = arith.constant dense<0.000000e+00> : vector<128x64xf32>
    %27 = tpu.matmul %10, %3, %cst_18 {dimension_numbers = #tpu.dot_dimension_numbers<[1], [0], [0], [1], [0, 0, 1, 1], [], []>} : vector<128x9xf32>, vector<9x64xf32>, vector<128x64xf32> -> vector<128x64xf32>
    %28 = vector.broadcast %4 : vector<1x64xf32> to vector<128x64xf32>
    %29 = arith.addf %27, %28 : vector<128x64xf32>
    %cst_19 = arith.constant 0.000000e+00 : f32
    %30 = vector.broadcast %cst_19 : f32 to vector<128x64xf32>
    %31 = arith.maximumf %29, %30 : vector<128x64xf32>
    %cst_20 = arith.constant dense<0.000000e+00> : vector<128x32xf32>
    %32 = tpu.matmul %31, %5, %cst_20 {dimension_numbers = #tpu.dot_dimension_numbers<[1], [0], [0], [1], [0, 0, 1, 1], [], []>} : vector<128x64xf32>, vector<64x32xf32>, vector<128x32xf32> -> vector<128x32xf32>
    %33 = vector.broadcast %6 : vector<1x32xf32> to vector<128x32xf32>
    %34 = arith.addf %32, %33 : vector<128x32xf32>
    %35 = arith.mulf %34, %34 : vector<128x32xf32>
    %cst_21 = arith.constant dense<0.000000e+00> : vector<128xf32>
    %36 = vector.multi_reduction <add>, %35, %cst_21 [1] : vector<128x32xf32> to vector<128xf32>
    %37 = vector.shape_cast %36 : vector<128xf32> to vector<128x1xf32>
    %38 = math.sqrt %37 : vector<128x1xf32>
    %cst_22 = arith.constant 1.000000e-07 : f32
    %39 = vector.broadcast %cst_22 : f32 to vector<128x1xf32>
    %40 = arith.addf %38, %39 : vector<128x1xf32>
    %41 = vector.broadcast %40 : vector<128x1xf32> to vector<128x32xf32>
    %42 = arith.divf %34, %41 : vector<128x32xf32>
    %cst_23 = arith.constant dense<0.000000e+00> : vector<128x128xf32>
    %43 = tpu.matmul %42, %26, %cst_23 {dimension_numbers = #tpu.dot_dimension_numbers<[1], [1], [0], [0], [0, 0, 1, 0], [], []>} : vector<128x32xf32>, vector<128x32xf32>, vector<128x128xf32> -> vector<128x128xf32>
    %44 = vector.extract_strided_slice %8 {offsets = [0, 0], sizes = [128, 3], strides = [1, 1]} : vector<128x9xf32> to vector<128x3xf32>
    %45 = vector.extract_strided_slice %8 {offsets = [0, 3], sizes = [128, 3], strides = [1, 1]} : vector<128x9xf32> to vector<128x3xf32>
    %46 = vector.extract_strided_slice %8 {offsets = [0, 6], sizes = [128, 3], strides = [1, 1]} : vector<128x9xf32> to vector<128x3xf32>
    %47 = vector.extract_strided_slice %10 {offsets = [0, 0], sizes = [128, 3], strides = [1, 1]} : vector<128x9xf32> to vector<128x3xf32>
    %48 = vector.extract_strided_slice %10 {offsets = [0, 3], sizes = [128, 3], strides = [1, 1]} : vector<128x9xf32> to vector<128x3xf32>
    %49 = vector.extract_strided_slice %10 {offsets = [0, 6], sizes = [128, 3], strides = [1, 1]} : vector<128x9xf32> to vector<128x3xf32>
    %cst_24 = arith.constant 1.000000e+00 : f32
    %50 = vector.broadcast %cst_24 : f32 to vector<1x3xf32>
    %51 = arith.mulf %46, %46 : vector<128x3xf32>
    %cst_25 = arith.constant dense<0.000000e+00> : vector<128xf32>
    %52 = vector.multi_reduction <add>, %51, %cst_25 [1] : vector<128x3xf32> to vector<128xf32>
    %53 = vector.shape_cast %52 : vector<128xf32> to vector<128x1xf32>
    %cst_26 = arith.constant 9.99999996E-13 : f32
    %54 = vector.broadcast %cst_26 : f32 to vector<128x1xf32>
    %55 = arith.addf %53, %54 : vector<128x1xf32>
    %56 = math.rsqrt %55 : vector<128x1xf32>
    %57 = vector.broadcast %56 : vector<128x1xf32> to vector<128x3xf32>
    %58 = arith.mulf %46, %57 : vector<128x3xf32>
    %59 = arith.mulf %49, %49 : vector<128x3xf32>
    %cst_27 = arith.constant dense<0.000000e+00> : vector<128xf32>
    %60 = vector.multi_reduction <add>, %59, %cst_27 [1] : vector<128x3xf32> to vector<128xf32>
    %61 = vector.shape_cast %60 : vector<128xf32> to vector<128x1xf32>
    %cst_28 = arith.constant 9.99999996E-13 : f32
    %62 = vector.broadcast %cst_28 : f32 to vector<128x1xf32>
    %63 = arith.addf %61, %62 : vector<128x1xf32>
    %64 = math.rsqrt %63 : vector<128x1xf32>
    %65 = vector.broadcast %64 : vector<128x1xf32> to vector<128x3xf32>
    %66 = arith.mulf %49, %65 : vector<128x3xf32>
    %cst_29 = arith.constant dense<0.000000e+00> : vector<128x128xf32>
    %67 = tpu.matmul %66, %58, %cst_29 {dimension_numbers = #tpu.dot_dimension_numbers<[1], [1], [0], [0], [0, 0, 1, 0], [], []>} : vector<128x3xf32>, vector<128x3xf32>, vector<128x128xf32> -> vector<128x128xf32>
    %cst_30 = arith.constant 8.000000e-01 : f32
    %68 = vector.broadcast %cst_30 : f32 to vector<128x128xf32>
    %69 = arith.subf %68, %67 : vector<128x128xf32>
    %cst_31 = arith.constant 5.000000e+00 : f32
    %70 = vector.broadcast %cst_31 : f32 to vector<128x128xf32>
    %71 = arith.mulf %70, %69 : vector<128x128xf32>
    %72 = math.exp %71 : vector<128x128xf32>
    %cst_32 = arith.constant 1.000000e+00 : f32
    %73 = vector.broadcast %cst_32 : f32 to vector<128x128xf32>
    %74 = arith.addf %73, %72 : vector<128x128xf32>
    %75 = tpu.reciprocal %74 {approx = true} : vector<128x128xf32> -> vector<128x128xf32>
    %76 = arith.mulf %43, %75 : vector<128x128xf32>
    %77 = arith.subf %43, %76 : vector<128x128xf32>
    %cst_33 = arith.constant 1.000000e+00 : f32
    %78 = vector.broadcast %cst_33 : f32 to vector<128x128xf32>
    %79 = arith.mulf %78, %76 : vector<128x128xf32>
    %80 = math.exp %79 : vector<128x128xf32>
    %cst_34 = arith.constant dense<0.000000e+00> : vector<128xf32>
    %81 = vector.multi_reduction <add>, %80, %cst_34 [1] : vector<128x128xf32> to vector<128xf32>
    %82 = vector.shape_cast %81 : vector<128xf32> to vector<128x1xf32>
    %cst_35 = arith.constant -1.000000e+00 : f32
    %83 = vector.broadcast %cst_35 : f32 to vector<128x128xf32>
    %84 = arith.mulf %83, %77 : vector<128x128xf32>
    %85 = math.exp %84 : vector<128x128xf32>
    %cst_36 = arith.constant dense<0.000000e+00> : vector<128xf32>
    %86 = vector.multi_reduction <add>, %85, %cst_36 [1] : vector<128x128xf32> to vector<128xf32>
    %87 = vector.shape_cast %86 : vector<128xf32> to vector<128x1xf32>
    %cst_37 = arith.constant 1.000000e+00 : f32
    %88 = vector.broadcast %cst_37 : f32 to vector<128x1xf32>
    %89 = arith.addf %88, %82 : vector<128x1xf32>
    %90 = math.log %89 : vector<128x1xf32>
    %cst_38 = arith.constant 1.000000e+00 : f32
    %91 = vector.broadcast %cst_38 : f32 to vector<128x1xf32>
    %92 = arith.mulf %90, %91 : vector<128x1xf32>
    %cst_39 = arith.constant 1.000000e+00 : f32
    %93 = vector.broadcast %cst_39 : f32 to vector<128x1xf32>
    %94 = arith.addf %93, %87 : vector<128x1xf32>
    %95 = math.log %94 : vector<128x1xf32>
    %cst_40 = arith.constant 1.000000e+00 : f32
    %96 = vector.broadcast %cst_40 : f32 to vector<128x1xf32>
    %97 = arith.mulf %95, %96 : vector<128x1xf32>
    %98 = arith.addf %92, %97 : vector<128x1xf32>
    %c0_41 = arith.constant 0 : index
    %c0_42 = arith.constant 0 : index
    %99 = vector.load %arg11[%c0_41, %c0_42] : memref<1x1xf32, #tpu.memory_space<vmem>>, vector<1x1xf32>
    %cst_43 = arith.constant dense<0.000000e+00> : vector<1xf32>
    %100 = vector.multi_reduction <add>, %98, %cst_43 [0] : vector<128x1xf32> to vector<1xf32>
    %101 = vector.shape_cast %100 : vector<1xf32> to vector<1x1xf32>
    %102 = arith.addf %99, %101 : vector<1x1xf32>
    %c0_44 = arith.constant 0 : index
    %c0_45 = arith.constant 0 : index
    %103 = vector.load %arg11[%c0_44, %c0_45] : memref<1x1xf32, #tpu.memory_space<vmem>>, vector<1x1xf32>
    tpu.vector_store %arg11[%c0_44, %c0_45], %102 {strides = array<i32>} : memref<1x1xf32, #tpu.memory_space<vmem>>, vector<1x1xf32>,
    %104 = arith.mulf %48, %48 : vector<128x3xf32>
    %cst_46 = arith.constant dense<0.000000e+00> : vector<128xf32>
    %105 = vector.multi_reduction <add>, %104, %cst_46 [1] : vector<128x3xf32> to vector<128xf32>
    %106 = vector.shape_cast %105 : vector<128xf32> to vector<128x1xf32>
    %107 = arith.mulf %45, %45 : vector<128x3xf32>
    %cst_47 = arith.constant dense<0.000000e+00> : vector<1x128xf32>
    %108 = tpu.matmul %50, %107, %cst_47 {dimension_numbers = #tpu.dot_dimension_numbers<[1], [1], [0], [0], [0, 0, 1, 0], [], []>} : vector<1x3xf32>, vector<128x3xf32>, vector<1x128xf32> -> vector<1x128xf32>
    %109 = vector.broadcast %106 : vector<128x1xf32> to vector<128x128xf32>
    %110 = vector.broadcast %108 : vector<1x128xf32> to vector<128x128xf32>
    %111 = arith.addf %109, %110 : vector<128x128xf32>
    %cst_48 = arith.constant dense<0.000000e+00> : vector<128x128xf32>
    %112 = tpu.matmul %48, %45, %cst_48 {dimension_numbers = #tpu.dot_dimension_numbers<[1], [1], [0], [0], [0, 0, 1, 0], [], []>} : vector<128x3xf32>, vector<128x3xf32>, vector<128x128xf32> -> vector<128x128xf32>
    %cst_49 = arith.constant 2.000000e+00 : f32
    %113 = vector.broadcast %cst_49 : f32 to vector<128x128xf32>
    %114 = arith.mulf %113, %112 : vector<128x128xf32>
    %115 = arith.subf %111, %114 : vector<128x128xf32>
    %cst_50 = arith.constant 0.000000e+00 : f32
    %116 = vector.broadcast %cst_50 : f32 to vector<128x128xf32>
    %117 = arith.maximumf %115, %116 : vector<128x128xf32>
    %118 = math.sqrt %117 : vector<128x128xf32>
    %cst_51 = arith.constant 0.577350259 : f32
    %119 = vector.broadcast %cst_51 : f32 to vector<128x128xf32>
    %120 = arith.mulf %118, %119 : vector<128x128xf32>
    %cst_52 = arith.constant 1.000000e+00 : f32
    %121 = vector.broadcast %cst_52 : f32 to vector<128x128xf32>
    %122 = arith.subf %121, %120 : vector<128x128xf32>
    %cst_53 = arith.constant 0.699999988 : f32
    %123 = vector.broadcast %cst_53 : f32 to vector<128x128xf32>
    %124 = arith.subf %123, %122 : vector<128x128xf32>
    %cst_54 = arith.constant 5.000000e+00 : f32
    %125 = vector.broadcast %cst_54 : f32 to vector<128x128xf32>
    %126 = arith.mulf %125, %124 : vector<128x128xf32>
    %127 = math.exp %126 : vector<128x128xf32>
    %cst_55 = arith.constant 1.000000e+00 : f32
    %128 = vector.broadcast %cst_55 : f32 to vector<128x128xf32>
    %129 = arith.addf %128, %127 : vector<128x128xf32>
    %130 = tpu.reciprocal %129 {approx = true} : vector<128x128xf32> -> vector<128x128xf32>
    %131 = arith.mulf %43, %130 : vector<128x128xf32>
    %132 = arith.subf %43, %131 : vector<128x128xf32>
    %cst_56 = arith.constant 1.000000e+00 : f32
    %133 = vector.broadcast %cst_56 : f32 to vector<128x128xf32>
    %134 = arith.mulf %133, %131 : vector<128x128xf32>
    %135 = math.exp %134 : vector<128x128xf32>
    %cst_57 = arith.constant dense<0.000000e+00> : vector<128xf32>
    %136 = vector.multi_reduction <add>, %135, %cst_57 [1] : vector<128x128xf32> to vector<128xf32>
    %137 = vector.shape_cast %136 : vector<128xf32> to vector<128x1xf32>
    %cst_58 = arith.constant -1.000000e+00 : f32
    %138 = vector.broadcast %cst_58 : f32 to vector<128x128xf32>
    %139 = arith.mulf %138, %132 : vector<128x128xf32>
    %140 = math.exp %139 : vector<128x128xf32>
    %cst_59 = arith.constant dense<0.000000e+00> : vector<128xf32>
    %141 = vector.multi_reduction <add>, %140, %cst_59 [1] : vector<128x128xf32> to vector<128xf32>
    %142 = vector.shape_cast %141 : vector<128xf32> to vector<128x1xf32>
    %cst_60 = arith.constant 1.000000e+00 : f32
    %143 = vector.broadcast %cst_60 : f32 to vector<128x1xf32>
    %144 = arith.addf %143, %137 : vector<128x1xf32>
    %145 = math.log %144 : vector<128x1xf32>
    %cst_61 = arith.constant 1.000000e+00 : f32
    %146 = vector.broadcast %cst_61 : f32 to vector<128x1xf32>
    %147 = arith.mulf %145, %146 : vector<128x1xf32>
    %cst_62 = arith.constant 1.000000e+00 : f32
    %148 = vector.broadcast %cst_62 : f32 to vector<128x1xf32>
    %149 = arith.addf %148, %142 : vector<128x1xf32>
    %150 = math.log %149 : vector<128x1xf32>
    %cst_63 = arith.constant 1.000000e+00 : f32
    %151 = vector.broadcast %cst_63 : f32 to vector<128x1xf32>
    %152 = arith.mulf %150, %151 : vector<128x1xf32>
    %153 = arith.addf %147, %152 : vector<128x1xf32>
    %c0_64 = arith.constant 0 : index
    %c0_65 = arith.constant 0 : index
    %154 = vector.load %arg12[%c0_64, %c0_65] : memref<1x1xf32, #tpu.memory_space<vmem>>, vector<1x1xf32>
    %cst_66 = arith.constant dense<0.000000e+00> : vector<1xf32>
    %155 = vector.multi_reduction <add>, %153, %cst_66 [0] : vector<128x1xf32> to vector<1xf32>
    %156 = vector.shape_cast %155 : vector<1xf32> to vector<1x1xf32>
    %157 = arith.addf %154, %156 : vector<1x1xf32>
    %c0_67 = arith.constant 0 : index
    %c0_68 = arith.constant 0 : index
    %158 = vector.load %arg12[%c0_67, %c0_68] : memref<1x1xf32, #tpu.memory_space<vmem>>, vector<1x1xf32>
    tpu.vector_store %arg12[%c0_67, %c0_68], %157 {strides = array<i32>} : memref<1x1xf32, #tpu.memory_space<vmem>>, vector<1x1xf32>,
    %159 = arith.mulf %47, %47 : vector<128x3xf32>
    %cst_69 = arith.constant dense<0.000000e+00> : vector<128xf32>
    %160 = vector.multi_reduction <add>, %159, %cst_69 [1] : vector<128x3xf32> to vector<128xf32>
    %161 = vector.shape_cast %160 : vector<128xf32> to vector<128x1xf32>
    %162 = arith.mulf %44, %44 : vector<128x3xf32>
    %cst_70 = arith.constant dense<0.000000e+00> : vector<1x128xf32>
    %163 = tpu.matmul %50, %162, %cst_70 {dimension_numbers = #tpu.dot_dimension_numbers<[1], [1], [0], [0], [0, 0, 1, 0], [], []>} : vector<1x3xf32>, vector<128x3xf32>, vector<1x128xf32> -> vector<1x128xf32>
    %164 = vector.broadcast %161 : vector<128x1xf32> to vector<128x128xf32>
    %165 = vector.broadcast %163 : vector<1x128xf32> to vector<128x128xf32>
    %166 = arith.addf %164, %165 : vector<128x128xf32>
    %cst_71 = arith.constant dense<0.000000e+00> : vector<128x128xf32>
    %167 = tpu.matmul %47, %44, %cst_71 {dimension_numbers = #tpu.dot_dimension_numbers<[1], [1], [0], [0], [0, 0, 1, 0], [], []>} : vector<128x3xf32>, vector<128x3xf32>, vector<128x128xf32> -> vector<128x128xf32>
    %cst_72 = arith.constant 2.000000e+00 : f32
    %168 = vector.broadcast %cst_72 : f32 to vector<128x128xf32>
    %169 = arith.mulf %168, %167 : vector<128x128xf32>
    %170 = arith.subf %166, %169 : vector<128x128xf32>
    %cst_73 = arith.constant 0.000000e+00 : f32
    %171 = vector.broadcast %cst_73 : f32 to vector<128x128xf32>
    %172 = arith.maximumf %170, %171 : vector<128x128xf32>
    %173 = math.sqrt %172 : vector<128x128xf32>
    %cst_74 = arith.constant 0.000000e+00 : f32
    %174 = vector.broadcast %cst_74 : f32 to vector<128x128xf32>
    %175 = arith.subf %174, %173 : vector<128x128xf32>
    %cst_75 = arith.constant 5.000000e+01 : f32
    %176 = vector.broadcast %cst_75 : f32 to vector<128x128xf32>
    %177 = arith.mulf %175, %176 : vector<128x128xf32>
    %178 = math.exp %177 : vector<128x128xf32>
    %cst_76 = arith.constant 5.000000e-01 : f32
    %179 = vector.broadcast %cst_76 : f32 to vector<128x128xf32>
    %180 = arith.subf %179, %178 : vector<128x128xf32>
    %cst_77 = arith.constant 5.000000e+00 : f32
    %181 = vector.broadcast %cst_77 : f32 to vector<128x128xf32>
    %182 = arith.mulf %181, %180 : vector<128x128xf32>
    %183 = math.exp %182 : vector<128x128xf32>
    %cst_78 = arith.constant 1.000000e+00 : f32
    %184 = vector.broadcast %cst_78 : f32 to vector<128x128xf32>
    %185 = arith.addf %184, %183 : vector<128x128xf32>
    %186 = tpu.reciprocal %185 {approx = true} : vector<128x128xf32> -> vector<128x128xf32>
    %187 = arith.mulf %43, %186 : vector<128x128xf32>
    %188 = arith.subf %43, %187 : vector<128x128xf32>
    %cst_79 = arith.constant 1.000000e+00 : f32
    %189 = vector.broadcast %cst_79 : f32 to vector<128x128xf32>
    %190 = arith.mulf %189, %187 : vector<128x128xf32>
    %191 = math.exp %190 : vector<128x128xf32>
    %cst_80 = arith.constant dense<0.000000e+00> : vector<128xf32>
    %192 = vector.multi_reduction <add>, %191, %cst_80 [1] : vector<128x128xf32> to vector<128xf32>
    %193 = vector.shape_cast %192 : vector<128xf32> to vector<128x1xf32>
    %cst_81 = arith.constant -1.000000e+00 : f32
    %194 = vector.broadcast %cst_81 : f32 to vector<128x128xf32>
    %195 = arith.mulf %194, %188 : vector<128x128xf32>
    %196 = math.exp %195 : vector<128x128xf32>
    %cst_82 = arith.constant dense<0.000000e+00> : vector<128xf32>
    %197 = vector.multi_reduction <add>, %196, %cst_82 [1] : vector<128x128xf32> to vector<128xf32>
    %198 = vector.shape_cast %197 : vector<128xf32> to vector<128x1xf32>
    %cst_83 = arith.constant 1.000000e+00 : f32
    %199 = vector.broadcast %cst_83 : f32 to vector<128x1xf32>
    %200 = arith.addf %199, %193 : vector<128x1xf32>
    %201 = math.log %200 : vector<128x1xf32>
    %cst_84 = arith.constant 1.000000e+00 : f32
    %202 = vector.broadcast %cst_84 : f32 to vector<128x1xf32>
    %203 = arith.mulf %201, %202 : vector<128x1xf32>
    %cst_85 = arith.constant 1.000000e+00 : f32
    %204 = vector.broadcast %cst_85 : f32 to vector<128x1xf32>
    %205 = arith.addf %204, %198 : vector<128x1xf32>
    %206 = math.log %205 : vector<128x1xf32>
    %cst_86 = arith.constant 1.000000e+00 : f32
    %207 = vector.broadcast %cst_86 : f32 to vector<128x1xf32>
    %208 = arith.mulf %206, %207 : vector<128x1xf32>
    %209 = arith.addf %203, %208 : vector<128x1xf32>
    %c0_87 = arith.constant 0 : index
    %c0_88 = arith.constant 0 : index
    %210 = vector.load %arg13[%c0_87, %c0_88] : memref<1x1xf32, #tpu.memory_space<vmem>>, vector<1x1xf32>
    %cst_89 = arith.constant dense<0.000000e+00> : vector<1xf32>
    %211 = vector.multi_reduction <add>, %209, %cst_89 [0] : vector<128x1xf32> to vector<1xf32>
    %212 = vector.shape_cast %211 : vector<1xf32> to vector<1x1xf32>
    %213 = arith.addf %210, %212 : vector<1x1xf32>
    %c0_90 = arith.constant 0 : index
    %c0_91 = arith.constant 0 : index
    %214 = vector.load %arg13[%c0_90, %c0_91] : memref<1x1xf32, #tpu.memory_space<vmem>>, vector<1x1xf32>
    tpu.vector_store %arg13[%c0_90, %c0_91], %213 {strides = array<i32>} : memref<1x1xf32, #tpu.memory_space<vmem>>, vector<1x1xf32>,
    %cst_92 = arith.constant 14.2857141 : f32
    %215 = vector.broadcast %cst_92 : f32 to vector<128x128xf32>
    %216 = arith.mulf %43, %215 : vector<128x128xf32>
    %c0_93 = arith.constant 0 : index
    %c0_94 = arith.constant 0 : index
    %c0_95 = arith.constant 0 : index
    %217 = vector.load %arg4[%c0_93, %c0_94, %c0_95] : memref<1x128x1xf32, #tpu.memory_space<vmem>>, vector<1x128x1xf32>
    %218 = vector.shape_cast %217 : vector<1x128x1xf32> to vector<128x1xf32>
    %c0_96 = arith.constant 0 : index
    %c0_97 = arith.constant 0 : index
    %c0_98 = arith.constant 0 : index
    %219 = vector.load %arg5[%c0_96, %c0_97, %c0_98] : memref<1x1x128xf32, #tpu.memory_space<vmem>>, vector<1x1x128xf32>
    %220 = vector.shape_cast %219 : vector<1x1x128xf32> to vector<1x128xf32>
    %221 = vector.broadcast %218 : vector<128x1xf32> to vector<128x128xf32>
    %222 = vector.broadcast %220 : vector<1x128xf32> to vector<128x128xf32>
    %223 = arith.cmpf oeq, %221, %222 : vector<128x128xf32>
    %224 = arith.extui %223 : vector<128x128xi1> to vector<128x128xi32>
    %225 = arith.sitofp %224 : vector<128x128xi32> to vector<128x128xf32>
    %226 = math.exp %216 : vector<128x128xf32>
    %cst_99 = arith.constant 1.000000e+00 : f32
    %227 = vector.broadcast %cst_99 : f32 to vector<128x128xf32>
    %228 = arith.subf %227, %225 : vector<128x128xf32>
    %229 = arith.mulf %226, %228 : vector<128x128xf32>
    %cst_100 = arith.constant dense<0.000000e+00> : vector<128xf32>
    %230 = vector.multi_reduction <add>, %229, %cst_100 [1] : vector<128x128xf32> to vector<128xf32>
    %231 = vector.shape_cast %230 : vector<128xf32> to vector<128x1xf32>
    %232 = vector.broadcast %231 : vector<128x1xf32> to vector<128x128xf32>
    %233 = arith.addf %226, %232 : vector<128x128xf32>
    %234 = math.log %233 : vector<128x128xf32>
    %235 = arith.subf %234, %216 : vector<128x128xf32>
    %cst_101 = arith.constant dense<0.000000e+00> : vector<128xf32>
    %236 = vector.multi_reduction <add>, %225, %cst_101 [1] : vector<128x128xf32> to vector<128xf32>
    %237 = vector.shape_cast %236 : vector<128xf32> to vector<128x1xf32>
    %cst_102 = arith.constant 9.99999997E-7 : f32
    %238 = vector.broadcast %cst_102 : f32 to vector<128x1xf32>
    %239 = arith.maximumf %237, %238 : vector<128x1xf32>
    %240 = tpu.reciprocal %239 {approx = true} : vector<128x1xf32> -> vector<128x1xf32>
    %241 = vector.broadcast %240 : vector<128x1xf32> to vector<128x128xf32>
    %242 = arith.mulf %225, %241 : vector<128x128xf32>
    %243 = arith.mulf %235, %242 : vector<128x128xf32>
    %cst_103 = arith.constant dense<0.000000e+00> : vector<128xf32>
    %244 = vector.multi_reduction <add>, %243, %cst_103 [1] : vector<128x128xf32> to vector<128xf32>
    %245 = vector.shape_cast %244 : vector<128xf32> to vector<128x1xf32>
    %cst_104 = arith.constant 0.000000e+00 : f32
    %246 = vector.broadcast %cst_104 : f32 to vector<128x1xf32>
    %247 = arith.cmpf oeq, %237, %246 : vector<128x1xf32>
    %248 = arith.extui %247 : vector<128x1xi1> to vector<128x1xi32>
    %249 = arith.sitofp %248 : vector<128x1xi32> to vector<128x1xf32>
    %cst_105 = arith.constant 1.000000e+00 : f32
    %250 = vector.broadcast %cst_105 : f32 to vector<128x1xf32>
    %251 = arith.subf %250, %249 : vector<128x1xf32>
    %c0_106 = arith.constant 0 : index
    %c0_107 = arith.constant 0 : index
    %252 = vector.load %arg14[%c0_106, %c0_107] : memref<1x1xf32, #tpu.memory_space<vmem>>, vector<1x1xf32>
    %253 = arith.mulf %245, %251 : vector<128x1xf32>
    %cst_108 = arith.constant dense<0.000000e+00> : vector<1xf32>
    %254 = vector.multi_reduction <add>, %253, %cst_108 [0] : vector<128x1xf32> to vector<1xf32>
    %255 = vector.shape_cast %254 : vector<1xf32> to vector<1x1xf32>
    %256 = arith.addf %252, %255 : vector<1x1xf32>
    %c0_109 = arith.constant 0 : index
    %c0_110 = arith.constant 0 : index
    %257 = vector.load %arg14[%c0_109, %c0_110] : memref<1x1xf32, #tpu.memory_space<vmem>>, vector<1x1xf32>
    tpu.vector_store %arg14[%c0_109, %c0_110], %256 {strides = array<i32>} : memref<1x1xf32, #tpu.memory_space<vmem>>, vector<1x1xf32>,
    %c0_111 = arith.constant 0 : index
    %c0_112 = arith.constant 0 : index
    %258 = vector.load %arg15[%c0_111, %c0_112] : memref<1x1xf32, #tpu.memory_space<vmem>>, vector<1x1xf32>
    %cst_113 = arith.constant dense<0.000000e+00> : vector<1xf32>
    %259 = vector.multi_reduction <add>, %251, %cst_113 [0] : vector<128x1xf32> to vector<1xf32>
    %260 = vector.shape_cast %259 : vector<1xf32> to vector<1x1xf32>
    %261 = arith.addf %258, %260 : vector<1x1xf32>
    %c0_114 = arith.constant 0 : index
    %c0_115 = arith.constant 0 : index
    %262 = vector.load %arg15[%c0_114, %c0_115] : memref<1x1xf32, #tpu.memory_space<vmem>>, vector<1x1xf32>
    tpu.vector_store %arg15[%c0_114, %c0_115], %261 {strides = array<i32>} : memref<1x1xf32, #tpu.memory_space<vmem>>, vector<1x1xf32>,
    %c0_116 = arith.constant 0 : index
    %c0_117 = arith.constant 0 : index
    %263 = vector.load %arg14[%c0_116, %c0_117] : memref<1x1xf32, #tpu.memory_space<vmem>>, vector<1x1xf32>
    %c0_118 = arith.constant 0 : index
    %c0_119 = arith.constant 0 : index
    %264 = vector.load %arg15[%c0_118, %c0_119] : memref<1x1xf32, #tpu.memory_space<vmem>>, vector<1x1xf32>
    %cst_120 = arith.constant 9.99999997E-7 : f32
    %265 = vector.broadcast %cst_120 : f32 to vector<1x1xf32>
    %266 = arith.maximumf %264, %265 : vector<1x1xf32>
    %267 = arith.divf %263, %266 : vector<1x1xf32>
    %268 = tpu.iota {dimensions = array<i32: 2>} : vector<1x1x4xi32>
    %c0_i32_121 = arith.constant 0 : i32
    %269 = vector.broadcast %c0_i32_121 : i32 to vector<1x1x4xi32>
    %270 = arith.cmpi eq, %268, %269 : vector<1x1x4xi32>
    %c0_122 = arith.constant 0 : index
    %c0_123 = arith.constant 0 : index
    %271 = vector.load %arg11[%c0_122, %c0_123] : memref<1x1xf32, #tpu.memory_space<vmem>>, vector<1x1xf32>
    %cst_124 = arith.constant 7.812500e-03 : f32
    %272 = vector.broadcast %cst_124 : f32 to vector<1x1xf32>
    %273 = arith.mulf %271, %272 : vector<1x1xf32>
    %c1_i32 = arith.constant 1 : i32
    %274 = vector.broadcast %c1_i32 : i32 to vector<1x1x4xi32>
    %275 = arith.cmpi eq, %268, %274 : vector<1x1x4xi32>
    %c0_125 = arith.constant 0 : index
    %c0_126 = arith.constant 0 : index
    %276 = vector.load %arg12[%c0_125, %c0_126] : memref<1x1xf32, #tpu.memory_space<vmem>>, vector<1x1xf32>
    %cst_127 = arith.constant 7.812500e-03 : f32
    %277 = vector.broadcast %cst_127 : f32 to vector<1x1xf32>
    %278 = arith.mulf %276, %277 : vector<1x1xf32>
    %c2_i32 = arith.constant 2 : i32
    %279 = vector.broadcast %c2_i32 : i32 to vector<1x1x4xi32>
    %280 = arith.cmpi eq, %268, %279 : vector<1x1x4xi32>
    %c0_128 = arith.constant 0 : index
    %c0_129 = arith.constant 0 : index
    %281 = vector.load %arg13[%c0_128, %c0_129] : memref<1x1xf32, #tpu.memory_space<vmem>>, vector<1x1xf32>
    %cst_130 = arith.constant 7.812500e-03 : f32
    %282 = vector.broadcast %cst_130 : f32 to vector<1x1xf32>
    %283 = arith.mulf %281, %282 : vector<1x1xf32>
    %284 = vector.shape_cast %283 : vector<1x1xf32> to vector<1x1x1xf32>
    %285 = vector.broadcast %284 : vector<1x1x1xf32> to vector<1x1x4xf32>
    %286 = vector.shape_cast %267 : vector<1x1xf32> to vector<1x1x1xf32>
    %287 = vector.broadcast %286 : vector<1x1x1xf32> to vector<1x1x4xf32>
    %288 = arith.select %280, %285, %287 : vector<1x1x4xi1>, vector<1x1x4xf32>
    %289 = vector.shape_cast %278 : vector<1x1xf32> to vector<1x1x1xf32>
    %290 = vector.broadcast %289 : vector<1x1x1xf32> to vector<1x1x4xf32>
    %291 = arith.select %275, %290, %288 : vector<1x1x4xi1>, vector<1x1x4xf32>
    %292 = vector.shape_cast %273 : vector<1x1xf32> to vector<1x1x1xf32>
    %293 = vector.broadcast %292 : vector<1x1x1xf32> to vector<1x1x4xf32>
    %294 = arith.select %270, %293, %291 : vector<1x1x4xi1>, vector<1x1x4xf32>
    %c0_131 = arith.constant 0 : index
    %c0_132 = arith.constant 0 : index
    %c0_133 = arith.constant 0 : index
    %295 = vector.load %arg10[%c0_131, %c0_132, %c0_133] : memref<1x1x4xf32, #tpu.memory_space<vmem>>, vector<1x1x4xf32>
    tpu.vector_store %arg10[%c0_131, %c0_132, %c0_133], %294 {strides = array<i32>} : memref<1x1x4xf32, #tpu.memory_space<vmem>>, vector<1x1x4xf32>,
    return
  }
  func.func @transform_0(%arg0: i32, %arg1: i32) -> (i32, i32, i32) {
    %c0_i32 = arith.constant 0 : i32
    %c0_i32_0 = arith.constant 0 : i32
    return %arg0, %arg1, %c0_i32 : i32, i32, i32
  }
  func.func @transform_1(%arg0: i32, %arg1: i32) -> (i32, i32, i32) {
    %c0_i32 = arith.constant 0 : i32
    %c0_i32_0 = arith.constant 0 : i32
    %c0_i32_1 = arith.constant 0 : i32
    return %arg0, %c0_i32, %c0_i32_0 : i32, i32, i32
  }
  func.func @transform_2(%arg0: i32, %arg1: i32) -> (i32, i32, i32) {
    %c0_i32 = arith.constant 0 : i32
    %c0_i32_0 = arith.constant 0 : i32
    return %arg0, %arg1, %c0_i32 : i32, i32, i32
  }
  func.func @transform_3(%arg0: i32, %arg1: i32) -> (i32, i32, i32) {
    %c0_i32 = arith.constant 0 : i32
    %c0_i32_0 = arith.constant 0 : i32
    %c0_i32_1 = arith.constant 0 : i32
    return %arg0, %c0_i32, %c0_i32_0 : i32, i32, i32
  }
  func.func @transform_4(%arg0: i32, %arg1: i32) -> (i32, i32) {
    %c0_i32 = arith.constant 0 : i32
    %c0_i32_0 = arith.constant 0 : i32
    %c0_i32_1 = arith.constant 0 : i32
    return %c0_i32, %c0_i32_0 : i32, i32
  }
  func.func @transform_5(%arg0: i32, %arg1: i32) -> (i32, i32) {
    %c0_i32 = arith.constant 0 : i32
    %c0_i32_0 = arith.constant 0 : i32
    %c0_i32_1 = arith.constant 0 : i32
    return %c0_i32, %c0_i32_0 : i32, i32
  }
  func.func @transform_6(%arg0: i32, %arg1: i32) -> (i32, i32) {
    %c0_i32 = arith.constant 0 : i32
    %c0_i32_0 = arith.constant 0 : i32
    %c0_i32_1 = arith.constant 0 : i32
    return %c0_i32, %c0_i32_0 : i32, i32
  }
  func.func @transform_7(%arg0: i32, %arg1: i32) -> (i32, i32) {
    %c0_i32 = arith.constant 0 : i32
    %c0_i32_0 = arith.constant 0 : i32
    %c0_i32_1 = arith.constant 0 : i32
    return %c0_i32, %c0_i32_0 : i32, i32
  }
  func.func @transform_8(%arg0: i32, %arg1: i32) -> (i32, i32, i32) {
    %c0_i32 = arith.constant 0 : i32
    %c0_i32_0 = arith.constant 0 : i32
    %c0_i32_1 = arith.constant 0 : i32
    return %arg0, %c0_i32, %c0_i32_0 : i32, i32, i32
  }
}

</mosaic_0001>

<bundles_post_ra>
// kernel: tpu_custom_call.1
= control target key start
LH: loop header
LB: loop body
LE: loop exit
PB: predicated region body
PF: predicated region fallthrough
CT: control target
= control target key end

     0   :  { %s12349_s0 = inlined_call_operand.vmem [shape: f32[2,128,9], index: 0, kind: input, shape index: {}]   ;;  %s12350_s1 = inlined_call_operand.vmem [shape: f32[2,128,9], index: 1, kind: input, shape index: {}]   ;;  %s12351_s2 = inlined_call_operand.vmem [shape: f32[2,128,1], index: 2, kind: input, shape index: {}]   ;;  %s12352_s3 = inlined_call_operand.vmem [shape: f32[2,1,128], index: 3, kind: input, shape index: {}]   ;;  %s12353_s4 = inlined_call_operand.vmem [shape: f32[9,64], index: 4, kind: input, shape index: {}]   ;;  %s12354_s5 = inlined_call_operand.vmem [shape: f32[1,64], index: 5, kind: input, shape index: {}]   ;;  %s12355_s6 = inlined_call_operand.vmem [shape: f32[64,32], index: 6, kind: input, shape index: {}]   ;;  %s12356_s7 = inlined_call_operand.vmem [shape: f32[1,32], index: 7, kind: input, shape index: {}]   ;;  %s12357_s8 = inlined_call_operand.hbm [shape: f32[2,1,4], index: 8, kind: output, shape index: {}]  }
   0x1   :  { %12534 = sst [smem:[#allocation115_spill]] %s12349_s0 }
   0x2   :  { %12535 = sst [smem:[#allocation116_spill]] %s12350_s1 }
   0x3   :  { %13 = vsyncpa [#allocation8], 0 }
   0x4   :  { %15 = vsyncpa [#allocation8 + $0x1], 0  ;;  %s8538_s27 = smov 0   ;;  %s8540_s28 = smov 0  }
   0x5   :  { %s8542_s29 = smov 0   ;;  %s8544_s30 = smov 0  }
   0x6   :  { %s8546_s9 = smov 0   ;;  %s8548_s10 = smov 0  }
   0x7 LB: > { %s5932_s11 = sadd.s32 4294967295, %s8482_s10   ;;  %s5933_s12 = sadd.s32 4294967294, %s8482_s10   ;;  %s8482_s10 = sphi %s8548_s10, %s21_s10   ;;  %s8478_s9 = sphi %s8546_s9, %s13011_s9   ;;  %s8474_s30 = sphi %s8544_s30, %s13010_s30   ;;  %s8470_s29 = sphi %s8542_s29, %s13009_s29   ;;  %s8466_s28 = sphi %s8540_s28, %s13008_s28   ;;  %s8462_s27 = sphi %s8538_s27, %s13007_s27  }
   0x8   : > { %s33_s13 = sadd.s32 1, %s8478_s9  ;;  %s232_s14 = sadd.s32 1, %s8470_s29 }
   0x9   : > { %p35_p0 = scmp.ge.s32.totalorder %s33_s13, 2  ;;  %p242_p1 = scmp.ne.s32.totalorder %s8470_s29, %s8466_s28 }
   0xa   : > { %p243_p2 = scmp.eq.s32.totalorder %s5932_s11, 1  ;;  %p248_p3 = scmp.ne.s32.totalorder %s8466_s28, %s8462_s27 }
   0xb   : > { %s13013_s13 = smov (%p35_p0, %s33_s13), 0  ;;  %p249_p5 = scmp.eq.s32.totalorder %s5933_s12, 1 }
   0xc   : > { %p8578_p4 = por %p243_p2, %p242_p1  ;;  %s229_s16 = ssub.s32 %s8478_s9, %s13013_s13 }
   0xd   : > { %p5936_p6 = scmp.ge.s32.totalorder %s8482_s10, 1  ;;  %p230_p7 = scmp.eq.s32.totalorder %s229_s16, 0 }
   0xe   : > { %p8585_p8 = por %p249_p5, %p248_p3  ;;  %p319_p9 = scmp.lt.s32.totalorder %s8482_s10, 3 }
   0xf   : > { %s8591_s18 = scalar_select %p230_p7, %s8470_s29, %s232_s14  }
  0x10   : > { %p320_p10 = pnand %p5936_p6, %p319_p9 }
  0x12   : > { %323 = sbr.rel (%p320_p10) target bundleno = 1902 (0x76e), region = 52 }
  0x19   : > { %v411_v0 = vld [vmem:[%s12353_s4] sm:$0xff]  ;;  %v412_v1 = vld [vmem:[%s12353_s4 + $0x8] sm:$0x1]  ;;  %vm510_vm0 = vcmask 1040384   ;;  %p374_p11 = scmp.lt.s32.totalorder %s8474_s30, 1  ;;  %vm8484_vm1 = vmmov 1  }
  0x1a   : > { %v8600_v2 = vpack.c.bf16 %v412_v1, %v411_v0  ;;  %vm8602_vm2 = vmpackc.low %vm510_vm0, %vm8484_vm1  ;;  %vm461_vm3 = vcmask 72704   ;;  %s12540_s1 = sld [smem:[#allocation116_spill]]  ;;  %s12358_s12 = smov 122   ;;  %v414_v40 = vld [vmem:[%s12355_s6] sm:$0xff]  ;;  %v415_v41 = vld [vmem:[%s12355_s6 + $0x8] sm:$0xff]  ;;  %vm2047_vm4 = vcmask 23552  }
  0x1b   : > { %s8607_s23 = scalar_select %p374_p11, %s8474_s30, 1  ;;  %v416_v42 = vld [vmem:[%s12355_s6 + $0x10] sm:$0xff]  ;;  %v8803_v43 = vpack.c.bf16 %v415_v41, %v414_v40  ;;  %v417_v44 = vld [vmem:[%s12355_s6 + $0x18] sm:$0xff]  ;;  %v418_v46 = vld [vmem:[%s12355_s6 + $0x20] sm:$0xff]  ;;  %vm681_vm5 = vcmask 523264   ;;  %vm891_vm6 = vcmask 261120  }
  0x1c   : > { %6890 = vmatprep.subr.msk.bf16.mxu0 %vm8602_vm2, %v8600_v2  ;;  %s12549_s0 = sld [smem:[#allocation115_spill]]  ;;  %v8808_v45 = vpack.c.bf16 %v417_v44, %v416_v42  ;;  %v419_v47 = vld [vmem:[%s12355_s6 + $0x28] sm:$0xff]  ;;  %v420_v49 = vld [vmem:[%s12355_s6 + $0x30] sm:$0xff]  ;;  %v421_v50 = vld [vmem:[%s12355_s6 + $0x38] sm:$0xff]  ;;  %s12556_s25 = smov 122  }
  0x1d   : > { %6893 = vmatpush3.bf16.msk.msra.mxu0 %vm8602_vm2, %v8600_v2  ;;  %s8616_s24 = sshll.u32 %s8607_s23, 7  ;;  %7188 = vmatprep.subr.bf16.mxu1 %v8803_v43  ;;  %v8821_v48 = vpack.c.bf16 %v419_v47, %v418_v46  ;;  %v8836_v51 = vpack.c.bf16 %v421_v50, %v420_v49  ;;  %vm9203_vm7 = vmpackc.low %vm2047_vm4, %vm2047_vm4  ;;  %s8486_s21 = smov 125  }
  0x1e   : > { %6895 = vmatprep.subr.bf16.mxu0 %v8803_v43  ;;  %7192 = vmatpush3.bf16.msra.mxu1 %v8803_v43  ;;  %vm9419_vm1 = vmpackc.low %vm891_vm6, %vm891_vm6  ;;  %s10261_s22 = scalar_lea.vmem %s12351_s2, %s8616_s24  ;;  %s6206_s26 = sshll.u32 %s8474_s30, 4 }
  0x1f   : > { %7189 = vmatprep.subr.bf16.mxu1 %v8808_v45 }
  0x20   : > { %s8622_s11 = scalar_lea.vmem %s12540_s1, %s8616_s24 }
  0x21   : > { %v8625_v4 = vld [vmem:[%s8622_s11] sm:$0xff]  ;;  %v8628_v5 = vld [vmem:[%s8622_s11 + $0x8] sm:$0xff]  ;;  %v8631_v6 = vld [vmem:[%s8622_s11 + $0x10] sm:$0xff] }
  0x22   : > { %6462 = vmatprep.mubr.msk.f32.mxu0 %vm461_vm3, %v8625_v4  ;;  %v8637_v7 = vmul.f32 %v8628_v5, %v8628_v5  ;;  %v8641_v8 = vmul.f32 %v8625_v4, %v8625_v4  ;;  %v8650_v9 = vld [vmem:[%s8622_s11 + $0x18] sm:$0xff]  ;;  %v8654_v10 = vmul.f32 %v8631_v6, %v8631_v6  ;;  %v8657_v11 = vld [vmem:[%s8622_s11 + $0x20] sm:$0xff]  ;;  %v8672_v13 = vld [vmem:[%s8622_s11 + $0x28] sm:$0xff]  ;;  %s8756_s19 = scalar_lea.vmem %s12549_s0, %s8616_s24  ;;  %7193 = vmatpush3.bf16.msra.mxu1 %v8808_v45  ;;  %s12302_s0 = scalar_lea.hbm %s12357_s8, %s6206_s26 }
  0x23   : > { %6463 = vmatmul.mubr.msk.f32.vlgmr.msra.gmra.mrb[0].mxu0 %vm461_vm3, %v8628_v5  ;;  %v8663_v12 = vmul.f32 %v8657_v11, %v8657_v11  ;;  %v8676_v14 = vmul.f32 %v8650_v9, %v8650_v9  ;;  %v8679_v15 = vld [vmem:[%s8622_s11 + $0x30] sm:$0xff]  ;;  %v8694_v17 = vld [vmem:[%s8622_s11 + $0x38] sm:$0xff]  ;;  %v8698_v18 = vmul.f32 %v8672_v13, %v8672_v13  ;;  %v8701_v19 = vld [vmem:[%s8622_s11 + $0x40] sm:$0xff]  ;;  %7190 = vmatprep.subr.bf16.mxu1 %v8821_v48 }
  0x24   : > { %2001 = vrot.lane.b32.xlu1 %v8637_v7, %s12358_s12  ;;  %1999 = vrot.lane.b32.xlu0 %v8641_v8, %s12358_s12  ;;  %v8685_v16 = vmul.f32 %v8679_v15, %v8679_v15  ;;  %v8707_v20 = vmul.f32 %v8701_v19, %v8701_v19  ;;  %v8716_v21 = vld [vmem:[%s8622_s11 + $0x48] sm:$0xff]  ;;  %v8720_v22 = vmul.f32 %v8694_v17, %v8694_v17  ;;  %v433_v23 = vld [vmem:[%s8622_s11 + $0x50] sm:$0xff] }
  0x25   : > { %6465 = vmatprep.mubr.msk.f32.mxu0 %vm461_vm3, %v8631_v6  ;;  %12542 = vst [vmem:[#allocation11_spill] sm:$0xff] %v8698_v18  ;;  %v8725_v24 = vmul.f32 %v433_v23, %v433_v23  ;;  %v434_v25 = vld [vmem:[%s8622_s11 + $0x58] sm:$0xff]  ;;  %v8735_v26 = vmul.f32 %v8716_v21, %v8716_v21  ;;  %v435_v27 = vld [vmem:[%s8622_s11 + $0x60] sm:$0xff]  ;;  %v436_v29 = vld [vmem:[%s8622_s11 + $0x68] sm:$0xff]  ;;  %6897 = vmatpush3.bf16.msra.mxu0 %v8803_v43 }
  0x26   : > { %12541 = vst [vmem:[#allocation10_spill] sm:$0xff] %v8685_v16  ;;  %12543 = vst [vmem:[#allocation12_spill] sm:$0xff] %v8707_v20  ;;  %v8740_v28 = vmul.f32 %v435_v27, %v435_v27  ;;  %v8747_v30 = vmul.f32 %v434_v25, %v434_v25  ;;  %v437_v31 = vld [vmem:[%s8622_s11 + $0x70] sm:$0xff]  ;;  %v8761_v33 = vld [vmem:[%s8756_s19 + $0x8] sm:$0xff]  ;;  %v8768_v35 = vmul.f32 %v436_v29, %v436_v29  ;;  %6899 = vmatprep.subr.bf16.mxu0 %v8808_v45 }
  0x27   : > { %6466 = vmatmul.mubr.msk.f32.gmra.mrb[2].mxu0 %vm461_vm3, %v8650_v9  ;;  %12544 = vst [vmem:[#allocation13_spill] sm:$0xff] %v8720_v22  ;;  %12545 = vst [vmem:[#allocation14_spill] sm:$0xff] %v8725_v24  ;;  %v8758_v32 = vmul.f32 %v437_v31, %v437_v31  ;;  %v438_v34 = vld [vmem:[%s8622_s11 + $0x78] sm:$0xff]  ;;  %v8774_v36 = vmul.f32 %v8761_v33, %v8761_v33  ;;  %v8782_v38 = vld [vmem:[%s8756_s19] sm:$0xff]  ;;  %7194 = vmatpush3.bf16.msra.mxu1 %v8821_v48 }
  0x28   : > { %2003 = vrot.lane.b32.xlu1 %v8654_v10, %s12358_s12  ;;  %6468 = vmatprep.mubr.msk.f32.mxu0 %vm461_vm3, %v8657_v11  ;;  %12546 = vst [vmem:[#allocation15_spill] sm:$0xff] %v8735_v26  ;;  %12547 = vst [vmem:[#allocation16_spill] sm:$0xff] %v8740_v28  ;;  %v8779_v37 = vmul.f32 %v438_v34, %v438_v34  ;;  %v8790_v39 = vmul.f32 %v8782_v38, %v8782_v38  ;;  %v8859_v46 = vld [vmem:[%s8756_s19 + $0x18] sm:$0xff]  ;;  %v8866_v49 = vld [vmem:[%s8756_s19 + $0x20] sm:$0xff] }
  0x29   : > { %2007 = vrot.lane.b32.xlu0 %v8663_v12, %s12358_s12  ;;  %12548 = vst [vmem:[#allocation17_spill] sm:$0xff] %v8747_v30  ;;  %12550 = vst [vmem:[#allocation18_spill] sm:$0xff] %v8758_v32  ;;  %6901 = vmatpush3.bf16.msra.mxu0 %v8808_v45  ;;  %v8863_v47 = vmul.f32 %v8859_v46, %v8859_v46  ;;  %v8869_v50 = vld [vmem:[%s8756_s19 + $0x10] sm:$0xff] }
  0x2a   : > { %12551 = vst [vmem:[#allocation19_spill] sm:$0xff] %v8768_v35  ;;  %12552 = vst [vmem:[#allocation20_spill] sm:$0xff] %v8774_v36  ;;  %6903 = vmatprep.subr.bf16.mxu0 %v8821_v48  ;;  %7191 = vmatprep.subr.bf16.mxu1 %v8836_v51 }
  0x2b   : > { %6469 = vmatmul.mubr.msk.f32.gmra.mrb[4].mxu0 %vm461_vm3, %v8672_v13  ;;  %12553 = vst [vmem:[#allocation21_spill] sm:$0xff] %v8779_v37  ;;  %12554 = vst [vmem:[#allocation22_spill] sm:$0xff] %v8790_v39  ;;  %7195 = vmatpush3.bf16.msra.mxu1 %v8836_v51 }
  0x2c   : > { %2005 = vrot.lane.b32.xlu1 %v8676_v14, %s12358_s12  ;;  %6471 = vmatprep.mubr.msk.f32.mxu0 %vm461_vm3, %v8679_v15  ;;  %12555 = vst [vmem:[#allocation23_spill] sm:$0xff] %v8863_v47 }
  0x2d   : > { %2011 = vrot.lane.b32.xlu0 %v8685_v16, %s12358_s12  ;;  %6905 = vmatpush3.bf16.msra.mxu0 %v8821_v48 }
  0x2e   : > { %6907 = vmatprep.subr.bf16.mxu0 %v8836_v51  ;;  %6917 = vmatprep.subr.bf16.mxu1 %v8803_v43 }
  0x2f   : > { %6472 = vmatmul.mubr.msk.f32.gmra.mrb[6].mxu0 %vm461_vm3, %v8694_v17 }
  0x30   : > { %2009 = vrot.lane.b32.xlu1 %v8698_v18, %s12358_s12  ;;  %6474 = vmatprep.mubr.msk.f32.mxu0 %vm461_vm3, %v8701_v19 }
  0x31   : > { %2015 = vrot.lane.b32.xlu0 %v8707_v20, %s12358_s12  ;;  %6909 = vmatpush3.bf16.msra.mxu0 %v8836_v51 }
  0x32   : > { %6912 = vmatprep.subr.msk.bf16.mxu0 %vm8602_vm2, %v8600_v2 }
  0x33   : > { %6475 = vmatmul.mubr.msk.f32.gmra.mrb[8].mxu0 %vm461_vm3, %v8716_v21 }
  0x34   : > { %2013 = vrot.lane.b32.xlu1 %v8720_v22, %s12358_s12  ;;  %6477 = vmatprep.mubr.msk.f32.mxu0 %vm461_vm3, %v433_v23 }
  0x35   : > { %2019 = vrot.lane.b32.xlu0 %v8725_v24, %s12358_s12 }
  0x37   : > { %6478 = vmatmul.mubr.msk.f32.gmra.mrb[10].mxu0 %vm461_vm3, %v434_v25 }
  0x38   : > { %2017 = vrot.lane.b32.xlu1 %v8735_v26, %s12358_s12  ;;  %6480 = vmatprep.mubr.msk.f32.mxu0 %vm461_vm3, %v435_v27 }
  0x39   : > { %2023 = vrot.lane.b32.xlu0 %v8740_v28, %s12358_s12 }
  0x3b   : > { %6481 = vmatmul.mubr.msk.f32.gmra.mrb[12].mxu0 %vm461_vm3, %v436_v29 }
  0x3c   : > { %2021 = vrot.lane.b32.xlu1 %v8747_v30, %s12358_s12  ;;  %6483 = vmatprep.mubr.msk.f32.mxu0 %vm461_vm3, %v437_v31 }
  0x3d   : > { %2027 = vrot.lane.b32.xlu0 %v8758_v32, %s12358_s12 }
  0x3f   : > { %6484 = vmatmul.mubr.msk.f32.gmra.mrb[14].mxu0 %vm461_vm3, %v438_v34 }
  0x40   : > { %2025 = vrot.lane.b32.xlu1 %v8768_v35, %s12358_s12 }
  0x41   : > { %2178 = vrot.lane.b32.xlu0 %v8774_v36, %s12358_s12 }
  0x44   : > { %2029 = vrot.lane.b32.xlu1 %v8779_v37, %s12358_s12 }
  0x48   : > { %2176 = vrot.lane.b32.xlu1 %v8790_v39, %s12358_s12 }
  0x96   : > { %v2002_v52 = vpop.permute.xlu1 %2001  ;;  %v2000_v53 = vpop.permute.xlu0 %1999 }
  0x97   : > { %v2048_v54 = vsel %vm2047_vm4, %v2000_v53, 0.0  ;;  %v2051_v55 = vsel %vm2047_vm4, %v2002_v52, 0.0  ;;  %v8875_v52 = vmul.f32 %v8866_v49, %v8866_v49  ;;  %v8879_v53 = vmul.f32 %v8869_v50, %v8869_v50 }
  0x98   : > { %2049 = vadd.xlane.f32.xlu0 %v2048_v54  ;;  %2052 = vadd.xlane.f32.xlu1 %v2051_v55 }
  0x99   : > { %12557 = vst [vmem:[#allocation24_spill] sm:$0xff] %v8875_v52  ;;  %12558 = vst [vmem:[#allocation25_spill] sm:$0xff] %v8879_v53 }
  0x9a   : > { %v2004_v56 = vpop.permute.xlu1 %2003 }
  0x9b   : > { %v2054_v57 = vsel %vm2047_vm4, %v2004_v56, 0.0  ;;  %v2008_v58 = vpop.permute.xlu0 %2007 }
  0x9c   : > { %2055 = vadd.xlane.f32.xlu0 %v2054_v57  ;;  %v2060_v62 = vsel %vm2047_vm4, %v2008_v58, 0.0  ;;  %v8888_v58 = vld [vmem:[%s8756_s19 + $0x30] sm:$0xff] }
  0x9e   : > { %v2006_v59 = vpop.permute.xlu1 %2005 }
  0x9f   : > { %v2057_v60 = vsel %vm2047_vm4, %v2006_v59, 0.0  ;;  %v2012_v61 = vpop.permute.xlu0 %2011  ;;  %v8893_v59 = vld [vmem:[%s12354_s5] ss:$0 sm:$0xff] }
  0xa0   : > { %2058 = vadd.xlane.f32.xlu0 %v2057_v60  ;;  %v2066_v23 = vsel %vm2047_vm4, %v2012_v61, 0.0  ;;  %v8896_v60 = vld [vmem:[%s8756_s19 + $0x28] sm:$0xff] }
  0xa2   : > { %v2010_v63 = vpop.permute.xlu1 %2009 }
  0xa3   : > { %v2063_v0 = vsel %vm2047_vm4, %v2010_v63, 0.0  ;;  %v2016_v1 = vpop.permute.xlu0 %2015 }
  0xa4   : > { %2061 = vadd.xlane.f32.xlu0 %v2060_v62  ;;  %2064 = vadd.xlane.f32.xlu1 %v2063_v0  ;;  %v2072_v29 = vsel %vm2047_vm4, %v2016_v1, 0.0  ;;  %v8900_v62 = vmul.f32 %v8888_v58, %v8888_v58  ;;  %v8905_v1 = vmul.f32 %v8896_v60, %v8896_v60 }
  0xa6   : > { %v2014_v25 = vpop.permute.xlu1 %2013  ;;  %12559 = vst [vmem:[#allocation26_spill] sm:$0xff] %v8900_v62  ;;  %12560 = vst [vmem:[#allocation27_spill] sm:$0xff] %v8905_v1 }
  0xa7   : > { %v2069_v27 = vsel %vm2047_vm4, %v2014_v25, 0.0  ;;  %v2020_v34 = vpop.permute.xlu0 %2019 }
  0xa8   : > { %2067 = vadd.xlane.f32.xlu0 %v2066_v23  ;;  %2070 = vadd.xlane.f32.xlu1 %v2069_v27  ;;  %v2078_v41 = vsel %vm2047_vm4, %v2020_v34, 0.0  ;;  %v8908_v23 = vld [vmem:[%s8756_s19 + $0x38] sm:$0xff]  ;;  %v8912_v27 = vld [vmem:[%s8756_s19 + $0x40] sm:$0xff] }
  0xaa   : > { %v2018_v31 = vpop.permute.xlu1 %2017 }
  0xab   : > { %v2075_v40 = vsel %vm2047_vm4, %v2018_v31, 0.0  ;;  %v2024_v56 = vpop.permute.xlu0 %2023 }
  0xac   : > { %2073 = vadd.xlane.f32.xlu0 %v2072_v29  ;;  %2076 = vadd.xlane.f32.xlu1 %v2075_v40  ;;  %v2084_v57 = vsel %vm2047_vm4, %v2024_v56, 0.0  ;;  %v8918_v40 = vmul.f32 %v8908_v23, %v8908_v23 }
  0xae   : > { %v2022_v42 = vpop.permute.xlu1 %2021  ;;  %12561 = vst [vmem:[#allocation28_spill] sm:$0xff] %v8918_v40 }
  0xaf   : > { %v2081_v44 = vsel %vm2047_vm4, %v2022_v42, 0.0 }
  0xb0   : > { %2079 = vadd.xlane.f32.xlu0 %v2078_v41  ;;  %2082 = vadd.xlane.f32.xlu1 %v2081_v44  ;;  %v8925_v44 = vmul.f32 %v8912_v27, %v8912_v27 }
  0xb2   : > { %v2026_v54 = vpop.permute.xlu1 %2025  ;;  %12562 = vst [vmem:[#allocation29_spill] sm:$0xff] %v8925_v44 }
  0xb3   : > { %v2087_v55 = vsel %vm2047_vm4, %v2026_v54, 0.0 }
  0xc1   : > { %2182 = vrot.lane.b32.xlu1 %v8863_v47, %s12556_s25 }
  0xc5   : > { %2184 = vrot.lane.b32.xlu1 %v8875_v52, %s12556_s25 }
  0xc6   : > { %2180 = vrot.lane.b32.xlu0 %v8879_v53, %s12556_s25 }
  0xe5   : > { %2088 = vadd.xlane.f32.xlu0 %v2087_v55 }
  0xe9   : > { %2085 = vadd.xlane.f32.xlu1 %v2084_v57 }
  0xf6   : > { %v6464_v61 = vpop.f32.mrb[0].mxu0 }
  0xf7   : > { %v586_v63 = vadd.f32 %v6464_v61, %v8893_v59  ;;  %v580_v0 = vpop.f32.mrb[1].mxu0 }
  0xf8   : > { %v581_v25 = vadd.f32 %v8893_v59, %v580_v0 }
  0xf9   : > { %v660_v29 = vmax.f32 %v586_v63, 0.0 }
  0xfa   : > { %v659_v31 = vmax.f32 %v581_v25, 0.0  ;;  %v6467_v34 = vpop.f32.mrb[2].mxu0  ;;  %2188 = vrot.lane.b32.xlu1 %v8900_v62, %s12556_s25 }
  0xfb   : > { %v596_v41 = vadd.f32 %v6467_v34, %v8893_v59  ;;  %v590_v42 = vpop.f32.mrb[3].mxu0  ;;  %2186 = vrot.lane.b32.xlu0 %v8905_v1, %s12556_s25 }
  0xfc   : > { %v591_v54 = vadd.f32 %v8893_v59, %v590_v42  ;;  %6502 = vmatprep.mubr.msk.f32.mxu0 %vm681_vm5, %v659_v31 }
  0xfd   : > { %v662_v55 = vmax.f32 %v596_v41, 0.0  ;;  %6503 = vmatmul.mubr.msk.f32.vlgmr.msra.gmra.mrb[16].mxu0 %vm681_vm5, %v660_v29 }
  0xfe   : > { %v661_v56 = vmax.f32 %v591_v54, 0.0  ;;  %v6470_v57 = vpop.f32.mrb[4].mxu0  ;;  %2190 = vrot.lane.b32.xlu1 %v8918_v40, %s12556_s25  ;;  %6915 = vmatpush3.bf16.msk.msra.mxu0 %vm8602_vm2, %v8600_v2 }
  0xff   : > { %v606_v61 = vadd.f32 %v6470_v57, %v8893_v59  ;;  %v600_v63 = vpop.f32.mrb[5].mxu0  ;;  %2192 = vrot.lane.b32.xlu0 %v8925_v44, %s12556_s25 }
 0x100   : > { %v601_v0 = vadd.f32 %v8893_v59, %v600_v63  ;;  %6505 = vmatprep.mubr.msk.f32.mxu0 %vm681_vm5, %v661_v56 }
 0x101   : > { %v664_v25 = vmax.f32 %v606_v61, 0.0  ;;  %6506 = vmatmul.mubr.msk.f32.gmra.mrb[18].mxu0 %vm681_vm5, %v662_v55 }
 0x102   : > { %v663_v29 = vmax.f32 %v601_v0, 0.0  ;;  %v6473_v31 = vpop.f32.mrb[6].mxu0 }
 0x103   : > { %v616_v34 = vadd.f32 %v6473_v31, %v8893_v59  ;;  %v610_v41 = vpop.f32.mrb[7].mxu0 }
 0x104   : > { %v611_v2 = vadd.f32 %v8893_v59, %v610_v41  ;;  %6508 = vmatprep.mubr.msk.f32.mxu0 %vm681_vm5, %v663_v29 }
 0x105   : > { %v666_v3 = vmax.f32 %v616_v34, 0.0  ;;  %6509 = vmatmul.mubr.msk.f32.gmra.mrb[20].mxu0 %vm681_vm5, %v664_v25 }
 0x106   : > { %v665_v42 = vmax.f32 %v611_v2, 0.0  ;;  %v6476_v54 = vpop.f32.mrb[8].mxu0 }
 0x107   : > { %v626_v57 = vadd.f32 %v6476_v54, %v8893_v59  ;;  %v620_v56 = vpop.f32.mrb[9].mxu0 }
 0x108   : > { %v621_v61 = vadd.f32 %v8893_v59, %v620_v56  ;;  %6511 = vmatprep.mubr.msk.f32.mxu0 %vm681_vm5, %v665_v42 }
 0x109   : > { %v668_v55 = vmax.f32 %v626_v57, 0.0  ;;  %6512 = vmatmul.mubr.msk.f32.gmra.mrb[22].mxu0 %vm681_vm5, %v666_v3 }
 0x10a   : > { %v667_v63 = vmax.f32 %v621_v61, 0.0  ;;  %v6479_v0 = vpop.f32.mrb[10].mxu0  ;;  %6530 = vmatprep.mubr.msk.f32.mxu0 %vm461_vm3, %v8782_v38 }
 0x10b   : > { %v636_v29 = vadd.f32 %v6479_v0, %v8893_v59  ;;  %v630_v25 = vpop.f32.mrb[11].mxu0  ;;  %v2028_v0 = vpop.permute.xlu0 %2027 }
 0x10c   : > { %v631_v31 = vadd.f32 %v8893_v59, %v630_v25  ;;  %6514 = vmatprep.mubr.msk.f32.mxu1 %vm681_vm5, %v667_v63  ;;  %v8993_v63 = vld [vmem:[%s8756_s19 + $0x50] sm:$0xff]  ;;  %v452_v25 = vld [vmem:[%s8756_s19 + $0x68] sm:$0xff] }
 0x10d   : > { %v670_v34 = vmax.f32 %v636_v29, 0.0  ;;  %6515 = vmatmul.mubr.msk.f32.vlgmr.msra.gmra.mrb[0].mxu1 %vm681_vm5, %v668_v55  ;;  %6531 = vmatmul.mubr.msk.f32.vlgmr.msra.gmra.mrb[24].mxu0 %vm461_vm3, %v8761_v33  ;;  %v9000_v29 = vld [vmem:[%s8756_s19 + $0x58] sm:$0xff] }
 0x10e   : > { %v669_v41 = vmax.f32 %v631_v31, 0.0  ;;  %v6482_v2 = vpop.f32.mrb[12].mxu0  ;;  %6533 = vmatprep.mubr.msk.f32.mxu0 %vm461_vm3, %v8869_v50  ;;  %6919 = vmatpush3.bf16.msra.mxu1 %v8803_v43  ;;  %v453_v31 = vld [vmem:[%s8756_s19 + $0x70] sm:$0xff] }
 0x10f   : > { %v646_v38 = vadd.f32 %v6482_v2, %v8893_v59  ;;  %v640_v3 = vpop.f32.mrb[13].mxu0  ;;  %6921 = vmatprep.subr.bf16.mxu1 %v8808_v45 }
 0x110   : > { %v641_v42 = vadd.f32 %v8893_v59, %v640_v3  ;;  %6517 = vmatprep.mubr.msk.f32.mxu1 %vm681_vm5, %v669_v41  ;;  %v9015_v41 = vmul.f32 %v8993_v63, %v8993_v63 }
 0x111   : > { %v672_v54 = vmax.f32 %v646_v38, 0.0  ;;  %6518 = vmatmul.mubr.msk.f32.gmra.mrb[2].mxu1 %vm681_vm5, %v670_v34  ;;  %6534 = vmatmul.mubr.msk.f32.gmra.mrb[26].mxu0 %vm461_vm3, %v8859_v46  ;;  %v454_v34 = vld [vmem:[%s8756_s19 + $0x78] sm:$0xff]  ;;  %v9025_v38 = vmul.f32 %v9000_v29, %v9000_v29 }
 0x112   : > { %v671_v33 = vmax.f32 %v641_v42, 0.0  ;;  %v6485_v57 = vpop.f32.mrb[14].mxu0  ;;  %6536 = vmatprep.mubr.msk.f32.mxu0 %vm461_vm3, %v8866_v49  ;;  %6923 = vmatpush3.bf16.msra.mxu1 %v8808_v45  ;;  %v2030_v45 = vpop.permute.xlu1 %2029  ;;  %12563 = vst [vmem:[#allocation30_spill] sm:$0xff] %v9015_v41  ;;  %v9033_v42 = vmul.f32 %v452_v25, %v452_v25 }
 0x113   : > { %v656_v43 = vadd.f32 %v6485_v57, %v8893_v59  ;;  %v650_v56 = vpop.f32.mrb[15].mxu0  ;;  %6925 = vmatprep.subr.bf16.mxu1 %v8821_v48  ;;  %12565 = vst [vmem:[#allocation32_spill] sm:$0xff] %v9025_v38 }
 0x114   : > { %6520 = vmatprep.mubr.msk.f32.mxu1 %vm681_vm5, %v671_v33  ;;  %v651_v61 = vadd.f32 %v8893_v59, %v650_v56  ;;  %12567 = vst [vmem:[#allocation34_spill] sm:$0xff] %v9033_v42  ;;  %v2179_v33 = vpop.permute.xlu0 %2178 }
 0x115   : > { %6521 = vmatmul.mubr.msk.f32.gmra.mrb[4].mxu1 %vm681_vm5, %v672_v54  ;;  %v674_v55 = vmax.f32 %v656_v43, 0.0  ;;  %6537 = vmatmul.mubr.msk.f32.gmra.mrb[28].mxu0 %vm461_vm3, %v8896_v60  ;;  %v9039_v54 = vmul.f32 %v453_v31, %v453_v31 }
 0x116   : > { %v673_v49 = vmax.f32 %v651_v61, 0.0  ;;  %6539 = vmatprep.mubr.msk.f32.mxu0 %vm461_vm3, %v8888_v58  ;;  %6927 = vmatpush3.bf16.msra.mxu1 %v8821_v48  ;;  %v8989_v58 = vld [vmem:[%s8756_s19 + $0x48] sm:$0xff]  ;;  %v2093_v48 = vsel %vm2047_vm4, %v2030_v45, 0.0  ;;  %v2177_v56 = vpop.permute.xlu1 %2176 }
 0x117   : > { %6929 = vmatprep.subr.bf16.mxu1 %v8836_v51  ;;  %v9019_v2 = vmul.f32 %v8989_v58, %v8989_v58  ;;  %12568 = vst [vmem:[#allocation35_spill] sm:$0xff] %v9039_v54  ;;  %v2224_v61 = vsel %vm2047_vm4, %v2177_v56, 0.0 }
 0x118   : > { %6523 = vmatprep.mubr.msk.f32.mxu1 %vm681_vm5, %v673_v49 }
 0x119   : > { %6524 = vmatmul.mubr.msk.f32.gmra.mrb[6].mxu1 %vm681_vm5, %v674_v55  ;;  %6540 = vmatmul.mubr.msk.f32.gmra.mrb[30].mxu0 %vm461_vm3, %v8908_v23  ;;  %12564 = vst [vmem:[#allocation31_spill] sm:$0xff] %v9019_v2 }
 0x11a   : > { %6542 = vmatprep.mubr.msk.f32.mxu0 %vm461_vm3, %v8912_v27  ;;  %6931 = vmatpush3.bf16.msra.mxu1 %v8836_v51  ;;  %v2090_v27 = vsel %vm2047_vm4, %v2028_v0, 0.0  ;;  %v451_v51 = vld [vmem:[%s8756_s19 + $0x60] sm:$0xff] }
 0x11b   : > { %v9029_v3 = vmul.f32 %v451_v51, %v451_v51 }
 0x11d   : > { %6543 = vmatmul.mubr.msk.f32.gmra.mrb[32].mxu0 %vm461_vm3, %v8989_v58  ;;  %12566 = vst [vmem:[#allocation33_spill] sm:$0xff] %v9029_v3 }
 0x11e   : > { %2094 = vadd.xlane.f32.xlu0 %v2093_v48  ;;  %6545 = vmatprep.mubr.msk.f32.mxu0 %vm461_vm3, %v8993_v63 }
 0x121   : > { %6546 = vmatmul.mubr.msk.f32.gmra.mrb[34].mxu0 %vm461_vm3, %v9000_v29 }
 0x122   : > { %2091 = vadd.xlane.f32.xlu1 %v2090_v27  ;;  %6548 = vmatprep.mubr.msk.f32.mxu0 %vm461_vm3, %v451_v51  ;;  %v2227_v51 = vsel %vm2047_vm4, %v2179_v33, 0.0 }
 0x125   : > { %6549 = vmatmul.mubr.msk.f32.gmra.mrb[36].mxu0 %vm461_vm3, %v452_v25  ;;  %v2050_v57 = vpop.xlane.xlu0 %2049  ;;  %v2053_v49 = vpop.xlane.xlu1 %2052 }
 0x126   : > { %6551 = vmatprep.mubr.msk.f32.mxu0 %vm461_vm3, %v453_v31  ;;  %v2096_v48 = vadd.f32 1e-12, %v2050_v57  ;;  %v2097_v27 = vadd.f32 1e-12, %v2053_v49 }
 0x129   : > { %6552 = vmatmul.mubr.msk.f32.gmra.mrb[38].mxu0 %vm461_vm3, %v454_v34  ;;  %v2056_v43 = vpop.xlane.xlu0 %2055 }
 0x12a   : > { %v2098_v0 = vadd.f32 1e-12, %v2056_v43 }
 0x12d   : > { %v2059_v55 = vpop.xlane.xlu0 %2058 }
 0x12e   : > { %v2099_v45 = vadd.f32 1e-12, %v2059_v55 }
 0x130   : > { %7381 = vrsqrt.f32 %v2099_v45 }
 0x131   : > { %7383 = vrsqrt.f32 %v2096_v48  ;;  %v2065_v45 = vpop.xlane.xlu1 %2064 }
 0x132   : > { %7385 = vrsqrt.f32 %v2098_v0 }
 0x133   : > { %2196 = vrot.lane.b32.xlu1 %v9015_v41, %s12556_s25  ;;  %7387 = vrsqrt.f32 %v2097_v27 }
 0x134   : > { %2194 = vrot.lane.b32.xlu0 %v9019_v2, %s12556_s25 }
 0x135   : > { %v2071_v0 = vpop.xlane.xlu1 %2070 }
 0x137   : > { %2198 = vrot.lane.b32.xlu1 %v9025_v38, %s12556_s25 }
 0x138   : > { %2200 = vrot.lane.b32.xlu0 %v9029_v3, %s12556_s25 }
 0x139   : > { %v2077_v27 = vpop.xlane.xlu1 %2076 }
 0x13a   : > { %v7382_v25 = vpop.eup %7381 }
 0x13b   : > { %2202 = vrot.lane.b32.xlu1 %v9033_v42, %s12556_s25  ;;  %v7384_v31 = vpop.eup %7383  ;;  %v9045_v42 = vmul.f32 %v454_v34, %v454_v34  ;;  %v2062_v34 = vpop.xlane.xlu0 %2061 }
 0x13c   : > { %v7386_v38 = vpop.eup %7385  ;;  %v2128_v43 = vmul.f32 %v7384_v31, %v8625_v4  ;;  %v2100_v4 = vadd.f32 1e-12, %v2062_v34 }
 0x13d   : > { %12569 = vst [vmem:[#allocation36_spill] sm:$0xff] %v9045_v42  ;;  %v7388_v56 = vpop.eup %7387  ;;  %v2130_v57 = vmul.f32 %v7386_v38, %v8631_v6 }
 0x13e   : > { %v2129_v55 = vmul.f32 %v7388_v56, %v8628_v5  ;;  %v2101_v5 = vadd.f32 1e-12, %v2065_v45  ;;  %7389 = vrsqrt.f32 %v2100_v4 }
 0x13f   : > { %2204 = vrot.lane.b32.xlu1 %v9039_v54, %s12556_s25  ;;  %v2068_v48 = vpop.xlane.xlu0 %2067 }
 0x140   : > { %v7259_v33 = vpack.i.bf16 %v2129_v55, %v2128_v43  ;;  %v2102_v56 = vadd.f32 1e-12, %v2068_v48  ;;  %7391 = vrsqrt.f32 %v2101_v5 }
 0x142   : > { %7393 = vrsqrt.f32 %v2102_v56 }
 0x148   : > { %v7390_v34 = vpop.eup %7389 }
 0x149   : > { %v2132_v5 = vmul.f32 %v7390_v34, %v8657_v11 }
 0x157   : > { %2225 = vadd.xlane.f32.xlu0 %v2224_v61  ;;  %v2131_v61 = vmul.f32 %v7382_v25, %v8650_v9  ;;  %v2074_v9 = vpop.xlane.xlu0 %2073  ;;  %v9057_v25 = vpop.xlane.xlu1 %2082 }
 0x158   : > { %v2104_v34 = vadd.f32 1e-12, %v2074_v9 }
 0x159   : > { %v7264_v49 = vpack.i.bf16 %v2131_v61, %v2130_v57  ;;  %v2103_v61 = vadd.f32 1e-12, %v2071_v0 }
 0x15b   : > { %v2183_v38 = vpop.permute.xlu1 %2182  ;;  %7395 = vrsqrt.f32 %v2103_v61 }
 0x15c   : > { %v2233_v43 = vsel %vm2047_vm4, %v2183_v38, 0.0  ;;  %7397 = vrsqrt.f32 %v2104_v34 }
 0x15f   : > { %v2185_v57 = vpop.permute.xlu1 %2184 }
 0x163   : > { %2228 = vadd.xlane.f32.xlu1 %v2227_v51  ;;  %v9055_v51 = vpop.xlane.xlu0 %2079 }
 0x167   : > { %v2181_v6 = vpop.permute.xlu0 %2180 }
 0x168   : > { %v2230_v31 = vsel %vm2047_vm4, %v2181_v6, 0.0  ;;  %v7392_v6 = vpop.eup %7391 }
 0x169   : > { %v7394_v0 = vpop.eup %7393  ;;  %v2133_v38 = vmul.f32 %v7392_v6, %v8672_v13  ;;  %v2105_v6 = vadd.f32 1e-12, %v2077_v27 }
 0x16b   : > { %7399 = vrsqrt.f32 %v2105_v6 }
 0x16d   : > { %2206 = vrot.lane.b32.xlu0 %v9045_v42, %s12556_s25 }
 0x171   : > { %7265 = vrot.lane.b32.xlu0 %v7264_v49, %s12556_s25 }
 0x172   : > { %v9061_v55 = vpop.xlane.xlu0 %2088 }
 0x174   : > { %7260 = vrot.lane.b32.xlu1 %v7259_v33, %s12556_s25  ;;  %v2236_v33 = vsel %vm2047_vm4, %v2185_v57, 0.0  ;;  %v2134_v57 = vmul.f32 %v7394_v0, %v8679_v15 }
 0x176   : > { %v9063_v49 = vpop.xlane.xlu1 %2085  ;;  %v2187_v45 = vpop.permute.xlu0 %2186 }
 0x177   : > { %v2239_v48 = vsel %vm2047_vm4, %v2187_v45, 0.0 }
 0x17a   : > { %v2189_v4 = vpop.permute.xlu1 %2188  ;;  %v2193_v42 = vpop.permute.xlu0 %2192 }
 0x17b   : > { %v2242_v56 = vsel %vm2047_vm4, %v2189_v4, 0.0  ;;  %v2248_v11 = vsel %vm2047_vm4, %v2193_v42, 0.0 }
 0x17e   : > { %v2191_v61 = vpop.permute.xlu1 %2190 }
 0x17f   : > { %v2245_v45 = vsel %vm2047_vm4, %v2191_v61, 0.0 }
 0x190   : > { %2231 = vadd.xlane.f32.xlu0 %v2230_v31  ;;  %v7396_v31 = vpop.eup %7395 }
 0x198   : > { %2234 = vadd.xlane.f32.xlu1 %v2233_v43  ;;  %v7269_v43 = vpack.i.bf16 %v2133_v38, %v2132_v5  ;;  %v7398_v38 = vpop.eup %7397 }
 0x19c   : > { %2237 = vadd.xlane.f32.xlu1 %v2236_v33  ;;  %v2135_v33 = vmul.f32 %v7396_v31, %v8694_v17  ;;  %v7400_v31 = vpop.eup %7399 }
 0x19d   : > { %v2137_v9 = vmul.f32 %v7400_v31, %v8716_v21 }
 0x1a0   : > { %2240 = vadd.xlane.f32.xlu1 %v2239_v48  ;;  %v7274_v48 = vpack.i.bf16 %v2135_v33, %v2134_v57 }
 0x1a4   : > { %2243 = vadd.xlane.f32.xlu1 %v2242_v56  ;;  %v2136_v56 = vmul.f32 %v7398_v38, %v8701_v19 }
 0x1a6   : > { %7270 = vrot.lane.b32.xlu0 %v7269_v43, %s12556_s25  ;;  %v7279_v61 = vpack.i.bf16 %v2137_v9, %v2136_v56  ;;  %v9089_v43 = vld [vmem:[%s12356_s7] ss:$0 sm:$0xff] }
 0x1a8   : > { %2246 = vadd.xlane.f32.xlu1 %v2245_v45 }
 0x1aa   : > { %7275 = vrot.lane.b32.xlu0 %v7274_v48, %s12556_s25 }
 0x1ab   : > { %v9080_v5 = vpop.xlane.xlu0 %2094 }
 0x1ac   : > { %2249 = vadd.xlane.f32.xlu1 %v2248_v11 }
 0x1af   : > { %v9076_v13 = vpop.xlane.xlu1 %2091  ;;  %v2195_v42 = vpop.permute.xlu0 %2194 }
 0x1b0   : > { %v2251_v27 = vsel %vm2047_vm4, %v2195_v42, 0.0 }
 0x1b3   : > { %v2197_v4 = vpop.permute.xlu1 %2196 }
 0x1b4   : > { %v2254_v15 = vsel %vm2047_vm4, %v2197_v4, 0.0 }
 0x1b5   : > { %2255 = vadd.xlane.f32.xlu1 %v2254_v15 }
 0x1b7   : > { %v2199_v17 = vpop.permute.xlu1 %2198 }
 0x1b8   : > { %v2257_v0 = vsel %vm2047_vm4, %v2199_v17, 0.0 }
 0x1b9   : > { %2258 = vadd.xlane.f32.xlu1 %v2257_v0 }
 0x1bb   : > { %v2203_v54 = vpop.permute.xlu1 %2202 }
 0x1bf   : > { %v2205_v52 = vpop.permute.xlu1 %2204 }
 0x1c9   : > { %2252 = vadd.xlane.f32.xlu0 %v2251_v27  ;;  %v9114_v27 = vpop.permute.xlu0 %2200 }
 0x1ca   : > { %7280 = vrot.lane.b32.xlu1 %v7279_v61, %s12556_s25 }
 0x1d0   : > { %v6504_v57 = vpop.f32.mrb[16].mxu0 }
 0x1d1   : > { %v9092_v33 = vadd.f32 %v6504_v57, %v9089_v43  ;;  %v796_v45 = vpop.f32.mrb[17].mxu0 }
 0x1d2   : > { %v9095_v19 = vadd.f32 %v9089_v43, %v796_v45 }
 0x1d3   : > { %v876_v21 = vmul.f32 %v9092_v33, %v9092_v33 }
 0x1d4   : > { %v6507_v48 = vpop.f32.mrb[18].mxu0  ;;  %v875_v11 = vmul.f32 %v9095_v19, %v9095_v19 }
 0x1d5   : > { %v895_v34 = vsel %vm891_vm6, %v876_v21, 0.0  ;;  %v806_v6 = vpop.f32.mrb[19].mxu0 }
 0x1d6   : > { %896 = vadd.xlane.f32.xlu0 %v895_v34  ;;  %v892_v4 = vsel %vm891_vm6, %v875_v11, 0.0 }
 0x1d8   : > { %v6510_v15 = vpop.f32.mrb[20].mxu0 }
 0x1d9   : > { %v816_v17 = vpop.f32.mrb[21].mxu0  ;;  %v9158_v62 = vadd.f32 %v6510_v15, %v9089_v43 }
 0x1da   : > { %v9104_v0 = vadd.f32 %v9089_v43, %v816_v17  ;;  %893 = vadd.xlane.f32.xlu0 %v892_v4 }
 0x1db   : > { %12575 = vst [vmem:[#allocation42_spill] sm:$0xff] %v9158_v62 }
 0x1dc   : > { %12570 = vst [vmem:[#allocation37_spill] sm:$0xff] %v9104_v0  ;;  %v9106_v38 = vpop.f32.mrb[22].mxu0  ;;  %v879_v31 = vmul.f32 %v9104_v0, %v9104_v0 }
 0x1dd   : > { %v826_v42 = vpop.f32.mrb[23].mxu0 }
 0x1de   : > { %v9111_v56 = vadd.f32 %v9089_v43, %v826_v42  ;;  %v904_v9 = vsel %vm891_vm6, %v879_v31, 0.0 }
 0x1df   : > { %905 = vadd.xlane.f32.xlu0 %v904_v9 }
 0x1e0   : > { %12571 = vst [vmem:[#allocation38_spill] sm:$0xff] %v9111_v56  ;;  %v9116_v61 = vpop.f32.mrb[0].mxu1  ;;  %v6532_v57 = vpop.f32.mrb[24].mxu0  ;;  %v881_v45 = vmul.f32 %v9111_v56, %v9111_v56  ;;  %v2263_v56 = vsel %vm2047_vm4, %v2203_v54, 0.0 }
 0x1e1   : > { %v1220_v21 = vadd.f32 %v6532_v57, %v8893_v59  ;;  %v836_v11 = vpop.f32.mrb[1].mxu1  ;;  %v1214_v34 = vpop.f32.mrb[25].mxu0  ;;  %v9133_v57 = vadd.f32 %v6507_v48, %v9089_v43 }
 0x1e2   : > { %v9122_v4 = vadd.f32 %v9089_v43, %v836_v11  ;;  %v1215_v17 = vadd.f32 %v8893_v59, %v1214_v34  ;;  %v910_v31 = vsel %vm891_vm6, %v881_v45, 0.0 }
 0x1e3   : > { %v1294_v42 = vmax.f32 %v1220_v21, 0.0  ;;  %911 = vadd.xlane.f32.xlu0 %v910_v31 }
 0x1e4   : > { %12572 = vst [vmem:[#allocation39_spill] sm:$0xff] %v9122_v4  ;;  %v1293_v9 = vmax.f32 %v1215_v17, 0.0  ;;  %v9126_v2 = vpop.f32.mrb[2].mxu1  ;;  %v9128_v40 = vpop.xlane.xlu0 %2225  ;;  %v883_v1 = vmul.f32 %v9122_v4, %v9122_v4 }
 0x1e5   : > { %v846_v47 = vpop.f32.mrb[3].mxu1  ;;  %v6535_v11 = vpop.f32.mrb[26].mxu0 }
 0x1e6   : > { %v9136_v34 = vadd.f32 %v9089_v43, %v846_v47  ;;  %6570 = vmatprep.mubr.msk.f32.mxu1 %vm681_vm5, %v1293_v9  ;;  %v916_v45 = vsel %vm891_vm6, %v883_v1, 0.0  ;;  %v1230_v21 = vadd.f32 %v6535_v11, %v8893_v59  ;;  %v1224_v17 = vpop.f32.mrb[27].mxu0  ;;  %v9148_v47 = vadd.f32 %v9089_v43, %v806_v6 }
 0x1e7   : > { %917 = vadd.xlane.f32.xlu0 %v916_v45  ;;  %6571 = vmatmul.mubr.msk.f32.vlgmr.msra.gmra.mrb[8].mxu1 %vm681_vm5, %v1294_v42  ;;  %v1225_v31 = vadd.f32 %v8893_v59, %v1224_v17  ;;  %v878_v1 = vmul.f32 %v9133_v57, %v9133_v57 }
 0x1e8   : > { %12573 = vst [vmem:[#allocation40_spill] sm:$0xff] %v9136_v34  ;;  %v9143_v48 = vpop.f32.mrb[4].mxu1  ;;  %v885_v36 = vmul.f32 %v9136_v34, %v9136_v34  ;;  %v1296_v3 = vmax.f32 %v1230_v21, 0.0  ;;  %v6538_v41 = vpop.f32.mrb[28].mxu0 }
 0x1e9   : > { %v856_v9 = vpop.f32.mrb[5].mxu1  ;;  %v1295_v11 = vmax.f32 %v1225_v31, 0.0  ;;  %v1240_v17 = vadd.f32 %v6538_v41, %v8893_v59  ;;  %v1234_v44 = vpop.f32.mrb[29].mxu0  ;;  %v877_v41 = vmul.f32 %v9148_v47, %v9148_v47 }
 0x1ea   : > { %v9153_v45 = vadd.f32 %v9089_v43, %v856_v9  ;;  %v922_v42 = vsel %vm891_vm6, %v885_v36, 0.0  ;;  %v2207_v21 = vpop.permute.xlu0 %2206  ;;  %v1235_v6 = vadd.f32 %v8893_v59, %v1234_v44  ;;  %v901_v36 = vsel %vm891_vm6, %v878_v1, 0.0 }
 0x1eb   : > { %923 = vadd.xlane.f32.xlu0 %v922_v42  ;;  %6573 = vmatprep.mubr.msk.f32.mxu1 %vm681_vm5, %v1295_v11  ;;  %v1298_v53 = vmax.f32 %v1240_v17, 0.0 }
 0x1ec   : > { %12574 = vst [vmem:[#allocation41_spill] sm:$0xff] %v9153_v45  ;;  %v887_v31 = vmul.f32 %v9153_v45, %v9153_v45  ;;  %v9164_v9 = vpop.f32.mrb[6].mxu1  ;;  %6574 = vmatmul.mubr.msk.f32.gmra.mrb[10].mxu1 %vm681_vm5, %v1296_v3  ;;  %v6541_v42 = vpop.f32.mrb[30].mxu0  ;;  %v1297_v11 = vmax.f32 %v1235_v6, 0.0  ;;  %v9174_v45 = vadd.f32 %v9106_v38, %v9089_v43  ;;  %v880_v3 = vmul.f32 %v9158_v62, %v9158_v62 }
 0x1ed   : > { %v866_v15 = vpop.f32.mrb[7].mxu1  ;;  %v1250_v39 = vadd.f32 %v6541_v42, %v8893_v59  ;;  %v1244_v34 = vpop.f32.mrb[31].mxu0  ;;  %v898_v6 = vsel %vm891_vm6, %v877_v41, 0.0  ;;  %v9189_v62 = vadd.f32 %v9116_v61, %v9089_v43 }
 0x1ee   : > { %902 = vadd.xlane.f32.xlu1 %v901_v36  ;;  %v928_v44 = vsel %vm891_vm6, %v887_v31, 0.0  ;;  %12576 = vst [vmem:[#allocation43_spill] sm:$0xff] %v9174_v45  ;;  %v1245_v1 = vadd.f32 %v8893_v59, %v1244_v34  ;;  %6576 = vmatprep.mubr.msk.f32.mxu1 %vm681_vm5, %v1297_v11  ;;  %v7266_v31 = vpop.permute.xlu0 %7265  ;;  %v907_v11 = vsel %vm891_vm6, %v880_v3, 0.0 }
 0x1ef   : > { %929 = vadd.xlane.f32.xlu0 %v928_v44  ;;  %v1300_v36 = vmax.f32 %v1250_v39, 0.0  ;;  %v882_v39 = vmul.f32 %v9174_v45, %v9174_v45  ;;  %v7267_v41 = vunpack.i.l.bf16 %v7266_v31  ;;  %v2266_v45 = vsel %vm2047_vm4, %v2205_v52, 0.0 }
 0x1f0   : > { %v9179_v4 = vpop.xlane.xlu1 %2228  ;;  %v6544_v17 = vpop.f32.mrb[32].mxu0  ;;  %v1299_v42 = vmax.f32 %v1245_v1, 0.0  ;;  %6577 = vmatmul.mubr.msk.f32.gmra.mrb[12].mxu1 %vm681_vm5, %v1298_v53  ;;  %v7268_v53 = vunpack.i.h.bf16 %v7266_v31 }
 0x1f1   : > { %v1260_v38 = vadd.f32 %v6544_v17, %v8893_v59  ;;  %v1254_v44 = vpop.f32.mrb[33].mxu0  ;;  %v9196_v17 = vadd.f32 %v9089_v43, %v866_v15 }
 0x1f2   : > { %899 = vadd.xlane.f32.xlu1 %v898_v6  ;;  %v1255_v34 = vadd.f32 %v8893_v59, %v1254_v44  ;;  %6579 = vmatprep.mubr.msk.f32.mxu1 %vm681_vm5, %v1299_v42 }
 0x1f3   : > { %2264 = vadd.xlane.f32.xlu0 %v2263_v56  ;;  %v1302_v61 = vmax.f32 %v1260_v38, 0.0  ;;  %v2269_v38 = vsel %vm2047_vm4, %v2207_v21, 0.0  ;;  %v889_v52 = vmul.f32 %v9196_v17, %v9196_v17 }
 0x1f4   : > { %v7261_v1 = vpop.permute.xlu1 %7260  ;;  %v1301_v54 = vmax.f32 %v1255_v34, 0.0  ;;  %v6547_v6 = vpop.f32.mrb[34].mxu0  ;;  %6580 = vmatmul.mubr.msk.f32.gmra.mrb[14].mxu1 %vm681_vm5, %v1300_v36  ;;  %v913_v36 = vsel %vm891_vm6, %v882_v39, 0.0  ;;  %v884_v34 = vmul.f32 %v9189_v62, %v9189_v62 }
 0x1f5   : > { %v7263_v44 = vunpack.i.h.bf16 %v7261_v1  ;;  %v7262_v0 = vunpack.i.l.bf16 %v7261_v1  ;;  %v1270_v56 = vadd.f32 %v6547_v6, %v8893_v59  ;;  %v1264_v3 = vpop.f32.mrb[35].mxu0  ;;  %v9217_v6 = vadd.f32 %v9126_v2, %v9089_v43 }
 0x1f6   : > { %908 = vadd.xlane.f32.xlu1 %v907_v11  ;;  %v1265_v15 = vadd.f32 %v8893_v59, %v1264_v3  ;;  %6582 = vmatprep.mubr.msk.f32.mxu1 %vm681_vm5, %v1301_v54  ;;  %v6986_v3 = vpack.c.bf16 %v7268_v53, %v7267_v41  ;;  %v2106_v2 = vadd.f32 1e-12, %v9055_v51  ;;  %v919_v53 = vsel %vm891_vm6, %v884_v34, 0.0 }
 0x1f7   : > { %v6980_v42 = vpack.c.bf16 %v7263_v44, %v7262_v0  ;;  %2267 = vadd.xlane.f32.xlu0 %v2266_v45  ;;  %v1304_v0 = vmax.f32 %v1270_v56, 0.0  ;;  %v934_v41 = vsel %vm891_vm6, %v889_v52, 0.0  ;;  %v886_v56 = vmul.f32 %v9217_v6, %v9217_v6 }
 0x1f8   : > { %v1303_v11 = vmax.f32 %v1265_v15, 0.0  ;;  %v6550_v1 = vpop.f32.mrb[36].mxu0  ;;  %6583 = vmatmul.mubr.msk.f32.gmra.mrb[16].mxu1 %vm681_vm5, %v1302_v61  ;;  %v9234_v61 = vadd.f32 %v9143_v48, %v9089_v43  ;;  %7401 = vrsqrt.f32 %v2106_v2  ;;  %v9245_v34 = vadd.f32 %v9164_v9, %v9089_v43  ;;  %v9267_v2 = vld [vmem:[%s8622_s11 + $0x50] sm:$0xff] }
 0x1f9   : > { %6982 = vmatprep.subr.msk.bf16.mxu1 %vm9203_vm7, %v6980_v42  ;;  %v1280_v45 = vadd.f32 %v6550_v1, %v8893_v59  ;;  %v1274_v21 = vpop.f32.mrb[37].mxu0  ;;  %v925_v52 = vsel %vm891_vm6, %v886_v56, 0.0 }
 0x1fa   : > { %914 = vadd.xlane.f32.xlu1 %v913_v36  ;;  %6985 = vmatpush3.bf16.xpose.msk.msra.mxu1 %vm9203_vm7, %v6980_v42  ;;  %v1275_v39 = vadd.f32 %v8893_v59, %v1274_v21  ;;  %v2107_v36 = vadd.f32 1e-12, %v9057_v25  ;;  %v2111_v25 = vadd.f32 1e-12, %v9080_v5  ;;  %v890_v9 = vmul.f32 %v9245_v34, %v9245_v34 }
 0x1fb   : > { %2270 = vadd.xlane.f32.xlu0 %v2269_v38  ;;  %6988 = vmatprep.subr.msk.bf16.mxu1 %vm9203_vm7, %v6986_v3  ;;  %v1306_v15 = vmax.f32 %v1280_v45, 0.0  ;;  %v2260_v21 = vsel %vm2047_vm4, %v9114_v27, 0.0 }
 0x1fc   : > { %v1305_v54 = vmax.f32 %v1275_v39, 0.0  ;;  %6585 = vmatprep.mubr.msk.f32.mxu1 %vm681_vm5, %v1303_v11  ;;  %v6553_v44 = vpop.f32.mrb[38].mxu0  ;;  %v888_v11 = vmul.f32 %v9234_v61, %v9234_v61  ;;  %7403 = vrsqrt.f32 %v2107_v36  ;;  %v2272_v39 = vadd.f32 1e-12, %v9128_v40  ;;  %v9276_v40 = vld [vmem:[%s8622_s11 + $0x70] sm:$0xff] }
 0x1fd   : > { %6586 = vmatmul.mubr.msk.f32.gmra.mrb[18].mxu1 %vm681_vm5, %v1304_v0  ;;  %v1290_v51 = vadd.f32 %v6553_v44, %v8893_v59  ;;  %v1284_v42 = vpop.f32.mrb[39].mxu0  ;;  %v2108_v0 = vadd.f32 1e-12, %v9063_v49  ;;  %v9271_v49 = vld [vmem:[%s8622_s11 + $0x58] sm:$0xff] }
 0x1fe   : > { %920 = vadd.xlane.f32.xlu1 %v919_v53  ;;  %v1285_v38 = vadd.f32 %v8893_v59, %v1284_v42  ;;  %6588 = vmatprep.mubr.msk.f32.mxu1 %vm681_vm5, %v1305_v54  ;;  %v2110_v59 = vadd.f32 1e-12, %v9076_v13  ;;  %v931_v43 = vsel %vm891_vm6, %v888_v11, 0.0  ;;  %v2109_v13 = vadd.f32 1e-12, %v9061_v55  ;;  %v9288_v11 = vld [vmem:[%s8622_s11 + $0x60] sm:$0xff] }
 0x1ff   : > { %935 = vadd.xlane.f32.xlu0 %v934_v41  ;;  %v1308_v1 = vmax.f32 %v1290_v51, 0.0  ;;  %v2273_v54 = vadd.f32 1e-12, %v9179_v4  ;;  %v9281_v51 = vld [vmem:[%s8622_s11 + $0x78] sm:$0xff]  ;;  %v8347_v4 = vld [vmem:[%s8622_s11] sm:$0xff] }
 0x200   : > { %v1307_v48 = vmax.f32 %v1285_v38, 0.0  ;;  %7405 = vrsqrt.f32 %v2110_v59  ;;  %v9292_v59 = vld [vmem:[%s8622_s11 + $0x68] sm:$0xff] }
 0x201   : > { %6589 = vmatmul.mubr.msk.f32.gmra.mrb[20].mxu1 %vm681_vm5, %v1306_v15  ;;  %7407 = vrsqrt.f32 %v2111_v25 }
 0x202   : > { %926 = vadd.xlane.f32.xlu1 %v925_v52  ;;  %6991 = vmatpush3.bf16.xpose.msk.msra.mxu1 %vm9203_vm7, %v6986_v3  ;;  %v937_v3 = vsel %vm891_vm6, %v890_v9, 0.0  ;;  %v7402_v45 = vpop.eup %7401  ;;  %7409 = vrsqrt.f32 %v2109_v13 }
 0x203   : > { %6591 = vmatprep.mubr.msk.f32.mxu1 %vm681_vm5, %v1307_v48  ;;  %7411 = vrsqrt.f32 %v2108_v0  ;;  %v2138_v55 = vmul.f32 %v9267_v2, %v7402_v45  ;;  %v8348_v48 = vld [vmem:[%s8622_s11 + $0x8] sm:$0xff] }
 0x204   : > { %7413 = vrsqrt.f32 %v2272_v39  ;;  %v7299_v52 = vpack.i.bf16 %v8348_v48, %v8347_v4 }
 0x205   : > { %6592 = vmatmul.mubr.msk.f32.gmra.mrb[22].mxu1 %vm681_vm5, %v1308_v1  ;;  %7415 = vrsqrt.f32 %v2273_v54  ;;  %v7314_v54 = vpack.i.bf16 %v8676_v14, %v8654_v10 }
 0x206   : > { %932 = vadd.xlane.f32.xlu1 %v931_v43  ;;  %v7404_v5 = vpop.eup %7403 }
 0x207   : > { %v2139_v53 = vmul.f32 %v9271_v49, %v7404_v5 }
 0x209   : > { %v7284_v27 = vpack.i.bf16 %v2139_v53, %v2138_v55  ;;  %v7304_v55 = vpack.i.bf16 %v8637_v7, %v8641_v8 }
 0x20a   : > { %938 = vadd.xlane.f32.xlu1 %v937_v3  ;;  %v7406_v41 = vpop.eup %7405  ;;  %v9298_v3 = vld [vmem:[%s8756_s19] sm:$0xff] }
 0x20b   : > { %v7408_v44 = vpop.eup %7407  ;;  %v2142_v56 = vmul.f32 %v9276_v40, %v7406_v41 }
 0x20c   : > { %v7410_v15 = vpop.eup %7409  ;;  %v2143_v42 = vmul.f32 %v9281_v51, %v7408_v44 }
 0x20d   : > { %v7412_v36 = vpop.eup %7411  ;;  %v2141_v25 = vmul.f32 %v9292_v59, %v7410_v15  ;;  %v8353_v15 = vld [vmem:[%s8622_s11 + $0x10] sm:$0xff] }
 0x20e   : > { %2261 = vadd.xlane.f32.xlu1 %v2260_v21  ;;  %v7294_v38 = vpack.i.bf16 %v2143_v42, %v2142_v56  ;;  %v2140_v1 = vmul.f32 %v9288_v11, %v7412_v36  ;;  %v7414_v43 = vpop.eup %7413  ;;  %v9303_v21 = vld [vmem:[%s8756_s19 + $0x8] sm:$0xff]  ;;  %v8354_v42 = vld [vmem:[%s8622_s11 + $0x18] sm:$0xff] }
 0x20f   : > { %v7416_v0 = vpop.eup %7415  ;;  %v2304_v45 = vmul.f32 %v9298_v3, %v7414_v43  ;;  %v7309_v36 = vpack.i.bf16 %v8354_v42, %v8353_v15  ;;  %v8360_v15 = vld [vmem:[%s8622_s11 + $0x48] sm:$0xff] }
 0x210   : > { %v7289_v13 = vpack.i.bf16 %v2141_v25, %v2140_v1  ;;  %v2305_v39 = vmul.f32 %v9303_v21, %v7416_v0  ;;  %v7324_v1 = vpack.i.bf16 %v8698_v18, %v8663_v12 }
 0x215   : > { %7285 = vrot.lane.b32.xlu0 %v7284_v27, %s12556_s25 }
 0x219   : > { %7295 = vrot.lane.b32.xlu0 %v7294_v38, %s12556_s25 }
 0x21d   : > { %v2232_v9 = vpop.xlane.xlu0 %2231  ;;  %7300 = vrot.lane.b32.xlu0 %v7299_v52, %s8486_s21 }
 0x21e   : > { %v2274_v38 = vadd.f32 1e-12, %v2232_v9  ;;  %v8355_v9 = vld [vmem:[%s8622_s11 + $0x20] sm:$0xff] }
 0x21f   : > { %7290 = vrot.lane.b32.xlu1 %v7289_v13, %s12556_s25  ;;  %v8356_v13 = vld [vmem:[%s8622_s11 + $0x28] sm:$0xff] }
 0x220   : > { %v7319_v0 = vpack.i.bf16 %v8356_v13, %v8355_v9  ;;  %v9347_v13 = vld [vmem:[%s8756_s19 + $0x20] sm:$0xff] }
 0x221   : > { %v7271_v5 = vpop.permute.xlu0 %7270  ;;  %2336 = vrot.lane.b32.xlu0 %v2304_v45, %s12556_s25 }
 0x222   : > { %v7273_v53 = vunpack.i.h.bf16 %v7271_v5  ;;  %v7272_v41 = vunpack.i.l.bf16 %v7271_v5  ;;  %v7334_v5 = vpack.i.bf16 %v8720_v22, %v8685_v16 }
 0x223   : > { %2338 = vrot.lane.b32.xlu1 %v2305_v39, %s12556_s25 }
 0x224   : > { %v6992_v44 = vpack.c.bf16 %v7273_v53, %v7272_v41  ;;  %v8358_v53 = vld [vmem:[%s8622_s11 + $0x38] sm:$0xff] }
 0x225   : > { %v7276_v27 = vpop.permute.xlu0 %7275  ;;  %7305 = vrot.lane.b32.xlu0 %v7304_v55, %s8486_s21  ;;  %v2235_v56 = vpop.xlane.xlu1 %2234  ;;  %v8357_v55 = vld [vmem:[%s8622_s11 + $0x30] sm:$0xff] }
 0x226   : > { %v7278_v4 = vunpack.i.h.bf16 %v7276_v27  ;;  %v7277_v48 = vunpack.i.l.bf16 %v7276_v27  ;;  %v2275_v52 = vadd.f32 1e-12, %v2235_v56  ;;  %6994 = vmatprep.subr.msk.bf16.mxu1 %vm9203_vm7, %v6992_v44  ;;  %v7329_v41 = vpack.i.bf16 %v8358_v53, %v8357_v55  ;;  %v8359_v56 = vld [vmem:[%s8622_s11 + $0x40] sm:$0xff] }
 0x227   : > { %7315 = vrot.lane.b32.xlu1 %v7314_v54, %s8486_s21  ;;  %6997 = vmatpush3.bf16.xpose.msk.msra.mxu1 %vm9203_vm7, %v6992_v44  ;;  %v7344_v44 = vpack.i.bf16 %v8735_v26, %v8707_v20  ;;  %v7339_v42 = vpack.i.bf16 %v8360_v15, %v8359_v56  ;;  %v9369_v15 = vld [vmem:[%s8756_s19 + $0x40] sm:$0xff]  ;;  %v12609_v26 = vmov 0.0|0.0  }
 0x228   : > { %v6998_v25 = vpack.c.bf16 %v7278_v4, %v7277_v48  ;;  %7417 = vrsqrt.f32 %v2275_v52 }
 0x229   : > { %7310 = vrot.lane.b32.xlu0 %v7309_v36, %s8486_s21  ;;  %v2238_v43 = vpop.xlane.xlu1 %2237  ;;  %7419 = vrsqrt.f32 %v2274_v38 }
 0x22a   : > { %v2276_v45 = vadd.f32 1e-12, %v2238_v43  ;;  %7000 = vmatprep.subr.msk.bf16.mxu1 %vm9203_vm7, %v6998_v25 }
 0x22b   : > { %7325 = vrot.lane.b32.xlu1 %v7324_v1, %s8486_s21 }
 0x22c   : > { %7421 = vrsqrt.f32 %v2276_v45  ;;  %v7349_v45 = vpack.i.bf16 %v9271_v49, %v9267_v2 }
 0x22d   : > { %7320 = vrot.lane.b32.xlu0 %v7319_v0, %s8486_s21  ;;  %v2241_v39 = vpop.xlane.xlu1 %2240 }
 0x22e   : > { %v2277_v54 = vadd.f32 1e-12, %v2241_v39  ;;  %v7354_v39 = vpack.i.bf16 %v8747_v30, %v8725_v24  ;;  %v12600_v30 = vld [vmem:[#allocation31_spill] sm:$0xff] }
 0x22f   : > { %7335 = vrot.lane.b32.xlu1 %v7334_v5, %s8486_s21  ;;  %7003 = vmatpush3.bf16.xpose.msk.msra.mxu1 %vm9203_vm7, %v6998_v25 }
 0x230   : > { %7423 = vrsqrt.f32 %v2277_v54 }
 0x231   : > { %7330 = vrot.lane.b32.xlu0 %v7329_v41, %s8486_s21  ;;  %v2244_v27 = vpop.xlane.xlu1 %2243  ;;  %v9360_v41 = vld [vmem:[%s8756_s19 + $0x30] sm:$0xff] }
 0x232   : > { %v7418_v36 = vpop.eup %7417  ;;  %v2278_v38 = vadd.f32 1e-12, %v2244_v27 }
 0x233   : > { %7345 = vrot.lane.b32.xlu1 %v7344_v44, %s8486_s21  ;;  %v7420_v4 = vpop.eup %7419  ;;  %v2307_v52 = vmul.f32 %v7418_v36, %v8859_v46 }
 0x234   : > { %7425 = vrsqrt.f32 %v2278_v38  ;;  %v2306_v43 = vmul.f32 %v7420_v4, %v8869_v50 }
 0x235   : > { %7340 = vrot.lane.b32.xlu0 %v7339_v42, %s8486_s21  ;;  %v2247_v48 = vpop.xlane.xlu1 %2246 }
 0x236   : > { %v7422_v1 = vpop.eup %7421  ;;  %v2279_v25 = vadd.f32 1e-12, %v2247_v48 }
 0x237   : > { %2342 = vrot.lane.b32.xlu1 %v2307_v52, %s12556_s25  ;;  %v2308_v0 = vmul.f32 %v9347_v13, %v7422_v1  ;;  %v7369_v52 = vpack.i.bf16 %v9281_v51, %v9276_v40 }
 0x238   : > { %7427 = vrsqrt.f32 %v2279_v25  ;;  %v7374_v25 = vpack.i.bf16 %v8779_v37, %v8758_v32 }
 0x239   : > { %2340 = vrot.lane.b32.xlu0 %v2306_v43, %s12556_s25  ;;  %v2250_v9 = vpop.xlane.xlu1 %2249 }
 0x23a   : > { %v7424_v46 = vpop.eup %7423  ;;  %v2280_v5 = vadd.f32 1e-12, %v2250_v9 }
 0x23b   : > { %2344 = vrot.lane.b32.xlu1 %v2308_v0, %s12556_s25  ;;  %v2309_v50 = vmul.f32 %v7424_v46, %v8896_v60  ;;  %v7359_v60 = vpack.i.bf16 %v9292_v59, %v9288_v11 }
 0x23c   : > { %7429 = vrsqrt.f32 %v2280_v5 }
 0x23d   : > { %7350 = vrot.lane.b32.xlu0 %v7349_v45, %s8486_s21 }
 0x23e   : > { %v7426_v55 = vpop.eup %7425 }
 0x23f   : > { %2346 = vrot.lane.b32.xlu1 %v2309_v50, %s12556_s25  ;;  %v2310_v54 = vmul.f32 %v9360_v41, %v7426_v55 }
 0x241   : > { %7355 = vrot.lane.b32.xlu0 %v7354_v39, %s8486_s21 }
 0x242   : > { %v7428_v53 = vpop.eup %7427  ;;  %v2256_v2 = vpop.xlane.xlu1 %2255 }
 0x243   : > { %v2282_v49 = vadd.f32 1e-12, %v2256_v2  ;;  %v2311_v44 = vmul.f32 %v7428_v53, %v8908_v23  ;;  %v7364_v23 = vpack.i.bf16 %v8768_v35, %v8740_v28 }
 0x245   : > { %7431 = vrsqrt.f32 %v2282_v49  ;;  %2348 = vrot.lane.b32.xlu0 %v2310_v54, %s12556_s25  ;;  %2350 = vrot.lane.b32.xlu1 %v2311_v44, %s12556_s25 }
 0x246   : > { %v7430_v27 = vpop.eup %7429  ;;  %v2259_v56 = vpop.xlane.xlu1 %2258 }
 0x247   : > { %v2312_v42 = vmul.f32 %v9369_v15, %v7430_v27  ;;  %v2283_v9 = vadd.f32 1e-12, %v2259_v56 }
 0x249   : > { %2352 = vrot.lane.b32.xlu1 %v2312_v42, %s12556_s25  ;;  %7360 = vrot.lane.b32.xlu0 %v7359_v60, %s8486_s21 }
 0x24a   : > { %v7281_v36 = vpop.permute.xlu1 %7280 }
 0x24b   : > { %v7283_v38 = vunpack.i.h.bf16 %v7281_v36  ;;  %v7282_v4 = vunpack.i.l.bf16 %v7281_v36 }
 0x24d   : > { %v7004_v48 = vpack.c.bf16 %v7283_v38, %v7282_v4  ;;  %7365 = vrot.lane.b32.xlu0 %v7364_v23, %s8486_s21 }
 0x24f   : > { %v7432_v11 = vpop.eup %7431  ;;  %7006 = vmatprep.subr.msk.bf16.mxu1 %vm9203_vm7, %v7004_v48 }
 0x250   : > { %7009 = vmatpush3.bf16.xpose.msk.msra.mxu1 %vm9203_vm7, %v7004_v48  ;;  %v2314_v59 = vmul.f32 %v7432_v11, %v8993_v63 }
 0x252   : > { %2356 = vrot.lane.b32.xlu0 %v2314_v59, %s12556_s25 }
 0x256   : > { %v2253_v1 = vpop.xlane.xlu0 %2252  ;;  %7370 = vrot.lane.b32.xlu0 %v7369_v52, %s8486_s21 }
 0x257   : > { %v2281_v43 = vadd.f32 1e-12, %v2253_v1 }
 0x259   : > { %7433 = vrsqrt.f32 %v2281_v43 }
 0x25a   : > { %7375 = vrot.lane.b32.xlu0 %v7374_v25, %s8486_s21  ;;  %7435 = vrsqrt.f32 %v2283_v9 }
 0x263   : > { %v7434_v0 = vpop.eup %7433  ;;  %v897_v45 = vpop.xlane.xlu0 %896 }
 0x264   : > { %7437 = vrsqrt.f32 %v897_v45  ;;  %v2313_v63 = vmul.f32 %v7434_v0, %v8989_v58  ;;  %v7436_v46 = vpop.eup %7435  ;;  %vm949_vm8 = vcmp.eq.f32.partialorder %v897_v45, inf  ;;  %v952_v55 = vand.u32 2147483648, %v897_v45 }
 0x265   : > { %v2315_v51 = vmul.f32 %v7436_v46, %v9000_v29  ;;  %vm951_vm9 = vcmp.eq.f32.partialorder %v897_v45, 0.0 }
 0x266   : > { %2354 = vrot.lane.b32.xlu1 %v2313_v63, %s12556_s25 }
 0x267   : > { %v894_v40 = vpop.xlane.xlu0 %893 }
 0x268   : > { %7439 = vrsqrt.f32 %v894_v40  ;;  %vm942_vm10 = vcmp.eq.f32.partialorder %v894_v40, inf  ;;  %v945_v58 = vand.u32 2147483648, %v894_v40  ;;  %vm944_vm11 = vcmp.eq.f32.partialorder %v894_v40, 0.0 }
 0x26a   : > { %2358 = vrot.lane.b32.xlu1 %v2315_v51, %s12556_s25 }
 0x26c   : > { %v906_v5 = vpop.xlane.xlu0 %905 }
 0x26d   : > { %7441 = vrsqrt.f32 %v906_v5  ;;  %vm970_vm12 = vcmp.eq.f32.partialorder %v906_v5, inf  ;;  %v973_v1 = vand.u32 2147483648, %v906_v5  ;;  %vm972_vm13 = vcmp.eq.f32.partialorder %v906_v5, 0.0 }
 0x26e   : > { %v7438_v50 = vpop.eup %7437 }
 0x26f   : > { %v948_v39 = vmul.f32 %v7438_v50, %v897_v45 }
 0x270   : > { %v9393_v53 = vpop.xlane.xlu0 %911 }
 0x271   : > { %v950_v2 = vsel %vm949_vm8, %v897_v45, %v948_v39  ;;  %vm984_vm15 = vcmp.eq.f32.partialorder %v9393_v53, inf  ;;  %vm986_vm2 = vcmp.eq.f32.partialorder %v9393_v53, 0.0 }
 0x272   : > { %v7440_v49 = vpop.eup %7439  ;;  %v953_v44 = vsel %vm951_vm9, %v952_v55, %v950_v2 }
 0x273   : > { %v941_v54 = vmul.f32 %v7440_v49, %v894_v40  ;;  %v1053_v56 = vadd.f32 1e-07, %v953_v44 }
 0x274   : > { %v9395_v60 = vpop.xlane.xlu0 %917 }
 0x275   : > { %v943_v29 = vsel %vm942_vm10, %v894_v40, %v941_v54  ;;  %vm998_vm10 = vcmp.eq.f32.partialorder %v9395_v60, inf }
 0x276   : > { %v946_v27 = vsel %vm944_vm11, %v945_v58, %v943_v29  ;;  %vm1000_vm11 = vcmp.eq.f32.partialorder %v9395_v60, 0.0 }
 0x277   : > { %v1052_v42 = vadd.f32 1e-07, %v946_v27  ;;  %v7442_v4 = vpop.eup %7441  ;;  %v987_v27 = vand.u32 2147483648, %v9393_v53 }
 0x278   : > { %v9397_v23 = vpop.xlane.xlu0 %923  ;;  %v969_v11 = vmul.f32 %v7442_v4, %v906_v5 }
 0x279   : > { %7443 = vrcp.f32 %v1052_v42 }
 0x27a   : > { %7445 = vrsqrt.f32 %v9393_v53  ;;  %v971_v9 = vsel %vm970_vm12, %v906_v5, %v969_v11 }
 0x27b   : > { %7447 = vrcp.f32 %v1053_v56  ;;  %v903_v36 = vpop.xlane.xlu1 %902  ;;  %v974_v51 = vsel %vm972_vm13, %v973_v1, %v971_v9  ;;  %vm1012_vm13 = vcmp.eq.f32.partialorder %v9397_v23, inf }
 0x27c   : > { %7449 = vrsqrt.f32 %v903_v36  ;;  %v9400_v38 = vpop.xlane.xlu0 %929  ;;  %vm963_vm14 = vcmp.eq.f32.partialorder %v903_v36, inf  ;;  %v966_v2 = vand.u32 2147483648, %v903_v36  ;;  %vm965_vm0 = vcmp.eq.f32.partialorder %v903_v36, 0.0 }
 0x27d   : > { %v1056_v44 = vadd.f32 1e-07, %v974_v51 }
 0x27f   : > { %v900_v48 = vpop.xlane.xlu1 %899 }
 0x280   : > { %7451 = vrsqrt.f32 %v900_v48  ;;  %v9402_v59 = vpop.xlane.xlu0 %2264  ;;  %vm956_vm3 = vcmp.eq.f32.partialorder %v900_v48, inf  ;;  %v959_v11 = vand.u32 2147483648, %v900_v48  ;;  %vm958_vm5 = vcmp.eq.f32.partialorder %v900_v48, 0.0 }
 0x281   : > { %7453 = vrsqrt.f32 %v9395_v60 }
 0x283   : > { %v7444_v52 = vpop.eup %7443  ;;  %v9405_v25 = vpop.xlane.xlu1 %908 }
 0x284   : > { %v7446_v43 = vpop.eup %7445  ;;  %7455 = vrsqrt.f32 %v9405_v25  ;;  %v2268_v0 = vpop.xlane.xlu0 %2267  ;;  %v1069_v40 = vmul.f32 %v7444_v52, %v9095_v19  ;;  %vm977_vm8 = vcmp.eq.f32.partialorder %v9405_v25, inf  ;;  %vm979_vm9 = vcmp.eq.f32.partialorder %v9405_v25, 0.0 }
 0x285   : > { %v7448_v45 = vpop.eup %7447  ;;  %v2286_v63 = vadd.f32 1e-12, %v2268_v0  ;;  %v983_v50 = vmul.f32 %v7446_v43, %v9393_v53 }
 0x286   : > { %v7450_v46 = vpop.eup %7449  ;;  %v1071_v49 = vmul.f32 %v7448_v45, %v9092_v33 }
 0x287   : > { %v962_v39 = vmul.f32 %v7450_v46, %v903_v36  ;;  %v9410_v55 = vpop.xlane.xlu1 %914  ;;  %7457 = vrsqrt.f32 %v2286_v63  ;;  %v985_v4 = vsel %vm984_vm15, %v9393_v53, %v983_v50 }
 0x288   : > { %v9413_v5 = vpop.xlane.xlu0 %2270  ;;  %7459 = vrsqrt.f32 %v9410_v55  ;;  %v6932_v33 = vpack.c.bf16 %v1071_v49, %v1069_v40  ;;  %v988_v45 = vsel %vm986_vm2, %v987_v27, %v985_v4  ;;  %v1001_v4 = vand.u32 2147483648, %v9395_v60 }
 0x289   : > { %v964_v58 = vsel %vm963_vm14, %v903_v36, %v962_v39  ;;  %7461 = vrsqrt.f32 %v9397_v23  ;;  %vm991_vm12 = vcmp.eq.f32.partialorder %v9410_v55, inf  ;;  %vm993_vm14 = vcmp.eq.f32.partialorder %v9410_v55, 0.0 }
 0x28a   : > { %v7452_v54 = vpop.eup %7451  ;;  %v967_v29 = vsel %vm965_vm0, %v966_v2, %v964_v58  ;;  %6934 = vmatprep.subr.msk.bf16.mxu0 %vm9419_vm1, %v6932_v33  ;;  %vm1014_vm2 = vcmp.eq.f32.partialorder %v9397_v23, 0.0 }
 0x28b   : > { %v1055_v56 = vadd.f32 1e-07, %v967_v29  ;;  %v955_v42 = vmul.f32 %v7452_v54, %v900_v48  ;;  %v9426_v36 = vpop.xlane.xlu1 %920  ;;  %v7454_v1 = vpop.eup %7453  ;;  %6937 = vmatpush3.bf16.xpose.msk.msra.mxu0 %vm9419_vm1, %v6932_v33 }
 0x28c   : > { %7463 = vrsqrt.f32 %v9426_v36  ;;  %v9432_v52 = vpop.xlane.xlu0 %935  ;;  %v997_v51 = vmul.f32 %v7454_v1, %v9395_v60  ;;  %vm1005_vm15 = vcmp.eq.f32.partialorder %v9426_v36, inf  ;;  %vm1007_vm0 = vcmp.eq.f32.partialorder %v9426_v36, 0.0 }
 0x28d   : > { %v957_v43 = vsel %vm956_vm3, %v900_v48, %v955_v42  ;;  %7465 = vrcp.f32 %v1056_v44  ;;  %v980_v48 = vand.u32 2147483648, %v9405_v25  ;;  %v1058_v44 = vadd.f32 1e-07, %v988_v45 }
 0x28e   : > { %v7456_v9 = vpop.eup %7455  ;;  %v960_v0 = vsel %vm958_vm5, %v959_v11, %v957_v43  ;;  %7467 = vrcp.f32 %v1055_v56  ;;  %v9452_v56 = vld [vmem:[%s8756_s19 + $0x70] sm:$0xff]  ;;  %v2285_v11 = vadd.f32 1e-12, %v9402_v59 }
 0x28f   : > { %v1054_v63 = vadd.f32 1e-07, %v960_v0  ;;  %v976_v46 = vmul.f32 %v7456_v9, %v9405_v25  ;;  %v9439_v40 = vpop.xlane.xlu1 %926  ;;  %v999_v9 = vsel %vm998_vm10, %v9395_v60, %v997_v51  ;;  %v994_v0 = vand.u32 2147483648, %v9410_v55 }
 0x290   : > { %v7286_v50 = vpop.permute.xlu0 %7285  ;;  %v1015_v60 = vand.u32 2147483648, %v9397_v23  ;;  %vm1019_vm3 = vcmp.eq.f32.partialorder %v9439_v40, inf  ;;  %vm1021_vm5 = vcmp.eq.f32.partialorder %v9439_v40, 0.0  ;;  %vm1028_vm10 = vcmp.eq.f32.partialorder %v9400_v38, 0.0 }
 0x291   : > { %7469 = vrcp.f32 %v1054_v63  ;;  %v978_v53 = vsel %vm977_vm8, %v9405_v25, %v976_v46  ;;  %v7288_v39 = vunpack.i.h.bf16 %v7286_v50  ;;  %v7287_v2 = vunpack.i.l.bf16 %v7286_v50  ;;  %v7458_v49 = vpop.eup %7457 }
 0x292   : > { %v981_v58 = vsel %vm979_vm9, %v980_v48, %v978_v53  ;;  %7471 = vrsqrt.f32 %v9439_v40  ;;  %v7460_v54 = vpop.eup %7459  ;;  %v2318_v25 = vmul.f32 %v9452_v56, %v7458_v49  ;;  %v1002_v53 = vsel %vm1000_vm11, %v1001_v4, %v999_v9 }
 0x293   : > { %v1057_v29 = vadd.f32 1e-07, %v981_v58  ;;  %v7010_v33 = vpack.c.bf16 %v7288_v39, %v7287_v2  ;;  %v9449_v27 = vpop.xlane.xlu1 %932  ;;  %v7462_v42 = vpop.eup %7461  ;;  %v990_v1 = vmul.f32 %v7460_v54, %v9410_v55  ;;  %vm1026_vm8 = vcmp.eq.f32.partialorder %v9400_v38, inf }
 0x294   : > { %7473 = vrsqrt.f32 %v9449_v27  ;;  %v9459_v43 = vpop.permute.xlu0 %7295  ;;  %2364 = vrot.lane.b32.xlu0 %v2318_v25, %s12556_s25  ;;  %v1011_v63 = vmul.f32 %v7462_v42, %v9397_v23  ;;  %v2287_v25 = vadd.f32 1e-12, %v9413_v5  ;;  %v8365_v5 = vld [vmem:[%s8756_s19 + $0x10] sm:$0xff]  ;;  %vm1033_vm9 = vcmp.eq.f32.partialorder %v9449_v27, inf }
 0x295   : > { %7475 = vrcp.f32 %v1057_v29  ;;  %7012 = vmatprep.subr.msk.bf16.mxu1 %vm9203_vm7, %v7010_v33  ;;  %v992_v45 = vsel %vm991_vm12, %v9410_v55, %v990_v1  ;;  %v1008_v55 = vand.u32 2147483648, %v9426_v36  ;;  %v1060_v29 = vadd.f32 1e-07, %v1002_v53 }
 0x296   : > { %v7464_v59 = vpop.eup %7463  ;;  %7477 = vrsqrt.f32 %v9400_v38  ;;  %7015 = vmatpush3.bf16.xpose.msk.msra.mxu1 %vm9203_vm7, %v7010_v33  ;;  %v995_v46 = vsel %vm993_vm14, %v994_v0, %v992_v45  ;;  %v1013_v33 = vsel %vm1012_vm13, %v9397_v23, %v1011_v63  ;;  %v1022_v45 = vand.u32 2147483648, %v9439_v40  ;;  %v12581_v63 = vld [vmem:[#allocation37_spill] sm:$0xff] }
 0x297   : > { %7479 = vrcp.f32 %v1058_v44  ;;  %v1004_v51 = vmul.f32 %v7464_v59, %v9426_v36  ;;  %v9477_v48 = vpop.xlane.xlu1 %938  ;;  %v7466_v50 = vpop.eup %7465  ;;  %v1059_v39 = vadd.f32 1e-07, %v995_v46  ;;  %v7298_v53 = vunpack.i.h.bf16 %v9459_v43 }
 0x298   : > { %v9483_v2 = vpop.permute.xlu0 %7300  ;;  %v7468_v49 = vpop.eup %7467  ;;  %7481 = vrsqrt.f32 %v2285_v11  ;;  %3287 = vrot.lane.b32.xlu0 %v9298_v3, %s8486_s21  ;;  %v1029_v23 = vand.u32 2147483648, %v9400_v38  ;;  %vm1035_vm11 = vcmp.eq.f32.partialorder %v9449_v27, 0.0  ;;  %vm1047_vm12 = vcmp.eq.f32.partialorder %v9477_v48, inf }
 0x299   : > { %v1006_v58 = vsel %vm1005_vm15, %v9426_v36, %v1004_v51  ;;  %7483 = vrcp.f32 %v1059_v39  ;;  %v1075_v9 = vmul.f32 %v7468_v49, %v9133_v57  ;;  %v1077_v57 = vmul.f32 %v7466_v50, %v12581_v63  ;;  %v12582_v50 = vld [vmem:[#allocation42_spill] sm:$0xff] }
 0x29a   : > { %v1009_v54 = vsel %vm1007_vm0, %v1008_v55, %v1006_v58  ;;  %7485 = vrsqrt.f32 %v9477_v48  ;;  %v7297_v39 = vunpack.i.l.bf16 %v9459_v43  ;;  %v1036_v63 = vand.u32 2147483648, %v9449_v27 }
 0x29b   : > { %v7470_v44 = vpop.eup %7469  ;;  %v1061_v42 = vadd.f32 1e-07, %v1009_v54  ;;  %v2262_v36 = vpop.xlane.xlu1 %2261  ;;  %7487 = vrsqrt.f32 %v9432_v52  ;;  %vm1040_vm13 = vcmp.eq.f32.partialorder %v9432_v52, inf  ;;  %vm1049_vm14 = vcmp.eq.f32.partialorder %v9477_v48, 0.0 }
 0x29c   : > { %v7472_v4 = vpop.eup %7471  ;;  %v2284_v3 = vadd.f32 1e-12, %v2262_v36  ;;  %v2337_v11 = vpop.permute.xlu0 %2336  ;;  %v1073_v1 = vmul.f32 %v7470_v44, %v9148_v47  ;;  %3291 = vrot.lane.b32.xlu0 %v8365_v5, %s8486_s21  ;;  %vm1042_vm15 = vcmp.eq.f32.partialorder %v9432_v52, 0.0 }
 0x29d   : > { %v1018_v0 = vmul.f32 %v7472_v4, %v9439_v40  ;;  %6682 = vmatprep.mubr.msk.f32.mxu1 %vm2047_vm4, %v2337_v11 }
 0x29e   : > { %v7474_v59 = vpop.eup %7473  ;;  %7489 = vrsqrt.f32 %v2284_v3  ;;  %v6938_v47 = vpack.c.bf16 %v1075_v9, %v1073_v1 }
 0x29f   : > { %v7476_v46 = vpop.eup %7475  ;;  %7491 = vrcp.f32 %v1061_v42  ;;  %v1020_v51 = vsel %vm1019_vm3, %v9439_v40, %v1018_v0  ;;  %v7291_v55 = vpop.permute.xlu1 %7290  ;;  %v1032_v3 = vmul.f32 %v7474_v59, %v9449_v27  ;;  %v1016_v40 = vsel %vm1014_vm2, %v1015_v60, %v1013_v33  ;;  %v12583_v33 = vld [vmem:[#allocation38_spill] sm:$0xff] }
 0x2a0   : > { %v7478_v49 = vpop.eup %7477  ;;  %v1023_v58 = vsel %vm1021_vm5, %v1022_v45, %v1020_v51  ;;  %v7293_v54 = vunpack.i.h.bf16 %v7291_v55  ;;  %v7292_v44 = vunpack.i.l.bf16 %v7291_v55  ;;  %v9512_v36 = vpop.permute.xlu0 %7305  ;;  %6940 = vmatprep.subr.msk.bf16.mxu0 %vm9419_vm1, %v6938_v47  ;;  %v1079_v42 = vmul.f32 %v7476_v46, %v12582_v50  ;;  %3295 = vrot.lane.b32.xlu0 %v9347_v13, %s8486_s21  ;;  %v12584_v51 = vld [vmem:[#allocation43_spill] sm:$0xff] }
 0x2a1   : > { %v7480_v4 = vpop.eup %7479  ;;  %7493 = vrcp.f32 %v1060_v29  ;;  %6943 = vmatpush3.bf16.xpose.msk.msra.mxu0 %vm9419_vm1, %v6938_v47  ;;  %v1025_v9 = vmul.f32 %v7478_v49, %v9400_v38  ;;  %v1063_v0 = vadd.f32 1e-07, %v1023_v58  ;;  %v7022_v59 = vpack.c.bf16 %v7298_v53, %v7297_v39 }
 0x2a2   : > { %v7016_v43 = vpack.c.bf16 %v7293_v54, %v7292_v44  ;;  %v6944_v11 = vpack.c.bf16 %v1079_v42, %v1077_v57  ;;  %v7482_v1 = vpop.eup %7481  ;;  %7495 = vrsqrt.f32 %v2287_v25  ;;  %v1062_v13 = vadd.f32 1e-07, %v1016_v40 }
 0x2a3   : > { %v9525_v5 = vpop.permute.xlu1 %2338  ;;  %v7484_v29 = vpop.eup %7483  ;;  %v1034_v60 = vsel %vm1033_vm9, %v9449_v27, %v1032_v3  ;;  %v1081_v25 = vmul.f32 %v7480_v4, %v12583_v33  ;;  %v7303_v57 = vunpack.i.h.bf16 %v9483_v2  ;;  %v7302_v46 = vunpack.i.l.bf16 %v9483_v2  ;;  %v9559_v4 = vld [vmem:[%s8756_s19 + $0x60] sm:$0xff] }
 0x2a4   : > { %v9529_v45 = vpop.permute.xlu0 %7310  ;;  %6946 = vmatprep.subr.msk.bf16.mxu0 %vm9419_vm1, %v6944_v11  ;;  %7018 = vmatprep.subr.msk.bf16.mxu1 %vm9203_vm7, %v7016_v43  ;;  %v7486_v47 = vpop.eup %7485  ;;  %v1083_v53 = vmul.f32 %v7484_v29, %v12584_v51  ;;  %v1027_v55 = vsel %vm1026_vm8, %v9400_v38, %v1025_v9  ;;  %7497 = vrcp.f32 %v1063_v0  ;;  %v1037_v2 = vsel %vm1035_vm11, %v1036_v63, %v1034_v60  ;;  %v9577_v60 = vld [vmem:[%s8756_s19 + $0x68] sm:$0xff] }
 0x2a5   : > { %7021 = vmatpush3.bf16.xpose.msk.msra.mxu1 %vm9203_vm7, %v7016_v43  ;;  %v7488_v39 = vpop.eup %7487  ;;  %7499 = vrcp.f32 %v1062_v13  ;;  %v1046_v42 = vmul.f32 %v7486_v47, %v9477_v48  ;;  %v1030_v27 = vsel %vm1028_vm10, %v1029_v23, %v1027_v55  ;;  %v7060_v3 = vpack.c.bf16 %v7303_v57, %v7302_v46 }
 0x2a6   : > { %7024 = vmatprep.subr.msk.bf16.mxu1 %vm9203_vm7, %v7022_v59  ;;  %v6950_v44 = vpack.c.bf16 %v1083_v53, %v1081_v25  ;;  %v1039_v43 = vmul.f32 %v7488_v39, %v9432_v52  ;;  %v1065_v9 = vadd.f32 1e-07, %v1037_v2  ;;  %v1064_v13 = vadd.f32 1e-07, %v1030_v27 }
 0x2a7   : > { %v9551_v49 = vpop.permute.xlu1 %7315  ;;  %v1048_v23 = vsel %vm1047_vm12, %v9477_v48, %v1046_v42  ;;  %v2317_v33 = vmul.f32 %v9577_v60, %v7482_v1  ;;  %v1050_v47 = vand.u32 2147483648, %v9477_v48  ;;  %v7313_v63 = vunpack.i.h.bf16 %v9529_v45 }
 0x2a8   : > { %v7490_v58 = vpop.eup %7489  ;;  %v9553_v54 = vpop.permute.xlu0 %7320  ;;  %v7312_v57 = vunpack.i.l.bf16 %v9529_v45  ;;  %v1041_v51 = vsel %vm1040_vm13, %v9432_v52, %v1039_v43  ;;  %7501 = vrcp.f32 %v1065_v9 }
 0x2a9   : > { %v7492_v50 = vpop.eup %7491  ;;  %6949 = vmatpush3.bf16.xpose.msk.msra.mxu0 %vm9419_vm1, %v6944_v11  ;;  %v2316_v38 = vmul.f32 %v9559_v4, %v7490_v58  ;;  %v1051_v53 = vsel %vm1049_vm14, %v1050_v47, %v1048_v23  ;;  %7503 = vrcp.f32 %v1064_v13  ;;  %v9598_v58 = vld [vmem:[%s8756_s19 + $0x78] sm:$0xff]  ;;  %v7323_v43 = vunpack.i.h.bf16 %v9553_v54 }
 0x2aa   : > { %6952 = vmatprep.subr.msk.bf16.mxu0 %vm9419_vm1, %v6950_v44  ;;  %v1087_v29 = vmul.f32 %v7492_v50, %v9189_v62  ;;  %v12585_v62 = vld [vmem:[#allocation39_spill] sm:$0xff]  ;;  %v7066_v50 = vpack.c.bf16 %v7313_v63, %v7312_v57  ;;  %v7322_v9 = vunpack.i.l.bf16 %v9553_v54  ;;  %v9633_v57 = vld [vmem:[%s12356_s7] ss:$0 sm:$0xff] }
 0x2ab   : > { %v7494_v40 = vpop.eup %7493  ;;  %2360 = vrot.lane.b32.xlu1 %v2316_v38, %s12556_s25  ;;  %v9566_v0 = vpop.permute.xlu1 %7325  ;;  %v1067_v38 = vadd.f32 1e-07, %v1051_v53 }
 0x2ac   : > { %v9569_v11 = vpop.permute.xlu0 %7330  ;;  %v7496_v25 = vpop.eup %7495  ;;  %v1085_v46 = vmul.f32 %v7494_v40, %v12585_v62  ;;  %v7072_v54 = vpack.c.bf16 %v7323_v43, %v7322_v9 }
 0x2ad   : > { %7027 = vmatpush3.bf16.xpose.msk.msra.mxu1 %vm9203_vm7, %v7022_v59  ;;  %v1043_v59 = vand.u32 2147483648, %v9432_v52  ;;  %v2319_v48 = vmul.f32 %v9598_v58, %v7496_v25  ;;  %7505 = vrcp.f32 %v1067_v38  ;;  %v7332_v53 = vunpack.i.l.bf16 %v9569_v11 }
 0x2ae   : > { %7062 = vmatprep.subr.msk.bf16.mxu1 %vm9203_vm7, %v7060_v3  ;;  %v6956_v45 = vpack.c.bf16 %v1087_v29, %v1085_v46  ;;  %v7498_v55 = vpop.eup %7497  ;;  %v12586_v29 = vld [vmem:[#allocation40_spill] sm:$0xff] }
 0x2af   : > { %2362 = vrot.lane.b32.xlu1 %v2317_v33, %s12556_s25  ;;  %v9589_v1 = vpop.permute.xlu1 %7335  ;;  %v1044_v2 = vsel %vm1042_vm15, %v1043_v59, %v1041_v51  ;;  %v7500_v42 = vpop.eup %7499  ;;  %v1091_v52 = vmul.f32 %v7498_v55, %v9217_v6  ;;  %v7333_v59 = vunpack.i.h.bf16 %v9569_v11  ;;  %v12587_v55 = vld [vmem:[#allocation41_spill] sm:$0xff] }
 0x2b0   : > { %v9592_v39 = vpop.permute.xlu0 %7340  ;;  %v1089_v13 = vmul.f32 %v7500_v42, %v12586_v29 }
 0x2b1   : > { %6955 = vmatpush3.bf16.xpose.msk.msra.mxu0 %vm9419_vm1, %v6950_v44  ;;  %v1066_v44 = vadd.f32 1e-07, %v1044_v2  ;;  %v8371_v2 = vld [vmem:[%s8756_s19 + $0x28] sm:$0xff] }
 0x2b2   : > { %6958 = vmatprep.subr.msk.bf16.mxu0 %vm9419_vm1, %v6956_v45  ;;  %v7502_v23 = vpop.eup %7501 }
 0x2b3   : > { %2366 = vrot.lane.b32.xlu1 %v2319_v48, %s12556_s25  ;;  %v9604_v27 = vpop.permute.xlu1 %7345  ;;  %7507 = vrcp.f32 %v1066_v44  ;;  %v7504_v25 = vpop.eup %7503  ;;  %v1095_v51 = vmul.f32 %v7502_v23, %v9234_v61  ;;  %v7078_v44 = vpack.c.bf16 %v7333_v59, %v7332_v53  ;;  %v7342_v23 = vunpack.i.l.bf16 %v9592_v39  ;;  %s400_s25 = scalar_lea.vmem %s12352_s3, %s8607_s23  ;;  %s371_s23 = sand.u32 1, %s8466_s28  }
 0x2b4   : > { %v2341_v40 = vpop.permute.xlu0 %2340  ;;  %6683 = vmatmul.mubr.msk.f32.vlgmr.msra.gmra.mrb[24].mxu1 %vm2047_vm4, %v9525_v5  ;;  %v1093_v48 = vmul.f32 %v7504_v25, %v12587_v55  ;;  %s372_s14 = scalar_lea.vmem [#allocation7], %s371_s23  ;;  %s5812_s30 = scalar_lea.sflag [#allocation8], %s371_s23 }
 0x2b5   : > { %6685 = vmatprep.mubr.msk.f32.mxu1 %vm2047_vm4, %v2341_v40  ;;  %7065 = vmatpush3.bf16.xpose.msk.msra.mxu1 %vm9203_vm7, %v7060_v3  ;;  %v6962_v3 = vpack.c.bf16 %v1091_v52, %v1089_v13  ;;  %s5824_s16 = sshll.u32 %s372_s14, 4  ;;  %s12304_s16 = int_to_ptr.vmem [resolvable:$true] %s5824_s16 }
 0x2b6   : > { %7068 = vmatprep.subr.msk.bf16.mxu1 %vm9203_vm7, %v7066_v50  ;;  %v6968_v11 = vpack.c.bf16 %v1095_v51, %v1093_v48  ;;  %s8404_s1 = scalar_lea.vmem %s12304_s16, 16 }
 0x2b7   : > { %3289 = vrot.lane.b32.xlu1 %v9303_v21, %s8486_s21  ;;  %v2343_v6 = vpop.permute.xlu1 %2342  ;;  %v8369_v21 = vld [vmem:[%s8756_s19 + $0x18] sm:$0xff]  ;;  %v7506_v52 = vpop.eup %7505  ;;  %p8405_p12 = scmp.ne.s32.totalorder %s12304_s16, %s8404_s1 }
 0x2b8   : > { %v9619_v5 = vpop.permute.xlu0 %7350  ;;  %6686 = vmatmul.mubr.msk.f32.gmra.mrb[26].mxu1 %vm2047_vm4, %v2343_v6  ;;  %v1099_v29 = vmul.f32 %v7506_v52, %v9245_v34 }
 0x2b9   : > { %6961 = vmatpush3.bf16.xpose.msk.msra.mxu0 %vm9419_vm1, %v6956_v45  ;;  %v7353_v59 = vunpack.i.h.bf16 %v9619_v5  ;;  %v7352_v53 = vunpack.i.l.bf16 %v9619_v5  ;;  %p8406_p13 = pnand %p8405_p12, %p8578_p4 }
 0x2ba   : > { %v9624_v33 = vpop.f32.mrb[8].mxu1  ;;  %6964 = vmatprep.subr.msk.bf16.mxu0 %vm9419_vm1, %v6962_v3 }
 0x2bb   : > { %3293 = vrot.lane.b32.xlu1 %v8369_v21, %s8486_s21  ;;  %v2345_v47 = vpop.permute.xlu1 %2344  ;;  %v1423_v63 = vpop.f32.mrb[9].mxu1  ;;  %v7090_v48 = vpack.c.bf16 %v7353_v59, %v7352_v53  ;;  %v9736_v59 = vld [vmem:[%s8756_s19 + $0x38] sm:$0xff]  ;;  %p8407_p0 = pneg %p8406_p13 }
 0x2bc   : > { %v9636_v62 = vadd.f32 %v9633_v57, %v1423_v63  ;;  %v9638_v46 = vpop.permute.xlu0 %7355  ;;  %6688 = vmatprep.mubr.msk.f32.mxu1 %vm2047_vm4, %v2345_v47 }
 0x2bd   : > { %7071 = vmatpush3.bf16.xpose.msk.msra.mxu1 %vm9203_vm7, %v7066_v50  ;;  %v7508_v43 = vpop.eup %7507 }
 0x2be   : > { %v1502_v45 = vmul.f32 %v9636_v62, %v9636_v62  ;;  %7074 = vmatprep.subr.msk.bf16.mxu1 %vm9203_vm7, %v7072_v54  ;;  %v1097_v25 = vmul.f32 %v7508_v43, %v9196_v17  ;;  %v9708_v43 = vadd.f32 %v9633_v57, %v9624_v33 }
 0x2bf   : > { %3297 = vrot.lane.b32.xlu1 %v8371_v2, %s8486_s21  ;;  %v2347_v42 = vpop.permute.xlu1 %2346  ;;  %v9653_v61 = vpop.f32.mrb[10].mxu1 }
 0x2c0   : > { %v2349_v38 = vpop.permute.xlu0 %2348  ;;  %6689 = vmatmul.mubr.msk.f32.gmra.mrb[28].mxu1 %vm2047_vm4, %v2347_v42  ;;  %v1518_v50 = vsel %vm891_vm6, %v1502_v45, 0.0  ;;  %v9657_v40 = vpop.f32.mrb[11].mxu1  ;;  %v6974_v47 = vpack.c.bf16 %v1099_v29, %v1097_v25 }
 0x2c1   : > { %6967 = vmatpush3.bf16.xpose.msk.msra.mxu0 %vm9419_vm1, %v6962_v3  ;;  %6691 = vmatprep.mubr.msk.f32.mxu1 %vm2047_vm4, %v2349_v38  ;;  %v7343_v3 = vunpack.i.h.bf16 %v9592_v39 }
 0x2c2   : > { %1519 = vadd.xlane.f32.xlu0 %v1518_v50  ;;  %6970 = vmatprep.subr.msk.bf16.mxu0 %vm9419_vm1, %v6968_v11 }
 0x2c3   : > { %v2351_v9 = vpop.permute.xlu1 %2350  ;;  %v9666_v13 = vpop.f32.mrb[12].mxu1 }
 0x2c4   : > { %6692 = vmatmul.mubr.msk.f32.gmra.mrb[30].mxu1 %vm2047_vm4, %v2351_v9  ;;  %v1443_v6 = vpop.f32.mrb[13].mxu1  ;;  %v7361_v39 = vpop.permute.xlu0 %7360 }
 0x2c5   : > { %7077 = vmatpush3.bf16.xpose.msk.msra.mxu1 %vm9203_vm7, %v7072_v54  ;;  %v7084_v54 = vpack.c.bf16 %v7343_v3, %v7342_v23  ;;  %v7363_v50 = vunpack.i.h.bf16 %v7361_v39  ;;  %v7362_v5 = vunpack.i.l.bf16 %v7361_v39  ;;  %v9733_v39 = vadd.f32 %v9633_v57, %v1443_v6 }
 0x2c6   : > { %7080 = vmatprep.subr.msk.bf16.mxu1 %vm9203_vm7, %v7078_v44 }
 0x2c7   : > { %v2353_v21 = vpop.permute.xlu1 %2352  ;;  %v9676_v34 = vpop.f32.mrb[14].mxu1  ;;  %v7096_v9 = vpack.c.bf16 %v7363_v50, %v7362_v5  ;;  %v1506_v53 = vmul.f32 %v9733_v39, %v9733_v39 }
 0x2c8   : > { %6694 = vmatprep.mubr.msk.f32.mxu1 %vm2047_vm4, %v2353_v21  ;;  %v1453_v63 = vpop.f32.mrb[15].mxu1  ;;  %v9694_v2 = vpop.permute.xlu0 %7365 }
 0x2c9   : > { %6973 = vmatpush3.bf16.xpose.msk.msra.mxu0 %vm9419_vm1, %v6968_v11  ;;  %v1530_v6 = vsel %vm891_vm6, %v1506_v53, 0.0 }
 0x2ca   : > { %6976 = vmatprep.subr.msk.bf16.mxu0 %vm9419_vm1, %v6974_v47 }
 0x2cb   : > { %v9682_v51 = vpop.f32.mrb[16].mxu1 }
 0x2cc   : > { %v1463_v17 = vpop.f32.mrb[17].mxu1  ;;  %v2357_v11 = vpop.permute.xlu0 %2356 }
 0x2cd   : > { %7083 = vmatpush3.bf16.xpose.msk.msra.mxu1 %vm9203_vm7, %v7078_v44  ;;  %v9750_v5 = vadd.f32 %v9633_v57, %v1463_v17 }
 0x2ce   : > { %7086 = vmatprep.subr.msk.bf16.mxu1 %vm9203_vm7, %v7084_v54 }
 0x2d0   : > { %v9690_v45 = vpop.f32.mrb[18].mxu1  ;;  %v7371_v3 = vpop.permute.xlu0 %7370 }
 0x2d1   : > { %6979 = vmatpush3.bf16.xpose.msk.msra.mxu0 %vm9419_vm1, %v6974_v47  ;;  %v1473_v55 = vpop.f32.mrb[19].mxu1  ;;  %v7373_v23 = vunpack.i.h.bf16 %v7371_v3  ;;  %v7372_v25 = vunpack.i.l.bf16 %v7371_v3  ;;  %v9726_v47 = vadd.f32 %v9633_v57, %v9657_v40 }
 0x2d3   : > { %v7102_v21 = vpack.c.bf16 %v7373_v23, %v7372_v25 }
 0x2d4   : > { %v9696_v42 = vpop.f32.mrb[20].mxu1 }
 0x2d5   : > { %v1483_v38 = vpop.f32.mrb[21].mxu1  ;;  %7089 = vmatpush3.bf16.xpose.msk.msra.mxu1 %vm9203_vm7, %v7084_v54  ;;  %v1504_v54 = vmul.f32 %v9726_v47, %v9726_v47 }
 0x2d6   : > { %7092 = vmatprep.subr.msk.bf16.mxu1 %vm9203_vm7, %v7090_v48  ;;  %v9762_v3 = vadd.f32 %v9633_v57, %v1483_v38  ;;  %v9776_v38 = vadd.f32 %v9633_v57, %v9653_v61 }
 0x2d7   : > { %v1524_v40 = vsel %vm891_vm6, %v1504_v54, 0.0  ;;  %v9784_v54 = vpop.permute.xlu0 %7375 }
 0x2d8   : > { %3299 = vrot.lane.b32.xlu0 %v9360_v41, %s8486_s21  ;;  %v9704_v19 = vpop.f32.mrb[22].mxu1  ;;  %v2355_v52 = vpop.permute.xlu1 %2354  ;;  %v1503_v41 = vmul.f32 %v9708_v43, %v9708_v43  ;;  %v1514_v17 = vmul.f32 %v9762_v3, %v9762_v3 }
 0x2d9   : > { %v1493_v44 = vpop.f32.mrb[23].mxu1  ;;  %6695 = vmatmul.mubr.msk.f32.gmra.mrb[32].mxu1 %vm2047_vm4, %v2355_v52 }
 0x2da   : > { %6697 = vmatprep.mubr.msk.f32.mxu1 %vm2047_vm4, %v2357_v11  ;;  %v1521_v33 = vsel %vm891_vm6, %v1503_v41, 0.0  ;;  %v1510_v11 = vmul.f32 %v9750_v5, %v9750_v5  ;;  %v9768_v23 = vadd.f32 %v9633_v57, %v1493_v44  ;;  %v1554_v25 = vsel %vm891_vm6, %v1514_v17, 0.0 }
 0x2db   : > { %v9782_v44 = vadd.f32 %v9633_v57, %v9666_v13  ;;  %v9798_v13 = vadd.f32 %v9633_v57, %v9682_v51 }
 0x2dc   : > { %v2359_v29 = vpop.permute.xlu1 %2358 }
 0x2dd   : > { %7095 = vmatpush3.bf16.xpose.msk.msra.mxu1 %vm9203_vm7, %v7090_v48  ;;  %v9744_v48 = vadd.f32 %v9633_v57, %v1453_v63  ;;  %v1507_v53 = vmul.f32 %v9782_v44, %v9782_v44 }
 0x2de   : > { %6698 = vmatmul.mubr.msk.f32.gmra.mrb[34].mxu1 %vm2047_vm4, %v2359_v29  ;;  %7098 = vmatprep.subr.msk.bf16.mxu1 %vm9203_vm7, %v7096_v9  ;;  %v1542_v29 = vsel %vm891_vm6, %v1510_v11, 0.0 }
 0x2df   : > { %v1508_v50 = vmul.f32 %v9744_v48, %v9744_v48  ;;  %v1533_v11 = vsel %vm891_vm6, %v1507_v53, 0.0 }
 0x2e1   : > { %v1536_v52 = vsel %vm891_vm6, %v1508_v50, 0.0  ;;  %v12399_v50 = vmov 0.0|0.0  }
 0x2e2   : > { %7028 = vmatprep.subr.bf16.mxu0 %v12399_v50 }
 0x2e3   : > { %1522 = vadd.xlane.f32.xlu1 %v1521_v33 }
 0x2e5   : > { %7101 = vmatpush3.bf16.xpose.msk.msra.mxu1 %vm9203_vm7, %v7096_v9  ;;  %v9756_v9 = vadd.f32 %v9633_v57, %v1473_v55  ;;  %v1516_v55 = vmul.f32 %v9768_v23, %v9768_v23 }
 0x2e6   : > { %7104 = vmatprep.subr.msk.bf16.mxu1 %vm9203_vm7, %v7102_v21 }
 0x2e7   : > { %v1512_v63 = vmul.f32 %v9756_v9, %v9756_v9  ;;  %v1560_v33 = vsel %vm891_vm6, %v1516_v55, 0.0 }
 0x2e9   : > { %v1548_v41 = vsel %vm891_vm6, %v1512_v63, 0.0 }
 0x2ed   : > { %7107 = vmatpush3.bf16.xpose.msk.msra.mxu1 %vm9203_vm7, %v7102_v21  ;;  %v1505_v21 = vmul.f32 %v9776_v38, %v9776_v38 }
 0x2ef   : > { %v1527_v61 = vsel %vm891_vm6, %v1505_v21, 0.0 }
 0x2f4   : > { %3301 = vrot.lane.b32.xlu1 %v9736_v59, %s8486_s21 }
 0x2f7   : > { %1525 = vadd.xlane.f32.xlu0 %v1524_v40  ;;  %v9790_v40 = vadd.f32 %v9633_v57, %v9676_v34  ;;  %v1511_v34 = vmul.f32 %v9798_v13, %v9798_v13 }
 0x2fb   : > { %1531 = vadd.xlane.f32.xlu0 %v1530_v6  ;;  %v1509_v6 = vmul.f32 %v9790_v40, %v9790_v40 }
 0x2fd   : > { %v1539_v17 = vsel %vm891_vm6, %v1509_v6, 0.0 }
 0x2ff   : > { %1537 = vadd.xlane.f32.xlu0 %v1536_v52 }
 0x303   : > { %1543 = vadd.xlane.f32.xlu0 %v1542_v29  ;;  %v9806_v29 = vadd.f32 %v9633_v57, %v9690_v45  ;;  %v1545_v45 = vsel %vm891_vm6, %v1511_v34, 0.0 }
 0x305   : > { %v1513_v55 = vmul.f32 %v9806_v29, %v9806_v29 }
 0x306   : > { %v2365_v52 = vpop.permute.xlu0 %2364 }
 0x307   : > { %1549 = vadd.xlane.f32.xlu0 %v1548_v41 }
 0x30a   : > { %v3288_v41 = vpop.permute.xlu0 %3287 }
 0x30b   : > { %1555 = vadd.xlane.f32.xlu0 %v1554_v25  ;;  %v9814_v25 = vadd.f32 %v9633_v57, %v9696_v42  ;;  %v1551_v42 = vsel %vm891_vm6, %v1513_v55, 0.0  ;;  %v12591_v55 = vld [vmem:[#allocation26_spill] sm:$0xff] }
 0x30d   : > { %v1515_v53 = vmul.f32 %v9814_v25, %v9814_v25 }
 0x30e   : > { %v3292_v21 = vpop.permute.xlu0 %3291 }
 0x30f   : > { %1561 = vadd.xlane.f32.xlu0 %v1560_v33 }
 0x318   : > { %1528 = vadd.xlane.f32.xlu1 %v1527_v61  ;;  %v9825_v61 = vadd.f32 %v9633_v57, %v9704_v19  ;;  %v3296_v57 = vpop.permute.xlu0 %3295 }
 0x31c   : > { %1534 = vadd.xlane.f32.xlu1 %v1533_v11  ;;  %v9830_v11 = vld [vmem:[%s8756_s19 + $0x50] sm:$0xff] }
 0x31d   : > { %v2361_v63 = vpop.permute.xlu1 %2360 }
 0x31e   : > { %6700 = vmatprep.mubr.msk.f32.mxu1 %vm2047_vm4, %v2361_v63 }
 0x320   : > { %1540 = vadd.xlane.f32.xlu1 %v1539_v17  ;;  %v12588_v17 = vld [vmem:[#allocation22_spill] sm:$0xff] }
 0x321   : > { %v2363_v51 = vpop.permute.xlu1 %2362 }
 0x322   : > { %6701 = vmatmul.mubr.msk.f32.gmra.mrb[36].mxu1 %vm2047_vm4, %v2363_v51  ;;  %v9854_v51 = vld [vmem:[%s8756_s19 + $0x48] sm:$0xff] }
 0x323   : > { %6703 = vmatprep.mubr.msk.f32.mxu1 %vm2047_vm4, %v2365_v52  ;;  %v1557_v52 = vsel %vm891_vm6, %v1515_v53, 0.0  ;;  %v8377_v53 = vld [vmem:[%s8622_s11 + $0x8] sm:$0xff] }
 0x324   : > { %1546 = vadd.xlane.f32.xlu1 %v1545_v45  ;;  %v12592_v45 = vld [vmem:[#allocation29_spill] sm:$0xff] }
 0x325   : > { %v2367_v33 = vpop.permute.xlu1 %2366  ;;  %3303 = vrot.lane.b32.xlu0 %v9369_v15, %s8486_s21  ;;  %v1517_v15 = vmul.f32 %v9825_v61, %v9825_v61  ;;  %v4184_v20 = vsel %vm2047_vm4, %v12592_v45, 0.0 }
 0x326   : > { %6704 = vmatmul.mubr.msk.f32.gmra.mrb[38].mxu1 %vm2047_vm4, %v2367_v33  ;;  %v12593_v33 = vld [vmem:[#allocation30_spill] sm:$0xff] }
 0x327   : > { %6773 = vmatprep.mubr.msk.f32.mxu1 %vm2047_vm4, %v3288_v41  ;;  %v1563_v63 = vsel %vm891_vm6, %v1517_v15, 0.0  ;;  %v12590_v41 = vld [vmem:[#allocation24_spill] sm:$0xff] }
 0x328   : > { %1552 = vadd.xlane.f32.xlu1 %v1551_v42 }
 0x329   : > { %v3290_v6 = vpop.permute.xlu1 %3289  ;;  %3307 = vrot.lane.b32.xlu0 %v9830_v11, %s8486_s21 }
 0x32a   : > { %6774 = vmatmul.mubr.msk.f32.vlgmr.msra.gmra.mrb[40].mxu1 %vm2047_vm4, %v3290_v6  ;;  %v12594_v6 = vld [vmem:[#allocation33_spill] sm:$0xff] }
 0x32b   : > { %6776 = vmatprep.mubr.msk.f32.mxu1 %vm2047_vm4, %v3292_v21  ;;  %v8376_v21 = vld [vmem:[%s8622_s11] sm:$0xff] }
 0x32c   : > { %1558 = vadd.xlane.f32.xlu1 %v1557_v52  ;;  %v7140_v42 = vpack.c.bf16 %v8377_v53, %v8376_v21  ;;  %v8379_v52 = vld [vmem:[%s8622_s11 + $0x18] sm:$0xff]  ;;  %v8380_v21 = vld [vmem:[%s8622_s11 + $0x20] sm:$0xff]  ;;  %v8381_v53 = vld [vmem:[%s8622_s11 + $0x28] sm:$0xff] }
 0x32d   : > { %v3294_v19 = vpop.permute.xlu1 %3293  ;;  %3311 = vrot.lane.b32.xlu0 %v9559_v4, %s8486_s21  ;;  %v12589_v4 = vld [vmem:[#allocation25_spill] sm:$0xff] }
 0x32e   : > { %6777 = vmatmul.mubr.msk.f32.gmra.mrb[42].mxu1 %vm2047_vm4, %v3294_v19  ;;  %7142 = vmatprep.subr.msk.bf16.mxu1 %vm9203_vm7, %v7140_v42  ;;  %v12595_v19 = vld [vmem:[#allocation20_spill] sm:$0xff] }
 0x32f   : > { %6779 = vmatprep.mubr.msk.f32.mxu1 %vm2047_vm4, %v3296_v57  ;;  %7145 = vmatpush3.bf16.xpose.msk.msra.mxu1 %vm9203_vm7, %v7140_v42  ;;  %v7152_v42 = vpack.c.bf16 %v8381_v53, %v8380_v21  ;;  %v8382_v21 = vld [vmem:[%s8622_s11 + $0x30] sm:$0xff]  ;;  %v8383_v53 = vld [vmem:[%s8622_s11 + $0x38] sm:$0xff] }
 0x330   : > { %1564 = vadd.xlane.f32.xlu1 %v1563_v63  ;;  %v7158_v28 = vpack.c.bf16 %v8383_v53, %v8382_v21  ;;  %v8387_v21 = vld [vmem:[%s8622_s11 + $0x58] sm:$0xff] }
 0x331   : > { %v3298_v34 = vpop.permute.xlu1 %3297  ;;  %3315 = vrot.lane.b32.xlu0 %v9452_v56, %s8486_s21  ;;  %v9861_v56 = vld [vmem:[%s8756_s19 + $0x58] sm:$0xff] }
 0x332   : > { %6780 = vmatmul.mubr.msk.f32.gmra.mrb[44].mxu1 %vm2047_vm4, %v3298_v34  ;;  %v12597_v34 = vld [vmem:[#allocation23_spill] sm:$0xff] }
 0x335   : > { %3034 = vrot.lane.b32.xlu0 %v12588_v17, %s8486_s21 }
 0x339   : > { %3038 = vrot.lane.b32.xlu0 %v12589_v4, %s8486_s21 }
 0x33d   : > { %3042 = vrot.lane.b32.xlu0 %v12590_v41, %s8486_s21 }
 0x341   : > { %3305 = vrot.lane.b32.xlu1 %v9854_v51, %s8486_s21  ;;  %3046 = vrot.lane.b32.xlu0 %v12591_v55, %s8486_s21 }
 0x345   : > { %3309 = vrot.lane.b32.xlu1 %v9861_v56, %s8486_s21  ;;  %3050 = vrot.lane.b32.xlu0 %v12592_v45, %s8486_s21 }
 0x349   : > { %3313 = vrot.lane.b32.xlu1 %v9577_v60, %s8486_s21  ;;  %3054 = vrot.lane.b32.xlu0 %v12593_v33, %s8486_s21  ;;  %v8378_v60 = vld [vmem:[%s8622_s11 + $0x10] sm:$0xff] }
 0x34a   : > { %v7146_v57 = vpack.c.bf16 %v8379_v52, %v8378_v60  ;;  %v12598_v60 = vld [vmem:[#allocation27_spill] sm:$0xff] }
 0x34c   : > { %7148 = vmatprep.subr.msk.bf16.mxu1 %vm9203_vm7, %v7146_v57 }
 0x34d   : > { %3317 = vrot.lane.b32.xlu1 %v9598_v58, %s8486_s21  ;;  %3058 = vrot.lane.b32.xlu0 %v12594_v6, %s8486_s21  ;;  %v12596_v58 = vld [vmem:[#allocation35_spill] sm:$0xff] }
 0x34e   : > { %7151 = vmatpush3.bf16.xpose.msk.msra.mxu1 %vm9203_vm7, %v7146_v57  ;;  %v12599_v57 = vld [vmem:[#allocation28_spill] sm:$0xff] }
 0x34f   : > { %v1520_v15 = vpop.xlane.xlu0 %1519  ;;  %7154 = vmatprep.subr.msk.bf16.mxu1 %vm9203_vm7, %v7152_v42 }
 0x350   : > { %7509 = vrsqrt.f32 %v1520_v15  ;;  %vm1568_vm1 = vcmp.eq.f32.partialorder %v1520_v15, inf  ;;  %vm1570_vm0 = vcmp.eq.f32.partialorder %v1520_v15, 0.0 }
 0x351   : > { %3036 = vrot.lane.b32.xlu1 %v12595_v19, %s8486_s21  ;;  %3062 = vrot.lane.b32.xlu0 %v12596_v58, %s8486_s21 }
 0x353   : > { %v3300_v63 = vpop.permute.xlu0 %3299 }
 0x354   : > { %6782 = vmatprep.mubr.msk.f32.mxu1 %vm2047_vm4, %v3300_v63  ;;  %v1571_v63 = vand.u32 2147483648, %v1520_v15 }
 0x355   : > { %3040 = vrot.lane.b32.xlu1 %v12597_v34, %s8486_s21 }
 0x356   : > { %7157 = vmatpush3.bf16.xpose.msk.msra.mxu1 %vm9203_vm7, %v7152_v42 }
 0x357   : > { %7160 = vmatprep.subr.msk.bf16.mxu1 %vm9203_vm7, %v7158_v28 }
 0x359   : > { %3044 = vrot.lane.b32.xlu1 %v12598_v60, %s8486_s21 }
 0x35a   : > { %v7510_v52 = vpop.eup %7509 }
 0x35b   : > { %v1567_v50 = vmul.f32 %v7510_v52, %v1520_v15 }
 0x35d   : > { %v1569_v37 = vsel %vm1568_vm1, %v1520_v15, %v1567_v50  ;;  %3048 = vrot.lane.b32.xlu1 %v12599_v57, %s8486_s21  ;;  %v8384_v50 = vld [vmem:[%s8622_s11 + $0x40] sm:$0xff]  ;;  %v8385_v15 = vld [vmem:[%s8622_s11 + $0x48] sm:$0xff] }
 0x35e   : > { %v1572_v32 = vsel %vm1570_vm0, %v1571_v63, %v1569_v37  ;;  %v7164_v52 = vpack.c.bf16 %v8385_v15, %v8384_v50  ;;  %7163 = vmatpush3.bf16.xpose.msk.msra.mxu1 %vm9203_vm7, %v7158_v28  ;;  %v8386_v63 = vld [vmem:[%s8622_s11 + $0x50] sm:$0xff]  ;;  %v4160_v28 = vsel %vm2047_vm4, %v12588_v17, 0.0  ;;  %v8488_v15 = vmov 0   ;;  %v8388_v17 = vld [vmem:[%s8622_s11 + $0x60] sm:$0xff] }
 0x35f   : > { %v1678_v35 = vadd.f32 1e-07, %v1572_v32  ;;  %v12601_v32 = vld [vmem:[#allocation32_spill] sm:$0xff]  ;;  %v7170_v53 = vpack.c.bf16 %v8387_v21, %v8386_v63  ;;  %7380 = vset.pattern.permute.xlu0 %v8488_v15  ;;  %7379 = vset.pattern.permute.xlu1 %v8488_v15  ;;  %v8389_v21 = vld [vmem:[%s8622_s11 + $0x68] sm:$0xff] }
 0x360   : > { %7166 = vmatprep.subr.msk.bf16.mxu1 %vm9203_vm7, %v7164_v52  ;;  %v12603_v50 = vld [vmem:[#allocation36_spill] sm:$0xff]  ;;  %v7176_v24 = vpack.c.bf16 %v8389_v21, %v8388_v17 }
 0x361   : > { %7511 = vrcp.f32 %v1678_v35  ;;  %3052 = vrot.lane.b32.xlu1 %v12600_v30, %s8486_s21  ;;  %v12602_v35 = vld [vmem:[#allocation34_spill] sm:$0xff] }
 0x365   : > { %3056 = vrot.lane.b32.xlu1 %v12601_v32, %s8486_s21 }
 0x366   : > { %7169 = vmatpush3.bf16.xpose.msk.msra.mxu1 %vm9203_vm7, %v7164_v52 }
 0x367   : > { %7172 = vmatprep.subr.msk.bf16.mxu1 %vm9203_vm7, %v7170_v53 }
 0x369   : > { %3060 = vrot.lane.b32.xlu1 %v12602_v35, %s8486_s21 }
 0x36b   : > { %v7512_v37 = vpop.eup %7511 }
 0x36c   : > { %v1695_v42 = vmul.f32 %v7512_v37, %v9636_v62  ;;  %v4166_v37 = vsel %vm2047_vm4, %v12589_v4, 0.0  ;;  %v4172_v4 = vsel %vm2047_vm4, %v12590_v41, 0.0 }
 0x36d   : > { %3064 = vrot.lane.b32.xlu1 %v12603_v50, %s8486_s21 }
 0x36e   : > { %6626 = vmatprep.mubr.msk.f32.mxu0 %vm891_vm6, %v1695_v42  ;;  %v4169_v42 = vsel %vm2047_vm4, %v12597_v34, 0.0  ;;  %7175 = vmatpush3.bf16.xpose.msk.msra.mxu1 %vm9203_vm7, %v7170_v53  ;;  %v4178_v34 = vsel %vm2047_vm4, %v12591_v55, 0.0 }
 0x36f   : > { %7178 = vmatprep.subr.msk.bf16.mxu1 %vm9203_vm7, %v7176_v24 }
 0x370   : > { %v1523_v62 = vpop.xlane.xlu1 %1522  ;;  %4161 = vadd.xlane.f32.xlu0 %v4160_v28 }
 0x371   : > { %7513 = vrsqrt.f32 %v1523_v62  ;;  %vm1575_vm2 = vcmp.eq.f32.partialorder %v1523_v62, inf  ;;  %v1578_v15 = vand.u32 2147483648, %v1523_v62  ;;  %vm1577_vm3 = vcmp.eq.f32.partialorder %v1523_v62, 0.0 }
 0x374   : > { %v3302_v63 = vpop.permute.xlu1 %3301  ;;  %4167 = vadd.xlane.f32.xlu0 %v4166_v37 }
 0x375   : > { %6783 = vmatmul.mubr.msk.f32.gmra.mrb[46].mxu1 %vm2047_vm4, %v3302_v63 }
 0x376   : > { %7181 = vmatpush3.bf16.xpose.msk.msra.mxu1 %vm9203_vm7, %v7176_v24  ;;  %v7307_v24 = vunpack.i.l.bf16 %v9512_v36 }
 0x378   : > { %4170 = vadd.xlane.f32.xlu0 %v4169_v42 }
 0x37b   : > { %v7514_v52 = vpop.eup %7513 }
 0x37c   : > { %v1574_v28 = vmul.f32 %v7514_v52, %v1523_v62  ;;  %4173 = vadd.xlane.f32.xlu0 %v4172_v4  ;;  %v8390_v4 = vld [vmem:[%s8622_s11 + $0x70] sm:$0xff]  ;;  %v8391_v52 = vld [vmem:[%s8622_s11 + $0x78] sm:$0xff]  ;;  %s8492_s11 = smov [#allocation7]  }
 0x37d   : > { %v7182_v55 = vpack.c.bf16 %v8391_v52, %v8390_v4  ;;  %s8408_s12 = sshll.u32 %s8492_s11, 4  ;;  %s8409_s12 = int_to_ptr.vmem [resolvable:$false] %s8408_s12 }
 0x37e   : > { %v1576_v37 = vsel %vm1575_vm2, %v1523_v62, %v1574_v28  ;;  %p8411_p1 = scmp.lt.s32.totalorder %s12304_s16, %s8409_s12 }
 0x37f   : > { %v1579_v53 = vsel %vm1577_vm3, %v1578_v15, %v1576_v37  ;;  %v7308_v15 = vunpack.i.h.bf16 %v9512_v36  ;;  %7184 = vmatprep.subr.msk.bf16.mxu1 %vm9203_vm7, %v7182_v55 }
 0x380   : > { %v1679_v63 = vadd.f32 1e-07, %v1579_v53  ;;  %4179 = vadd.xlane.f32.xlu0 %v4178_v34  ;;  %7187 = vmatpush3.bf16.xpose.msk.msra.mxu1 %vm9203_vm7, %v7182_v55  ;;  %v4163_v53 = vsel %vm2047_vm4, %v12595_v19, 0.0  ;;  %v4175_v19 = vsel %vm2047_vm4, %v12598_v60, 0.0 }
 0x382   : > { %7515 = vrcp.f32 %v1679_v63 }
 0x384   : > { %v1526_v41 = vpop.xlane.xlu0 %1525 }
 0x385   : > { %7517 = vrsqrt.f32 %v1526_v41  ;;  %vm1582_vm5 = vcmp.eq.f32.partialorder %v1526_v41, inf  ;;  %v1585_v4 = vand.u32 2147483648, %v1526_v41  ;;  %vm1584_vm8 = vcmp.eq.f32.partialorder %v1526_v41, 0.0 }
 0x387   : > { %v9949_v17 = vpop.f32.mrb[24].mxu1 }
 0x388   : > { %12604 = vst [vmem:[#allocation37_spill] sm:$0xff] %v9949_v17  ;;  %v9951_v21 = vpop.xlane.xlu0 %1531  ;;  %v9953_v42 = vpop.f32.mrb[25].mxu1 }
 0x389   : > { %12605 = vst [vmem:[#allocation42_spill] sm:$0xff] %v9953_v42  ;;  %vm1596_vm9 = vcmp.eq.f32.partialorder %v9951_v21, inf  ;;  %vm1598_vm10 = vcmp.eq.f32.partialorder %v9951_v21, 0.0 }
 0x38b   : > { %v9957_v28 = vpop.f32.mrb[26].mxu1 }
 0x38c   : > { %12606 = vst [vmem:[#allocation38_spill] sm:$0xff] %v9957_v28  ;;  %v7516_v62 = vpop.eup %7515  ;;  %v9961_v34 = vpop.xlane.xlu0 %1537  ;;  %v7029_v28 = vpack.c.bf16 %v7308_v15, %v7307_v24 }
 0x38d   : > { %v9963_v37 = vpop.f32.mrb[27].mxu1  ;;  %v1697_v52 = vmul.f32 %v7516_v62, %v9708_v43  ;;  %v7318_v43 = vunpack.i.h.bf16 %v9551_v49  ;;  %v7317_v62 = vunpack.i.l.bf16 %v9551_v49  ;;  %v7328_v49 = vunpack.i.h.bf16 %v9566_v0 }
 0x38e   : > { %12607 = vst [vmem:[#allocation43_spill] sm:$0xff] %v9963_v37  ;;  %vm1610_vm11 = vcmp.eq.f32.partialorder %v9961_v34, inf  ;;  %vm1612_vm12 = vcmp.eq.f32.partialorder %v9961_v34, 0.0 }
 0x38f   : > { %v7518_v63 = vpop.eup %7517  ;;  %6627 = vmatmul.mubr.msk.f32.vlgmr.msra.gmra.mrb[40].mxu0 %vm891_vm6, %v1697_v52 }
 0x390   : > { %v1581_v36 = vmul.f32 %v7518_v63, %v1526_v41  ;;  %v9972_v42 = vpop.xlane.xlu0 %1543  ;;  %7031 = vmatpush3.bf16.xpose.msk.msra.mxu0 %vm9203_vm7, %v7029_v28  ;;  %v7033_v28 = vpack.c.bf16 %v7318_v43, %v7317_v62  ;;  %v7337_v43 = vunpack.i.l.bf16 %v9589_v1 }
 0x391   : > { %4164 = vadd.xlane.f32.xlu1 %v4163_v53  ;;  %7032 = vmatprep.subr.bf16.mxu0 %v12609_v26  ;;  %vm1624_vm13 = vcmp.eq.f32.partialorder %v9972_v42, inf  ;;  %vm1626_vm14 = vcmp.eq.f32.partialorder %v9972_v42, 0.0 }
 0x392   : > { %v1583_v37 = vsel %vm1582_vm5, %v1526_v41, %v1581_v36  ;;  %v4181_v41 = vsel %vm2047_vm4, %v12599_v57, 0.0 }
 0x393   : > { %v1586_v55 = vsel %vm1584_vm8, %v1585_v4, %v1583_v37  ;;  %v9979_v17 = vpop.f32.mrb[28].mxu1  ;;  %v7327_v4 = vunpack.i.l.bf16 %v9566_v0  ;;  %v7338_v0 = vunpack.i.h.bf16 %v9589_v1 }
 0x394   : > { %12608 = vst [vmem:[#allocation39_spill] sm:$0xff] %v9979_v17  ;;  %v1680_v15 = vadd.f32 1e-07, %v1586_v55  ;;  %v9984_v24 = vpop.xlane.xlu0 %1549  ;;  %v9986_v53 = vpop.f32.mrb[29].mxu1 }
 0x395   : > { %12610 = vst [vmem:[#allocation40_spill] sm:$0xff] %v9986_v53  ;;  %4176 = vadd.xlane.f32.xlu1 %v4175_v19  ;;  %v7037_v36 = vpack.c.bf16 %v7328_v49, %v7327_v4  ;;  %v7348_v4 = vunpack.i.h.bf16 %v9604_v27  ;;  %vm1638_vm0 = vcmp.eq.f32.partialorder %v9984_v24, inf  ;;  %vm1640_vm2 = vcmp.eq.f32.partialorder %v9984_v24, 0.0 }
 0x396   : > { %7519 = vrcp.f32 %v1680_v15 }
 0x397   : > { %v9990_v60 = vpop.f32.mrb[30].mxu1  ;;  %7521 = vrsqrt.f32 %v9951_v21 }
 0x398   : > { %12611 = vst [vmem:[#allocation41_spill] sm:$0xff] %v9990_v60  ;;  %v9992_v37 = vpop.xlane.xlu0 %1555  ;;  %v9994_v63 = vpop.f32.mrb[31].mxu1  ;;  %7035 = vmatpush3.bf16.xpose.msk.msra.mxu0 %vm9203_vm7, %v7033_v28  ;;  %7523 = vrsqrt.f32 %v9961_v34 }
 0x399   : > { %12612 = vst [vmem:[#allocation22_spill] sm:$0xff] %v9994_v63  ;;  %4182 = vadd.xlane.f32.xlu1 %v4181_v41  ;;  %7036 = vmatprep.subr.bf16.mxu0 %v12609_v26  ;;  %7525 = vrsqrt.f32 %v9972_v42  ;;  %v7041_v41 = vpack.c.bf16 %v7338_v0, %v7337_v43  ;;  %v1599_v0 = vand.u32 2147483648, %v9951_v21  ;;  %vm1652_vm8 = vcmp.eq.f32.partialorder %v9992_v37, inf }
 0x39c   : > { %v10002_v57 = vpop.xlane.xlu0 %1561 }
 0x3a0   : > { %v7520_v52 = vpop.eup %7519  ;;  %v3304_v19 = vpop.permute.xlu0 %3303  ;;  %7039 = vmatpush3.bf16.xpose.msk.msra.mxu0 %vm9203_vm7, %v7037_v36 }
 0x3a1   : > { %v1699_v55 = vmul.f32 %v7520_v52, %v9726_v47  ;;  %6785 = vmatprep.mubr.msk.f32.mxu1 %vm2047_vm4, %v3304_v19  ;;  %7040 = vmatprep.subr.bf16.mxu0 %v12609_v26  ;;  %v7522_v47 = vpop.eup %7521  ;;  %v7347_v52 = vunpack.i.l.bf16 %v9604_v27  ;;  %v7358_v19 = vunpack.i.h.bf16 %v9638_v46 }
 0x3a2   : > { %v7524_v49 = vpop.eup %7523  ;;  %v1595_v1 = vmul.f32 %v7522_v47, %v9951_v21 }
 0x3a3   : > { %6629 = vmatprep.mubr.msk.f32.mxu0 %vm891_vm6, %v1699_v55  ;;  %v7357_v55 = vunpack.i.l.bf16 %v9638_v46  ;;  %v1609_v27 = vmul.f32 %v7524_v49, %v9961_v34  ;;  %v7526_v63 = vpop.eup %7525  ;;  %v7045_v60 = vpack.c.bf16 %v7348_v4, %v7347_v52 }
 0x3a4   : > { %v10014_v62 = vpop.permute.xlu0 %3307  ;;  %v1597_v47 = vsel %vm1596_vm9, %v9951_v21, %v1595_v1  ;;  %v1613_v21 = vand.u32 2147483648, %v9961_v34  ;;  %v1623_v1 = vmul.f32 %v7526_v63, %v9972_v42  ;;  %vm1654_vm9 = vcmp.eq.f32.partialorder %v9992_v37, 0.0 }
 0x3a5   : > { %v10016_v15 = vpop.xlane.xlu1 %1528  ;;  %v10046_v53 = vpack.c.bf16 %v7358_v19, %v7357_v55  ;;  %v1600_v52 = vsel %vm1598_vm10, %v1599_v0, %v1597_v47  ;;  %v1611_v19 = vsel %vm1610_vm11, %v9961_v34, %v1609_v27 }
 0x3a6   : > { %7527 = vrsqrt.f32 %v10016_v15  ;;  %vm1589_vm15 = vcmp.eq.f32.partialorder %v10016_v15, inf  ;;  %v1592_v27 = vand.u32 2147483648, %v10016_v15  ;;  %v1614_v47 = vsel %vm1612_vm12, %v1613_v21, %v1611_v19 }
 0x3a7   : > { %7529 = vrsqrt.f32 %v9984_v24  ;;  %vm1591_vm1 = vcmp.eq.f32.partialorder %v10016_v15, 0.0  ;;  %v1682_v22 = vadd.f32 1e-07, %v1600_v52  ;;  %v1625_v34 = vsel %vm1624_vm13, %v9972_v42, %v1623_v1 }
 0x3a8   : > { %v10020_v28 = vpop.permute.xlu0 %3311  ;;  %7043 = vmatpush3.bf16.xpose.msk.msra.mxu0 %vm9203_vm7, %v7041_v41  ;;  %v1641_v52 = vand.u32 2147483648, %v9984_v24 }
 0x3a9   : > { %v10025_v36 = vpop.xlane.xlu1 %1534  ;;  %7044 = vmatprep.subr.bf16.mxu0 %v12609_v26 }
 0x3aa   : > { %7531 = vrsqrt.f32 %v10025_v36  ;;  %vm1603_vm3 = vcmp.eq.f32.partialorder %v10025_v36, inf  ;;  %vm1605_vm5 = vcmp.eq.f32.partialorder %v10025_v36, 0.0 }
 0x3ab   : > { %7533 = vrsqrt.f32 %v9992_v37 }
 0x3ac   : > { %v10037_v43 = vpop.permute.xlu0 %3315  ;;  %v10044_v41 = vpop.f32.mrb[32].mxu1 }
 0x3ad   : > { %v10042_v46 = vpop.xlane.xlu1 %1540  ;;  %12613 = vst [vmem:[#allocation25_spill] sm:$0xff] %v10044_v41  ;;  %v10050_v17 = vpop.f32.mrb[33].mxu1  ;;  %v10058_v41 = vsel %vm2047_vm4, %v12593_v33, 0.0 }
 0x3ae   : > { %7535 = vrsqrt.f32 %v10042_v46  ;;  %12614 = vst [vmem:[#allocation24_spill] sm:$0xff] %v10050_v17  ;;  %vm1617_vm10 = vcmp.eq.f32.partialorder %v10042_v46, inf  ;;  %vm1619_vm11 = vcmp.eq.f32.partialorder %v10042_v46, 0.0 }
 0x3af   : > { %7537 = vrsqrt.f32 %v10002_v57 }
 0x3b0   : > { %v7528_v4 = vpop.eup %7527  ;;  %v3035_v55 = vpop.permute.xlu0 %3034  ;;  %7047 = vmatpush3.bf16.xpose.msk.msra.mxu0 %vm9203_vm7, %v7045_v60 }
 0x3b1   : > { %v7530_v49 = vpop.eup %7529  ;;  %v1588_v45 = vmul.f32 %v7528_v4, %v10016_v15  ;;  %v10066_v17 = vpop.f32.mrb[34].mxu1  ;;  %v3082_v0 = vsel %vm2047_vm4, %v3035_v55, 0.0  ;;  %v1627_v4 = vand.u32 2147483648, %v9972_v42  ;;  %7048 = vmatprep.subr.bf16.mxu0 %v12609_v26  ;;  %v1620_v42 = vand.u32 2147483648, %v10042_v46 }
 0x3b2   : > { %12615 = vst [vmem:[#allocation26_spill] sm:$0xff] %v10066_v17  ;;  %v10068_v33 = vpop.xlane.xlu1 %1546  ;;  %v10077_v63 = vpop.f32.mrb[35].mxu1  ;;  %3083 = vadd.xlane.f32.xlu1 %v3082_v0  ;;  %v1637_v60 = vmul.f32 %v7530_v49, %v9984_v24  ;;  %v1684_v0 = vadd.f32 1e-07, %v1614_v47  ;;  %v1606_v49 = vand.u32 2147483648, %v10025_v36 }
 0x3b3   : > { %7539 = vrsqrt.f32 %v10068_v33  ;;  %12616 = vst [vmem:[#allocation29_spill] sm:$0xff] %v10077_v63  ;;  %v1590_v55 = vsel %vm1589_vm15, %v10016_v15, %v1588_v45  ;;  %v1628_v1 = vsel %vm1626_vm14, %v1627_v4, %v1625_v34  ;;  %vm1631_vm12 = vcmp.eq.f32.partialorder %v10068_v33, inf }
 0x3b4   : > { %v7532_v17 = vpop.eup %7531  ;;  %v1593_v16 = vsel %vm1591_vm1, %v1592_v27, %v1590_v55  ;;  %v3039_v63 = vpop.permute.xlu0 %3038  ;;  %v1639_v47 = vsel %vm1638_vm0, %v9984_v24, %v1637_v60  ;;  %v1686_v34 = vadd.f32 1e-07, %v1628_v1  ;;  %v1634_v24 = vand.u32 2147483648, %v10068_v33 }
 0x3b5   : > { %v1681_v21 = vadd.f32 1e-07, %v1593_v16  ;;  %v1602_v19 = vmul.f32 %v7532_v17, %v10025_v36  ;;  %v7534_v45 = vpop.eup %7533  ;;  %v3088_v16 = vsel %vm2047_vm4, %v3039_v63, 0.0  ;;  %v1655_v63 = vand.u32 2147483648, %v9992_v37 }
 0x3b6   : > { %v10092_v15 = vpop.xlane.xlu1 %1552  ;;  %4185 = vadd.xlane.f32.xlu1 %v4184_v20  ;;  %v1651_v20 = vmul.f32 %v7534_v45, %v9992_v37  ;;  %vm1633_vm13 = vcmp.eq.f32.partialorder %v10068_v33, 0.0  ;;  %v12617_v1 = vunpack.i.l.bf16 %v9694_v2  ;;  %vm1666_vm14 = vcmp.eq.f32.partialorder %v10002_v57, inf }
 0x3b7   : > { %v1604_v27 = vsel %vm1603_vm3, %v10025_v36, %v1602_v19  ;;  %7541 = vrsqrt.f32 %v10092_v15  ;;  %vm1668_vm15 = vcmp.eq.f32.partialorder %v10002_v57, 0.0  ;;  %vm1645_vm1 = vcmp.eq.f32.partialorder %v10092_v15, inf }
 0x3b8   : > { %v7536_v17 = vpop.eup %7535  ;;  %v1607_v55 = vsel %vm1605_vm5, %v1606_v49, %v1604_v27  ;;  %7543 = vrcp.f32 %v1682_v22  ;;  %7051 = vmatpush3.bf16.xpose.msk.msra.mxu0 %vm9203_vm7, %v10046_v53  ;;  %v3043_v49 = vpop.permute.xlu0 %3042  ;;  %v1653_v53 = vsel %vm1652_vm8, %v9992_v37, %v1651_v20  ;;  %v1648_v37 = vand.u32 2147483648, %v10092_v15 }
 0x3b9   : > { %v1683_v18 = vadd.f32 1e-07, %v1607_v55  ;;  %v1616_v19 = vmul.f32 %v7536_v17, %v10042_v46  ;;  %7545 = vrcp.f32 %v1681_v21  ;;  %v7538_v22 = vpop.eup %7537  ;;  %7052 = vmatprep.subr.bf16.mxu0 %v12609_v26  ;;  %v1642_v21 = vsel %vm1640_vm2, %v1641_v52, %v1639_v47 }
 0x3ba   : > { %v10108_v36 = vpop.xlane.xlu1 %1558  ;;  %3089 = vadd.xlane.f32.xlu1 %v3088_v16  ;;  %v1665_v17 = vmul.f32 %v7538_v22, %v10002_v57  ;;  %v3094_v52 = vsel %vm2047_vm4, %v3043_v49, 0.0  ;;  %v7378_v55 = vunpack.i.h.bf16 %v9784_v54  ;;  %v4196_v49 = vsel %vm2047_vm4, %v12594_v6, 0.0 }
 0x3bb   : > { %v1618_v4 = vsel %vm1617_vm10, %v10042_v46, %v1616_v19  ;;  %7547 = vrsqrt.f32 %v10108_v36  ;;  %vm1647_vm0 = vcmp.eq.f32.partialorder %v10092_v15, 0.0  ;;  %vm1659_vm2 = vcmp.eq.f32.partialorder %v10108_v36, inf }
 0x3bc   : > { %v1621_v45 = vsel %vm1619_vm11, %v1620_v42, %v1618_v4  ;;  %7549 = vrcp.f32 %v1683_v18  ;;  %v1688_v42 = vadd.f32 1e-07, %v1642_v21  ;;  %v3047_v21 = vpop.permute.xlu0 %3046  ;;  %vm1661_vm3 = vcmp.eq.f32.partialorder %v10108_v36, 0.0 }
 0x3bd   : > { %v7540_v60 = vpop.eup %7539  ;;  %v1685_v27 = vadd.f32 1e-07, %v1621_v45  ;;  %7551 = vrcp.f32 %v1684_v0  ;;  %v12618_v0 = vunpack.i.h.bf16 %v9694_v2  ;;  %v1669_v45 = vand.u32 2147483648, %v10002_v57 }
 0x3be   : > { %v1630_v16 = vmul.f32 %v7540_v60, %v10068_v33  ;;  %v10128_v46 = vpop.xlane.xlu1 %1564  ;;  %4191 = vadd.xlane.f32.xlu1 %v10058_v41  ;;  %v7377_v41 = vunpack.i.l.bf16 %v9784_v54  ;;  %v1656_v60 = vsel %vm1654_vm9, %v1655_v63, %v1653_v53  ;;  %vm8489_vm9 = vmmov 0  }
 0x3bf   : > { %7553 = vrsqrt.f32 %v10128_v46  ;;  %v7053_v47 = vpack.c.bf16 %v12618_v0, %v12617_v1  ;;  %v3100_v0 = vsel %vm2047_vm4, %v3047_v21, 0.0  ;;  %vm1673_vm5 = vcmp.eq.f32.partialorder %v10128_v46, inf }
 0x3c0   : > { %v1632_v18 = vsel %vm1631_vm12, %v10068_v33, %v1630_v16  ;;  %7555 = vrcp.f32 %v1685_v27  ;;  %v1690_v27 = vadd.f32 1e-07, %v1656_v60  ;;  %vm1675_vm8 = vcmp.eq.f32.partialorder %v10128_v46, 0.0 }
 0x3c1   : > { %v1635_v20 = vsel %vm1633_vm13, %v1634_v24, %v1632_v18  ;;  %v7542_v19 = vpop.eup %7541  ;;  %7557 = vrcp.f32 %v1686_v34  ;;  %7055 = vmatpush3.bf16.xpose.msk.msra.mxu0 %vm9203_vm7, %v7053_v47  ;;  %v1667_v34 = vsel %vm1666_vm14, %v10002_v57, %v1665_v17  ;;  %v7057_v47 = vpack.c.bf16 %v7378_v55, %v7377_v41 }
 0x3c2   : > { %v1687_v22 = vadd.f32 1e-07, %v1635_v20  ;;  %v3306_v4 = vpop.permute.xlu1 %3305  ;;  %v7544_v33 = vpop.eup %7543  ;;  %v1644_v2 = vmul.f32 %v7542_v19, %v10092_v15  ;;  %3095 = vadd.xlane.f32.xlu1 %v3094_v52  ;;  %7056 = vmatprep.subr.bf16.mxu0 %v12609_v26  ;;  %v1670_v52 = vsel %vm1668_vm15, %v1669_v45, %v1667_v34  ;;  %v1676_v55 = vand.u32 2147483648, %v10128_v46 }
 0x3c3   : > { %v7546_v54 = vpop.eup %7545  ;;  %6786 = vmatmul.mubr.msk.f32.gmra.mrb[48].mxu1 %vm2047_vm4, %v3306_v4  ;;  %v1703_v24 = vmul.f32 %v7544_v33, %v9733_v39  ;;  %v3051_v19 = vpop.permute.xlu0 %3050 }
 0x3c4   : > { %v1646_v63 = vsel %vm1645_vm1, %v10092_v15, %v1644_v2  ;;  %v1701_v6 = vmul.f32 %v7546_v54, %v9776_v38  ;;  %7559 = vrcp.f32 %v1687_v22  ;;  %6788 = vmatprep.mubr.msk.f32.mxu1 %vm2047_vm4, %v10014_v62  ;;  %v1662_v62 = vand.u32 2147483648, %v10108_v36 }
 0x3c5   : > { %v7548_v53 = vpop.eup %7547  ;;  %v1649_v16 = vsel %vm1647_vm0, %v1648_v37, %v1646_v63  ;;  %7561 = vrcp.f32 %v1688_v42  ;;  %v1692_v22 = vadd.f32 1e-07, %v1670_v52  ;;  %v4202_v2 = vsel %vm2047_vm4, %v12596_v58, 0.0  ;;  %v8394_v52 = vld [vmem:[%s8756_s19 + $0x10] sm:$0xff] }
 0x3c6   : > { %v3310_v17 = vpop.permute.xlu1 %3309  ;;  %v7550_v18 = vpop.eup %7549  ;;  %v1689_v1 = vadd.f32 1e-07, %v1649_v16  ;;  %v1658_v15 = vmul.f32 %v7548_v53, %v10108_v36  ;;  %6630 = vmatmul.mubr.msk.f32.gmra.mrb[42].mxu0 %vm891_vm6, %v1701_v6  ;;  %4197 = vadd.xlane.f32.xlu1 %v4196_v49  ;;  %v3106_v63 = vsel %vm2047_vm4, %v3051_v19, 0.0  ;;  %v8392_v6 = vld [vmem:[%s8756_s19] sm:$0xff] }
 0x3c7   : > { %v7552_v38 = vpop.eup %7551  ;;  %6632 = vmatprep.mubr.msk.f32.mxu0 %vm891_vm6, %v1703_v24  ;;  %v1705_v39 = vmul.f32 %v7550_v18, %v9782_v44  ;;  %6789 = vmatmul.mubr.msk.f32.gmra.mrb[50].mxu1 %vm2047_vm4, %v3310_v17  ;;  %v3055_v58 = vpop.permute.xlu0 %3054  ;;  %v4187_v17 = vsel %vm2047_vm4, %v12600_v30, 0.0  ;;  %v8393_v18 = vld [vmem:[%s8756_s19 + $0x8] sm:$0xff] }
 0x3c8   : > { %v1660_v20 = vsel %vm1659_vm2, %v10108_v36, %v1658_v15  ;;  %7563 = vrcp.f32 %v1689_v1  ;;  %6791 = vmatprep.mubr.msk.f32.mxu1 %vm2047_vm4, %v10020_v28  ;;  %v1707_v36 = vmul.f32 %v7552_v38, %v9744_v48  ;;  %v3112_v16 = vsel %vm2047_vm4, %v3055_v58, 0.0  ;;  %v5195_v58 = vld [vmem:[%s10261_s22 + $0x40] sm:$0xff] }
 0x3c9   : > { %v7554_v57 = vpop.eup %7553  ;;  %v1663_v4 = vsel %vm1661_vm3, %v1662_v62, %v1660_v20  ;;  %7565 = vrcp.f32 %v1690_v27  ;;  %7059 = vmatpush3.bf16.xpose.msk.msra.mxu0 %vm9203_vm7, %v7057_v47  ;;  %v4193_v47 = vsel %vm2047_vm4, %v12601_v32, 0.0  ;;  %v8397_v20 = vld [vmem:[%s8756_s19 + $0x28] sm:$0xff] }
 0x3ca   : > { %v7556_v42 = vpop.eup %7555  ;;  %v1672_v44 = vmul.f32 %v7554_v57, %v10128_v46  ;;  %v3314_v33 = vpop.permute.xlu1 %3313  ;;  %v1691_v60 = vadd.f32 1e-07, %v1663_v4  ;;  %3101 = vadd.xlane.f32.xlu1 %v3100_v0  ;;  %6633 = vmatmul.mubr.msk.f32.gmra.mrb[44].mxu0 %vm891_vm6, %v1705_v39  ;;  %v8395_v39 = vld [vmem:[%s8756_s19 + $0x18] sm:$0xff]  ;;  %v8491_v4 = vmov 1.0  }
 0x3cb   : > { %v7558_v41 = vpop.eup %7557  ;;  %v1709_v45 = vmul.f32 %v7556_v42, %v9790_v40  ;;  %6792 = vmatmul.mubr.msk.f32.gmra.mrb[52].mxu1 %vm2047_vm4, %v3314_v33  ;;  %6635 = vmatprep.mubr.msk.f32.mxu0 %vm891_vm6, %v1707_v36  ;;  %v3059_v24 = vpop.permute.xlu0 %3058  ;;  %v8398_v42 = vld [vmem:[%s8756_s19 + $0x30] sm:$0xff]  ;;  %v8400_v33 = vld [vmem:[%s8756_s19 + $0x60] sm:$0xff] }
 0x3cc   : > { %v1674_v28 = vsel %vm1673_vm5, %v10128_v46, %v1672_v44  ;;  %7567 = vrcp.f32 %v1691_v60  ;;  %7108 = vmatprep.subr.bf16.mxu0 %v12609_v26  ;;  %6794 = vmatprep.mubr.msk.f32.mxu1 %vm2047_vm4, %v10037_v43  ;;  %v1711_v40 = vmul.f32 %v7558_v41, %v9750_v5  ;;  %v3118_v38 = vsel %vm2047_vm4, %v3059_v24, 0.0  ;;  %v5191_v41 = vld [vmem:[%s10261_s22 + $0x20] sm:$0xff]  ;;  %v5201_v24 = vld [vmem:[%s10261_s22 + $0x70] sm:$0xff] }
 0x3cd   : > { %v1677_v49 = vsel %vm1675_vm8, %v1676_v55, %v1674_v28  ;;  %7569 = vrcp.f32 %v1692_v22  ;;  %v8399_v22 = vld [vmem:[%s8756_s19 + $0x40] sm:$0xff]  ;;  %v12619_v55 = vld [vmem:[#allocation11_spill] sm:$0xff] }
 0x3ce   : > { %v1693_v48 = vadd.f32 1e-07, %v1677_v49  ;;  %v3318_v54 = vpop.permute.xlu1 %3317  ;;  %v7560_v46 = vpop.eup %7559  ;;  %4203 = vadd.xlane.f32.xlu1 %v4202_v2  ;;  %6636 = vmatmul.mubr.msk.f32.gmra.mrb[46].mxu0 %vm891_vm6, %v1709_v45  ;;  %v7117_v36 = vpack.c.bf16 %v12619_v55, %v8663_v12  ;;  %v5193_v45 = vld [vmem:[%s10261_s22 + $0x30] sm:$0xff] }
 0x3cf   : > { %v7562_v34 = vpop.eup %7561  ;;  %v1713_v37 = vmul.f32 %v7560_v46, %v9798_v13  ;;  %6795 = vmatmul.mubr.msk.f32.gmra.mrb[54].mxu1 %vm2047_vm4, %v3318_v54  ;;  %6638 = vmatprep.mubr.msk.f32.mxu0 %vm891_vm6, %v1711_v40  ;;  %v12620_v54 = vld [vmem:[#allocation10_spill] sm:$0xff]  ;;  %v12621_v46 = vld [vmem:[#allocation13_spill] sm:$0xff] }
 0x3d0   : > { %7571 = vrcp.f32 %v1693_v48  ;;  %6864 = vmatprep.mubr.msk.f32.mxu1 %vm2047_vm4, %v8392_v6  ;;  %v1715_v21 = vmul.f32 %v7562_v34, %v9756_v9  ;;  %v7121_v40 = vpack.c.bf16 %v12621_v46, %v12620_v54  ;;  %v5197_v6 = vld [vmem:[%s10261_s22 + $0x50] sm:$0xff] }
 0x3d2   : > { %v3037_v43 = vpop.permute.xlu1 %3036  ;;  %v7564_v5 = vpop.eup %7563  ;;  %3107 = vadd.xlane.f32.xlu1 %v3106_v63  ;;  %6639 = vmatmul.mubr.msk.f32.gmra.mrb[48].mxu0 %vm891_vm6, %v1713_v37 }
 0x3d3   : > { %v3085_v53 = vsel %vm2047_vm4, %v3037_v43, 0.0  ;;  %v7566_v13 = vpop.eup %7565  ;;  %v1717_v27 = vmul.f32 %v7564_v5, %v9806_v29  ;;  %6641 = vmatprep.mubr.msk.f32.mxu0 %vm891_vm6, %v1715_v21  ;;  %6865 = vmatmul.mubr.msk.f32.vlgmr.msra.gmra.mrb[56].mxu1 %vm2047_vm4, %v8393_v18  ;;  %v12622_v21 = vld [vmem:[#allocation12_spill] sm:$0xff] }
 0x3d4   : > { %3086 = vadd.xlane.f32.xlu0 %v3085_v53  ;;  %6867 = vmatprep.mubr.msk.f32.mxu1 %vm2047_vm4, %v8394_v52  ;;  %v1719_v29 = vmul.f32 %v7566_v13, %v9762_v3  ;;  %v8396_v3 = vld [vmem:[%s8756_s19 + $0x20] sm:$0xff]  ;;  %v12623_v53 = vld [vmem:[#allocation15_spill] sm:$0xff] }
 0x3d5   : > { %v7125_v13 = vpack.c.bf16 %v12623_v53, %v12622_v21  ;;  %v12624_v52 = vld [vmem:[#allocation14_spill] sm:$0xff] }
 0x3d6   : > { %v3041_v9 = vpop.permute.xlu1 %3040  ;;  %v7568_v1 = vpop.eup %7567  ;;  %3113 = vadd.xlane.f32.xlu1 %v3112_v16  ;;  %6642 = vmatmul.mubr.msk.f32.gmra.mrb[50].mxu0 %vm891_vm6, %v1717_v27  ;;  %v5199_v27 = vld [vmem:[%s10261_s22 + $0x60] sm:$0xff] }
 0x3d7   : > { %v7570_v15 = vpop.eup %7569  ;;  %v1721_v30 = vmul.f32 %v7568_v1, %v9814_v25  ;;  %6644 = vmatprep.mubr.msk.f32.mxu0 %vm891_vm6, %v1719_v29  ;;  %v3091_v62 = vsel %vm2047_vm4, %v3041_v9, 0.0  ;;  %6868 = vmatmul.mubr.msk.f32.gmra.mrb[58].mxu1 %vm2047_vm4, %v8395_v39  ;;  %v12625_v1 = vld [vmem:[#allocation17_spill] sm:$0xff] }
 0x3d8   : > { %4188 = vadd.xlane.f32.xlu0 %v4187_v17  ;;  %6870 = vmatprep.mubr.msk.f32.mxu1 %vm2047_vm4, %v8396_v3  ;;  %v1723_v57 = vmul.f32 %v7570_v15, %v9768_v23  ;;  %v7109_v23 = vpack.c.bf16 %v8637_v7, %v8641_v8  ;;  %v4199_v7 = vsel %vm2047_vm4, %v12602_v35, 0.0  ;;  %v7129_v29 = vpack.c.bf16 %v12625_v1, %v12624_v52  ;;  %v5187_v15 = vld [vmem:[%s10261_s22] sm:$0xff]  ;;  %v5190_v39 = vld [vmem:[%s10261_s22 + $0x18] sm:$0xff] }
 0x3d9   : > { %v12628_v3 = vld [vmem:[#allocation18_spill] sm:$0xff] }
 0x3da   : > { %v7572_v0 = vpop.eup %7571  ;;  %3119 = vadd.xlane.f32.xlu1 %v3118_v38  ;;  %6645 = vmatmul.mubr.msk.f32.gmra.mrb[52].mxu0 %vm891_vm6, %v1721_v30  ;;  %v3045_v19 = vpop.permute.xlu1 %3044  ;;  %v12626_v30 = vld [vmem:[#allocation16_spill] sm:$0xff]  ;;  %v12627_v38 = vld [vmem:[#allocation19_spill] sm:$0xff] }
 0x3db   : > { %v1725_v25 = vmul.f32 %v7572_v0, %v9825_v61  ;;  %6647 = vmatprep.mubr.msk.f32.mxu0 %vm891_vm6, %v1723_v57  ;;  %6871 = vmatmul.mubr.msk.f32.gmra.mrb[60].mxu1 %vm2047_vm4, %v8397_v20  ;;  %v12412_v61 = vmov 0.0   ;;  %v3097_v32 = vsel %vm2047_vm4, %v3045_v19, 0.0  ;;  %v5192_v0 = vld [vmem:[%s10261_s22 + $0x28] sm:$0xff]  ;;  %v12629_v57 = vld [vmem:[#allocation21_spill] sm:$0xff] }
 0x3dc   : > { %3092 = vadd.xlane.f32.xlu0 %v3091_v62  ;;  %6873 = vmatprep.mubr.msk.f32.mxu1 %vm2047_vm4, %v8398_v42  ;;  %v7133_v62 = vpack.c.bf16 %v12627_v38, %v12626_v30  ;;  %v5196_v20 = vld [vmem:[%s10261_s22 + $0x48] sm:$0xff]  ;;  %v5198_v19 = vld [vmem:[%s10261_s22 + $0x58] sm:$0xff]  ;;  %v3063_v42 = vpop.permute.xlu0 %3062 }
 0x3de   : > { %6648 = vmatmul.mubr.msk.f32.gmra.mrb[54].mxu0 %vm891_vm6, %v1725_v25  ;;  %v3049_v8 = vpop.permute.xlu1 %3048  ;;  %v7137_v25 = vpack.c.bf16 %v12629_v57, %v12628_v3 }
 0x3df   : > { %6738 = vmatprep.mubr.msk.f32.mxu0 %vm8489_vm9, %v12412_v61  ;;  %6874 = vmatmul.mubr.msk.f32.gmra.mrb[62].mxu1 %vm2047_vm4, %v9736_v59  ;;  %v7113_v59 = vpack.c.bf16 %v8676_v14, %v8654_v10  ;;  %v3103_v35 = vsel %vm2047_vm4, %v3049_v8, 0.0  ;;  %v4205_v10 = vsel %vm2047_vm4, %v12603_v50, 0.0  ;;  %v8401_v14 = vld [vmem:[%s8756_s19 + $0x68] sm:$0xff]  ;;  %v8403_v50 = vld [vmem:[%s8756_s19 + $0x78] sm:$0xff] }
 0x3e0   : > { %4194 = vadd.xlane.f32.xlu0 %v4193_v47  ;;  %6876 = vmatprep.mubr.msk.f32.mxu1 %vm2047_vm4, %v8399_v22  ;;  %v5194_v47 = vld [vmem:[%s10261_s22 + $0x38] sm:$0xff] }
 0x3e1   : > { %v5202_v22 = vld [vmem:[%s10261_s22 + $0x78] sm:$0xff] }
 0x3e2   : > { %6739 = vmatmul.mubr.msk.f32.vlgmr.msra.gmra.mrb[56].mxu0 %vm2047_vm4, %v8491_v4  ;;  %v3053_v44 = vpop.permute.xlu1 %3052 }
 0x3e3   : > { %7111 = vmatpush3.bf16.xpose.msk.msra.mxu0 %vm9203_vm7, %v7109_v23  ;;  %6877 = vmatmul.mubr.msk.f32.gmra.mrb[64].mxu1 %vm2047_vm4, %v9854_v51  ;;  %v5188_v51 = vld [vmem:[%s10261_s22 + $0x8] sm:$0xff]  ;;  %v3109_v28 = vsel %vm2047_vm4, %v3053_v44, 0.0 }
 0x3e4   : > { %3098 = vadd.xlane.f32.xlu0 %v3097_v32  ;;  %7112 = vmatprep.subr.bf16.mxu0 %v12609_v26  ;;  %v3124_v32 = vsel %vm2047_vm4, %v3063_v42, 0.0 }
 0x3e5   : > { %6879 = vmatprep.mubr.msk.f32.mxu1 %vm2047_vm4, %v9830_v11  ;;  %6829 = vmatprep.mubr.msk.f32.mxu0 %vm8489_vm9, %v12412_v61  ;;  %v5189_v11 = vld [vmem:[%s10261_s22 + $0x10] sm:$0xff] }
 0x3e6   : > { %v3057_v60 = vpop.permute.xlu1 %3056 }
 0x3e7   : > { %6880 = vmatmul.mubr.msk.f32.gmra.mrb[66].mxu1 %vm2047_vm4, %v9861_v56  ;;  %v8402_v56 = vld [vmem:[%s8756_s19 + $0x70] sm:$0xff]  ;;  %v3115_v2 = vsel %vm2047_vm4, %v3057_v60, 0.0 }
 0x3e8   : > { %4200 = vadd.xlane.f32.xlu0 %v4199_v7  ;;  %6882 = vmatprep.mubr.msk.f32.mxu1 %vm2047_vm4, %v8400_v33 }
 0x3ea   : > { %v3061_v12 = vpop.permute.xlu1 %3060 }
 0x3eb   : > { %5211 = vperm.xlu1 %7379, %v5188_v51   ;;  %7115 = vmatpush3.bf16.xpose.msk.msra.mxu0 %vm9203_vm7, %v7113_v59  ;;  %v3121_v34 = vsel %vm2047_vm4, %v3061_v12, 0.0  ;;  %v12633_v59 = vld [vmem:[#allocation37_spill] sm:$0xff] }
 0x3ec   : > { %3104 = vadd.xlane.f32.xlu0 %v3103_v35  ;;  %6883 = vmatmul.mubr.msk.f32.gmra.mrb[68].mxu1 %vm2047_vm4, %v8401_v14  ;;  %v2626_v51 = vsub.f32 0.8, %v12633_v59  ;;  %v12634_v35 = vld [vmem:[#allocation42_spill] sm:$0xff] }
 0x3ed   : > { %7116 = vmatprep.subr.bf16.mxu0 %v12609_v26  ;;  %6885 = vmatprep.mubr.msk.f32.mxu1 %vm2047_vm4, %v8402_v56 }
 0x3ee   : > { %v3065_v23 = vpop.permute.xlu1 %3064  ;;  %v2642_v33 = vmul.f32 5.0, %v2626_v51 }
 0x3ef   : > { %5216 = vperm.xlu1 %7379, %v5189_v11  }
 0x3f0   : > { %4206 = vadd.xlane.f32.xlu0 %v4205_v10  ;;  %6886 = vmatmul.mubr.msk.f32.gmra.mrb[70].mxu1 %vm2047_vm4, %v8403_v50  ;;  %v2659_v56 = vmul.f32 1.442695, %v2642_v33  ;;  %v3127_v50 = vsel %vm2047_vm4, %v3065_v23, 0.0 }
 0x3f2   : > { %7573 = vpow2.f32 %v2659_v56 }
 0x3f3   : > { %5226 = vperm.xlu1 %7379, %v5191_v41   ;;  %7119 = vmatpush3.bf16.xpose.msk.msra.mxu0 %vm9203_vm7, %v7117_v36 }
 0x3f4   : > { %3110 = vadd.xlane.f32.xlu0 %v3109_v28  ;;  %7120 = vmatprep.subr.bf16.mxu0 %v12609_v26 }
 0x3f5   : > { %v10295_v49 = vpop.f32.mrb[36].mxu1 }
 0x3f6   : > { %v10298_v48 = vpop.f32.mrb[37].mxu1 }
 0x3f7   : > { %5236 = vperm.xlu1 %7379, %v5193_v45  }
 0x3f8   : > { %3116 = vadd.xlane.f32.xlu0 %v3115_v2 }
 0x3f9   : > { %v10304_v37 = vpop.f32.mrb[38].mxu1 }
 0x3fa   : > { %v10306_v63 = vpop.f32.mrb[39].mxu1 }
 0x3fb   : > { %5246 = vperm.xlu1 %7379, %v5195_v58   ;;  %7123 = vmatpush3.bf16.xpose.msk.msra.mxu0 %vm9203_vm7, %v7121_v40 }
 0x3fc   : > { %3122 = vadd.xlane.f32.xlu0 %v3121_v34  ;;  %7124 = vmatprep.subr.bf16.mxu0 %v12609_v26  ;;  %v7574_v54 = vpop.eup %7573 }
 0x3fd   : > { %v10311_v43 = vpop.f32.mrb[40].mxu1  ;;  %v10366_v10 = vpop.xlane.xlu0 %4161  ;;  %v2690_v34 = vadd.f32 1.0, %v7574_v54 }
 0x3fe   : > { %v10314_v5 = vpop.f32.mrb[41].mxu1  ;;  %12635 = vst [vmem:[#allocation35_spill] sm:$0xff] %v10366_v10 }
 0x3ff   : > { %5256 = vperm.xlu1 %7379, %v5197_v6  }
 0x401   : > { %v10319_v16 = vpop.f32.mrb[42].mxu1  ;;  %v10374_v41 = vpop.xlane.xlu0 %4167 }
 0x402   : > { %v10321_v17 = vpop.f32.mrb[43].mxu1  ;;  %12638 = vst [vmem:[#allocation28_spill] sm:$0xff] %v10374_v41 }
 0x403   : > { %5266 = vperm.xlu1 %7379, %v5199_v27   ;;  %7127 = vmatpush3.bf16.xpose.msk.msra.mxu0 %vm9203_vm7, %v7125_v13 }
 0x404   : > { %7128 = vmatprep.subr.bf16.mxu0 %v12609_v26 }
 0x405   : > { %v10326_v18 = vpop.f32.mrb[44].mxu1  ;;  %v10381_v2 = vpop.xlane.xlu0 %4170 }
 0x406   : > { %v10329_v9 = vpop.f32.mrb[45].mxu1  ;;  %12641 = vst [vmem:[#allocation34_spill] sm:$0xff] %v10381_v2 }
 0x407   : > { %5276 = vperm.xlu1 %7379, %v5201_v24  }
 0x409   : > { %v10387_v58 = vpop.xlane.xlu0 %4173 }
 0x40a   : > { %12644 = vst [vmem:[#allocation10_spill] sm:$0xff] %v10387_v58 }
 0x40b   : > { %7131 = vmatpush3.bf16.xpose.msk.msra.mxu0 %vm9203_vm7, %v7129_v29 }
 0x40c   : > { %7132 = vmatprep.subr.bf16.mxu0 %v12609_v26 }
 0x40d   : > { %v10391_v53 = vpop.xlane.xlu0 %4179 }
 0x40e   : > { %12646 = vst [vmem:[#allocation12_spill] sm:$0xff] %v10391_v53 }
 0x412   : > { %5206 = vperm.xlu0 %7380, %v5187_v15  }
 0x413   : > { %7135 = vmatpush3.bf16.xpose.msk.msra.mxu0 %vm9203_vm7, %v7133_v62 }
 0x414   : > { %7136 = vmatprep.subr.bf16.mxu0 %v12609_v26  ;;  %v5200_v26 = vld [vmem:[%s10261_s22 + $0x68] sm:$0xff]  ;;  %s8410_s22 = scalar_lea.vmem %s8409_s12, 32 }
 0x415   : > { %p8412_p2 = scmp.lt.s32.totalorder %s8410_s22, %s8404_s1 }
 0x416   : > { %5221 = vperm.xlu0 %7380, %v5190_v39  }
 0x417   : > { %p8413_p3 = por %p8412_p2, %p8411_p1 }
 0x419   : > { %p8414_p5 = pnand %p8413_p3, %p8407_p0 }
 0x41a   : > { %5231 = vperm.xlu0 %7380, %v5192_v0   ;;  %v12664_v0 = vld [vmem:[#allocation25_spill] sm:$0xff] }
 0x41b   : > { %7139 = vmatpush3.bf16.xpose.msk.msra.mxu0 %vm9203_vm7, %v7137_v25 }
 0x41e   : > { %5241 = vperm.xlu0 %7380, %v5194_v47   ;;  %v10356_v7 = vpop.xlane.xlu1 %4164 }
 0x41f   : > { %12630 = vst [vmem:[#allocation30_spill] sm:$0xff] %v10356_v7 }
 0x422   : > { %5251 = vperm.xlu0 %7380, %v5196_v20   ;;  %6830 = vmatmul.mubr.msk.f32.vlgmr.msra.gmra.mrb[58].mxu0 %vm2047_vm4, %v8491_v4  ;;  %v10358_v31 = vpop.xlane.xlu1 %4176  ;;  %v2625_v4 = vsub.f32 0.8, %v12634_v35 }
 0x423   : > { %12631 = vst [vmem:[#allocation33_spill] sm:$0xff] %v10358_v31 }
 0x424   : > { %v2641_v11 = vmul.f32 5.0, %v2625_v4  ;;  %v12657_v4 = vld [vmem:[#allocation39_spill] sm:$0xff] }
 0x425   : > { %v2630_v33 = vsub.f32 0.8, %v12657_v4 }
 0x426   : > { %5261 = vperm.xlu0 %7380, %v5198_v19   ;;  %v10360_v8 = vpop.xlane.xlu1 %4182  ;;  %v2657_v60 = vmul.f32 1.442695, %v2641_v11  ;;  %v10429_v19 = vld [vmem:[%s400_s25] ss:$0 sm:$0xff] }
 0x427   : > { %12632 = vst [vmem:[#allocation20_spill] sm:$0xff] %v10360_v8 }
 0x428   : > { %7575 = vpow2.f32 %v2657_v60  ;;  %v12659_v60 = vld [vmem:[#allocation40_spill] sm:$0xff] }
 0x429   : > { %7577 = vrcp.f32 %v2690_v34 }
 0x42a   : > { %5271 = vperm.xlu0 %7380, %v5200_v26   ;;  %v12653_v26 = vld [vmem:[#allocation38_spill] sm:$0xff] }
 0x42b   : > { %3125 = vadd.xlane.f32.xlu1 %v3124_v32  ;;  %v2628_v23 = vsub.f32 0.8, %v12653_v26  ;;  %v12662_v26 = vld [vmem:[#allocation22_spill] sm:$0xff] }
 0x42d   : > { %v2644_v35 = vmul.f32 5.0, %v2628_v23 }
 0x42e   : > { %5281 = vperm.xlu0 %7380, %v5202_v22   ;;  %v12655_v22 = vld [vmem:[#allocation43_spill] sm:$0xff] }
 0x42f   : > { %v2627_v59 = vsub.f32 0.8, %v12655_v22  ;;  %v2663_v54 = vmul.f32 1.442695, %v2644_v35  ;;  %v2631_v22 = vsub.f32 0.8, %v12662_v26 }
 0x430   : > { %v12665_v35 = vld [vmem:[#allocation24_spill] sm:$0xff]  ;;  %v12668_v26 = vld [vmem:[#allocation26_spill] sm:$0xff] }
 0x431   : > { %v2643_v56 = vmul.f32 5.0, %v2627_v59  ;;  %v2634_v59 = vsub.f32 0.8, %v12664_v0 }
 0x432   : > { %v7576_v40 = vpop.eup %7575 }
 0x433   : > { %v2689_v6 = vadd.f32 1.0, %v7576_v40  ;;  %v7578_v1 = vpop.eup %7577  ;;  %v2646_v40 = vmul.f32 5.0, %v2630_v33  ;;  %v2633_v33 = vsub.f32 0.8, %v12665_v35 }
 0x435   : > { %7579 = vrcp.f32 %v2689_v6  ;;  %v2661_v6 = vmul.f32 1.442695, %v2643_v56  ;;  %v2667_v57 = vmul.f32 1.442695, %v2646_v40  ;;  %v2650_v56 = vmul.f32 5.0, %v2634_v59 }
 0x436   : > { %7581 = vpow2.f32 %v2663_v54  ;;  %v2649_v40 = vmul.f32 5.0, %v2633_v33 }
 0x437   : > { %7583 = vpow2.f32 %v2661_v6  ;;  %v2636_v6 = vsub.f32 0.8, %v12668_v26  ;;  %v2637_v26 = vsub.f32 0.8, %v10298_v48 }
 0x438   : > { %7585 = vpow2.f32 %v2667_v57  ;;  %v2675_v57 = vmul.f32 1.442695, %v2650_v56  ;;  %v2673_v59 = vmul.f32 1.442695, %v2649_v40  ;;  %v2640_v40 = vsub.f32 0.8, %v10304_v37 }
 0x439   : > { %v2652_v35 = vmul.f32 5.0, %v2636_v6 }
 0x43f   : > { %v10364_v44 = vpop.xlane.xlu1 %3083  ;;  %v7580_v30 = vpop.eup %7579 }
 0x443   : > { %v10368_v14 = vpop.xlane.xlu1 %4185 }
 0x444   : > { %12636 = vst [vmem:[#allocation23_spill] sm:$0xff] %v10368_v14 }
 0x447   : > { %v10370_v55 = vpop.xlane.xlu1 %3089 }
 0x448   : > { %12637 = vst [vmem:[#allocation27_spill] sm:$0xff] %v10370_v55  ;;  %v10372_v36 = vpop.f32.mrb[46].mxu1 }
 0x449   : > { %v10376_v28 = vpop.f32.mrb[47].mxu1 }
 0x44a   : > { %12639 = vst [vmem:[#allocation31_spill] sm:$0xff] %v10376_v28 }
 0x44b   : > { %v10379_v45 = vpop.xlane.xlu1 %4191 }
 0x44c   : > { %12640 = vst [vmem:[#allocation32_spill] sm:$0xff] %v10379_v45 }
 0x44d   : > { %3128 = vadd.xlane.f32.xlu0 %v3127_v50  ;;  %v2629_v50 = vsub.f32 0.8, %v12659_v60  ;;  %v2647_v60 = vmul.f32 5.0, %v2631_v22  ;;  %v7582_v22 = vpop.eup %7581 }
 0x44e   : > { %v2692_v45 = vadd.f32 1.0, %v7582_v22 }
 0x44f   : > { %v10383_v12 = vpop.xlane.xlu1 %3095  ;;  %v2669_v54 = vmul.f32 1.442695, %v2647_v60  ;;  %v2638_v60 = vsub.f32 0.8, %v10295_v49  ;;  %v2653_v49 = vmul.f32 5.0, %v2637_v26 }
 0x450   : > { %12642 = vst [vmem:[#allocation36_spill] sm:$0xff] %v10383_v12 }
 0x453   : > { %v10385_v46 = vpop.xlane.xlu1 %4197 }
 0x454   : > { %12643 = vst [vmem:[#allocation11_spill] sm:$0xff] %v10385_v46 }
 0x457   : > { %v10389_v21 = vpop.xlane.xlu1 %3101 }
 0x458   : > { %12645 = vst [vmem:[#allocation13_spill] sm:$0xff] %v10389_v21 }
 0x45b   : > { %v10393_v13 = vpop.xlane.xlu1 %4203 }
 0x45c   : > { %12647 = vst [vmem:[#allocation15_spill] sm:$0xff] %v10393_v13 }
 0x45f   : > { %v10395_v27 = vpop.xlane.xlu1 %3107 }
 0x460   : > { %12648 = vst [vmem:[#allocation14_spill] sm:$0xff] %v10395_v27 }
 0x461   : > { %v10397_v24 = vpop.xlane.xlu0 %3086 }
 0x462   : > { %v10401_v29 = vpop.f32.mrb[40].mxu0 }
 0x463   : > { %v10399_v52 = vpop.xlane.xlu1 %3113  ;;  %12649 = vst [vmem:[#allocation17_spill] sm:$0xff] %v10401_v29  ;;  %v10406_v38 = vmul.f32 %v7578_v1, %v10401_v29  ;;  %v10408_v62 = vpop.f32.mrb[41].mxu0  ;;  %v2645_v1 = vmul.f32 5.0, %v2629_v50  ;;  %v10460_v0 = vmul.f32 14.285714, %v10401_v29 }
 0x464   : > { %v10411_v39 = vmul.f32 %v7580_v30, %v10408_v62  ;;  %v12661_v30 = vld [vmem:[#allocation41_spill] sm:$0xff] }
 0x465   : > { %v10403_v15 = vpop.xlane.xlu0 %4188  ;;  %v2665_v4 = vmul.f32 1.442695, %v2645_v1  ;;  %v12669_v1 = vld [vmem:[#allocation29_spill] sm:$0xff]  ;;  %12670 = vst [vmem:[#allocation41_spill] sm:$0xff] %v10460_v0 }
 0x466   : > { %12650 = vst [vmem:[#allocation16_spill] sm:$0xff] %v10403_v15 }
 0x467   : > { %v10415_v3 = vpop.xlane.xlu1 %3119  ;;  %7587 = vpow2.f32 %v2665_v4 }
 0x469   : > { %v10419_v25 = vpop.xlane.xlu0 %3092 }
 0x46a   : > { %12651 = vst [vmem:[#allocation19_spill] sm:$0xff] %v10419_v25 }
 0x46b   : > { %v10425_v47 = vpop.permute.xlu1 %5211 }
 0x46c   : > { %vm5291_vm6 = vcmp.eq.f32.partialorder %v10425_v47, %v10429_v19 }
 0x46d   : > { %v10427_v20 = vpop.xlane.xlu0 %4194 }
 0x46e   : > { %12652 = vst [vmem:[#allocation18_spill] sm:$0xff] %v10427_v20  ;;  %v2635_v20 = vsub.f32 0.8, %v12669_v1  ;;  %v5340_v1 = vmul.f32 1.442695, %v10460_v0 }
 0x46f   : > { %v5217_v42 = vpop.permute.xlu1 %5216 }
 0x470   : > { %vm5292_vm4 = vcmp.eq.f32.partialorder %v5217_v42, %v10429_v19  ;;  %v2632_v42 = vsub.f32 0.8, %v12661_v30  ;;  %v10455_v30 = vmul.f32 14.285714, %v10408_v62  ;;  %v2651_v33 = vmul.f32 5.0, %v2635_v20 }
 0x471   : > { %v10433_v32 = vpop.xlane.xlu0 %3098  ;;  %v10437_v51 = vsel %vm5292_vm4, 1.0, %v12412_v61 }
 0x472   : > { %12654 = vst [vmem:[#allocation21_spill] sm:$0xff] %v10433_v32  ;;  %12656 = vst [vmem:[#allocation37_spill] sm:$0xff] %v10437_v51  ;;  %5502 = vadd.xlane.f32.xlu0 %v10437_v51  ;;  %v2648_v61 = vmul.f32 5.0, %v2632_v42  ;;  %v5338_v4 = vmul.f32 1.442695, %v10455_v30 }
 0x473   : > { %12667 = vst [vmem:[#allocation40_spill] sm:$0xff] %v10455_v30  ;;  %v2679_v30 = vmul.f32 1.442695, %v2652_v35  ;;  %v2677_v6 = vmul.f32 1.442695, %v2651_v33 }
 0x474   : > { %v2671_v50 = vmul.f32 1.442695, %v2648_v61  ;;  %v7584_v61 = vpop.eup %7583 }
 0x475   : > { %v10441_v11 = vpop.xlane.xlu0 %4200  ;;  %v7586_v15 = vpop.eup %7585 }
 0x476   : > { %12658 = vst [vmem:[#allocation42_spill] sm:$0xff] %v10441_v11  ;;  %7589 = vpow2.f32 %v2671_v50  ;;  %v7588_v50 = vpop.eup %7587  ;;  %v2694_v48 = vadd.f32 1.0, %v7586_v15  ;;  %v12672_v15 = vmov 0.0  }
 0x477   : > { %7591 = vpow2.f32 %v2669_v54  ;;  %v2654_v54 = vmul.f32 5.0, %v2638_v60  ;;  %v2693_v20 = vadd.f32 1.0, %v7588_v50 }
 0x478   : > { %7593 = vpow2.f32 %v2675_v57  ;;  %v2639_v57 = vsub.f32 0.8, %v10306_v63 }
 0x479   : > { %v10444_v34 = vpop.xlane.xlu0 %3104  ;;  %7595 = vpow2.f32 %v5338_v4  ;;  %v2683_v22 = vmul.f32 1.442695, %v2654_v54 }
 0x47a   : > { %12660 = vst [vmem:[#allocation38_spill] sm:$0xff] %v10444_v34  ;;  %7597 = vpow2.f32 %v2673_v59  ;;  %v2681_v59 = vmul.f32 1.442695, %v2653_v49 }
 0x47b   : > { %7599 = vpow2.f32 %v5340_v1 }
 0x47c   : > { %7601 = vrcp.f32 %v2692_v45  ;;  %v2655_v45 = vmul.f32 5.0, %v2639_v57 }
 0x47d   : > { %v10448_v23 = vpop.xlane.xlu0 %4206 }
 0x47e   : > { %12663 = vst [vmem:[#allocation43_spill] sm:$0xff] %v10448_v23 }
 0x480   : > { %v7590_v4 = vpop.eup %7589 }
 0x481   : > { %v10452_v11 = vpop.xlane.xlu0 %3110  ;;  %v7592_v37 = vpop.eup %7591  ;;  %v2696_v1 = vadd.f32 1.0, %v7590_v4 }
 0x482   : > { %12666 = vst [vmem:[#allocation39_spill] sm:$0xff] %v10452_v11  ;;  %v7594_v60 = vpop.eup %7593  ;;  %v2695_v50 = vadd.f32 1.0, %v7592_v37 }
 0x483   : > { %v10482_v26 = vpop.eup %7595 }
 0x484   : > { %12675 = vst [vmem:[#allocation26_spill] sm:$0xff] %v10482_v26 }
 0x485   : > { %v10462_v42 = vpop.xlane.xlu0 %3116 }
 0x486   : > { %12671 = vst [vmem:[#allocation22_spill] sm:$0xff] %v10462_v42  ;;  %v2691_v42 = vadd.f32 1.0, %v7584_v61  ;;  %v2656_v61 = vmul.f32 5.0, %v2640_v40  ;;  %v7598_v40 = vpop.eup %7597 }
 0x488   : > { %7603 = vrcp.f32 %v2691_v42  ;;  %v10476_v42 = vsel %vm5291_vm6, 1.0, %v12672_v15  ;;  %v2687_v47 = vmul.f32 1.442695, %v2656_v61 }
 0x489   : > { %v10468_v56 = vpop.xlane.xlu0 %3122  ;;  %7605 = vpow2.f32 %v2679_v30  ;;  %12673 = vst [vmem:[#allocation25_spill] sm:$0xff] %v10476_v42  ;;  %v5227_v30 = vpop.permute.xlu1 %5226 }
 0x48a   : > { %7607 = vpow2.f32 %v2677_v6  ;;  %v5371_v6 = vsub.f32 1.0, %v10476_v42  ;;  %vm5294_vm11 = vcmp.eq.f32.partialorder %v5227_v30, %v10429_v19 }
 0x48b   : > { %7609 = vrcp.f32 %v2694_v48  ;;  %v10488_v48 = vpop.eup %7599  ;;  %v10499_v37 = vsel %vm5294_vm11, 1.0, %v12672_v15 }
 0x48c   : > { %7611 = vrcp.f32 %v2693_v20  ;;  %12676 = vst [vmem:[#allocation29_spill] sm:$0xff] %v10488_v48  ;;  %v2685_v20 = vmul.f32 1.442695, %v2655_v45  ;;  %v7602_v61 = vpop.eup %7601  ;;  %12680 = vst [vmem:[#allocation47_spill] sm:$0xff] %v10499_v37  ;;  %v5387_v0 = vmul.f32 %v10488_v48, %v5371_v6 }
 0x48d   : > { %7613 = vpow2.f32 %v2683_v22 }
 0x48e   : > { %7615 = vpow2.f32 %v2681_v59 }
 0x48f   : > { %7617 = vpow2.f32 %v2687_v47  ;;  %v5237_v47 = vpop.permute.xlu1 %5236 }
 0x490   : > { %7619 = vrcp.f32 %v2696_v1  ;;  %vm5296_vm13 = vcmp.eq.f32.partialorder %v5237_v47, %v10429_v19 }
 0x491   : > { %v5207_v35 = vpop.permute.xlu0 %5206  ;;  %7621 = vrcp.f32 %v2695_v50 }
 0x492   : > { %vm5290_vm7 = vcmp.eq.f32.partialorder %v5207_v35, %v10429_v19  ;;  %v7604_v59 = vpop.eup %7603  ;;  %v2698_v35 = vadd.f32 1.0, %v7594_v60  ;;  %7623 = vpow2.f32 %v2685_v20 }
 0x493   : > { %v10479_v63 = vsel %vm5290_vm7, 1.0, %v12672_v15  ;;  %v7606_v45 = vpop.eup %7605  ;;  %v5247_v58 = vpop.permute.xlu1 %5246 }
 0x494   : > { %12674 = vst [vmem:[#allocation24_spill] sm:$0xff] %v10479_v63  ;;  %v5370_v33 = vsub.f32 1.0, %v10479_v63  ;;  %7625 = vrcp.f32 %v2698_v35  ;;  %vm5298_vm15 = vcmp.eq.f32.partialorder %v5247_v58, %v10429_v19 }
 0x495   : > { %v5222_v54 = vpop.permute.xlu0 %5221  ;;  %v10594_v11 = vsel %vm5298_vm15, 1.0, %v12672_v15 }
 0x496   : > { %vm5293_vm10 = vcmp.eq.f32.partialorder %v5222_v54, %v10429_v19  ;;  %v5386_v49 = vmul.f32 %v10482_v26, %v5370_v33  ;;  %v10493_v22 = vpop.f32.mrb[48].mxu1  ;;  %v2697_v33 = vadd.f32 1.0, %v7598_v40  ;;  %12692 = vst [vmem:[#allocation59_spill] sm:$0xff] %v10594_v11 }
 0x497   : > { %v10491_v57 = vsel %vm5293_vm10, 1.0, %v12672_v15  ;;  %12678 = vst [vmem:[#allocation45_spill] sm:$0xff] %v10493_v22  ;;  %v10496_v4 = vpop.f32.mrb[49].mxu1 }
 0x498   : > { %12677 = vst [vmem:[#allocation44_spill] sm:$0xff] %v10491_v57  ;;  %5402 = vadd.xlane.f32.xlu1 %v5386_v49  ;;  %5504 = vadd.xlane.f32.xlu0 %v10491_v57  ;;  %12679 = vst [vmem:[#allocation46_spill] sm:$0xff] %v10496_v4  ;;  %v7608_v49 = vpop.eup %7607  ;;  %7627 = vrcp.f32 %v2697_v33 }
 0x499   : > { %v5232_v30 = vpop.permute.xlu0 %5231  ;;  %v10501_v54 = vpop.f32.mrb[42].mxu0  ;;  %v2699_v8 = vadd.f32 1.0, %v7608_v49 }
 0x49a   : > { %vm5295_vm12 = vcmp.eq.f32.partialorder %v5232_v30, %v10429_v19  ;;  %v10506_v26 = vmul.f32 %v7602_v61, %v10501_v54  ;;  %v10508_v60 = vpop.f32.mrb[43].mxu0  ;;  %v10510_v1 = vpop.f32.mrb[50].mxu1  ;;  %v2700_v61 = vadd.f32 1.0, %v7606_v45 }
 0x49b   : > { %12681 = vst [vmem:[#allocation48_spill] sm:$0xff] %v10510_v1  ;;  %v7610_v14 = vpop.eup %7609  ;;  %v10513_v50 = vmul.f32 %v7604_v59, %v10508_v60  ;;  %v10516_v40 = vmul.f32 14.285714, %v10508_v60  ;;  %v10519_v6 = vpop.f32.mrb[51].mxu1  ;;  %v10526_v1 = vsel %vm5295_vm12, 1.0, %v12672_v15 }
 0x49c   : > { %5404 = vadd.xlane.f32.xlu1 %v5387_v0  ;;  %5506 = vadd.xlane.f32.xlu0 %v10499_v37  ;;  %v7612_v20 = vpop.eup %7611  ;;  %12683 = vst [vmem:[#allocation50_spill] sm:$0xff] %v10526_v1  ;;  %7629 = vrcp.f32 %v2700_v61  ;;  %v10548_v0 = vsel %vm5296_vm13, 1.0, %v12672_v15 }
 0x49d   : > { %12682 = vst [vmem:[#allocation49_spill] sm:$0xff] %v10516_v40  ;;  %v7614_v59 = vpop.eup %7613  ;;  %v5242_v53 = vpop.permute.xlu0 %5241  ;;  %v5342_v45 = vmul.f32 1.442695, %v10516_v40  ;;  %12684 = vst [vmem:[#allocation51_spill] sm:$0xff] %v10548_v0  ;;  %7631 = vrcp.f32 %v2699_v8 }
 0x49e   : > { %v7616_v31 = vpop.eup %7615  ;;  %v10531_v35 = vpop.f32.mrb[44].mxu0  ;;  %v2702_v49 = vadd.f32 1.0, %v7614_v59  ;;  %vm5297_vm14 = vcmp.eq.f32.partialorder %v5242_v53, %v10429_v19 }
 0x49f   : > { %v10534_v48 = vpop.f32.mrb[52].mxu1  ;;  %v10537_v30 = vmul.f32 %v7610_v14, %v10531_v35  ;;  %v10539_v13 = vpop.f32.mrb[45].mxu0  ;;  %v2701_v23 = vadd.f32 1.0, %v7616_v31  ;;  %7633 = vpow2.f32 %v5342_v45  ;;  %v10573_v45 = vsel %vm5297_vm14, 1.0, %v12672_v15 }
 0x4a0   : > { %5508 = vadd.xlane.f32.xlu0 %v10526_v1  ;;  %v10542_v33 = vpop.f32.mrb[53].mxu1  ;;  %v10545_v47 = vmul.f32 %v7612_v20, %v10539_v13  ;;  %v7618_v40 = vpop.eup %7617  ;;  %7635 = vrcp.f32 %v2702_v49  ;;  %12686 = vst [vmem:[#allocation53_spill] sm:$0xff] %v10573_v45 }
 0x4a1   : > { %v7620_v46 = vpop.eup %7619  ;;  %v10555_v59 = vpop.f32.mrb[46].mxu0  ;;  %v2704_v7 = vadd.f32 1.0, %v7618_v40  ;;  %7637 = vrcp.f32 %v2701_v23 }
 0x4a2   : > { %v10557_v20 = vpop.f32.mrb[54].mxu1  ;;  %v7622_v2 = vpop.eup %7621  ;;  %v10560_v41 = vmul.f32 %v7620_v46, %v10555_v59 }
 0x4a3   : > { %v10562_v31 = vpop.f32.mrb[47].mxu0  ;;  %v10565_v8 = vpop.f32.mrb[55].mxu1  ;;  %7639 = vrcp.f32 %v2704_v7 }
 0x4a4   : > { %5510 = vadd.xlane.f32.xlu0 %v10548_v0  ;;  %v7624_v14 = vpop.eup %7623  ;;  %v10568_v61 = vmul.f32 %v7622_v2, %v10562_v31  ;;  %v5252_v40 = vpop.permute.xlu0 %5251 }
 0x4a5   : > { %v7626_v10 = vpop.eup %7625  ;;  %v10580_v49 = vpop.f32.mrb[48].mxu0  ;;  %v2703_v27 = vadd.f32 1.0, %v7624_v14  ;;  %vm5299_vm1 = vcmp.eq.f32.partialorder %v5252_v40, %v10429_v19 }
 0x4a6   : > { %12685 = vst [vmem:[#allocation52_spill] sm:$0xff] %v10568_v61  ;;  %12687 = vst [vmem:[#allocation54_spill] sm:$0xff] %v10580_v49  ;;  %v7628_v2 = vpop.eup %7627  ;;  %v10583_v4 = vmul.f32 %v7626_v10, %v10580_v49  ;;  %v10585_v53 = vpop.f32.mrb[49].mxu0 }
 0x4a7   : > { %12689 = vst [vmem:[#allocation56_spill] sm:$0xff] %v10585_v53  ;;  %v10588_v23 = vpop.f32.mrb[56].mxu1  ;;  %v10591_v58 = vmul.f32 %v7628_v2, %v10585_v53  ;;  %v5257_v46 = vpop.permute.xlu1 %5256  ;;  %7641 = vrcp.f32 %v2703_v27  ;;  %v5372_v2 = vsub.f32 1.0, %v10437_v51 }
 0x4a8   : > { %12688 = vst [vmem:[#allocation55_spill] sm:$0xff] %v10583_v4  ;;  %5512 = vadd.xlane.f32.xlu0 %v10573_v45  ;;  %12690 = vst [vmem:[#allocation57_spill] sm:$0xff] %v10588_v23  ;;  %v10596_v22 = vpop.f32.mrb[57].mxu1  ;;  %v7630_v14 = vpop.eup %7629  ;;  %vm5300_vm0 = vcmp.eq.f32.partialorder %v5257_v46, %v10429_v19 }
 0x4a9   : > { %12691 = vst [vmem:[#allocation58_spill] sm:$0xff] %v10591_v58  ;;  %12693 = vst [vmem:[#allocation60_spill] sm:$0xff] %v10596_v22  ;;  %v10603_v23 = vpop.f32.mrb[50].mxu0  ;;  %v7632_v7 = vpop.eup %7631  ;;  %v10620_v58 = vsel %vm5299_vm1, 1.0, %v12672_v15 }
 0x4aa   : > { %12694 = vst [vmem:[#allocation61_spill] sm:$0xff] %v10603_v23  ;;  %v10607_v21 = vmul.f32 %v7630_v14, %v10603_v23  ;;  %v10609_v61 = vpop.f32.mrb[51].mxu0  ;;  %v10612_v22 = vpop.f32.mrb[58].mxu1  ;;  %12699 = vst [vmem:[#allocation66_spill] sm:$0xff] %v10620_v58  ;;  %v12704_v14 = vlaneseq }
 0x4ab   : > { %12696 = vst [vmem:[#allocation63_spill] sm:$0xff] %v10612_v22  ;;  %v10614_v40 = vpop.eup %7633  ;;  %v10617_v34 = vmul.f32 %v7632_v7, %v10609_v61  ;;  %v10622_v27 = vpop.f32.mrb[59].mxu1 }
 0x4ac   : > { %12695 = vst [vmem:[#allocation62_spill] sm:$0xff] %v10607_v21  ;;  %5514 = vadd.xlane.f32.xlu0 %v10594_v11  ;;  %12697 = vst [vmem:[#allocation64_spill] sm:$0xff] %v10614_v40  ;;  %v7636_v51 = vpop.eup %7635  ;;  %v10631_v4 = vpop.permute.xlu1 %5266  ;;  %v5388_v28 = vmul.f32 %v10614_v40, %v5372_v2  ;;  %v3268_v46 = vshrl.u32 %v12704_v14, 7 }
 0x4ad   : > { %12698 = vst [vmem:[#allocation65_spill] sm:$0xff] %v10617_v34  ;;  %12700 = vst [vmem:[#allocation67_spill] sm:$0xff] %v10622_v27  ;;  %v10629_v22 = vpop.f32.mrb[52].mxu0  ;;  %v7638_v7 = vpop.eup %7637  ;;  %v10647_v34 = vsel %vm5300_vm0, 1.0, %v12672_v15  ;;  %vm5302_vm3 = vcmp.eq.f32.partialorder %v10631_v4, %v10429_v19  ;;  %v10745_v4 = vmul.f32 14.285714, %v10562_v31 }
 0x4ae   : > { %12701 = vst [vmem:[#allocation68_spill] sm:$0xff] %v10629_v22  ;;  %v10635_v32 = vmul.f32 %v7636_v51, %v10629_v22  ;;  %v10637_v27 = vpop.f32.mrb[53].mxu0  ;;  %v10641_v21 = vpop.f32.mrb[60].mxu1  ;;  %12707 = vst [vmem:[#allocation73_spill] sm:$0xff] %v10647_v34  ;;  %5406 = vadd.xlane.f32.xlu1 %v5388_v28  ;;  %v10668_v28 = vmul.f32 14.285714, %v10501_v54 }
 0x4af   : > { %12703 = vst [vmem:[#allocation70_spill] sm:$0xff] %v10637_v27  ;;  %12705 = vst [vmem:[#allocation71_spill] sm:$0xff] %v10641_v21  ;;  %v10644_v10 = vmul.f32 %v7638_v7, %v10637_v27  ;;  %v10649_v12 = vpop.f32.mrb[61].mxu1  ;;  %v7640_v2 = vpop.eup %7639  ;;  %v10662_v21 = vsub.s32 0, %v3268_v46 }
 0x4b0   : > { %12702 = vst [vmem:[#allocation69_spill] sm:$0xff] %v10635_v32  ;;  %5516 = vadd.xlane.f32.xlu0 %v10620_v58  ;;  %12708 = vst [vmem:[#allocation74_spill] sm:$0xff] %v10649_v12  ;;  %v10675_v40 = vpop.permute.xlu1 %5276  ;;  %v5262_v58 = vpop.permute.xlu0 %5261 }
 0x4b1   : > { %12706 = vst [vmem:[#allocation72_spill] sm:$0xff] %v10644_v10  ;;  %v10655_v25 = vpop.f32.mrb[54].mxu0  ;;  %12712 = vst [vmem:[#allocation78_spill] sm:$0xff] %v10662_v21  ;;  %v7642_v32 = vpop.eup %7641  ;;  %vm5301_vm2 = vcmp.eq.f32.partialorder %v5262_v58, %v10429_v19  ;;  %vm5304_vm8 = vcmp.eq.f32.partialorder %v10675_v40, %v10429_v19 }
 0x4b2   : > { %12709 = vst [vmem:[#allocation75_spill] sm:$0xff] %v10655_v25  ;;  %v10658_v14 = vmul.f32 %v7640_v2, %v10655_v25  ;;  %v10660_v7 = vpop.f32.mrb[55].mxu0  ;;  %v10665_v12 = vpop.f32.mrb[62].mxu1  ;;  %12714 = vst [vmem:[#allocation80_spill] sm:$0xff] %v10668_v28  ;;  %5498 = vadd.xlane.f32.xlu1 %v10479_v63  ;;  %v10691_v2 = vmul.f32 2.0, %v10534_v48  ;;  %v10713_v63 = vmul.f32 2.0, %v10542_v33 }
 0x4b3   : > { %12711 = vst [vmem:[#allocation77_spill] sm:$0xff] %v10660_v7  ;;  %12713 = vst [vmem:[#allocation79_spill] sm:$0xff] %v10665_v12  ;;  %v10670_v51 = vpop.f32.mrb[63].mxu1  ;;  %v10678_v46 = vmul.f32 %v7642_v32, %v10660_v7  ;;  %v10684_v12 = vmul.f32 2.0, %v10519_v6  ;;  %v5344_v32 = vmul.f32 1.442695, %v10668_v28 }
 0x4b4   : > { %12710 = vst [vmem:[#allocation76_spill] sm:$0xff] %v10658_v14  ;;  %5518 = vadd.xlane.f32.xlu0 %v10647_v34  ;;  %12715 = vst [vmem:[#allocation81_spill] sm:$0xff] %v10670_v51  ;;  %v10729_v33 = vmul.f32 2.0, %v10565_v8  ;;  %v10735_v28 = vsel %vm5301_vm2, 1.0, %v12672_v15  ;;  %v5272_v8 = vpop.permute.xlu0 %5271 }
 0x4b5   : > { %12716 = vst [vmem:[#allocation82_spill] sm:$0xff] %v10678_v46  ;;  %v3263_v10 = vpop.f32.mrb[56].mxu0  ;;  %7643 = vpow2.f32 %v5344_v32  ;;  %12723 = vst [vmem:[#allocation89_spill] sm:$0xff] %v10735_v28  ;;  %vm5303_vm5 = vcmp.eq.f32.partialorder %v5272_v8, %v10429_v19 }
 0x4b6   : > { %v10681_v34 = vrot.slane %v3263_v10, %v10662_v21  ;;  %v6740_v55 = vpop.f32.mrb[57].mxu0  ;;  %v10686_v51 = vpop.f32.mrb[64].mxu1  ;;  %5500 = vadd.xlane.f32.xlu1 %v10476_v42  ;;  %v10706_v10 = vmul.f32 14.285714, %v10539_v13  ;;  %12722 = vst [vmem:[#allocation88_spill] sm:$0xff] %v10729_v33  ;;  %12726 = vst [vmem:[#allocation92_spill] sm:$0xff] %v10745_v4 }
 0x4b7   : > { %12717 = vst [vmem:[#allocation83_spill] sm:$0xff] %v10686_v51  ;;  %v10694_v14 = vpop.f32.mrb[65].mxu1  ;;  %v10748_v42 = vsel %vm5302_vm3, 1.0, %v12672_v15  ;;  %v10759_v51 = vmul.f32 14.285714, %v10555_v59 }
 0x4b8   : > { %12718 = vst [vmem:[#allocation84_spill] sm:$0xff] %v10694_v14  ;;  %v10699_v6 = vadd.f32 %v10681_v34, %v10399_v52  ;;  %v10703_v55 = vadd.f32 %v10681_v34, %v10468_v56  ;;  %12719 = vst [vmem:[#allocation85_spill] sm:$0xff] %v10706_v10  ;;  %v10710_v48 = vadd.f32 %v10681_v34, %v10415_v3  ;;  %v3126_v56 = vpop.xlane.xlu1 %3125  ;;  %v5346_v52 = vmul.f32 1.442695, %v10706_v10 }
 0x4b9   : > { %v10732_v58 = vadd.f32 %v10681_v34, %v3126_v56  ;;  %5520 = vadd.xlane.f32.xlu0 %v10735_v28  ;;  %12727 = vst [vmem:[#allocation93_spill] sm:$0xff] %v10748_v42  ;;  %v5373_v10 = vsub.f32 1.0, %v10491_v57  ;;  %12729 = vst [vmem:[#allocation95_spill] sm:$0xff] %v10759_v51  ;;  %v5350_v14 = vmul.f32 1.442695, %v10745_v4  ;;  %v10771_v57 = vsel %vm5303_vm5, 1.0, %v12672_v15 }
 0x4ba   : > { %v10720_v46 = vpop.f32.mrb[66].mxu1  ;;  %7645 = vpow2.f32 %v5346_v52  ;;  %v2755_v52 = vmul.f32 1.442695, %v10406_v38  ;;  %12733 = vst [vmem:[#allocation98_spill] sm:$0xff] %v10771_v57  ;;  %v2753_v33 = vmul.f32 1.442695, %v10411_v39  ;;  %v12735_v4 = vsub.f32 %v10408_v62, %v10411_v39 }
 0x4bb   : > { %12720 = vst [vmem:[#allocation86_spill] sm:$0xff] %v10720_v46  ;;  %v10724_v3 = vpop.f32.mrb[67].mxu1  ;;  %v10739_v46 = vmul.f32 14.285714, %v10531_v35  ;;  %v10789_v39 = vsel %vm5304_vm8, 1.0, %v12672_v15 }
 0x4bc   : > { %12721 = vst [vmem:[#allocation87_spill] sm:$0xff] %v10724_v3  ;;  %v12732_v3 = vsub.f32 %v10401_v29, %v10406_v38  ;;  %v10784_v38 = vmul.f32 14.285714, %v10585_v53  ;;  %12737 = vst [vmem:[#allocation101_spill] sm:$0xff] %v10789_v39 }
 0x4bd   : > { %12724 = vst [vmem:[#allocation90_spill] sm:$0xff] %v10739_v46  ;;  %5522 = vadd.xlane.f32.xlu0 %v10748_v42 }
 0x4be   : > { %v2818_v8 = vmul.f32 -1.0, %v12732_v3  ;;  %12736 = vst [vmem:[#allocation100_spill] sm:$0xff] %v10784_v38  ;;  %v5352_v3 = vmul.f32 1.442695, %v10759_v51  ;;  %v2757_v51 = vmul.f32 1.442695, %v10513_v50 }
 0x4bf   : > { %v10742_v32 = vpop.f32.mrb[68].mxu1 }
 0x4c0   : > { %12725 = vst [vmem:[#allocation91_spill] sm:$0xff] %v10742_v32  ;;  %v10750_v56 = vpop.f32.mrb[69].mxu1  ;;  %v5348_v32 = vmul.f32 1.442695, %v10739_v46  ;;  %v2835_v29 = vmul.f32 1.442695, %v2818_v8 }
 0x4c1   : > { %12728 = vst [vmem:[#allocation94_spill] sm:$0xff] %v10750_v56  ;;  %v10764_v56 = vpop.eup %7643  ;;  %5524 = vadd.xlane.f32.xlu0 %v10771_v57  ;;  %v2759_v8 = vmul.f32 1.442695, %v10506_v26 }
 0x4c2   : > { %7647 = vpow2.f32 %v5348_v32  ;;  %12731 = vst [vmem:[#allocation97_spill] sm:$0xff] %v10764_v56  ;;  %v5389_v32 = vmul.f32 %v10764_v56, %v5373_v10  ;;  %v12738_v10 = vsub.f32 %v10501_v54, %v10506_v26  ;;  %v10812_v26 = vmul.f32 14.285714, %v10609_v61 }
 0x4c3   : > { %v10762_v21 = vpop.f32.mrb[70].mxu1  ;;  %7649 = vpow2.f32 %v5350_v14  ;;  %v10798_v14 = vmul.f32 14.285714, %v10580_v49 }
 0x4c4   : > { %12730 = vst [vmem:[#allocation96_spill] sm:$0xff] %v10762_v21  ;;  %v10773_v46 = vpop.f32.mrb[71].mxu1  ;;  %v2817_v21 = vmul.f32 -1.0, %v12735_v4  ;;  %5408 = vadd.xlane.f32.xlu1 %v5389_v32  ;;  %7651 = vpow2.f32 %v2755_v52  ;;  %v2820_v4 = vmul.f32 -1.0, %v12738_v10  ;;  %v10795_v56 = vpop.eup %7645  ;;  %v5354_v52 = vmul.f32 1.442695, %v10784_v38 }
 0x4c5   : > { %12734 = vst [vmem:[#allocation99_spill] sm:$0xff] %v10773_v46  ;;  %v5374_v46 = vsub.f32 1.0, %v10499_v37  ;;  %7653 = vpow2.f32 %v2753_v33  ;;  %5526 = vadd.xlane.f32.xlu0 %v10789_v39  ;;  %12739 = vst [vmem:[#allocation102_spill] sm:$0xff] %v10795_v56  ;;  %v12741_v33 = vsub.f32 %v10508_v60, %v10513_v50  ;;  %v5375_v32 = vsub.f32 1.0, %v10526_v1 }
 0x4c6   : > { %v2833_v40 = vmul.f32 1.442695, %v2817_v21  ;;  %12740 = vst [vmem:[#allocation103_spill] sm:$0xff] %v10798_v14  ;;  %7655 = vpow2.f32 %v5352_v3  ;;  %v2839_v53 = vmul.f32 1.442695, %v2820_v4  ;;  %v5376_v3 = vsub.f32 1.0, %v10548_v0 }
 0x4c7   : > { %v2819_v21 = vmul.f32 -1.0, %v12741_v33  ;;  %v5390_v10 = vmul.f32 %v10795_v56, %v5374_v46  ;;  %7657 = vpow2.f32 %v2835_v29  ;;  %12743 = vst [vmem:[#allocation105_spill] sm:$0xff] %v10812_v26  ;;  %v5356_v33 = vmul.f32 1.442695, %v10798_v14  ;;  %v12758_v56 = vld [vmem:[#allocation21_spill] sm:$0xff] }
 0x4c8   : > { %7659 = vpow2.f32 %v2833_v40  ;;  %v12744_v29 = vsub.f32 %v10531_v35, %v10537_v30  ;;  %v3561_v40 = vmul.f32 2.0, %v10311_v43  ;;  %v2763_v4 = vmul.f32 1.442695, %v10537_v30 }
 0x4c9   : > { %5410 = vadd.xlane.f32.xlu1 %v5390_v10  ;;  %7661 = vpow2.f32 %v5354_v52  ;;  %v2837_v38 = vmul.f32 1.442695, %v2819_v21  ;;  %v12746_v52 = vsub.f32 %v10539_v13, %v10545_v47  ;;  %v10828_v21 = vmul.f32 2.0, %v10319_v16 }
 0x4ca   : > { %7663 = vpow2.f32 %v2759_v8  ;;  %v2822_v46 = vmul.f32 -1.0, %v12744_v29  ;;  %v3560_v8 = vmul.f32 2.0, %v10314_v5  ;;  %v2761_v29 = vmul.f32 1.442695, %v10545_v47 }
 0x4cb   : > { %7665 = vpow2.f32 %v2757_v51  ;;  %v2821_v10 = vmul.f32 -1.0, %v12746_v52  ;;  %v10834_v43 = vmul.f32 2.0, %v10321_v17  ;;  %v10837_v30 = vmul.f32 14.285714, %v10603_v23 }
 0x4cc   : > { %v10808_v37 = vpop.eup %7647  ;;  %7667 = vpow2.f32 %v2839_v53  ;;  %v5358_v51 = vmul.f32 1.442695, %v10812_v26  ;;  %v2843_v5 = vmul.f32 1.442695, %v2822_v46  ;;  %v5377_v16 = vsub.f32 1.0, %v10573_v45  ;;  %v10843_v53 = vpop.permute.xlu0 %5281 }
 0x4cd   : > { %12742 = vst [vmem:[#allocation104_spill] sm:$0xff] %v10808_v37  ;;  %v5391_v50 = vmul.f32 %v10808_v37, %v5375_v32  ;;  %v10819_v1 = vpop.eup %7649  ;;  %12747 = vst [vmem:[#allocation107_spill] sm:$0xff] %v10837_v30  ;;  %7669 = vpow2.f32 %v5356_v33  ;;  %v10849_v17 = vmul.f32 2.0, %v10326_v18  ;;  %v10852_v14 = vmul.f32 2.0, %v10329_v9 }
 0x4ce   : > { %12745 = vst [vmem:[#allocation106_spill] sm:$0xff] %v10819_v1  ;;  %v10831_v32 = vpop.eup %7651  ;;  %7671 = vpow2.f32 %v2837_v38  ;;  %v5392_v47 = vmul.f32 %v10819_v1, %v5376_v3  ;;  %v2841_v33 = vmul.f32 1.442695, %v2821_v10  ;;  %v10855_v26 = vmul.f32 2.0, %v10372_v36  ;;  %v12753_v1 = vld [vmem:[#allocation27_spill] sm:$0xff] }
 0x4cf   : > { %5412 = vadd.xlane.f32.xlu1 %v5391_v50  ;;  %v10840_v52 = vpop.eup %7653  ;;  %7673 = vpow2.f32 %v2763_v4  ;;  %v5378_v38 = vsub.f32 1.0, %v10594_v11  ;;  %v10859_v46 = vmul.f32 14.285714, %v10637_v27  ;;  %v10864_v18 = vmul.f32 2.0, %v10557_v20 }
 0x4d0   : > { %v10846_v50 = vpop.eup %7655  ;;  %7675 = vpow2.f32 %v2761_v29  ;;  %v5360_v9 = vmul.f32 1.442695, %v10837_v30  ;;  %v3271_v4 = vadd.f32 %v10681_v34, %v10364_v44  ;;  %v2767_v10 = vmul.f32 1.442695, %v10560_v41 }
 0x4d1   : > { %12748 = vst [vmem:[#allocation108_spill] sm:$0xff] %v10846_v50  ;;  %12749 = vst [vmem:[#allocation109_spill] sm:$0xff] %v10859_v46  ;;  %v10861_v3 = vpop.eup %7657  ;;  %7677 = vpow2.f32 %v5358_v51  ;;  %v5393_v29 = vmul.f32 %v10846_v50, %v5377_v16  ;;  %v10878_v20 = vmul.f32 14.285714, %v10629_v22  ;;  %v5362_v16 = vmul.f32 1.442695, %v10859_v46 }
 0x4d2   : > { %v10869_v36 = vpop.eup %7659  ;;  %7679 = vpow2.f32 %v2843_v5  ;;  %v3576_v44 = vsub.f32 %v3271_v4, %v3560_v8  ;;  %v12752_v5 = vld [vmem:[#allocation66_spill] sm:$0xff]  ;;  %v10914_v23 = vadd.f32 %v10681_v34, %v12758_v56  ;;  %v12774_v22 = vld [vmem:[#allocation45_spill] sm:$0xff]  ;;  %vm5305_vm9 = vcmp.eq.f32.partialorder %v10843_v53, %v10429_v19 }
 0x4d3   : > { %5414 = vadd.xlane.f32.xlu1 %v5392_v47  ;;  %v3272_v47 = vadd.f32 %v10681_v34, %v10397_v24  ;;  %v10875_v45 = vpop.eup %7661  ;;  %7681 = vpow2.f32 %v2841_v33  ;;  %12751 = vst [vmem:[#allocation111_spill] sm:$0xff] %v10878_v20  ;;  %v5379_v0 = vsub.f32 1.0, %v12752_v5  ;;  %v3273_v24 = vadd.f32 %v10681_v34, %v12753_v1  ;;  %v12755_v1 = vld [vmem:[#allocation19_spill] sm:$0xff]  ;;  %v12781_v53 = vld [vmem:[#allocation14_spill] sm:$0xff] }
 0x4d4   : > { %12750 = vst [vmem:[#allocation110_spill] sm:$0xff] %v10875_v45  ;;  %v10883_v30 = vpop.eup %7663  ;;  %v10892_v33 = vmul.f32 14.285714, %v10660_v7  ;;  %7683 = vpow2.f32 %v5360_v9  ;;  %v10896_v8 = vmax.f32 %v3576_v44, 0.0  ;;  %v5364_v9 = vmul.f32 1.442695, %v10878_v20 }
 0x4d5   : > { %v3577_v50 = vsub.f32 %v3272_v47, %v3561_v40  ;;  %v10889_v37 = vpop.eup %7665  ;;  %v3578_v40 = vsub.f32 %v3273_v24, %v10834_v43  ;;  %v3274_v47 = vadd.f32 %v10681_v34, %v12755_v1  ;;  %v12760_v24 = vld [vmem:[#allocation73_spill] sm:$0xff]  ;;  %v12762_v7 = vld [vmem:[#allocation52_spill] sm:$0xff] }
 0x4d6   : > { %12754 = vst [vmem:[#allocation27_spill] sm:$0xff] %v10892_v33  ;;  %v10898_v4 = vpop.eup %7667  ;;  %7685 = vrsqrt.f32 %v10896_v8  ;;  %v5380_v1 = vsub.f32 1.0, %v12760_v24  ;;  %v5366_v56 = vmul.f32 1.442695, %v10892_v33  ;;  %vm3610_vm4 = vcmp.eq.f32.partialorder %v10896_v8, inf }
 0x4d7   : > { %5416 = vadd.xlane.f32.xlu1 %v5393_v29  ;;  %v5394_v29 = vmul.f32 %v10875_v45, %v5378_v38  ;;  %v10901_v46 = vmax.f32 %v3577_v50, 0.0  ;;  %v10906_v5 = vpop.eup %7669  ;;  %v12759_v38 = vld [vmem:[#allocation31_spill] sm:$0xff]  ;;  %7687 = vpow2.f32 %v5362_v16  ;;  %v10932_v24 = vmax.f32 %v3578_v40, 0.0  ;;  %v12765_v45 = vld [vmem:[#allocation13_spill] sm:$0xff] }
 0x4d8   : > { %12756 = vst [vmem:[#allocation19_spill] sm:$0xff] %v10906_v5  ;;  %v10916_v50 = vpop.eup %7671  ;;  %v10919_v43 = vmul.f32 2.0, %v12759_v38  ;;  %7689 = vpow2.f32 %v2767_v10  ;;  %v5395_v38 = vmul.f32 %v10906_v5, %v5379_v0  ;;  %v10942_v33 = vadd.f32 %v10681_v34, %v12765_v45 }
 0x4d9   : > { %v10923_v20 = vpop.eup %7673  ;;  %7691 = vrsqrt.f32 %v10901_v46  ;;  %v12767_v0 = vsub.f32 %v10555_v59, %v10560_v41  ;;  %v5381_v41 = vsub.f32 1.0, %v10735_v28  ;;  %v10978_v5 = vmul.f32 2.0, %v12774_v22 }
 0x4da   : > { %v3129_v11 = vpop.xlane.xlu0 %3128  ;;  %v10928_v27 = vpop.eup %7675  ;;  %7693 = vpow2.f32 %v5364_v9  ;;  %v3613_v19 = vand.u32 2147483648, %v10896_v8  ;;  %vm3612_vm6 = vcmp.eq.f32.partialorder %v10896_v8, 0.0  ;;  %vm3617_vm7 = vcmp.eq.f32.partialorder %v10901_v46, inf }
 0x4db   : > { %v10881_v51 = vadd.f32 %v10681_v34, %v3129_v11  ;;  %v12757_v11 = vld [vmem:[#allocation36_spill] sm:$0xff]  ;;  %5418 = vadd.xlane.f32.xlu1 %v5394_v29  ;;  %12763 = vst [vmem:[#allocation21_spill] sm:$0xff] %v10928_v27  ;;  %v3579_v29 = vsub.f32 %v3274_v47, %v10828_v21  ;;  %v10935_v16 = vpop.eup %7677  ;;  %v2824_v40 = vmul.f32 -1.0, %v12767_v0  ;;  %v12768_v21 = vsub.f32 %v10562_v31, %v12762_v7 }
 0x4dc   : > { %v3275_v44 = vadd.f32 %v10681_v34, %v12757_v11  ;;  %12761 = vst [vmem:[#allocation36_spill] sm:$0xff] %v10923_v20  ;;  %v2765_v11 = vmul.f32 1.442695, %v12762_v7  ;;  %12764 = vst [vmem:[#allocation31_spill] sm:$0xff] %v10935_v16  ;;  %v10944_v20 = vpop.eup %7679  ;;  %7695 = vrsqrt.f32 %v10932_v24  ;;  %v5396_v7 = vmul.f32 %v10935_v16, %v5380_v1 }
 0x4dd   : > { %12766 = vst [vmem:[#allocation52_spill] sm:$0xff] %v10944_v20  ;;  %v2823_v47 = vmul.f32 -1.0, %v12768_v21  ;;  %v10958_v45 = vpop.eup %7681  ;;  %7697 = vpow2.f32 %v5366_v56  ;;  %v10964_v0 = vmax.f32 %v3579_v29, 0.0  ;;  %v12775_v56 = vld [vmem:[#allocation46_spill] sm:$0xff]  ;;  %v12776_v1 = vsub.f32 %v10703_v55, %v10691_v2 }
 0x4de   : > { %v3580_v10 = vsub.f32 %v3275_v44, %v10852_v14  ;;  %v12769_v14 = vsub.f32 %v10699_v6, %v10684_v12  ;;  %12770 = vst [vmem:[#allocation13_spill] sm:$0xff] %v10958_v45  ;;  %v10961_v44 = vmul.f32 14.285714, %v10655_v25  ;;  %v12772_v6 = vld [vmem:[#allocation38_spill] sm:$0xff]  ;;  %7699 = vpow2.f32 %v2765_v11 }
 0x4df   : > { %5420 = vadd.xlane.f32.xlu1 %v5395_v38  ;;  %v10973_v38 = vadd.f32 %v10681_v34, %v12772_v6  ;;  %v10981_v29 = vmul.f32 2.0, %v12775_v56  ;;  %v10988_v28 = vmul.f32 1.442695, %v2824_v40  ;;  %v10990_v12 = vmul.f32 1.442695, %v2823_v47  ;;  %v12777_v6 = vld [vmem:[#allocation55_spill] sm:$0xff] }
 0x4e0   : > { %v10955_v9 = vmax.f32 %v12769_v14, 0.0  ;;  %12771 = vst [vmem:[#allocation112_spill] sm:$0xff] %v10961_v44  ;;  %v10967_v21 = vmax.f32 %v3580_v10, 0.0  ;;  %v10975_v14 = vpop.eup %7683  ;;  %v10986_v10 = vmax.f32 %v12776_v1, 0.0  ;;  %v10993_v16 = vmul.f32 1.442695, %v12777_v6 }
 0x4e1   : > { %12773 = vst [vmem:[#allocation38_spill] sm:$0xff] %v10975_v14  ;;  %v7686_v22 = vpop.eup %7685  ;;  %v12778_v11 = vsub.f32 %v10710_v48, %v10713_v63  ;;  %v5368_v2 = vmul.f32 1.442695, %v10961_v44  ;;  %v5397_v40 = vmul.f32 %v10975_v14, %v5381_v41  ;;  %v11022_v1 = vsel %vm5305_vm9, 1.0, %v12672_v15 }
 0x4e2   : > { %7701 = vrsqrt.f32 %v10955_v9  ;;  %v11005_v55 = vpop.eup %7687  ;;  %v3609_v47 = vmul.f32 %v7686_v22, %v10896_v8  ;;  %12782 = vst [vmem:[#allocation55_spill] sm:$0xff] %v11022_v1  ;;  %v5383_v22 = vsub.f32 1.0, %v10771_v57  ;;  %v12784_v44 = vsub.f32 1.0, %v10748_v42 }
 0x4e3   : > { %5422 = vadd.xlane.f32.xlu1 %v5396_v7  ;;  %v10999_v56 = vmax.f32 %v12778_v11, 0.0  ;;  %7703 = vrsqrt.f32 %v10964_v0  ;;  %12779 = vst [vmem:[#allocation45_spill] sm:$0xff] %v11005_v55  ;;  %v11012_v48 = vpop.eup %7689  ;;  %v11019_v7 = vadd.f32 %v10681_v34, %v12781_v53  ;;  %vm3619_vm10 = vcmp.eq.f32.partialorder %v10901_v46, 0.0 }
 0x4e4   : > { %7705 = vrsqrt.f32 %v10967_v21  ;;  %12780 = vst [vmem:[#allocation46_spill] sm:$0xff] %v11012_v48  ;;  %v7692_v41 = vpop.eup %7691  ;;  %v3611_v11 = vsel %vm3610_vm4, %v10896_v8, %v3609_v47  ;;  %v5398_v14 = vmul.f32 %v11005_v55, %v12784_v44  ;;  %vm3624_vm11 = vcmp.eq.f32.partialorder %v10932_v24, inf }
 0x4e5   : > { %7707 = vrsqrt.f32 %v10986_v10  ;;  %v11027_v63 = vpop.eup %7693  ;;  %v3614_v53 = vsel %vm3612_vm6, %v3613_v19, %v3611_v11  ;;  %v3616_v48 = vmul.f32 %v7692_v41, %v10901_v46  ;;  %vm3626_vm12 = vcmp.eq.f32.partialorder %v10932_v24, 0.0 }
 0x4e6   : > { %12783 = vst [vmem:[#allocation14_spill] sm:$0xff] %v11027_v63  ;;  %7709 = vpow2.f32 %v5368_v2  ;;  %v7696_v25 = vpop.eup %7695  ;;  %v3720_v15 = vmul.f32 0.57735026, %v3614_v53  ;;  %v12786_v2 = vld [vmem:[#allocation39_spill] sm:$0xff]  ;;  %v3627_v53 = vand.u32 2147483648, %v10932_v24  ;;  %v12788_v44 = vsub.f32 1.0, %v10789_v39 }
 0x4e7   : > { %5424 = vadd.xlane.f32.xlu1 %v5397_v40  ;;  %v3620_v40 = vand.u32 2147483648, %v10901_v46  ;;  %v11036_v47 = vpop.eup %7697  ;;  %v3618_v8 = vsel %vm3617_vm7, %v10901_v46, %v3616_v48  ;;  %v3623_v57 = vmul.f32 %v7696_v25, %v10932_v24  ;;  %v11044_v19 = vadd.f32 %v10681_v34, %v12786_v2 }
 0x4e8   : > { %12785 = vst [vmem:[#allocation113_spill] sm:$0xff] %v11036_v47  ;;  %v3736_v41 = vsub.f32 1.0, %v3720_v15  ;;  %v11048_v42 = vpop.eup %7699  ;;  %7711 = vrsqrt.f32 %v10999_v56  ;;  %v5385_v2 = vsub.f32 1.0, %v11022_v1  ;;  %v5400_v55 = vmul.f32 %v11036_v47, %v12788_v44 }
 0x4e9   : > { %v3621_v11 = vsel %vm3619_vm10, %v3620_v40, %v3618_v8  ;;  %12787 = vst [vmem:[#allocation39_spill] sm:$0xff] %v11048_v42  ;;  %v3625_v25 = vsel %vm3624_vm11, %v10932_v24, %v3623_v57  ;;  %vm3631_vm13 = vcmp.eq.f32.partialorder %v10964_v0, inf  ;;  %vm3633_vm14 = vcmp.eq.f32.partialorder %v10964_v0, 0.0 }
 0x4ea   : > { %v3721_v46 = vmul.f32 0.57735026, %v3621_v11  ;;  %v3752_v15 = vsub.f32 0.7, %v3736_v41  ;;  %v3628_v40 = vsel %vm3626_vm12, %v3627_v53, %v3625_v25  ;;  %v3634_v25 = vand.u32 2147483648, %v10964_v0 }
 0x4eb   : > { %5426 = vadd.xlane.f32.xlu1 %v5398_v14  ;;  %v5399_v14 = vmul.f32 %v11027_v63, %v5383_v22  ;;  %v3722_v20 = vmul.f32 0.57735026, %v3628_v40  ;;  %vm3638_vm15 = vcmp.eq.f32.partialorder %v10967_v21, inf  ;;  %vm3640_vm1 = vcmp.eq.f32.partialorder %v10967_v21, 0.0 }
 0x4ec   : > { %v7702_v48 = vpop.eup %7701  ;;  %v3737_v42 = vsub.f32 1.0, %v3721_v46  ;;  %v3768_v24 = vmul.f32 5.0, %v3752_v15  ;;  %vm3680_vm0 = vcmp.eq.f32.partialorder %v10955_v9, inf  ;;  %vm3682_vm2 = vcmp.eq.f32.partialorder %v10955_v9, 0.0 }
 0x4ed   : > { %v7704_v8 = vpop.eup %7703  ;;  %v3738_v53 = vsub.f32 1.0, %v3722_v20  ;;  %v12790_v20 = vld [vmem:[#allocation58_spill] sm:$0xff]  ;;  %vm3701_vm3 = vcmp.eq.f32.partialorder %v10986_v10, inf  ;;  %vm3703_vm5 = vcmp.eq.f32.partialorder %v10986_v10, 0.0  ;;  %vm3694_vm8 = vcmp.eq.f32.partialorder %v10999_v56, inf }
 0x4ee   : > { %v7706_v57 = vpop.eup %7705  ;;  %v3630_v45 = vmul.f32 %v7704_v8, %v10964_v0  ;;  %v3753_v41 = vsub.f32 0.7, %v3737_v42  ;;  %v3784_v46 = vmul.f32 1.442695, %v3768_v24  ;;  %v2769_v63 = vmul.f32 1.442695, %v12790_v20 }
 0x4ef   : > { %5428 = vadd.xlane.f32.xlu1 %v5399_v14  ;;  %v7708_v22 = vpop.eup %7707  ;;  %v3637_v44 = vmul.f32 %v7706_v57, %v10967_v21  ;;  %v3641_v14 = vand.u32 2147483648, %v10967_v21  ;;  %v3754_v39 = vsub.f32 0.7, %v3738_v53  ;;  %vm3696_vm9 = vcmp.eq.f32.partialorder %v10999_v56, 0.0 }
 0x4f0   : > { %v3632_v40 = vsel %vm3631_vm13, %v10964_v0, %v3630_v45  ;;  %v11068_v15 = vpop.eup %7709  ;;  %v3769_v11 = vmul.f32 5.0, %v3753_v41  ;;  %7713 = vpow2.f32 %v3784_v46  ;;  %v12791_v41 = vsub.f32 %v10580_v49, %v12777_v6 }
 0x4f1   : > { %12789 = vst [vmem:[#allocation114_spill] sm:$0xff] %v11068_v15  ;;  %v3635_v47 = vsel %vm3633_vm14, %v3634_v25, %v3632_v40  ;;  %v3639_v42 = vsel %vm3638_vm15, %v10967_v21, %v3637_v44  ;;  %7715 = vpow2.f32 %v10988_v28  ;;  %v3770_v0 = vmul.f32 5.0, %v3754_v39  ;;  %v12792_v25 = vld [vmem:[#allocation88_spill] sm:$0xff] }
 0x4f2   : > { %v3723_v57 = vmul.f32 0.57735026, %v3635_v47  ;;  %v3786_v45 = vmul.f32 1.442695, %v3769_v11  ;;  %v3642_v24 = vsel %vm3640_vm1, %v3641_v14, %v3639_v42  ;;  %7717 = vpow2.f32 %v10990_v12  ;;  %v7712_v47 = vpop.eup %7711  ;;  %v12794_v12 = vld [vmem:[#allocation78_spill] sm:$0xff]  ;;  %v12795_v14 = vld [vmem:[#allocation60_spill] sm:$0xff] }
 0x4f3   : > { %5430 = vadd.xlane.f32.xlu1 %v5400_v55  ;;  %v2826_v53 = vmul.f32 -1.0, %v12791_v41  ;;  %v12793_v44 = vsub.f32 %v10732_v58, %v12792_v25  ;;  %v3788_v21 = vmul.f32 1.442695, %v3770_v0  ;;  %v3724_v11 = vmul.f32 0.57735026, %v3642_v24 }
 0x4f4   : > { %7719 = vpow2.f32 %v3786_v45  ;;  %v3739_v28 = vsub.f32 1.0, %v3723_v57  ;;  %v3679_v39 = vmul.f32 %v7702_v48, %v10955_v9  ;;  %v12797_v45 = vld [vmem:[#allocation57_spill] sm:$0xff]  ;;  %v3704_v25 = vand.u32 2147483648, %v10986_v10 }
 0x4f5   : > { %v4306_v8 = vpop.f32.mrb[58].mxu0  ;;  %v11081_v55 = vmax.f32 %v12793_v44, 0.0  ;;  %7721 = vpow2.f32 %v10993_v16  ;;  %v3740_v58 = vsub.f32 1.0, %v3724_v11  ;;  %v11089_v40 = vmul.f32 1.442695, %v2826_v53  ;;  %v12799_v44 = vld [vmem:[#allocation67_spill] sm:$0xff] }
 0x4f6   : > { %v6831_v27 = vpop.f32.mrb[59].mxu0  ;;  %v11087_v6 = vrot.slane %v4306_v8, %v12794_v12  ;;  %7723 = vpow2.f32 %v3788_v21  ;;  %v3755_v46 = vsub.f32 0.7, %v3739_v28  ;;  %v3700_v16 = vmul.f32 %v7708_v22, %v10986_v10  ;;  %v12798_v22 = vld [vmem:[#allocation30_spill] sm:$0xff]  ;;  %v12800_v21 = vld [vmem:[#allocation28_spill] sm:$0xff] }
 0x4f7   : > { %v5401_v27 = vmul.f32 %v11068_v15, %v5385_v2  ;;  %7725 = vpow2.f32 %v2769_v63  ;;  %v3683_v2 = vand.u32 2147483648, %v10955_v9  ;;  %v3681_v48 = vsel %vm3680_vm0, %v10955_v9, %v3679_v39  ;;  %v12796_v63 = vld [vmem:[#allocation35_spill] sm:$0xff] }
 0x4f8   : > { %7727 = vrsqrt.f32 %v11081_v55  ;;  %v4539_v8 = vmul.f32 2.0, %v12795_v14  ;;  %v3756_v42 = vsub.f32 0.7, %v3740_v58  ;;  %v4314_v57 = vadd.f32 %v11087_v6, %v12796_v63 }
 0x4f9   : > { %5432 = vadd.xlane.f32.xlu1 %v5401_v27  ;;  %v4540_v0 = vmul.f32 2.0, %v12797_v45  ;;  %v3771_v24 = vmul.f32 5.0, %v3755_v46  ;;  %v4315_v41 = vadd.f32 %v11087_v6, %v12798_v22  ;;  %v4541_v27 = vmul.f32 2.0, %v12799_v44  ;;  %v12803_v45 = vld [vmem:[#allocation63_spill] sm:$0xff] }
 0x4fa   : > { %v7714_v53 = vpop.eup %7713  ;;  %v4316_v28 = vadd.f32 %v11087_v6, %v12800_v21  ;;  %v3684_v39 = vsel %vm3682_vm2, %v3683_v2, %v3681_v48  ;;  %v3702_v46 = vsel %vm3701_vm3, %v10986_v10, %v3700_v16  ;;  %v3693_v58 = vmul.f32 %v7712_v47, %v10999_v56  ;;  %v12804_v2 = vld [vmem:[#allocation34_spill] sm:$0xff] }
 0x4fb   : > { %v11111_v11 = vpop.eup %7715  ;;  %v3816_v14 = vadd.f32 1.0, %v7714_v53  ;;  %v4542_v22 = vmul.f32 2.0, %v12803_v45  ;;  %v3772_v44 = vmul.f32 5.0, %v3756_v42  ;;  %v4555_v21 = vsub.f32 %v4314_v57, %v4539_v8  ;;  %v12806_v42 = vld [vmem:[#allocation11_spill] sm:$0xff] }
 0x4fc   : > { %12801 = vst [vmem:[#allocation58_spill] sm:$0xff] %v11111_v11  ;;  %v11119_v63 = vpop.eup %7717  ;;  %v4556_v9 = vsub.f32 %v4315_v41, %v4540_v0  ;;  %v4317_v48 = vadd.f32 %v11087_v6, %v12804_v2  ;;  %v3730_v16 = vmul.f32 0.57735026, %v3684_v39  ;;  %v3705_v47 = vsel %vm3703_vm5, %v3704_v25, %v3702_v46  ;;  %v12807_v0 = vld [vmem:[#allocation94_spill] sm:$0xff] }
 0x4fd   : > { %5528 = vadd.xlane.f32.xlu1 %v11022_v1  ;;  %12802 = vst [vmem:[#allocation88_spill] sm:$0xff] %v11119_v63  ;;  %7729 = vrcp.f32 %v3816_v14  ;;  %v3790_v1 = vmul.f32 1.442695, %v3771_v24  ;;  %v4557_v11 = vsub.f32 %v4316_v28, %v4541_v27  ;;  %v3695_v8 = vsel %vm3694_vm8, %v10999_v56, %v3693_v58  ;;  %v12809_v2 = vld [vmem:[#allocation74_spill] sm:$0xff] }
 0x4fe   : > { %v7720_v12 = vpop.eup %7719  ;;  %v4326_v57 = vadd.f32 %v11087_v6, %v12806_v42  ;;  %v4551_v24 = vmul.f32 2.0, %v12807_v0  ;;  %v3792_v41 = vmul.f32 1.442695, %v3772_v44  ;;  %v3697_v39 = vand.u32 2147483648, %v10999_v56 }
 0x4ff   : > { %v11125_v15 = vpop.eup %7721  ;;  %v3817_v53 = vadd.f32 1.0, %v7720_v12  ;;  %v11138_v25 = vmax.f32 %v4555_v21, 0.0  ;;  %v3733_v27 = vmul.f32 0.57735026, %v3705_v47  ;;  %v11140_v28 = vmax.f32 %v4556_v9, 0.0 }
 0x500   : > { %12805 = vst [vmem:[#allocation60_spill] sm:$0xff] %v11125_v15  ;;  %v7724_v63 = vpop.eup %7723  ;;  %v4558_v46 = vsub.f32 %v4317_v48, %v4542_v22  ;;  %v3746_v58 = vsub.f32 1.0, %v3730_v16  ;;  %v3698_v45 = vsel %vm3696_vm9, %v3697_v39, %v3695_v8  ;;  %v11144_v44 = vmax.f32 %v4557_v11, 0.0  ;;  %v12812_v39 = vld [vmem:[#allocation71_spill] sm:$0xff] }
 0x501   : > { %v11135_v14 = vpop.eup %7725  ;;  %7731 = vrcp.f32 %v3817_v53  ;;  %v3818_v10 = vadd.f32 1.0, %v7724_v63  ;;  %v4543_v42 = vmul.f32 2.0, %v12809_v2  ;;  %v4567_v0 = vsub.f32 %v4326_v57, %v4551_v24  ;;  %v12810_v63 = vld [vmem:[#allocation10_spill] sm:$0xff] }
 0x502   : > { %12808 = vst [vmem:[#allocation35_spill] sm:$0xff] %v11135_v14  ;;  %v7728_v12 = vpop.eup %7727  ;;  %7733 = vpow2.f32 %v3790_v1  ;;  %v4318_v21 = vadd.f32 %v11087_v6, %v12810_v63  ;;  %v11150_v1 = vmax.f32 %v4558_v46, 0.0  ;;  %v3749_v9 = vsub.f32 1.0, %v3733_v27 }
 0x503   : > { %7735 = vrcp.f32 %v3818_v10  ;;  %v11152_v22 = vmul.f32 0.57735026, %v3698_v45  ;;  %v3707_v56 = vmul.f32 %v7728_v12, %v11081_v55  ;;  %v3762_v11 = vsub.f32 0.7, %v3746_v58  ;;  %v12813_v45 = vld [vmem:[#allocation17_spill] sm:$0xff] }
 0x504   : > { %7737 = vpow2.f32 %v3792_v41  ;;  %v12811_v48 = vsub.f32 %v10914_v23, %v10849_v17  ;;  %v11163_v53 = vmax.f32 %v4567_v0, 0.0  ;;  %v4559_v8 = vsub.f32 %v4318_v21, %v4543_v42 }
 0x505   : > { %7739 = vrsqrt.f32 %v11138_v25  ;;  %vm3708_vm4 = vcmp.eq.f32.partialorder %v11081_v55, inf  ;;  %v11169_v41 = vsub.f32 0.7, %v3749_v9  ;;  %v11178_v12 = vmul.f32 5.0, %v3762_v11 }
 0x506   : > { %7741 = vrsqrt.f32 %v11140_v28  ;;  %v11160_v16 = vmax.f32 %v12811_v48, 0.0  ;;  %v11173_v17 = vsel %vm3708_vm4, %v11081_v55, %v3707_v56  ;;  %vm4589_vm6 = vcmp.eq.f32.partialorder %v11138_v25, inf }
 0x507   : > { %7743 = vrsqrt.f32 %v11144_v44  ;;  %v7730_v47 = vpop.eup %7729  ;;  %v11185_v42 = vmax.f32 %v4559_v8, 0.0  ;;  %vm4591_vm7 = vcmp.eq.f32.partialorder %v11138_v25, 0.0  ;;  %v4592_v21 = vand.u32 2147483648, %v11138_v25 }
 0x508   : > { %7745 = vpow2.f32 %v11089_v40  ;;  %v3848_v24 = vmul.f32 %v7730_v47, %v10408_v62  ;;  %v11176_v40 = vmul.f32 2.0, %v12812_v39  ;;  %vm4596_vm10 = vcmp.eq.f32.partialorder %v11140_v28, inf }
 0x509   : > { %7747 = vrsqrt.f32 %v11150_v1  ;;  %vm4598_vm11 = vcmp.eq.f32.partialorder %v11140_v28, 0.0  ;;  %vm4603_vm12 = vcmp.eq.f32.partialorder %v11144_v44, inf  ;;  %vm4605_vm13 = vcmp.eq.f32.partialorder %v11144_v44, 0.0 }
 0x50a   : > { %v3880_v27 = vmul.f32 1.442695, %v3848_v24  ;;  %v3864_v46 = vsub.f32 %v10408_v62, %v3848_v24  ;;  %7749 = vrsqrt.f32 %v11160_v16  ;;  %v4599_v24 = vand.u32 2147483648, %v11140_v28 }
 0x50b   : > { %v7732_v10 = vpop.eup %7731  ;;  %7751 = vrsqrt.f32 %v11163_v53  ;;  %vm3710_vm14 = vcmp.eq.f32.partialorder %v11081_v55, 0.0  ;;  %vm4610_vm15 = vcmp.eq.f32.partialorder %v11150_v1, inf  ;;  %vm4612_vm1 = vcmp.eq.f32.partialorder %v11150_v1, 0.0 }
 0x50c   : > { %v7734_v58 = vpop.eup %7733  ;;  %v3849_v2 = vmul.f32 %v7732_v10, %v12813_v45  ;;  %7753 = vpow2.f32 %v3880_v27  ;;  %v3944_v63 = vmul.f32 -1.0, %v3864_v46  ;;  %vm3645_vm0 = vcmp.eq.f32.partialorder %v11160_v16, inf }
 0x50d   : > { %v7736_v0 = vpop.eup %7735  ;;  %v3819_v27 = vadd.f32 1.0, %v7734_v58  ;;  %7755 = vrsqrt.f32 %v11185_v42  ;;  %vm3647_vm2 = vcmp.eq.f32.partialorder %v11160_v16, 0.0  ;;  %vm4617_vm3 = vcmp.eq.f32.partialorder %v11185_v42, inf }
 0x50e   : > { %v7738_v9 = vpop.eup %7737  ;;  %v3882_v56 = vmul.f32 1.442695, %v3849_v2  ;;  %v3865_v11 = vsub.f32 %v12813_v45, %v3849_v2  ;;  %v3960_v47 = vmul.f32 1.442695, %v3944_v63  ;;  %v3850_v8 = vmul.f32 %v7736_v0, %v10508_v60 }
 0x50f   : > { %v7740_v48 = vpop.eup %7739  ;;  %v3820_v23 = vadd.f32 1.0, %v7738_v9  ;;  %vm4619_vm5 = vcmp.eq.f32.partialorder %v11185_v42, 0.0  ;;  %vm4673_vm8 = vcmp.eq.f32.partialorder %v11163_v53, inf  ;;  %vm4675_vm9 = vcmp.eq.f32.partialorder %v11163_v53, 0.0 }
 0x510   : > { %v7742_v39 = vpop.eup %7741  ;;  %v3945_v10 = vmul.f32 -1.0, %v3865_v11  ;;  %v4588_v46 = vmul.f32 %v7740_v48, %v11138_v25  ;;  %7757 = vpow2.f32 %v3882_v56  ;;  %v3866_v57 = vsub.f32 %v10508_v60, %v3850_v8 }
 0x511   : > { %v7744_v2 = vpop.eup %7743  ;;  %v4595_v63 = vmul.f32 %v7742_v39, %v11140_v28  ;;  %7759 = vpow2.f32 %v3960_v47  ;;  %v4606_v56 = vand.u32 2147483648, %v11144_v44 }
 0x512   : > { %v11199_v15 = vpop.eup %7745  ;;  %v3962_v0 = vmul.f32 1.442695, %v3945_v10  ;;  %v4590_v11 = vsel %vm4589_vm6, %v11138_v25, %v4588_v46  ;;  %v4602_v58 = vmul.f32 %v7744_v2, %v11144_v44  ;;  %v12815_v25 = vld [vmem:[#allocation96_spill] sm:$0xff] }
 0x513   : > { %12814 = vst [vmem:[#allocation57_spill] sm:$0xff] %v11199_v15  ;;  %v7748_v48 = vpop.eup %7747  ;;  %v4593_v14 = vsel %vm4591_vm7, %v4592_v21, %v4590_v11  ;;  %v4597_v9 = vsel %vm4596_vm10, %v11140_v28, %v4595_v63  ;;  %v4554_v21 = vmul.f32 2.0, %v12815_v25  ;;  %v4613_v25 = vand.u32 2147483648, %v11150_v1 }
 0x514   : > { %7761 = vpow2.f32 %v3962_v0  ;;  %v4699_v47 = vsub.f32 0.0, %v4593_v14  ;;  %v4600_v39 = vsel %vm4598_vm11, %v4599_v24, %v4597_v9  ;;  %v4604_v10 = vsel %vm4603_vm12, %v11144_v44, %v4602_v58  ;;  %v7750_v46 = vpop.eup %7749  ;;  %v12816_v9 = vld [vmem:[#allocation99_spill] sm:$0xff] }
 0x515   : > { %7763 = vrcp.f32 %v3819_v27  ;;  %v4700_v2 = vsub.f32 0.0, %v4600_v39  ;;  %v4607_v63 = vsel %vm4605_vm13, %v4606_v56, %v4604_v10  ;;  %v11219_v11 = vpop.eup %7751  ;;  %v4609_v28 = vmul.f32 %v7748_v48, %v11150_v1  ;;  %v12818_v27 = vld [vmem:[#allocation43_spill] sm:$0xff] }
 0x516   : > { %7765 = vrcp.f32 %v3820_v23  ;;  %v4715_v0 = vmul.f32 50.0, %v4699_v47  ;;  %v4701_v14 = vsub.f32 0.0, %v4607_v63  ;;  %v7754_v24 = vpop.eup %7753  ;;  %v4553_v15 = vmul.f32 2.0, %v12816_v9 }
 0x517   : > { %v4716_v49 = vmul.f32 50.0, %v4700_v2  ;;  %v12817_v44 = vsub.f32 %v10942_v33, %v10919_v43  ;;  %v4329_v56 = vadd.f32 %v11087_v6, %v12818_v27  ;;  %3912 = vadd.xlane.f32.xlu0 %v7754_v24  ;;  %v4611_v39 = vsel %vm4610_vm15, %v11150_v1, %v4609_v28  ;;  %v7756_v63 = vpop.eup %7755 }
 0x518   : > { %v4731_v23 = vmul.f32 1.442695, %v4715_v0  ;;  %v4717_v47 = vmul.f32 50.0, %v4701_v14  ;;  %v3946_v48 = vmul.f32 -1.0, %v3866_v57  ;;  %v3644_v2 = vmul.f32 %v7750_v46, %v11160_v16 }
 0x519   : > { %v11227_v58 = vmax.f32 %v12817_v44, 0.0  ;;  %v4733_v10 = vmul.f32 1.442695, %v4716_v49  ;;  %v3884_v9 = vmul.f32 1.442695, %v3850_v8  ;;  %v12819_v44 = vld [vmem:[#allocation15_spill] sm:$0xff]  ;;  %v4614_v0 = vsel %vm4612_vm1, %v4613_v25, %v4611_v39 }
 0x51a   : > { %7767 = vpow2.f32 %v4731_v23  ;;  %v4735_v33 = vmul.f32 1.442695, %v4717_v47  ;;  %v7758_v43 = vpop.eup %7757  ;;  %v4328_v24 = vadd.f32 %v11087_v6, %v12819_v44  ;;  %v12820_v57 = vsub.f32 %v10973_v38, %v10855_v26 }
 0x51b   : > { %7769 = vpow2.f32 %v4733_v10  ;;  %v7760_v14 = vpop.eup %7759  ;;  %v12821_v46 = vsub.f32 1.0, %v11152_v22  ;;  %v4570_v8 = vsub.f32 %v4329_v56, %v4554_v21  ;;  %3914 = vadd.xlane.f32.xlu1 %v7758_v43  ;;  %v3964_v1 = vmul.f32 1.442695, %v3946_v48 }
 0x51c   : > { %v11240_v49 = vmax.f32 %v12820_v57, 0.0  ;;  %7771 = vpow2.f32 %v4735_v33  ;;  %3992 = vadd.xlane.f32.xlu0 %v7760_v14  ;;  %v4616_v27 = vmul.f32 %v7756_v63, %v11185_v42  ;;  %v3646_v23 = vsel %vm3645_vm0, %v11160_v16, %v3644_v2 }
 0x51d   : > { %v3764_v28 = vsub.f32 0.7, %v12821_v46  ;;  %7773 = vrsqrt.f32 %v11227_v58  ;;  %v12822_v38 = vand.u32 2147483648, %v11081_v55  ;;  %v4702_v21 = vsub.f32 0.0, %v4614_v0 }
 0x51e   : > { %v7762_v26 = vpop.eup %7761  ;;  %7775 = vpow2.f32 %v3884_v9  ;;  %v3648_v56 = vand.u32 2147483648, %v11160_v16  ;;  %v3781_v39 = vmul.f32 5.0, %v11169_v41  ;;  %v4569_v48 = vsub.f32 %v4328_v24, %v4553_v15 }
 0x51f   : > { %v3712_v22 = vsel %vm3710_vm14, %v12822_v38, %v11173_v17  ;;  %v7764_v47 = vpop.eup %7763  ;;  %7777 = vrsqrt.f32 %v11240_v49  ;;  %v11257_v25 = vmax.f32 %v4570_v8, 0.0  ;;  %3994 = vadd.xlane.f32.xlu1 %v7762_v26  ;;  %v4618_v16 = vsel %vm4617_vm3, %v11185_v42, %v4616_v27 }
 0x520   : > { %v7766_v10 = vpop.eup %7765  ;;  %v3851_v2 = vmul.f32 %v7764_v47, %v10501_v54  ;;  %v3649_v55 = vsel %vm3647_vm2, %v3648_v56, %v3646_v23  ;;  %v11261_v17 = vmul.f32 0.57735026, %v3712_v22  ;;  %2785 = vadd.xlane.f32.xlu0 %v10840_v52  ;;  %7779 = vpow2.f32 %v3964_v1 }
 0x521   : > { %v11265_v15 = vmul.f32 %v7766_v10, %v10539_v13  ;;  %v4718_v9 = vmul.f32 50.0, %v4702_v21  ;;  %v4620_v33 = vand.u32 2147483648, %v11185_v42  ;;  %v4672_v43 = vmul.f32 %v11219_v11, %v11163_v53 }
 0x522   : > { %v3886_v41 = vmul.f32 1.442695, %v3851_v2  ;;  %v3867_v63 = vsub.f32 %v10501_v54, %v3851_v2  ;;  %v11272_v44 = vmax.f32 %v4569_v48, 0.0  ;;  %v3725_v52 = vmul.f32 0.57735026, %v3649_v55  ;;  %v12823_v2 = vld [vmem:[#allocation33_spill] sm:$0xff] }
 0x523   : > { %7781 = vrsqrt.f32 %v11257_v25  ;;  %2787 = vadd.xlane.f32.xlu1 %v10831_v32  ;;  %v4621_v57 = vsel %vm4619_vm5, %v4620_v33, %v4618_v16  ;;  %v3868_v14 = vsub.f32 %v10539_v13, %v11265_v15  ;;  %v3804_v8 = vmul.f32 1.442695, %v11178_v12 }
 0x524   : > { %v7768_v24 = vpop.eup %7767  ;;  %v3947_v0 = vmul.f32 -1.0, %v3867_v63  ;;  %v3780_v1 = vmul.f32 5.0, %v3764_v28  ;;  %2865 = vadd.xlane.f32.xlu0 %v10869_v36  ;;  %7783 = vpow2.f32 %v3886_v41  ;;  %v4737_v26 = vmul.f32 1.442695, %v4718_v9 }
 0x525   : > { %v7770_v46 = vpop.eup %7769  ;;  %v4763_v42 = vsub.f32 0.5, %v7768_v24  ;;  %v4674_v38 = vsel %vm4673_vm8, %v11163_v53, %v4672_v43  ;;  %v4703_v21 = vsub.f32 0.0, %v4621_v57  ;;  %v3741_v56 = vsub.f32 1.0, %v3725_v52  ;;  %v12824_v24 = vld [vmem:[#allocation79_spill] sm:$0xff] }
 0x526   : > { %v7772_v11 = vpop.eup %7771  ;;  %v3966_v27 = vmul.f32 1.442695, %v3947_v0  ;;  %v4764_v23 = vsub.f32 0.5, %v7770_v46  ;;  %v4676_v12 = vand.u32 2147483648, %v11163_v53  ;;  %7785 = vrsqrt.f32 %v11272_v44  ;;  %v12825_v0 = vld [vmem:[#allocation81_spill] sm:$0xff] }
 0x527   : > { %v7774_v32 = vpop.eup %7773  ;;  %v4779_v22 = vmul.f32 5.0, %v4763_v42  ;;  %2867 = vadd.xlane.f32.xlu1 %v10861_v3  ;;  %v4765_v28 = vsub.f32 0.5, %v7772_v11  ;;  %v4319_v55 = vadd.f32 %v11087_v6, %v12823_v2  ;;  %v3888_v41 = vmul.f32 1.442695, %v11265_v15 }
 0x528   : > { %v7776_v47 = vpop.eup %7775  ;;  %v4780_v36 = vmul.f32 5.0, %v4764_v23  ;;  %7787 = vpow2.f32 %v3966_v27  ;;  %v4677_v16 = vsel %vm4675_vm9, %v4676_v12, %v4674_v38  ;;  %v3810_v33 = vmul.f32 1.442695, %v3781_v39  ;;  %v12826_v27 = vld [vmem:[#allocation12_spill] sm:$0xff] }
 0x529   : > { %v7778_v48 = vpop.eup %7777  ;;  %3916 = vadd.xlane.f32.xlu0 %v7776_v47  ;;  %v4795_v10 = vmul.f32 1.442695, %v4779_v22  ;;  %v4781_v63 = vmul.f32 5.0, %v4765_v28  ;;  %7789 = vpow2.f32 %v4737_v26  ;;  %v4719_v3 = vmul.f32 50.0, %v4703_v21 }
 0x52a   : > { %v7780_v9 = vpop.eup %7779  ;;  %v3757_v43 = vsub.f32 0.7, %v3741_v56  ;;  %v3750_v52 = vsub.f32 1.0, %v11261_v17  ;;  %v11292_v53 = vmul.f32 2.0, %v12824_v24  ;;  %v4545_v57 = vmul.f32 2.0, %v12825_v0 }
 0x52b   : > { %7791 = vpow2.f32 %v4795_v10  ;;  %3996 = vadd.xlane.f32.xlu1 %v7780_v9  ;;  %v4797_v46 = vmul.f32 1.442695, %v4780_v36  ;;  %v11295_v42 = vmul.f32 1.442695, %v3780_v1  ;;  %v4711_v11 = vsub.f32 0.0, %v4677_v16 }
 0x52c   : > { %7793 = vpow2.f32 %v3804_v8  ;;  %v4320_v39 = vadd.f32 %v11087_v6, %v12826_v27  ;;  %v4799_v26 = vmul.f32 1.442695, %v4781_v63  ;;  %v4560_v17 = vsub.f32 %v4319_v55, %v11176_v40 }
 0x52d   : > { %2789 = vadd.xlane.f32.xlu0 %v10889_v37  ;;  %v7782_v23 = vpop.eup %7781  ;;  %7795 = vpow2.f32 %v3888_v41  ;;  %v3651_v38 = vmul.f32 %v7774_v32, %v11227_v58  ;;  %v4739_v22 = vmul.f32 1.442695, %v4719_v3  ;;  %v3773_v21 = vmul.f32 5.0, %v3757_v43 }
 0x52e   : > { %7797 = vpow2.f32 %v3810_v33  ;;  %vm3652_vm4 = vcmp.eq.f32.partialorder %v11227_v58, inf  ;;  %v7784_v8 = vpop.eup %7783  ;;  %vm3654_vm6 = vcmp.eq.f32.partialorder %v11227_v58, 0.0  ;;  %v3655_v37 = vand.u32 2147483648, %v11227_v58 }
 0x52f   : > { %2869 = vadd.xlane.f32.xlu1 %v10916_v50  ;;  %7799 = vpow2.f32 %v4797_v46  ;;  %v3658_v1 = vmul.f32 %v7778_v48, %v11240_v49  ;;  %v4727_v56 = vmul.f32 50.0, %v4711_v11  ;;  %v4693_v40 = vmul.f32 %v7782_v23, %v11257_v25 }
 0x530   : > { %v3653_v32 = vsel %vm3652_vm4, %v11227_v58, %v3651_v38  ;;  %vm3659_vm7 = vcmp.eq.f32.partialorder %v11240_v49, inf  ;;  %v7786_v47 = vpop.eup %7785  ;;  %7801 = vpow2.f32 %v4799_v26  ;;  %v11310_v12 = vmax.f32 %v4560_v17, 0.0  ;;  %v12828_v58 = vld [vmem:[#allocation20_spill] sm:$0xff] }
 0x531   : > { %3918 = vadd.xlane.f32.xlu0 %v7784_v8  ;;  %v4561_v50 = vsub.f32 %v4320_v39, %v4545_v57  ;;  %vm3661_vm10 = vcmp.eq.f32.partialorder %v11240_v49, 0.0  ;;  %7803 = vpow2.f32 %v4739_v22  ;;  %v3794_v28 = vmul.f32 1.442695, %v3773_v21 }
 0x532   : > { %v7788_v36 = vpop.eup %7787  ;;  %v3662_v48 = vand.u32 2147483648, %v11240_v49  ;;  %v12827_v10 = vsub.f32 %v11019_v7, %v10981_v29  ;;  %vm4694_vm11 = vcmp.eq.f32.partialorder %v11257_v25, inf  ;;  %v4697_v16 = vand.u32 2147483648, %v11257_v25 }
 0x533   : > { %v7790_v55 = vpop.eup %7789  ;;  %3998 = vadd.xlane.f32.xlu1 %v7788_v36  ;;  %v3656_v41 = vsel %vm3654_vm6, %v3655_v37, %v3653_v32  ;;  %v3660_v63 = vsel %vm3659_vm7, %v11240_v49, %v3658_v1  ;;  %v4755_v33 = vmul.f32 1.442695, %v4727_v56  ;;  %v4695_v3 = vsel %vm4694_vm11, %v11257_v25, %v4693_v40  ;;  %v12830_v37 = vld [vmem:[#allocation84_spill] sm:$0xff]  ;;  %v12831_v56 = vld [vmem:[#allocation23_spill] sm:$0xff] }
 0x534   : > { %v11317_v2 = vmax.f32 %v12827_v10, 0.0  ;;  %v4686_v29 = vmul.f32 %v7786_v47, %v11272_v44  ;;  %v4766_v7 = vsub.f32 0.5, %v7790_v55  ;;  %7805 = vrsqrt.f32 %v11310_v12 }
 0x535   : > { %v7792_v9 = vpop.eup %7791  ;;  %2791 = vadd.xlane.f32.xlu0 %v10883_v30  ;;  %v11330_v24 = vmax.f32 %v4561_v50, 0.0  ;;  %v4321_v0 = vadd.f32 %v11087_v6, %v12828_v58  ;;  %7807 = vpow2.f32 %v3794_v28  ;;  %v3726_v11 = vmul.f32 0.57735026, %v3656_v41 }
 0x536   : > { %v4827_v43 = vadd.f32 1.0, %v7792_v9  ;;  %v11334_v57 = vpop.eup %7793  ;;  %v4782_v46 = vmul.f32 5.0, %v4766_v7  ;;  %v3663_v27 = vsel %vm3661_vm10, %v3662_v48, %v3660_v63  ;;  %v3766_v23 = vsub.f32 0.7, %v3750_v52 }
 0x537   : > { %v7796_v39 = vpop.eup %7795  ;;  %v12829_v30 = vsub.f32 %v10881_v51, %v10864_v18  ;;  %vm4696_vm12 = vcmp.eq.f32.partialorder %v11257_v25, 0.0  ;;  %2871 = vadd.xlane.f32.xlu1 %v10898_v4  ;;  %vm4687_vm13 = vcmp.eq.f32.partialorder %v11272_v44, inf  ;;  %v4562_v18 = vsub.f32 %v4321_v0, %v11292_v53 }
 0x538   : > { %7809 = vrcp.f32 %v4827_v43  ;;  %v11345_v17 = vpop.eup %7797  ;;  %v4698_v38 = vsel %vm4696_vm12, %v4697_v16, %v4695_v3  ;;  %v4801_v49 = vmul.f32 1.442695, %v4782_v46  ;;  %v4688_v22 = vsel %vm4687_vm13, %v11272_v44, %v4686_v29 }
 0x539   : > { %v11341_v26 = vmax.f32 %v12829_v30, 0.0  ;;  %3920 = vadd.xlane.f32.xlu0 %v7796_v39  ;;  %7811 = vrsqrt.f32 %v11317_v2  ;;  %v7800_v52 = vpop.eup %7799  ;;  %v3727_v51 = vmul.f32 0.57735026, %v3663_v27  ;;  %v4690_v4 = vand.u32 2147483648, %v11272_v44 }
 0x53a   : > { %7813 = vrsqrt.f32 %v11330_v24  ;;  %v4828_v25 = vadd.f32 1.0, %v7800_v52  ;;  %v3742_v21 = vsub.f32 1.0, %v3726_v11  ;;  %v7802_v8 = vpop.eup %7801  ;;  %v4547_v1 = vmul.f32 2.0, %v12830_v37 }
 0x53b   : > { %7815 = vpow2.f32 %v4755_v33  ;;  %vm4689_vm14 = vcmp.eq.f32.partialorder %v11272_v44, 0.0  ;;  %v4322_v40 = vadd.f32 %v11087_v6, %v12831_v56  ;;  %v7804_v32 = vpop.eup %7803  ;;  %v4714_v47 = vsub.f32 0.0, %v4698_v38  ;;  %v12832_v44 = vld [vmem:[#allocation83_spill] sm:$0xff] }
 0x53c   : > { %7817 = vpow2.f32 %v4801_v49  ;;  %v4691_v53 = vsel %vm4689_vm14, %v4690_v4, %v4688_v22  ;;  %v4829_v50 = vadd.f32 1.0, %v7802_v8  ;;  %v4767_v36 = vsub.f32 0.5, %v7804_v32 }
 0x53d   : > { %7819 = vpow2.f32 %v11295_v42  ;;  %v11358_v28 = vmax.f32 %v4562_v18, 0.0  ;;  %v3743_v48 = vsub.f32 1.0, %v3727_v51  ;;  %v11360_v10 = vmul.f32 5.0, %v3766_v23 }
 0x53e   : > { %7821 = vrcp.f32 %v4828_v25  ;;  %v11364_v55 = vmul.f32 2.0, %v12832_v44  ;;  %v3758_v16 = vsub.f32 0.7, %v3742_v21  ;;  %v7806_v41 = vpop.eup %7805  ;;  %v4713_v63 = vsub.f32 0.0, %v4691_v53 }
 0x53f   : > { %7823 = vrsqrt.f32 %v11341_v26  ;;  %v4783_v42 = vmul.f32 5.0, %v4767_v36  ;;  %v4563_v9 = vsub.f32 %v4322_v40, %v4547_v1  ;;  %v7808_v33 = vpop.eup %7807  ;;  %v4730_v3 = vmul.f32 50.0, %v4714_v47  ;;  %v11393_v36 = vpop.xlane.xlu1 %5402 }
 0x540   : > { %7825 = vrcp.f32 %v4829_v50  ;;  %v4623_v29 = vmul.f32 %v7806_v41, %v11310_v12  ;;  %vm4624_vm15 = vcmp.eq.f32.partialorder %v11310_v12, inf  ;;  %v4627_v7 = vand.u32 2147483648, %v11310_v12 }
 0x541   : > { %v4803_v58 = vmul.f32 1.442695, %v4783_v42  ;;  %v3821_v0 = vadd.f32 1.0, %v7808_v33  ;;  %7827 = vrsqrt.f32 %v11358_v28  ;;  %v3759_v46 = vsub.f32 0.7, %v3743_v48 }
 0x542   : > { %v7810_v43 = vpop.eup %7809  ;;  %v4625_v39 = vsel %vm4624_vm15, %v11310_v12, %v4623_v29  ;;  %vm4626_vm1 = vcmp.eq.f32.partialorder %v11310_v12, 0.0  ;;  %v3774_v23 = vmul.f32 5.0, %v3758_v16  ;;  %v11376_v38 = vadd.f32 1.0, %v11334_v57 }
 0x543   : > { %v7812_v11 = vpop.eup %7811  ;;  %v11371_v27 = vmul.f32 %v7810_v43, %v10408_v62  ;;  %7829 = vpow2.f32 %v4803_v58  ;;  %v4628_v49 = vsel %vm4626_vm1, %v4627_v7, %v4625_v39  ;;  %v11378_v52 = vmax.f32 %v4563_v9, 0.0 }
 0x544   : > { %v7814_v30 = vpop.eup %7813  ;;  %v4704_v4 = vsub.f32 0.0, %v4628_v49  ;;  %7831 = vrcp.f32 %v3821_v0  ;;  %v11383_v21 = vmul.f32 50.0, %v4713_v63  ;;  %v3775_v8 = vmul.f32 5.0, %v3759_v46 }
 0x545   : > { %v7816_v22 = vpop.eup %7815  ;;  %v4891_v18 = vmul.f32 1.442695, %v11371_v27  ;;  %v4875_v51 = vsub.f32 %v10408_v62, %v11371_v27  ;;  %v4630_v12 = vmul.f32 %v7814_v30, %v11330_v24  ;;  %v3665_v57 = vmul.f32 %v7812_v11, %v11317_v2 }
 0x546   : > { %v7818_v25 = vpop.eup %7817  ;;  %v11389_v1 = vmul.f32 1.442695, %v4730_v3  ;;  %v3796_v40 = vmul.f32 1.442695, %v3774_v23  ;;  %v4775_v47 = vsub.f32 0.5, %v7816_v22  ;;  %v4720_v53 = vmul.f32 50.0, %v4704_v4  ;;  %v11407_v22 = vpop.xlane.xlu1 %5404 }
 0x547   : > { %v11387_v37 = vpop.eup %7819  ;;  %7833 = vpow2.f32 %v4891_v18  ;;  %v4830_v56 = vadd.f32 1.0, %v7818_v25  ;;  %vm4631_vm0 = vcmp.eq.f32.partialorder %v11330_v24, inf  ;;  %vm4633_vm2 = vcmp.eq.f32.partialorder %v11330_v24, 0.0 }
 0x548   : > { %v7822_v32 = vpop.eup %7821  ;;  %7835 = vrsqrt.f32 %v11378_v52  ;;  %v4632_v44 = vsel %vm4631_vm0, %v11330_v24, %v4630_v12  ;;  %vm3666_vm3 = vcmp.eq.f32.partialorder %v11317_v2, inf  ;;  %v4634_v41 = vand.u32 2147483648, %v11330_v24 }
 0x549   : > { %v7824_v50 = vpop.eup %7823  ;;  %v4860_v48 = vmul.f32 %v7822_v32, %v12813_v45  ;;  %7837 = vrcp.f32 %v4830_v56  ;;  %v3798_v63 = vmul.f32 1.442695, %v3775_v8  ;;  %v3667_v42 = vsel %vm3666_vm3, %v11317_v2, %v3665_v57 }
 0x54a   : > { %v7826_v16 = vpop.eup %7825  ;;  %7839 = vpow2.f32 %v3796_v40  ;;  %vm3668_vm5 = vcmp.eq.f32.partialorder %v11317_v2, 0.0  ;;  %v4741_v7 = vmul.f32 1.442695, %v4720_v53  ;;  %v4635_v43 = vsel %vm4633_vm2, %v4634_v41, %v4632_v44 }
 0x54b   : > { %v4893_v9 = vmul.f32 1.442695, %v4860_v48  ;;  %v4861_v33 = vmul.f32 %v7826_v16, %v10508_v60  ;;  %v7828_v3 = vpop.eup %7827  ;;  %v4876_v29 = vsub.f32 %v12813_v45, %v4860_v48  ;;  %v3669_v58 = vand.u32 2147483648, %v11317_v2  ;;  %v11420_v48 = vpop.xlane.xlu1 %5406 }
 0x54c   : > { %v4637_v46 = vmul.f32 %v7828_v3, %v11358_v28  ;;  %v4791_v39 = vmul.f32 5.0, %v4775_v47  ;;  %v4705_v18 = vsub.f32 0.0, %v4635_v43  ;;  %vm4638_vm8 = vcmp.eq.f32.partialorder %v11358_v28, inf }
 0x54d   : > { %7841 = vpow2.f32 %v4893_v9  ;;  %v4895_v0 = vmul.f32 1.442695, %v4861_v33  ;;  %v4877_v24 = vsub.f32 %v10508_v60, %v4861_v33  ;;  %v7830_v11 = vpop.eup %7829  ;;  %v4956_v23 = vmul.f32 -1.0, %v4876_v29 }
 0x54e   : > { %7843 = vpow2.f32 %v3798_v63  ;;  %v3670_v30 = vsel %vm3668_vm5, %v3669_v58, %v3667_v42  ;;  %v7832_v49 = vpop.eup %7831  ;;  %v4641_v60 = vand.u32 2147483648, %v11358_v28  ;;  %v4639_v8 = vsel %vm4638_vm8, %v11358_v28, %v4637_v46 }
 0x54f   : > { %7845 = vpow2.f32 %v4895_v0  ;;  %v4957_v45 = vmul.f32 -1.0, %v4877_v24  ;;  %v4973_v2 = vmul.f32 1.442695, %v4956_v23  ;;  %v11411_v4 = vmul.f32 %v7832_v49, %v10531_v35 }
 0x550   : > { %7847 = vpow2.f32 %v4741_v7  ;;  %vm4640_vm9 = vcmp.eq.f32.partialorder %v11358_v28, 0.0  ;;  %v3728_v57 = vmul.f32 0.57735026, %v3670_v30  ;;  %v4831_v40 = vadd.f32 1.0, %v7830_v11  ;;  %v11432_v11 = vpop.xlane.xlu1 %5498 }
 0x551   : > { %v7834_v25 = vpop.eup %7833  ;;  %v4975_v12 = vmul.f32 1.442695, %v4957_v45  ;;  %7849 = vpow2.f32 %v4973_v2  ;;  %v3869_v32 = vsub.f32 %v10531_v35, %v11411_v4  ;;  %v4642_v47 = vsel %vm4640_vm9, %v4641_v60, %v4639_v8  ;;  %v12833_v45 = vld [vmem:[#allocation16_spill] sm:$0xff] }
 0x552   : > { %v7836_v56 = vpop.eup %7835  ;;  %4923 = vadd.xlane.f32.xlu0 %v7834_v25  ;;  %7851 = vrcp.f32 %v11376_v38  ;;  %v3714_v53 = vmul.f32 %v7824_v50, %v11341_v26  ;;  %v4721_v44 = vmul.f32 50.0, %v4705_v18  ;;  %v4706_v16 = vsub.f32 0.0, %v4642_v47 }
 0x553   : > { %v7838_v41 = vpop.eup %7837  ;;  %v4819_v63 = vmul.f32 1.442695, %v4791_v39  ;;  %7853 = vpow2.f32 %v11389_v1  ;;  %v4759_v28 = vmul.f32 1.442695, %v11383_v21  ;;  %v4644_v42 = vmul.f32 %v7836_v56, %v11378_v52 }
 0x554   : > { %v7840_v9 = vpop.eup %7839  ;;  %v4862_v33 = vmul.f32 %v7838_v41, %v10501_v54  ;;  %7855 = vpow2.f32 %v4975_v12  ;;  %vm4645_vm4 = vcmp.eq.f32.partialorder %v11378_v52, inf  ;;  %v3744_v38 = vsub.f32 1.0, %v3728_v57 }
 0x555   : > { %7857 = vrcp.f32 %v4831_v40  ;;  %v4646_v50 = vsel %vm4645_vm4, %v11378_v52, %v4644_v42  ;;  %vm4647_vm6 = vcmp.eq.f32.partialorder %v11378_v52, 0.0  ;;  %v4648_v3 = vand.u32 2147483648, %v11378_v52 }
 0x556   : > { %v4897_v1 = vmul.f32 1.442695, %v4862_v33  ;;  %v4878_v21 = vsub.f32 %v10501_v54, %v4862_v33  ;;  %v4743_v7 = vmul.f32 1.442695, %v4721_v44  ;;  %v4722_v43 = vmul.f32 50.0, %v4706_v16 }
 0x557   : > { %v7842_v29 = vpop.eup %7841  ;;  %vm3715_vm7 = vcmp.eq.f32.partialorder %v11341_v26, inf  ;;  %7859 = vpow2.f32 %v4759_v28  ;;  %v3822_v0 = vadd.f32 1.0, %v7840_v9  ;;  %v4649_v24 = vsel %vm4647_vm6, %v4648_v3, %v4646_v50 }
 0x558   : > { %v7844_v58 = vpop.eup %7843  ;;  %4925 = vadd.xlane.f32.xlu1 %v7842_v29  ;;  %7861 = vpow2.f32 %v4819_v63  ;;  %v4958_v39 = vmul.f32 -1.0, %v4878_v21  ;;  %v4707_v23 = vsub.f32 0.0, %v4649_v24  ;;  %v3760_v52 = vsub.f32 0.7, %v3744_v38  ;;  %v11442_v63 = vpop.xlane.xlu1 %5500  ;;  %v12834_v21 = vld [vmem:[#allocation87_spill] sm:$0xff] }
 0x559   : > { %v7846_v46 = vpop.eup %7845  ;;  %v3716_v49 = vsel %vm3715_vm7, %v11341_v26, %v3714_v53  ;;  %v3718_v54 = vand.u32 2147483648, %v11341_v26  ;;  %7863 = vpow2.f32 %v4897_v1  ;;  %v4323_v18 = vadd.f32 %v11087_v6, %v12833_v45 }
 0x55a   : > { %v7848_v30 = vpop.eup %7847  ;;  %4927 = vadd.xlane.f32.xlu0 %v7846_v46  ;;  %v4977_v2 = vmul.f32 1.442695, %v4958_v39  ;;  %7865 = vpow2.f32 %v4743_v7  ;;  %v4745_v25 = vmul.f32 1.442695, %v4722_v43  ;;  %vm3717_vm10 = vcmp.eq.f32.partialorder %v11341_v26, 0.0  ;;  %v12835_v7 = vld [vmem:[#allocation32_spill] sm:$0xff] }
 0x55b   : > { %v4768_v60 = vsub.f32 0.5, %v7848_v30  ;;  %v7850_v12 = vpop.eup %7849  ;;  %7867 = vrcp.f32 %v3822_v0  ;;  %v3823_v8 = vadd.f32 1.0, %v7844_v58  ;;  %v4723_v57 = vmul.f32 50.0, %v4707_v23 }
 0x55c   : > { %v7852_v56 = vpop.eup %7851  ;;  %v3812_v40 = vmul.f32 1.442695, %v11360_v10  ;;  %v3719_v47 = vsel %vm3717_vm10, %v3718_v54, %v3716_v49  ;;  %5005 = vadd.xlane.f32.xlu1 %v7850_v12  ;;  %v3776_v44 = vmul.f32 5.0, %v3760_v52  ;;  %7869 = vpow2.f32 %v4977_v2  ;;  %v11468_v30 = vpop.xlane.xlu1 %5408 }
 0x55d   : > { %v4784_v53 = vmul.f32 5.0, %v4768_v60  ;;  %v11440_v16 = vpop.eup %7853  ;;  %7871 = vpow2.f32 %v4745_v25  ;;  %v4747_v42 = vmul.f32 1.442695, %v4723_v57  ;;  %v4564_v26 = vsub.f32 %v4323_v18, %v11364_v55 }
 0x55e   : > { %v7856_v41 = vpop.eup %7855  ;;  %v3829_v33 = vadd.f32 1.0, %v11345_v17  ;;  %v3735_v38 = vmul.f32 0.57735026, %v3719_v47  ;;  %7873 = vrcp.f32 %v3823_v8  ;;  %v11447_v10 = vmul.f32 %v7852_v56, %v10609_v61 }
 0x55f   : > { %v4805_v28 = vmul.f32 1.442695, %v4784_v53  ;;  %v7858_v9 = vpop.eup %7857  ;;  %7875 = vpow2.f32 %v3812_v40  ;;  %v4955_v3 = vmul.f32 -1.0, %v4875_v51  ;;  %v3800_v29 = vmul.f32 1.442695, %v3776_v44  ;;  %v11461_v51 = vpop.xlane.xlu0 %5502 }
 0x560   : > { %5007 = vadd.xlane.f32.xlu1 %v7856_v41  ;;  %v4863_v50 = vmul.f32 %v7858_v9, %v10539_v13  ;;  %v4549_v55 = vmul.f32 2.0, %v12834_v21  ;;  %v4324_v17 = vadd.f32 %v11087_v6, %v12835_v7  ;;  %v11459_v46 = vmax.f32 %v4564_v26, 0.0 }
 0x561   : > { %v7860_v1 = vpop.eup %7859  ;;  %7877 = vpow2.f32 %v4805_v28  ;;  %v3751_v27 = vsub.f32 1.0, %v3735_v38  ;;  %v12836_v39 = vsub.f32 %v11044_v19, %v10978_v5  ;;  %v4971_v49 = vmul.f32 1.442695, %v4955_v3 }
 0x562   : > { %v7862_v58 = vpop.eup %7861  ;;  %v4899_v0 = vmul.f32 1.442695, %v4863_v50  ;;  %v4879_v24 = vsub.f32 %v10539_v13, %v4863_v50  ;;  %7879 = vpow2.f32 %v4747_v42  ;;  %v3948_v45 = vmul.f32 -1.0, %v3868_v14  ;;  %v12837_v42 = vld [vmem:[#allocation48_spill] sm:$0xff] }
 0x563   : > { %v7864_v62 = vpop.eup %7863  ;;  %7881 = vrcp.f32 %v3829_v33  ;;  %v11466_v23 = vmax.f32 %v12836_v39, 0.0  ;;  %v4565_v60 = vsub.f32 %v4324_v17, %v4549_v55  ;;  %v4839_v25 = vadd.f32 1.0, %v7862_v58  ;;  %v11478_v56 = vpop.xlane.xlu0 %5504 }
 0x564   : > { %v7866_v52 = vpop.eup %7865  ;;  %4929 = vadd.xlane.f32.xlu0 %v7864_v62  ;;  %v4959_v54 = vmul.f32 -1.0, %v4879_v24  ;;  %7883 = vpow2.f32 %v3800_v29  ;;  %v3767_v8 = vsub.f32 0.7, %v3751_v27  ;;  %v4778_v57 = vsub.f32 0.5, %v11440_v16  ;;  %v11491_v33 = vpop.xlane.xlu1 %5410 }
 0x565   : > { %v7868_v18 = vpop.eup %7867  ;;  %7885 = vpow2.f32 %v4899_v0  ;;  %v4769_v2 = vsub.f32 0.5, %v7866_v52  ;;  %v4777_v14 = vsub.f32 0.5, %v7860_v1  ;;  %v3968_v40 = vmul.f32 1.442695, %v3948_v45  ;;  %v12838_v1 = vld [vmem:[#allocation22_spill] sm:$0xff] }
 0x566   : > { %v4979_v12 = vmul.f32 1.442695, %v4959_v54  ;;  %v11474_v5 = vmul.f32 %v7868_v18, %v10562_v31  ;;  %7887 = vrsqrt.f32 %v11459_v46  ;;  %v7870_v19 = vpop.eup %7869  ;;  %v11483_v28 = vmax.f32 %v4565_v60, 0.0  ;;  %v12839_v52 = vld [vmem:[#allocation86_spill] sm:$0xff] }
 0x567   : > { %v4785_v13 = vmul.f32 5.0, %v4769_v2  ;;  %7889 = vrsqrt.f32 %v11466_v23  ;;  %v7872_v15 = vpop.eup %7871  ;;  %5009 = vadd.xlane.f32.xlu1 %v7870_v19  ;;  %v11488_v26 = vmul.f32 2.0, %v12837_v42  ;;  %v3828_v9 = vadd.f32 1.0, %v11387_v37  ;;  %v11502_v0 = vpop.xlane.xlu0 %5506 }
 0x568   : > { %7891 = vpow2.f32 %v4971_v49  ;;  %v3870_v47 = vsub.f32 %v10562_v31, %v11474_v5  ;;  %v7874_v53 = vpop.eup %7873  ;;  %v4770_v41 = vsub.f32 0.5, %v7872_v15  ;;  %v3783_v3 = vmul.f32 5.0, %v3767_v8 }
 0x569   : > { %7893 = vpow2.f32 %v4979_v12  ;;  %v4807_v44 = vmul.f32 1.442695, %v4785_v13  ;;  %v11485_v16 = vpop.eup %7875  ;;  %v11494_v38 = vmul.f32 %v7874_v53, %v10555_v59  ;;  %v11498_v21 = vadd.f32 %v10681_v34, %v12838_v1 }
 0x56a   : > { %7895 = vrcp.f32 %v4839_v25  ;;  %v4786_v29 = vmul.f32 5.0, %v4770_v41  ;;  %v4794_v7 = vmul.f32 5.0, %v4778_v57  ;;  %v4793_v17 = vmul.f32 5.0, %v4777_v14  ;;  %v11510_v25 = vpop.xlane.xlu1 %5412 }
 0x56b   : > { %v7878_v50 = vpop.eup %7877  ;;  %7897 = vpow2.f32 %v4807_v44  ;;  %v3871_v62 = vsub.f32 %v10555_v59, %v11494_v38  ;;  %v11508_v49 = vmul.f32 2.0, %v12839_v52  ;;  %v3814_v18 = vmul.f32 1.442695, %v3783_v3  ;;  %v11519_v44 = vpop.xlane.xlu0 %5508 }
 0x56c   : > { %v7880_v55 = vpop.eup %7879  ;;  %7899 = vpow2.f32 %v3968_v40  ;;  %v4832_v58 = vadd.f32 1.0, %v7878_v50  ;;  %v4809_v24 = vmul.f32 1.442695, %v4786_v29  ;;  %v4825_v2 = vmul.f32 1.442695, %v4794_v7 }
 0x56d   : > { %v11500_v37 = vpop.eup %7881  ;;  %v4771_v27 = vsub.f32 0.5, %v7880_v55  ;;  %7901 = vrsqrt.f32 %v11483_v28  ;;  %v4823_v60 = vmul.f32 1.442695, %v4793_v17  ;;  %v3587_v12 = vsub.f32 %v11498_v21, %v11488_v26 }
 0x56e   : > { %v7884_v39 = vpop.eup %7883  ;;  %7903 = vrcp.f32 %v4832_v58  ;;  %vm3673_vm11 = vcmp.eq.f32.partialorder %v11466_v23, inf  ;;  %vm4652_vm12 = vcmp.eq.f32.partialorder %v11459_v46, inf  ;;  %v4655_v14 = vand.u32 2147483648, %v11459_v46  ;;  %v11530_v58 = vpop.xlane.xlu1 %5414 }
 0x56f   : > { %v7886_v34 = vpop.eup %7885  ;;  %7905 = vrcp.f32 %v3828_v9  ;;  %v4787_v54 = vmul.f32 5.0, %v4771_v27  ;;  %v3824_v15 = vadd.f32 1.0, %v7884_v39  ;;  %vm4654_vm13 = vcmp.eq.f32.partialorder %v11459_v46, 0.0  ;;  %v12840_v9 = vld [vmem:[#allocation18_spill] sm:$0xff] }
 0x570   : > { %v7888_v45 = vpop.eup %7887  ;;  %4931 = vadd.xlane.f32.xlu0 %v7886_v34  ;;  %7907 = vpow2.f32 %v4809_v24  ;;  %v3676_v42 = vand.u32 2147483648, %v11466_v23  ;;  %v4325_v50 = vadd.f32 %v11087_v6, %v12840_v9  ;;  %vm3675_vm14 = vcmp.eq.f32.partialorder %v11466_v23, 0.0 }
 0x571   : > { %v7890_v19 = vpop.eup %7889  ;;  %v4811_v8 = vmul.f32 1.442695, %v4787_v54  ;;  %v4651_v57 = vmul.f32 %v7888_v45, %v11459_v46  ;;  %7909 = vpow2.f32 %v4823_v60  ;;  %v12841_v45 = vld [vmem:[#allocation21_spill] sm:$0xff]  ;;  %vm4659_vm15 = vcmp.eq.f32.partialorder %v11483_v28, inf }
 0x572   : > { %v7892_v13 = vpop.eup %7891  ;;  %v3672_v40 = vmul.f32 %v7890_v19, %v11466_v23  ;;  %v4566_v52 = vsub.f32 %v4325_v50, %v11508_v49  ;;  %vm4661_vm1 = vcmp.eq.f32.partialorder %v11483_v28, 0.0  ;;  %v11548_v9 = vpop.xlane.xlu1 %5416  ;;  %v12843_v50 = vld [vmem:[#allocation13_spill] sm:$0xff]  ;;  %vm5626_vm9 = vcmp.eq.f32.partialorder %v11432_v11, 0.0 }
 0x573   : > { %v7894_v53 = vpop.eup %7893  ;;  %v4653_v41 = vsel %vm4652_vm12, %v11459_v46, %v4651_v57  ;;  %7911 = vpow2.f32 %v4811_v8  ;;  %v11536_v8 = vpop.xlane.xlu0 %5510  ;;  %vm5627_vm4 = vcmp.eq.f32.partialorder %v11442_v63, 0.0  ;;  %vm5628_vm7 = vcmp.eq.f32.partialorder %v11461_v51, 0.0 }
 0x574   : > { %v7896_v3 = vpop.eup %7895  ;;  %5003 = vadd.xlane.f32.xlu0 %v7892_v13  ;;  %5011 = vadd.xlane.f32.xlu1 %v7894_v53  ;;  %v4656_v29 = vsel %vm4654_vm13, %v4655_v14, %v4653_v41  ;;  %v3674_v1 = vsel %vm3673_vm11, %v11466_v23, %v3672_v40  ;;  %7913 = vrcp.f32 %v3824_v15  ;;  %v12842_v13 = vld [vmem:[#allocation70_spill] sm:$0xff]  ;;  %v4662_v14 = vand.u32 2147483648, %v11483_v28 }
 0x575   : > { %v7898_v55 = vpop.eup %7897  ;;  %v4708_v7 = vsub.f32 0.0, %v4656_v29  ;;  %v3677_v46 = vsel %vm3675_vm14, %v3676_v42, %v3674_v1  ;;  %7915 = vpow2.f32 %v3814_v18  ;;  %v11540_v15 = vmul.f32 %v7896_v3, %v12842_v13 }
 0x576   : > { %v7900_v17 = vpop.eup %7899  ;;  %v4833_v24 = vadd.f32 1.0, %v7898_v55  ;;  %v3729_v27 = vmul.f32 0.57735026, %v3677_v46  ;;  %7917 = vpow2.f32 %v4825_v2  ;;  %v11546_v42 = vmax.f32 %v4566_v52, 0.0 }
 0x577   : > { %v7902_v39 = vpop.eup %7901  ;;  %v4724_v34 = vmul.f32 50.0, %v4708_v7  ;;  %v3890_v3 = vmul.f32 1.442695, %v11411_v4  ;;  %vm5629_vm10 = vcmp.eq.f32.partialorder %v11478_v56, 0.0  ;;  %vm5630_vm11 = vcmp.eq.f32.partialorder %v11502_v0, 0.0 }
 0x578   : > { %v7904_v54 = vpop.eup %7903  ;;  %2793 = vadd.xlane.f32.xlu0 %v12841_v45  ;;  %4000 = vadd.xlane.f32.xlu1 %v7900_v17  ;;  %v3745_v23 = vsub.f32 1.0, %v3729_v27  ;;  %v4658_v60 = vmul.f32 %v7902_v39, %v11483_v28  ;;  %7919 = vrcp.f32 %v4833_v24  ;;  %v3830_v24 = vadd.f32 1.0, %v11485_v16  ;;  %v11556_v39 = vpop.xlane.xlu0 %5512 }
 0x579   : > { %v7906_v19 = vpop.eup %7905  ;;  %v4864_v57 = vmul.f32 %v7904_v54, %v10531_v35  ;;  %v4749_v18 = vmul.f32 1.442695, %v4724_v34  ;;  %vm4666_vm0 = vcmp.eq.f32.partialorder %v11546_v42, inf  ;;  %vm4668_vm2 = vcmp.eq.f32.partialorder %v11546_v42, 0.0 }
 0x57a   : > { %v3761_v49 = vsub.f32 0.7, %v3745_v23  ;;  %v4660_v2 = vsel %vm4659_vm15, %v11483_v28, %v4658_v60  ;;  %v7908_v40 = vpop.eup %7907  ;;  %v3949_v28 = vmul.f32 -1.0, %v3869_v32  ;;  %v11562_v4 = vmul.f32 %v7906_v19, %v12842_v13  ;;  %v12844_v60 = vld [vmem:[#allocation56_spill] sm:$0xff] }
 0x57b   : > { %v4901_v53 = vmul.f32 1.442695, %v4864_v57  ;;  %v4880_v41 = vsub.f32 %v10531_v35, %v4864_v57  ;;  %7921 = vpow2.f32 %v4749_v18  ;;  %v4834_v29 = vadd.f32 1.0, %v7908_v40  ;;  %v7910_v17 = vpop.eup %7909 }
 0x57c   : > { %2873 = vadd.xlane.f32.xlu1 %v12843_v50  ;;  %v3777_v1 = vmul.f32 5.0, %v3761_v49  ;;  %v4663_v55 = vsel %vm4661_vm1, %v4662_v14, %v4660_v2  ;;  %v3970_v16 = vmul.f32 1.442695, %v3949_v28  ;;  %v4841_v49 = vadd.f32 1.0, %v7910_v17  ;;  %v11567_v2 = vpop.xlane.xlu1 %5418 }
 0x57d   : > { %7923 = vpow2.f32 %v4901_v53  ;;  %v4960_v7 = vmul.f32 -1.0, %v4880_v41  ;;  %v4709_v46 = vsub.f32 0.0, %v4663_v55  ;;  %v7912_v27 = vpop.eup %7911  ;;  %vm5631_vm12 = vcmp.eq.f32.partialorder %v11519_v44, 0.0 }
 0x57e   : > { %7925 = vrcp.f32 %v4834_v29  ;;  %v3802_v52 = vmul.f32 1.442695, %v3777_v1  ;;  %v7914_v45 = vpop.eup %7913  ;;  %v4835_v23 = vadd.f32 1.0, %v7912_v27  ;;  %v11574_v29 = vpop.xlane.xlu0 %5514  ;;  %v3892_v27 = vmul.f32 1.442695, %v11474_v5 }
 0x57f   : > { %v4981_v34 = vmul.f32 1.442695, %v4960_v7  ;;  %v4725_v54 = vmul.f32 50.0, %v4709_v46  ;;  %7927 = vrsqrt.f32 %v11546_v42  ;;  %v7916_v32 = vpop.eup %7915  ;;  %v11565_v57 = vmul.f32 %v7914_v45, %v12844_v60 }
 0x580   : > { %7929 = vpow2.f32 %v3890_v3  ;;  %v7918_v18 = vpop.eup %7917  ;;  %v3831_v19 = vadd.f32 1.0, %v7916_v32  ;;  %vm5632_vm13 = vcmp.eq.f32.partialorder %v11536_v8, 0.0  ;;  %vm5633_vm14 = vcmp.eq.f32.partialorder %v11556_v39, 0.0 }
 0x581   : > { %7931 = vpow2.f32 %v4981_v34  ;;  %v3872_v40 = vsub.f32 %v12844_v60, %v11565_v57  ;;  %v4751_v53 = vmul.f32 1.442695, %v4725_v54  ;;  %v4842_v1 = vadd.f32 1.0, %v7918_v18 }
 0x582   : > { %7933 = vrcp.f32 %v4835_v23  ;;  %v7920_v14 = vpop.eup %7919  ;;  %v3950_v54 = vmul.f32 -1.0, %v3870_v47  ;;  %v12846_v47 = vld [vmem:[#allocation68_spill] sm:$0xff]  ;;  %v3896_v50 = vmul.f32 1.442695, %v11565_v57  ;;  %vm5634_vm15 = vcmp.eq.f32.partialorder %v11574_v29, 0.0 }
 0x583   : > { %7935 = vpow2.f32 %v3802_v52  ;;  %v4865_v41 = vmul.f32 %v7920_v14, %v10562_v31 }
 0x584   : > { %7937 = vrcp.f32 %v3830_v24  ;;  %v11577_v24 = vpop.xlane.xlu1 %5420 }
 0x585   : > { %v7922_v3 = vpop.eup %7921  ;;  %7939 = vpow2.f32 %v3970_v16  ;;  %v4903_v55 = vmul.f32 1.442695, %v4865_v41  ;;  %v4881_v7 = vsub.f32 %v10562_v31, %v4865_v41  ;;  %v12845_v16 = vsub.f32 %v12844_v60, %v12790_v20 }
 0x586   : > { %7941 = vrcp.f32 %v4841_v49  ;;  %v4772_v46 = vsub.f32 0.5, %v7922_v3  ;;  %v4669_v31 = vand.u32 2147483648, %v11546_v42 }
 0x587   : > { %v7924_v28 = vpop.eup %7923  ;;  %7943 = vpow2.f32 %v4751_v53  ;;  %v4961_v34 = vmul.f32 -1.0, %v4881_v7  ;;  %v2825_v18 = vmul.f32 -1.0, %v12845_v16  ;;  %v3972_v7 = vmul.f32 1.442695, %v3950_v54 }
 0x588   : > { %v7926_v17 = vpop.eup %7925  ;;  %7945 = vrcp.f32 %v3831_v19  ;;  %4933 = vadd.xlane.f32.xlu0 %v7924_v28  ;;  %v4788_v23 = vmul.f32 5.0, %v4772_v46  ;;  %v11588_v19 = vpop.xlane.xlu0 %5516  ;;  %v11610_v54 = vmax.f32 %v3587_v12, 0.0  ;;  %v12851_v12 = vld [vmem:[#allocation62_spill] sm:$0xff] }
 0x589   : > { %v7928_v52 = vpop.eup %7927  ;;  %7947 = vpow2.f32 %v4903_v55  ;;  %v4866_v45 = vmul.f32 %v7926_v17, %v10555_v59  ;;  %v4983_v49 = vmul.f32 1.442695, %v4961_v34  ;;  %v2849_v34 = vmul.f32 1.442695, %v2825_v18 }
 0x58a   : > { %v7930_v32 = vpop.eup %7929  ;;  %7949 = vrcp.f32 %v4842_v1  ;;  %v4665_v14 = vmul.f32 %v7928_v52, %v11546_v42  ;;  %v4813_v3 = vmul.f32 1.442695, %v4788_v23  ;;  %v11597_v1 = vmul.f32 %v11500_v37, %v12846_v47  ;;  %v11602_v52 = vpop.xlane.xlu1 %5422 }
 0x58b   : > { %v7932_v53 = vpop.eup %7931  ;;  %v4882_v41 = vsub.f32 %v10555_v59, %v4866_v45  ;;  %7951 = vpow2.f32 %v3892_v27  ;;  %vm3687_vm3 = vcmp.eq.f32.partialorder %v11610_v54, inf  ;;  %vm3689_vm5 = vcmp.eq.f32.partialorder %v11610_v54, 0.0 }
 0x58c   : > { %v7934_v5 = vpop.eup %7933  ;;  %3922 = vadd.xlane.f32.xlu0 %v7930_v32  ;;  %5013 = vadd.xlane.f32.xlu1 %v7932_v53  ;;  %v4667_v20 = vsel %vm4666_vm0, %v11546_v42, %v4665_v14  ;;  %12847 = vst [vmem:[#allocation30_spill] sm:$0xff] %v11597_v1  ;;  %7953 = vpow2.f32 %v4983_v49  ;;  %v12848_v42 = vld [vmem:[#allocation91_spill] sm:$0xff]  ;;  %v12849_v49 = vld [vmem:[#allocation42_spill] sm:$0xff]  ;;  %v12850_v53 = vld [vmem:[#allocation36_spill] sm:$0xff]  ;;  %vm5635_vm1 = vcmp.eq.f32.partialorder %v11588_v19, 0.0 }
 0x58d   : > { %v7936_v55 = vpop.eup %7935  ;;  %v11600_v28 = vmul.f32 %v7934_v5, %v12844_v60  ;;  %v4670_v46 = vsel %vm4668_vm2, %v4669_v31, %v4667_v20  ;;  %7955 = vpow2.f32 %v4813_v3  ;;  %v4552_v16 = vmul.f32 2.0, %v12848_v42  ;;  %v11615_v5 = vpop.xlane.xlu0 %5518 }
 0x58e   : > { %v7938_v17 = vpop.eup %7937  ;;  %v3825_v27 = vadd.f32 1.0, %v7936_v55  ;;  %v4710_v23 = vsub.f32 0.0, %v4670_v46  ;;  %v4327_v14 = vadd.f32 %v11087_v6, %v12849_v49  ;;  %v4905_v20 = vmul.f32 1.442695, %v4866_v45  ;;  %v12852_v45 = vld [vmem:[#allocation52_spill] sm:$0xff] }
 0x58f   : > { %v7940_v32 = vpop.eup %7939  ;;  %v4883_v37 = vsub.f32 %v12844_v60, %v11600_v28  ;;  %v4962_v55 = vmul.f32 -1.0, %v4882_v41  ;;  %v2775_v46 = vmul.f32 1.442695, %v12851_v12  ;;  %vm5636_vm0 = vcmp.eq.f32.partialorder %v11615_v5, 0.0 }
 0x590   : > { %v7942_v18 = vpop.eup %7941  ;;  %2795 = vadd.xlane.f32.xlu0 %v12850_v53  ;;  %4002 = vadd.xlane.f32.xlu1 %v7940_v32  ;;  %7957 = vrcp.f32 %v3825_v27  ;;  %v4726_v3 = vmul.f32 50.0, %v4710_v23  ;;  %v3894_v32 = vmul.f32 1.442695, %v11494_v38  ;;  %v4568_v27 = vsub.f32 %v4327_v14, %v4552_v16  ;;  %v11622_v53 = vpop.xlane.xlu1 %5424  ;;  %v12857_v38 = vld [vmem:[#allocation75_spill] sm:$0xff] }
 0x591   : > { %v7944_v31 = vpop.eup %7943  ;;  %7959 = vpow2.f32 %v3972_v7  ;;  %v12853_v7 = vld [vmem:[#allocation77_spill] sm:$0xff]  ;;  %v3951_v16 = vmul.f32 -1.0, %v3871_v62 }
 0x592   : > { %v7946_v21 = vpop.eup %7945  ;;  %7961 = vpow2.f32 %v2849_v34  ;;  %v4773_v6 = vsub.f32 0.5, %v7944_v31  ;;  %v4753_v42 = vmul.f32 1.442695, %v4726_v3  ;;  %v11626_v34 = vmul.f32 %v7942_v18, %v12853_v7 }
 0x593   : > { %v7948_v49 = vpop.eup %7947  ;;  %7963 = vrsqrt.f32 %v11610_v54  ;;  %v11629_v31 = vmul.f32 %v7938_v17, %v12853_v7  ;;  %v4985_v3 = vmul.f32 1.442695, %v4962_v55  ;;  %v11642_v59 = vmax.f32 %v4568_v27, 0.0 }
 0x594   : > { %v7950_v23 = vpop.eup %7949  ;;  %4935 = vadd.xlane.f32.xlu0 %v7948_v49  ;;  %2875 = vadd.xlane.f32.xlu1 %v12852_v45  ;;  %v4789_v41 = vmul.f32 5.0, %v4773_v6  ;;  %7965 = vpow2.f32 %v4753_v42  ;;  %12854 = vst [vmem:[#allocation67_spill] sm:$0xff] %v11626_v34  ;;  %v12856_v49 = vld [vmem:[#allocation26_spill] sm:$0xff]  ;;  %v11638_v42 = vpop.xlane.xlu0 %5520  ;;  %v3974_v55 = vmul.f32 1.442695, %v3951_v16  ;;  %v12863_v16 = vld [vmem:[#allocation39_spill] sm:$0xff] }
 0x595   : > { %12855 = vst [vmem:[#allocation28_spill] sm:$0xff] %v11629_v31  ;;  %7967 = vpow2.f32 %v4905_v20  ;;  %v7952_v14 = vpop.eup %7951  ;;  %v5434_v26 = vadd.f32 %v12856_v49, %v11393_v36  ;;  %v11645_v62 = vmul.f32 %v7950_v23, %v12857_v38  ;;  %v11648_v36 = vmul.f32 %v7946_v21, %v12857_v38  ;;  %v11652_v17 = vpop.xlane.xlu1 %5426  ;;  %v12862_v23 = vld [vmem:[#allocation54_spill] sm:$0xff] }
 0x596   : > { %7969 = vpow2.f32 %v2775_v46  ;;  %v4815_v45 = vmul.f32 1.442695, %v4789_v41  ;;  %v7954_v18 = vpop.eup %7953  ;;  %12861 = vst [vmem:[#allocation11_spill] sm:$0xff] %v11652_v17  ;;  %vm4680_vm8 = vcmp.eq.f32.partialorder %v11642_v59, inf  ;;  %vm4682_vm6 = vcmp.eq.f32.partialorder %v11642_v59, 0.0 }
 0x597   : > { %7971 = vpow2.f32 %v3894_v32  ;;  %v7956_v20 = vpop.eup %7955  ;;  %12858 = vst [vmem:[#allocation63_spill] sm:$0xff] %v11645_v62  ;;  %12859 = vst [vmem:[#allocation34_spill] sm:$0xff] %v11648_v36  ;;  %v12860_v32 = vld [vmem:[#allocation29_spill] sm:$0xff]  ;;  %vm5637_vm2 = vcmp.eq.f32.partialorder %v11638_v42, 0.0 }
 0x598   : > { %3924 = vadd.xlane.f32.xlu0 %v7952_v14  ;;  %5015 = vadd.xlane.f32.xlu1 %v7954_v18  ;;  %7973 = vpow2.f32 %v4815_v45  ;;  %v4836_v46 = vadd.f32 1.0, %v7956_v20  ;;  %v5435_v49 = vadd.f32 %v12860_v32, %v11407_v22  ;;  %v4963_v22 = vmul.f32 -1.0, %v4883_v37  ;;  %v11669_v20 = vpop.xlane.xlu0 %5522 }
 0x599   : > { %7975 = vpow2.f32 %v4985_v3  ;;  %v5530_v3 = vmax.f32 %v11432_v11, 1e-06  ;;  %v5531_v37 = vmax.f32 %v11442_v63, 1e-06  ;;  %v11684_v43 = vpop.xlane.xlu1 %5428 }
 0x59a   : > { %v7958_v41 = vpop.eup %7957  ;;  %7977 = vlog2.f32 %v5434_v26  ;;  %12866 = vst [vmem:[#allocation94_spill] sm:$0xff] %v11684_v43 }
 0x59b   : > { %v7960_v14 = vpop.eup %7959  ;;  %7979 = vrcp.f32 %v4836_v46  ;;  %v11657_v45 = vmul.f32 %v7958_v41, %v12862_v23  ;;  %v4907_v46 = vmul.f32 1.442695, %v11600_v28  ;;  %v3690_v28 = vand.u32 2147483648, %v11610_v54 }
 0x59c   : > { %v11659_v21 = vpop.eup %7961  ;;  %2797 = vadd.xlane.f32.xlu0 %v12863_v16  ;;  %4004 = vadd.xlane.f32.xlu1 %v7960_v14  ;;  %7981 = vrsqrt.f32 %v11642_v59  ;;  %v12864_v14 = vld [vmem:[#allocation61_spill] sm:$0xff]  ;;  %v11696_v34 = vpop.xlane.xlu0 %5524 }
 0x59d   : > { %v7964_v18 = vpop.eup %7963  ;;  %7983 = vpow2.f32 %v3974_v55  ;;  %v12865_v16 = vsub.f32 %v12864_v14, %v12851_v12  ;;  %v12867_v12 = vld [vmem:[#allocation88_spill] sm:$0xff] }
 0x59e   : > { %v7966_v32 = vpop.eup %7965  ;;  %7985 = vlog2.f32 %v5435_v49  ;;  %v3686_v6 = vmul.f32 %v7964_v18, %v11610_v54  ;;  %v4987_v49 = vmul.f32 1.442695, %v4963_v22 }
 0x59f   : > { %v2828_v27 = vmul.f32 -1.0, %v12865_v16  ;;  %v7968_v26 = vpop.eup %7967  ;;  %v4774_v35 = vsub.f32 0.5, %v7966_v32  ;;  %7987 = vrcp.f32 %v5530_v3  ;;  %v3952_v32 = vmul.f32 -1.0, %v3872_v40  ;;  %v12868_v3 = vld [vmem:[#allocation65_spill] sm:$0xff] }
 0x5a0   : > { %v11682_v55 = vpop.eup %7969  ;;  %4937 = vadd.xlane.f32.xlu0 %v7968_v26  ;;  %2877 = vadd.xlane.f32.xlu1 %v12867_v12  ;;  %v3688_v16 = vsel %vm3687_vm3, %v11610_v54, %v3686_v6  ;;  %7989 = vpow2.f32 %v4907_v46  ;;  %v12869_v31 = vsub.f32 %v10609_v61, %v12868_v3  ;;  %v2773_v6 = vmul.f32 1.442695, %v12868_v3  ;;  %v12873_v3 = vld [vmem:[#allocation46_spill] sm:$0xff] }
 0x5a1   : > { %v7972_v18 = vpop.eup %7971  ;;  %v4790_v41 = vmul.f32 5.0, %v4774_v35  ;;  %v3691_v36 = vsel %vm3689_vm5, %v3690_v28, %v3688_v16  ;;  %7991 = vrcp.f32 %v5531_v37  ;;  %v2855_v60 = vmul.f32 1.442695, %v2828_v27 }
 0x5a2   : > { %v7974_v62 = vpop.eup %7973  ;;  %v2827_v26 = vmul.f32 -1.0, %v12869_v31  ;;  %v3731_v12 = vmul.f32 0.57735026, %v3691_v36  ;;  %7993 = vpow2.f32 %v3896_v50  ;;  %v3976_v40 = vmul.f32 1.442695, %v3952_v32  ;;  %v11698_v36 = vpop.xlane.xlu1 %5430 }
 0x5a3   : > { %v7976_v22 = vpop.eup %7975  ;;  %v4837_v54 = vadd.f32 1.0, %v7974_v62  ;;  %v4817_v46 = vmul.f32 1.442695, %v4790_v41  ;;  %7995 = vpow2.f32 %v4987_v49  ;;  %12870 = vst [vmem:[#allocation74_spill] sm:$0xff] %v11698_v36  ;;  %v12871_v62 = vld [vmem:[#allocation69_spill] sm:$0xff]  ;;  %v12872_v49 = vld [vmem:[#allocation64_spill] sm:$0xff] }
 0x5a4   : > { %v7978_v43 = vpop.eup %7977  ;;  %3926 = vadd.xlane.f32.xlu0 %v7972_v18  ;;  %5017 = vadd.xlane.f32.xlu1 %v7976_v22  ;;  %v3747_v35 = vsub.f32 1.0, %v3731_v12  ;;  %v2853_v37 = vmul.f32 1.442695, %v2827_v26  ;;  %v2779_v41 = vmul.f32 1.442695, %v12871_v62  ;;  %v5436_v32 = vadd.f32 %v12872_v49, %v11420_v48 }
 0x5a5   : > { %v7980_v57 = vpop.eup %7979  ;;  %7997 = vrcp.f32 %v4837_v54  ;;  %v12874_v22 = vsub.f32 %v12846_v47, %v12871_v62  ;;  %v5451_v62 = vmul.f32 0.6931472, %v7978_v43  ;;  %vm5638_vm3 = vcmp.eq.f32.partialorder %v11669_v20, 0.0 }
 0x5a6   : > { %v7982_v31 = vpop.eup %7981  ;;  %v4868_v28 = vmul.f32 %v7980_v57, %v12862_v23  ;;  %7999 = vpow2.f32 %v4817_v46  ;;  %v3763_v16 = vsub.f32 0.7, %v3747_v35  ;;  %v11711_v35 = vpop.xlane.xlu0 %5526  ;;  %vm5639_vm5 = vcmp.eq.f32.partialorder %v11696_v34, 0.0 }
 0x5a7   : > { %v7984_v50 = vpop.eup %7983  ;;  %8001 = vpow2.f32 %v2773_v6  ;;  %v4679_v27 = vmul.f32 %v7982_v31, %v11642_v59  ;;  %v2830_v54 = vmul.f32 -1.0, %v12874_v22  ;;  %v12875_v6 = vld [vmem:[#allocation72_spill] sm:$0xff] }
 0x5a8   : > { %v7986_v18 = vpop.eup %7985  ;;  %8003 = vpow2.f32 %v2855_v60  ;;  %2799 = vadd.xlane.f32.xlu0 %v12873_v3  ;;  %4006 = vadd.xlane.f32.xlu1 %v7984_v50  ;;  %v4884_v26 = vsub.f32 %v12862_v23, %v4868_v28  ;;  %v3779_v12 = vmul.f32 5.0, %v3763_v16  ;;  %v2777_v46 = vmul.f32 1.442695, %v12875_v6 }
 0x5a9   : > { %8005 = vpow2.f32 %v3976_v40  ;;  %v7988_v57 = vpop.eup %7987  ;;  %v12876_v48 = vsub.f32 %v12842_v13, %v12875_v6  ;;  %v5532_v16 = vmax.f32 %v11461_v51, 1e-06  ;;  %v4681_v49 = vsel %vm4680_vm8, %v11642_v59, %v4679_v27  ;;  %v11721_v40 = vpop.xlane.xlu1 %5432 }
 0x5aa   : > { %8007 = vpow2.f32 %v2853_v37  ;;  %v3806_v31 = vmul.f32 1.442695, %v3779_v12  ;;  %v7990_v50 = vpop.eup %7989  ;;  %12877 = vst [vmem:[#allocation10_spill] sm:$0xff] %v11721_v40  ;;  %v12878_v37 = vld [vmem:[#allocation58_spill] sm:$0xff]  ;;  %v4683_v12 = vand.u32 2147483648, %v11642_v59  ;;  %v4964_v43 = vmul.f32 -1.0, %v4884_v26 }
 0x5ab   : > { %v2829_v60 = vmul.f32 -1.0, %v12876_v48  ;;  %8009 = vpow2.f32 %v2779_v41  ;;  %v7992_v3 = vpop.eup %7991  ;;  %v11725_v41 = vpop.xlane.xlu0 %3912  ;;  %v4909_v6 = vmul.f32 1.442695, %v4868_v28  ;;  %v12879_v48 = vld [vmem:[#allocation24_spill] sm:$0xff]  ;;  %v3898_v28 = vmul.f32 1.442695, %v11657_v45 }
 0x5ac   : > { %8011 = vlog2.f32 %v5436_v32  ;;  %4939 = vadd.xlane.f32.xlu0 %v7990_v50  ;;  %2879 = vadd.xlane.f32.xlu1 %v12878_v37  ;;  %v7994_v22 = vpop.eup %7993  ;;  %v2859_v32 = vmul.f32 1.442695, %v2830_v54  ;;  %v5562_v36 = vmul.f32 %v7988_v57, %v12879_v48  ;;  %v4684_v1 = vsel %vm4682_vm6, %v4683_v12, %v4681_v49  ;;  %v12880_v37 = vld [vmem:[#allocation40_spill] sm:$0xff]  ;;  %v12885_v12 = vld [vmem:[#allocation25_spill] sm:$0xff] }
 0x5ad   : > { %8013 = vpow2.f32 %v3806_v31  ;;  %v7996_v27 = vpop.eup %7995  ;;  %v5453_v50 = vmul.f32 0.6931472, %v7986_v18  ;;  %v5482_v17 = vsub.f32 %v5451_v62, %v12880_v37  ;;  %v12881_v26 = vmov 0.0   ;;  %v12886_v37 = vld [vmem:[#allocation76_spill] sm:$0xff] }
 0x5ae   : > { %8015 = vpow2.f32 %v2777_v46  ;;  %v11738_v54 = vsel %vm5626_vm9, 1.0, %v12881_v26  ;;  %v11743_v46 = vsel %vm5627_vm4, 1.0, %v12881_v26  ;;  %v4989_v57 = vmul.f32 1.442695, %v4964_v43 }
 0x5af   : > { %v7998_v40 = vpop.eup %7997  ;;  %8017 = vrcp.f32 %v5532_v16  ;;  %12882 = vst [vmem:[#allocation71_spill] sm:$0xff] %v11738_v54  ;;  %12883 = vst [vmem:[#allocation17_spill] sm:$0xff] %v11743_v46  ;;  %v12884_v31 = vsub.f32 %v12862_v23, %v11657_v45  ;;  %v4712_v62 = vsub.f32 0.0, %v4684_v1  ;;  %v5578_v11 = vmul.f32 %v5562_v36, %v5482_v17  ;;  %v11757_v43 = vpop.xlane.xlu0 %3992  ;;  %v12887_v17 = vld [vmem:[#allocation41_spill] sm:$0xff] }
 0x5b0   : > { %v8000_v47 = vpop.eup %7999  ;;  %3928 = vadd.xlane.f32.xlu0 %v7994_v22  ;;  %5019 = vadd.xlane.f32.xlu1 %v7996_v27  ;;  %v11733_v59 = vmul.f32 %v7998_v40, %v10609_v61  ;;  %8019 = vpow2.f32 %v4909_v6  ;;  %v11752_v40 = vpop.xlane.xlu1 %5528  ;;  %v5563_v22 = vmul.f32 %v7992_v3, %v12885_v12  ;;  %v2857_v6 = vmul.f32 1.442695, %v2829_v60 }
 0x5b1   : > { %v11745_v18 = vpop.eup %8001  ;;  %v3953_v16 = vmul.f32 -1.0, %v12884_v31  ;;  %v4838_v27 = vadd.f32 1.0, %v8000_v47  ;;  %8021 = vpow2.f32 %v2859_v32  ;;  %v12514_v23 = vsub.f32 1.0, %v11738_v54 }
 0x5b2   : > { %v11750_v49 = vpop.eup %8003  ;;  %v4885_v63 = vsub.f32 %v10609_v61, %v11733_v59  ;;  %v2783_v31 = vmul.f32 1.442695, %v12886_v37  ;;  %v5483_v36 = vsub.f32 %v5453_v50, %v12887_v17  ;;  %8023 = vpow2.f32 %v3898_v28 }
 0x5b3   : > { %v8006_v48 = vpop.eup %8005  ;;  %v11768_v47 = vsel %vm5628_vm7, 1.0, %v12881_v26  ;;  %8025 = vpow2.f32 %v4989_v57  ;;  %v3978_v3 = vmul.f32 1.442695, %v3953_v16  ;;  %v4728_v32 = vmul.f32 50.0, %v4712_v62 }
 0x5b4   : > { %v11761_v45 = vpop.eup %8007  ;;  %5594 = vadd.xlane.f32.xlu0 %v5578_v11  ;;  %4008 = vadd.xlane.f32.xlu1 %v8006_v48  ;;  %12888 = vst [vmem:[#allocation96_spill] sm:$0xff] %v11768_v47  ;;  %v11773_v1 = vpop.xlane.xlu1 %3914  ;;  %v5579_v11 = vmul.f32 %v5563_v22, %v5483_v36  ;;  %8027 = vrcp.f32 %v4838_v27  ;;  %v12889_v50 = vsub.f32 %v12857_v38, %v12886_v37  ;;  %v12890_v28 = vsub.f32 1.0, %v11743_v46  ;;  %v12891_v22 = vld [vmem:[#allocation97_spill] sm:$0xff] }
 0x5b5   : > { %v11770_v60 = vpop.eup %8009  ;;  %8029 = vpow2.f32 %v2857_v6  ;;  %v5437_v27 = vadd.f32 %v12891_v22, %v11468_v30  ;;  %v12892_v6 = vld [vmem:[#allocation35_spill] sm:$0xff]  ;;  %v11789_v36 = vpop.xlane.xlu0 %2785  ;;  %vm5640_vm8 = vcmp.eq.f32.partialorder %v11711_v35, 0.0  ;;  %vm5641_vm9 = vcmp.eq.f32.partialorder %v11752_v40, 0.0 }
 0x5b6   : > { %v8012_v12 = vpop.eup %8011  ;;  %v2832_v51 = vmul.f32 -1.0, %v12889_v50  ;;  %v5731_v57 = vadd.f32 %v12890_v28, %v12514_v23  ;;  %8031 = vpow2.f32 %v2783_v31  ;;  %v4965_v50 = vmul.f32 -1.0, %v4885_v63  ;;  %v12894_v31 = vld [vmem:[#allocation82_spill] sm:$0xff] }
 0x5b7   : > { %v8014_v48 = vpop.eup %8013  ;;  %8033 = vpow2.f32 %v3978_v3  ;;  %v4757_v28 = vmul.f32 1.442695, %v4728_v32  ;;  %v11794_v23 = vsel %vm5629_vm10, 1.0, %v12881_v26  ;;  %v2781_v16 = vmul.f32 1.442695, %v12894_v31 }
 0x5b8   : > { %v11783_v62 = vpop.eup %8015  ;;  %2801 = vadd.xlane.f32.xlu0 %v12892_v6  ;;  %5596 = vadd.xlane.f32.xlu1 %v5579_v11  ;;  %v3827_v37 = vadd.f32 1.0, %v8014_v48  ;;  %12893 = vst [vmem:[#allocation99_spill] sm:$0xff] %v11794_v23  ;;  %v5455_v46 = vmul.f32 0.6931472, %v8012_v12  ;;  %v2863_v22 = vmul.f32 1.442695, %v2832_v51  ;;  %v11801_v63 = vpop.xlane.xlu1 %3994 }
 0x5b9   : > { %v8018_v17 = vpop.eup %8017  ;;  %v12895_v11 = vsub.f32 1.0, %v11768_v47  ;;  %v4911_v32 = vmul.f32 1.442695, %v11733_v59  ;;  %v11809_v48 = vsel %vm5630_vm11, 1.0, %v12881_v26  ;;  %v4991_v6 = vmul.f32 1.442695, %v4965_v50  ;;  %v11823_v50 = vpop.xlane.xlu0 %2865 }
 0x5ba   : > { %8035 = vrcp.f32 %v3827_v37  ;;  %v8020_v30 = vpop.eup %8019  ;;  %12896 = vst [vmem:[#allocation43_spill] sm:$0xff] %v11809_v48  ;;  %v12898_v59 = vsub.f32 %v12853_v7, %v12894_v31  ;;  %v12899_v12 = vld [vmem:[#allocation49_spill] sm:$0xff]  ;;  %vm405_vm4 = vcmask 0   ;;  %vm5809_vm11 = vcmask 24576  }
 0x5bb   : > { %v5732_v3 = vadd.f32 %v5731_v57, %v12895_v11  ;;  %8037 = vlog2.f32 %v5437_v27  ;;  %v11811_v51 = vpop.eup %8021  ;;  %v12897_v57 = vsub.f32 %v10609_v61, %v11447_v10  ;;  %v5533_v11 = vmax.f32 %v11478_v56, 1e-06  ;;  %v12900_v61 = vld [vmem:[#allocation37_spill] sm:$0xff]  ;;  %408 = vst.msk [vmem:[#allocation4] sm:$0x1] %vm405_vm4, %v12881_v26 }
 0x5bc   : > { %4941 = vadd.xlane.f32.xlu0 %v8020_v30  ;;  %2881 = vadd.xlane.f32.xlu1 %v11659_v21  ;;  %8039 = vpow2.f32 %v4757_v28  ;;  %v8024_v21 = vpop.eup %8023  ;;  %v2831_v30 = vmul.f32 -1.0, %v12898_v59  ;;  %v5484_v47 = vsub.f32 %v5455_v46, %v12899_v12  ;;  %v12901_v28 = vsub.f32 1.0, %v11794_v23  ;;  %406 = vst.msk [vmem:[#allocation2] sm:$0x1] %vm405_vm4, %v12881_v26  ;;  %407 = vst.msk [vmem:[#allocation3] sm:$0x1] %vm405_vm4, %v12881_v26 }
 0x5bd   : > { %v3954_v27 = vmul.f32 -1.0, %v12897_v57  ;;  %8041 = vpow2.f32 %v2781_v16  ;;  %v8026_v54 = vpop.eup %8025  ;;  %v5564_v57 = vmul.f32 %v8018_v17, %v12900_v61  ;;  %v11831_v16 = vsel %vm5631_vm12, 1.0, %v12881_v26  ;;  %409 = vst.msk [vmem:[#allocation5] sm:$0x1] %vm405_vm4, %v12881_v26  ;;  %410 = vst.msk [vmem:[#allocation6] sm:$0x1] %vm405_vm4, %v12881_v26 }
 0x5be   : > { %v5733_v37 = vadd.f32 %v5732_v3, %v12901_v28  ;;  %12902 = vst [vmem:[#allocation15_spill] sm:$0xff] %v11831_v16  ;;  %v8028_v31 = vpop.eup %8027  ;;  %8043 = vpow2.f32 %v4911_v32  ;;  %v3900_v56 = vmul.f32 1.442695, %v11447_v10  ;;  %v11838_v17 = vsel %vm5632_vm13, 1.0, %v12881_v26  ;;  %v11847_v10 = vpop.xlane.xlu1 %2787 }
 0x5bf   : > { %12903 = vst [vmem:[#allocation33_spill] sm:$0xff] %v11838_v17  ;;  %v11840_v12 = vpop.eup %8029  ;;  %8045 = vpow2.f32 %v4991_v6  ;;  %v3980_v3 = vmul.f32 1.442695, %v3954_v27  ;;  %v4870_v59 = vmul.f32 %v8028_v31, %v12864_v14  ;;  %v12904_v61 = vsub.f32 1.0, %v11809_v48  ;;  %v11862_v28 = vpop.xlane.xlu0 %3916 }
 0x5c0   : > { %3930 = vadd.xlane.f32.xlu0 %v8024_v21  ;;  %5021 = vadd.xlane.f32.xlu1 %v8026_v54  ;;  %v11845_v54 = vpop.eup %8031  ;;  %8047 = vpow2.f32 %v2863_v22  ;;  %v5580_v32 = vmul.f32 %v5564_v57, %v5484_v47  ;;  %v11853_v46 = vsel %vm5633_vm14, 1.0, %v12881_v26  ;;  %v5534_v27 = vmax.f32 %v11502_v0, 1e-06  ;;  %v12908_v57 = vld [vmem:[#allocation102_spill] sm:$0xff] }
 0x5c1   : > { %v5734_v21 = vadd.f32 %v5733_v37, %v12904_v61  ;;  %12905 = vst [vmem:[#allocation79_spill] sm:$0xff] %v11845_v54  ;;  %12906 = vst [vmem:[#allocation81_spill] sm:$0xff] %v11853_v46  ;;  %v8034_v6 = vpop.eup %8033  ;;  %8049 = vrcp.f32 %v5533_v11  ;;  %v4886_v37 = vsub.f32 %v12864_v14, %v4870_v59  ;;  %v12907_v47 = vsub.f32 1.0, %v11831_v16 }
 0x5c2   : > { %8051 = vpow2.f32 %v3900_v56  ;;  %v5438_v61 = vadd.f32 %v12908_v57, %v11491_v33  ;;  %v12522_v0 = vsub.f32 1.0, %v11853_v46  ;;  %v4913_v23 = vmul.f32 1.442695, %v4870_v59  ;;  %v11879_v59 = vpop.xlane.xlu1 %2867 }
 0x5c3   : > { %v5735_v22 = vadd.f32 %v5734_v21, %v12907_v47  ;;  %8053 = vpow2.f32 %v3980_v3  ;;  %v11872_v21 = vsel %vm5634_vm15, 1.0, %v12881_v26  ;;  %v12913_v47 = vld [vmem:[#allocation57_spill] sm:$0xff] }
 0x5c4   : > { %v8036_v31 = vpop.eup %8035  ;;  %4010 = vadd.xlane.f32.xlu1 %v8034_v6  ;;  %5598 = vadd.xlane.f32.xlu0 %v5580_v32  ;;  %v12909_v32 = vsub.f32 1.0, %v11838_v17  ;;  %12910 = vst [vmem:[#allocation12_spill] sm:$0xff] %v11872_v21  ;;  %v2861_v6 = vmul.f32 1.442695, %v2831_v30  ;;  %8055 = vrcp.f32 %v5534_v27  ;;  %v12523_v27 = vsub.f32 1.0, %v11872_v21 }
 0x5c5   : > { %v3859_v11 = vmul.f32 %v8036_v31, %v12864_v14  ;;  %v8038_v48 = vpop.eup %8037  ;;  %v12912_v31 = vld [vmem:[#allocation60_spill] sm:$0xff]  ;;  %8057 = vlog2.f32 %v5438_v61  ;;  %v11890_v17 = vsel %vm5635_vm1, 1.0, %v12881_v26  ;;  %v5536_v21 = vmax.f32 %v11536_v8, 1e-06 }
 0x5c6   : > { %v5736_v56 = vadd.f32 %v5735_v22, %v12909_v32  ;;  %v8040_v33 = vpop.eup %8039  ;;  %v4966_v22 = vmul.f32 -1.0, %v4886_v37  ;;  %12914 = vst [vmem:[#allocation84_spill] sm:$0xff] %v11890_v17  ;;  %v5457_v54 = vmul.f32 0.6931472, %v8038_v48  ;;  %8059 = vpow2.f32 %v4913_v23  ;;  %v11894_v37 = vpop.xlane.xlu0 %2789  ;;  %v12918_v8 = vld [vmem:[#allocation44_spill] sm:$0xff] }
 0x5c7   : > { %v11876_v3 = vpop.eup %8041  ;;  %v3875_v57 = vsub.f32 %v12864_v14, %v3859_v11  ;;  %v4776_v32 = vsub.f32 0.5, %v8040_v33  ;;  %v3902_v61 = vmul.f32 1.442695, %v3859_v11  ;;  %v11904_v23 = vsel %vm5636_vm0, 1.0, %v12881_v26  ;;  %v11917_v46 = vpop.xlane.xlu1 %3996 }
 0x5c8   : > { %12911 = vst [vmem:[#allocation20_spill] sm:$0xff] %v11876_v3  ;;  %2803 = vadd.xlane.f32.xlu1 %v12912_v31  ;;  %2883 = vadd.xlane.f32.xlu0 %v12913_v47  ;;  %v5737_v30 = vadd.f32 %v5736_v56, %v12522_v0  ;;  %v8044_v16 = vpop.eup %8043  ;;  %v12527_v31 = vsub.f32 1.0, %v11890_v17  ;;  %v4993_v48 = vmul.f32 1.442695, %v4966_v22  ;;  %12916 = vst [vmem:[#allocation83_spill] sm:$0xff] %v11904_v23  ;;  %v11909_v11 = vsel %vm5637_vm2, 1.0, %v12881_v26 }
 0x5c9   : > { %v8046_v14 = vpop.eup %8045  ;;  %v4792_v33 = vmul.f32 5.0, %v4776_v32  ;;  %v3955_v0 = vmul.f32 -1.0, %v3875_v57 }
 0x5ca   : > { %v5738_v56 = vadd.f32 %v5737_v30, %v12523_v27  ;;  %v11899_v47 = vpop.eup %8047  ;;  %v11940_v22 = vpop.xlane.xlu0 %3918 }
 0x5cb   : > { %12915 = vst [vmem:[#allocation23_spill] sm:$0xff] %v11899_v47  ;;  %v8050_v32 = vpop.eup %8049  ;;  %v4821_v30 = vmul.f32 1.442695, %v4792_v33  ;;  %v12917_v47 = vld [vmem:[#allocation80_spill] sm:$0xff]  ;;  %v11923_v33 = vsel %vm5638_vm3, 1.0, %v12881_v26 }
 0x5cc   : > { %4943 = vadd.xlane.f32.xlu1 %v8044_v16  ;;  %5023 = vadd.xlane.f32.xlu0 %v8046_v14  ;;  %v5739_v27 = vadd.f32 %v5738_v56, %v12527_v31  ;;  %v12528_v16 = vsub.f32 1.0, %v11904_v23  ;;  %v8052_v57 = vpop.eup %8051  ;;  %v5535_v14 = vmax.f32 %v11519_v44, 1e-06  ;;  %v5485_v3 = vsub.f32 %v5457_v54, %v12917_v47 }
 0x5cd   : > { %v8054_v17 = vpop.eup %8053  ;;  %8061 = vpow2.f32 %v4821_v30  ;;  %v5565_v31 = vmul.f32 %v8050_v32, %v12918_v8  ;;  %v11933_v54 = vsel %vm5639_vm5, 1.0, %v12881_v26  ;;  %v11938_v47 = vsel %vm5640_vm8, 1.0, %v12881_v26 }
 0x5ce   : > { %v5740_v56 = vadd.f32 %v5739_v27, %v12528_v16  ;;  %8063 = vpow2.f32 %v3902_v61  ;;  %v8056_v30 = vpop.eup %8055  ;;  %v3982_v27 = vmul.f32 1.442695, %v3955_v0  ;;  %v12532_v61 = vsub.f32 1.0, %v11933_v54 }
 0x5cf   : > { %8065 = vpow2.f32 %v4993_v48  ;;  %v5537_v32 = vmax.f32 %v11556_v39, 1e-06  ;;  %v5581_v8 = vmul.f32 %v5565_v31, %v5485_v3  ;;  %v11949_v16 = vsel %vm5641_vm9, 1.0, %v12881_v26  ;;  %v8058_v44 = vpop.eup %8057  ;;  %v12922_v39 = vld [vmem:[#allocation104_spill] sm:$0xff]  ;;  %v11958_v31 = vpop.xlane.xlu1 %2869 }
 0x5d0   : > { %3932 = vadd.xlane.f32.xlu1 %v8052_v57  ;;  %4012 = vadd.xlane.f32.xlu0 %v8054_v17  ;;  %v12919_v17 = vsub.f32 1.0, %v11909_v11  ;;  %8067 = vpow2.f32 %v2861_v6  ;;  %12920 = vst [vmem:[#allocation16_spill] sm:$0xff] %v11949_v16  ;;  %v5538_v23 = vmax.f32 %v11574_v29, 1e-06  ;;  %v12921_v0 = vsub.f32 1.0, %v11923_v33 }
 0x5d1   : > { %8069 = vrcp.f32 %v5535_v14  ;;  %v5539_v6 = vmax.f32 %v11588_v19, 1e-06  ;;  %v5439_v3 = vadd.f32 %v12922_v39, %v11510_v25  ;;  %v12923_v29 = vsub.f32 %v12842_v13, %v11540_v15 }
 0x5d2   : > { %v5741_v57 = vadd.f32 %v5740_v56, %v12919_v17  ;;  %v12531_v56 = vsub.f32 1.0, %v11938_v47  ;;  %v8060_v17 = vpop.eup %8059  ;;  %8071 = vrcp.f32 %v5536_v21  ;;  %v12530_v21 = vsub.f32 1.0, %v11949_v16 }
 0x5d3   : > { %8073 = vpow2.f32 %v3982_v27  ;;  %v4967_v14 = vmul.f32 -1.0, %v12923_v29  ;;  %v5459_v19 = vmul.f32 0.6931472, %v8058_v44  ;;  %v4915_v25 = vmul.f32 1.442695, %v11540_v15  ;;  %v11979_v39 = vpop.xlane.xlu1 %3998  ;;  %v12925_v29 = vld [vmem:[#allocation85_spill] sm:$0xff] }
 0x5d4   : > { %v5742_v48 = vadd.f32 %v5741_v57, %v12921_v0  ;;  %2805 = vadd.xlane.f32.xlu0 %v11745_v18  ;;  %5600 = vadd.xlane.f32.xlu1 %v5581_v8  ;;  %8075 = vrcp.f32 %v5537_v32  ;;  %v11967_v0 = vpop.xlane.xlu0 %2791  ;;  %v5540_v15 = vmax.f32 %v11615_v5, 1e-06  ;;  %v5542_v26 = vmax.f32 %v11669_v20, 1e-06 }
 0x5d5   : > { %8077 = vrcp.f32 %v5538_v23  ;;  %v4995_v8 = vmul.f32 1.442695, %v4967_v14 }
 0x5d6   : > { %v5743_v57 = vadd.f32 %v5742_v48, %v12532_v61  ;;  %8079 = vrcp.f32 %v5539_v6  ;;  %v12924_v48 = vsub.f32 %v12842_v13, %v11562_v4  ;;  %v5486_v6 = vsub.f32 %v5459_v19, %v12925_v29 }
 0x5d7   : > { %v8062_v27 = vpop.eup %8061  ;;  %8081 = vlog2.f32 %v5439_v3  ;;  %v5541_v3 = vmax.f32 %v11638_v42, 1e-06  ;;  %v12926_v42 = vld [vmem:[#allocation47_spill] sm:$0xff] }
 0x5d8   : > { %v5744_v18 = vadd.f32 %v5743_v57, %v12531_v56  ;;  %4945 = vadd.xlane.f32.xlu0 %v8060_v17  ;;  %2885 = vadd.xlane.f32.xlu1 %v11761_v45  ;;  %v3956_v32 = vmul.f32 -1.0, %v12924_v48  ;;  %v8064_v44 = vpop.eup %8063  ;;  %v4840_v17 = vadd.f32 1.0, %v8062_v27  ;;  %8083 = vpow2.f32 %v4915_v25  ;;  %v11999_v25 = vpop.xlane.xlu0 %3920 }
 0x5d9   : > { %v8066_v45 = vpop.eup %8065  ;;  %v5566_v14 = vmul.f32 %v8056_v30, %v12926_v42  ;;  %v3904_v57 = vmul.f32 1.442695, %v11562_v4  ;;  %v5543_v30 = vmax.f32 %v11696_v34, 1e-06  ;;  %v12008_v42 = vpop.xlane.xlu1 %2871 }
 0x5da   : > { %v5745_v23 = vadd.f32 %v5744_v18, %v12530_v21  ;;  %v11993_v5 = vpop.eup %8067  ;;  %8085 = vrcp.f32 %v4840_v17  ;;  %v3984_v18 = vmul.f32 1.442695, %v3956_v32  ;;  %v5544_v17 = vmax.f32 %v11711_v35, 1e-06  ;;  %v12927_v32 = vld [vmem:[#allocation106_spill] sm:$0xff]  ;;  %v12935_v21 = vld [vmem:[#allocation45_spill] sm:$0xff] }
 0x5db   : > { %v11997_v19 = vpop.eup %8069  ;;  %8087 = vpow2.f32 %v4995_v8  ;;  %v5582_v29 = vmul.f32 %v5566_v14, %v5486_v6  ;;  %v5440_v20 = vadd.f32 %v12927_v32, %v11530_v58  ;;  %v12928_v6 = vld [vmem:[#allocation108_spill] sm:$0xff] }
 0x5dc   : > { %v5746_v13 = vrot.slane %v5745_v23, 4  ;;  %3934 = vadd.xlane.f32.xlu0 %v8064_v44  ;;  %5025 = vadd.xlane.f32.xlu1 %v8066_v45  ;;  %v12001_v48 = vpop.eup %8071  ;;  %8089 = vrcp.f32 %v5540_v15  ;;  %v5441_v35 = vadd.f32 %v12928_v6, %v11548_v9  ;;  %v12931_v9 = vld [vmem:[#allocation31_spill] sm:$0xff] }
 0x5dd   : > { %v8074_v44 = vpop.eup %8073  ;;  %8091 = vrcp.f32 %v5541_v3 }
 0x5de   : > { %v5747_v27 = vadd.f32 %v5746_v13, %v5745_v23  ;;  %v12005_v4 = vpop.eup %8075  ;;  %8093 = vpow2.f32 %v3904_v57  ;;  %v12929_v13 = vld [vmem:[#allocation110_spill] sm:$0xff] }
 0x5df   : > { %v12010_v8 = vpop.eup %8077  ;;  %8095 = vpow2.f32 %v3984_v18  ;;  %v12014_v23 = vpop.xlane.xlu0 %4923  ;;  %v5442_v14 = vadd.f32 %v12929_v13, %v11567_v2 }
 0x5e0   : > { %v5748_v45 = vrot.slane %v5747_v27, 2  ;;  %4014 = vadd.xlane.f32.xlu1 %v8074_v44  ;;  %5602 = vadd.xlane.f32.xlu0 %v5582_v29  ;;  %v12016_v34 = vpop.eup %8079  ;;  %8097 = vrcp.f32 %v5542_v26  ;;  %v12930_v29 = vld [vmem:[#allocation19_spill] sm:$0xff]  ;;  %v5444_v44 = vadd.f32 %v12931_v9, %v11602_v52 }
 0x5e1   : > { %v8082_v3 = vpop.eup %8081  ;;  %8099 = vrcp.f32 %v5543_v30  ;;  %v5443_v58 = vadd.f32 %v12930_v29, %v11577_v24 }
 0x5e2   : > { %v5749_v15 = vadd.f32 %v5748_v45, %v5747_v27  ;;  %8101 = vrcp.f32 %v5544_v17  ;;  %v5730_v27 = vld [vmem:[#allocation6] sm:$0x1]  ;;  %v8084_v26 = vpop.eup %8083  ;;  %v5461_v2 = vmul.f32 0.6931472, %v8082_v3  ;;  %v12932_v17 = vld [vmem:[#allocation38_spill] sm:$0xff] }
 0x5e3   : > { %8103 = vlog2.f32 %v5440_v20  ;;  %v5445_v32 = vadd.f32 %v12932_v17, %v11622_v53  ;;  %v12934_v20 = vld [vmem:[#allocation11_spill] sm:$0xff]  ;;  %v12939_v17 = vld [vmem:[#allocation50_spill] sm:$0xff] }
 0x5e4   : > { %v5750_v57 = vrot.slane %v5749_v15, 1  ;;  %2807 = vadd.xlane.f32.xlu1 %v11682_v55  ;;  %2887 = vadd.xlane.f32.xlu0 %v11750_v49  ;;  %v8086_v45 = vpop.eup %8085  ;;  %8105 = vlog2.f32 %v5441_v35  ;;  %v12933_v55 = vld [vmem:[#allocation68_spill] sm:$0xff]  ;;  %v5446_v56 = vadd.f32 %v12935_v21, %v12934_v20  ;;  %v12936_v35 = vld [vmem:[#allocation30_spill] sm:$0xff] }
 0x5e5   : > { %v12026_v18 = vpop.xlane.xlu1 %4925  ;;  %v8088_v24 = vpop.eup %8087  ;;  %8107 = vlog2.f32 %v5442_v14  ;;  %v4872_v6 = vmul.f32 %v8086_v45, %v12933_v55  ;;  %v3906_v3 = vmul.f32 1.442695, %v12936_v35 }
 0x5e6   : > { %v5751_v30 = vadd.f32 %v5750_v57, %v5749_v15  ;;  %v12033_v29 = vpop.eup %8089  ;;  %8109 = vlog2.f32 %v5443_v58  ;;  %v12937_v58 = vld [vmem:[#allocation90_spill] sm:$0xff] }
 0x5e7   : > { %v4928_v49 = vpop.xlane.xlu0 %4927  ;;  %v12037_v52 = vpop.eup %8091  ;;  %8111 = vlog2.f32 %v5444_v44  ;;  %v4917_v15 = vmul.f32 1.442695, %v4872_v6  ;;  %v4888_v53 = vsub.f32 %v12933_v55, %v4872_v6  ;;  %v12938_v44 = vsub.f32 %v12933_v55, %v12936_v35  ;;  %v12942_v55 = vld [vmem:[#allocation74_spill] sm:$0xff] }
 0x5e8   : > { %v5752_v13 = vadd.f32 %v5751_v30, %v5730_v27  ;;  %4947 = vadd.xlane.f32.xlu1 %v8084_v26  ;;  %5027 = vadd.xlane.f32.xlu0 %v8088_v24  ;;  %v8094_v57 = vpop.eup %8093  ;;  %8113 = vlog2.f32 %v5445_v32  ;;  %v5487_v27 = vsub.f32 %v5461_v2, %v12937_v58  ;;  %v5037_v9 = vadd.f32 1.0, %v4928_v49  ;;  %v12940_v32 = vld [vmem:[#allocation94_spill] sm:$0xff] }
 0x5e9   : > { %v12041_v14 = vpop.xlane.xlu1 %5005  ;;  %v8096_v21 = vpop.eup %8095  ;;  %8115 = vpow2.f32 %v4917_v15  ;;  %v4968_v26 = vmul.f32 -1.0, %v4888_v53  ;;  %v3957_v30 = vmul.f32 -1.0, %v12938_v44  ;;  %v5567_v24 = vmul.f32 %v11997_v19, %v12939_v17  ;;  %v12941_v2 = vld [vmem:[#allocation14_spill] sm:$0xff]  ;;  %v12943_v53 = vld [vmem:[#allocation113_spill] sm:$0xff] }
 0x5ea   : > { %5753 = vst.msk [vmem:[#allocation6] sm:$0x1] %vm405_vm4, %v5752_v13  ;;  %v12048_v45 = vpop.eup %8097  ;;  %8117 = vlog2.f32 %v5446_v56  ;;  %v5447_v49 = vadd.f32 %v12941_v2, %v12940_v32  ;;  %v5448_v35 = vadd.f32 %v12943_v53, %v12942_v55  ;;  %v12944_v44 = vld [vmem:[#allocation10_spill] sm:$0xff] }
 0x5eb   : > { %v12052_v6 = vpop.eup %8099  ;;  %v4997_v13 = vmul.f32 1.442695, %v4968_v26  ;;  %8119 = vpow2.f32 %v3906_v3  ;;  %v5583_v58 = vmul.f32 %v5567_v24, %v5487_v27  ;;  %v12945_v17 = vld [vmem:[#allocation114_spill] sm:$0xff]  ;;  %v5545_v26 = vmax.f32 %v11752_v40, 1e-06  ;;  %v12946_v27 = vld [vmem:[#allocation67_spill] sm:$0xff] }
 0x5ec   : > { %3936 = vadd.xlane.f32.xlu1 %v8094_v57  ;;  %4016 = vadd.xlane.f32.xlu0 %v8096_v21  ;;  %v12056_v15 = vpop.eup %8101  ;;  %8121 = vlog2.f32 %v5037_v9  ;;  %v3986_v21 = vmul.f32 1.442695, %v3957_v30  ;;  %v5449_v61 = vadd.f32 %v12945_v17, %v12944_v44  ;;  %v12947_v9 = vsub.f32 %v12853_v7, %v12946_v27 }
 0x5ed   : > { %v5008_v20 = vpop.xlane.xlu1 %5007  ;;  %v8104_v57 = vpop.eup %8103  ;;  %8123 = vpow2.f32 %v4997_v13 }
 0x5ee   : > { %v5085_v56 = vadd.f32 1.0, %v5008_v20  ;;  %v12060_v19 = vpop.eup %8105  ;;  %v4969_v24 = vmul.f32 -1.0, %v12947_v9  ;;  %v12948_v20 = vld [vmem:[#allocation28_spill] sm:$0xff]  ;;  %v5463_v40 = vmul.f32 0.6931472, %v8104_v57 }
 0x5ef   : > { %v12065_v3 = vpop.eup %8107  ;;  %v12949_v55 = vsub.f32 %v12853_v7, %v12948_v20  ;;  %v12950_v7 = vld [vmem:[#allocation63_spill] sm:$0xff] }
 0x5f0   : > { %5604 = vadd.xlane.f32.xlu1 %v5583_v58  ;;  %2809 = vadd.xlane.f32.xlu0 %v11783_v62  ;;  %8125 = vlog2.f32 %v5085_v56  ;;  %v12071_v30 = vpop.eup %8109  ;;  %v4919_v62 = vmul.f32 1.442695, %v12946_v27  ;;  %v4999_v56 = vmul.f32 1.442695, %v4969_v24  ;;  %v12951_v27 = vsub.f32 %v12857_v38, %v12950_v7 }
 0x5f1   : > { %8127 = vlog2.f32 %v5447_v49  ;;  %v4930_v32 = vpop.xlane.xlu0 %4929  ;;  %v12073_v13 = vpop.eup %8111  ;;  %v3958_v49 = vmul.f32 -1.0, %v12949_v55 }
 0x5f2   : > { %8129 = vlog2.f32 %v5448_v35  ;;  %v5038_v2 = vadd.f32 1.0, %v4930_v32  ;;  %v12079_v53 = vpop.eup %8113  ;;  %v4970_v9 = vmul.f32 -1.0, %v12951_v27 }
 0x5f3   : > { %8131 = vpow2.f32 %v3986_v21  ;;  %v8116_v58 = vpop.eup %8115  ;;  %v3908_v21 = vmul.f32 1.442695, %v12948_v20  ;;  %v12953_v20 = vld [vmem:[#allocation51_spill] sm:$0xff] }
 0x5f4   : > { %8133 = vlog2.f32 %v5449_v61  ;;  %2889 = vadd.xlane.f32.xlu1 %v11840_v12  ;;  %v5010_v35 = vpop.xlane.xlu1 %5009  ;;  %v12082_v44 = vpop.eup %8117  ;;  %4949 = vadd.xlane.f32.xlu0 %v8116_v58  ;;  %v3988_v61 = vmul.f32 1.442695, %v3958_v49  ;;  %v4024_v12 = vadd.f32 1.0, %v11725_v41  ;;  %v5001_v27 = vmul.f32 1.442695, %v4970_v9 }
 0x5f5   : > { %8135 = vrcp.f32 %v5545_v26  ;;  %v5086_v17 = vadd.f32 1.0, %v5010_v35  ;;  %v8120_v32 = vpop.eup %8119  ;;  %v12952_v26 = vld [vmem:[#allocation92_spill] sm:$0xff]  ;;  %v5568_v35 = vmul.f32 %v12001_v48, %v12953_v20  ;;  %v4025_v49 = vadd.f32 1.0, %v11773_v1 }
 0x5f6   : > { %8137 = vlog2.f32 %v5038_v2  ;;  %v8122_v57 = vpop.eup %8121  ;;  %v5488_v24 = vsub.f32 %v5463_v40, %v12952_v26  ;;  %v4921_v2 = vmul.f32 1.442695, %v12950_v7  ;;  %v4073_v20 = vadd.f32 1.0, %v11801_v63 }
 0x5f7   : > { %8139 = vpow2.f32 %v4919_v62  ;;  %v8124_v55 = vpop.eup %8123  ;;  %v5056_v41 = vmul.f32 0.6931472, %v8122_v57 }
 0x5f8   : > { %8141 = vlog2.f32 %v5086_v17  ;;  %5029 = vadd.xlane.f32.xlu1 %v8124_v55  ;;  %3938 = vadd.xlane.f32.xlu0 %v8120_v32  ;;  %v5035_v17 = vadd.f32 1.0, %v12014_v23  ;;  %v5084_v32 = vadd.f32 1.0, %v12041_v14 }
 0x5f9   : > { %8143 = vpow2.f32 %v4999_v56  ;;  %v5584_v56 = vmul.f32 %v5568_v35, %v5488_v24  ;;  %v4072_v24 = vadd.f32 1.0, %v11757_v43 }
 0x5fa   : > { %v8126_v58 = vpop.eup %8125  ;;  %8145 = vpow2.f32 %v3908_v21 }
 0x5fb   : > { %v12093_v62 = vpop.eup %8127  ;;  %v5104_v16 = vmul.f32 0.6931472, %v8126_v58  ;;  %8147 = vpow2.f32 %v3988_v61  ;;  %v5036_v61 = vadd.f32 1.0, %v12026_v18 }
 0x5fc   : > { %v12096_v40 = vpop.eup %8129  ;;  %8149 = vlog2.f32 %v4024_v12  ;;  %5606 = vadd.xlane.f32.xlu0 %v5584_v56 }
 0x5fd   : > { %v8132_v7 = vpop.eup %8131  ;;  %v12100_v26 = vadd.f32 %v5104_v16, %v5056_v41  ;;  %v4932_v48 = vpop.xlane.xlu0 %4931  ;;  %8151 = vpow2.f32 %v4921_v2  ;;  %v2897_v41 = vadd.f32 1.0, %v11789_v36  ;;  %v2898_v36 = vadd.f32 1.0, %v11847_v10  ;;  %v12957_v10 = vld [vmem:[#allocation53_spill] sm:$0xff] }
 0x5fe   : > { %v12102_v21 = vpop.eup %8133  ;;  %4018 = vadd.xlane.f32.xlu1 %v8132_v7  ;;  %v5039_v1 = vadd.f32 1.0, %v4932_v48  ;;  %8153 = vpow2.f32 %v5001_v27 }
 0x5ff   : > { %v12104_v9 = vpop.eup %8135  ;;  %8155 = vlog2.f32 %v4025_v49  ;;  %v5465_v49 = vmul.f32 0.6931472, %v12060_v19 }
 0x600   : > { %v8138_v57 = vpop.eup %8137  ;;  %8157 = vlog2.f32 %v5035_v17  ;;  %2891 = vadd.xlane.f32.xlu0 %v11811_v51  ;;  %v12954_v17 = vld [vmem:[#allocation34_spill] sm:$0xff] }
 0x601   : > { %v8140_v23 = vpop.eup %8139  ;;  %8159 = vlog2.f32 %v5084_v32  ;;  %v5012_v14 = vpop.xlane.xlu1 %5011  ;;  %v5058_v18 = vmul.f32 0.6931472, %v8138_v57  ;;  %v3910_v7 = vmul.f32 1.442695, %v12954_v17  ;;  %v12955_v19 = vsub.f32 %v12857_v38, %v12954_v17  ;;  %v12956_v57 = vld [vmem:[#allocation95_spill] sm:$0xff] }
 0x602   : > { %v5004_v16 = vpop.xlane.xlu0 %5003  ;;  %v8142_v12 = vpop.eup %8141  ;;  %2811 = vadd.xlane.f32.xlu1 %v11770_v60  ;;  %8161 = vlog2.f32 %v5039_v1  ;;  %v5087_v55 = vadd.f32 1.0, %v5012_v14  ;;  %v5489_v14 = vsub.f32 %v5465_v49, %v12956_v57  ;;  %v5569_v38 = vmul.f32 %v12005_v4, %v12957_v10 }
 0x603   : > { %v5083_v2 = vadd.f32 1.0, %v5004_v16  ;;  %v8144_v58 = vpop.eup %8143  ;;  %8163 = vlog2.f32 %v5036_v61  ;;  %v5106_v35 = vmul.f32 0.6931472, %v8142_v12  ;;  %v3959_v1 = vmul.f32 -1.0, %v12955_v19 }
 0x604   : > { %v8146_v27 = vpop.eup %8145  ;;  %8165 = vlog2.f32 %v5087_v55  ;;  %5031 = vadd.xlane.f32.xlu0 %v8144_v58  ;;  %v2945_v12 = vadd.f32 1.0, %v11823_v50  ;;  %v2946_v55 = vadd.f32 1.0, %v11879_v59  ;;  %v12137_v50 = vmul.f32 0.6931472, %v12071_v30 }
 0x605   : > { %v8148_v43 = vpop.eup %8147  ;;  %v12113_v56 = vadd.f32 %v5106_v35, %v5058_v18  ;;  %8167 = vlog2.f32 %v5083_v2  ;;  %v12115_v60 = vpop.xlane.xlu1 %4000  ;;  %v3990_v18 = vmul.f32 1.442695, %v3959_v1  ;;  %v4026_v49 = vadd.f32 1.0, %v11862_v28  ;;  %v12958_v28 = vld [vmem:[#allocation20_spill] sm:$0xff] }
 0x606   : > { %v2794_v51 = vpop.xlane.xlu0 %2793  ;;  %v12118_v32 = vpop.eup %8149  ;;  %8169 = vlog2.f32 %v4072_v24  ;;  %4951 = vadd.xlane.f32.xlu1 %v8140_v23  ;;  %v5585_v59 = vmul.f32 %v5569_v38, %v5489_v14  ;;  %v12144_v4 = vmul.f32 0.6931472, %v12079_v53  ;;  %v4027_v30 = vadd.f32 1.0, %v11940_v22  ;;  %v12959_v38 = vld [vmem:[#allocation100_spill] sm:$0xff] }
 0x607   : > { %v2901_v63 = vadd.f32 1.0, %v2794_v51  ;;  %v8152_v48 = vpop.eup %8151  ;;  %8171 = vlog2.f32 %v4073_v20  ;;  %v12134_v20 = vmul.f32 0.6931472, %v12065_v3  ;;  %v4074_v3 = vadd.f32 1.0, %v11917_v46 }
 0x608   : > { %v12124_v61 = vpop.eup %8153  ;;  %8173 = vlog2.f32 %v2897_v41  ;;  %4020 = vadd.xlane.f32.xlu0 %v8148_v43  ;;  %v12141_v41 = vmul.f32 0.6931472, %v12073_v13  ;;  %v2899_v51 = vadd.f32 1.0, %v11894_v37  ;;  %v4075_v13 = vadd.f32 1.0, %v11979_v39 }
 0x609   : > { %v12127_v16 = vpop.eup %8155  ;;  %8175 = vpow2.f32 %v3910_v7  ;;  %v2874_v23 = vpop.xlane.xlu1 %2873  ;;  %v12154_v37 = vmul.f32 0.6931472, %v12082_v44  ;;  %v2947_v22 = vadd.f32 1.0, %v11958_v31  ;;  %v2900_v39 = vadd.f32 1.0, %v11967_v0 }
 0x60a   : > { %v8158_v24 = vpop.eup %8157  ;;  %3940 = vadd.xlane.f32.xlu1 %v8146_v27  ;;  %8177 = vlog2.f32 %v2901_v63  ;;  %v2949_v2 = vadd.f32 1.0, %v2874_v23  ;;  %v12162_v10 = vmul.f32 0.6931472, %v12093_v62  ;;  %v2948_v44 = vadd.f32 1.0, %v12008_v42 }
 0x60b   : > { %v8160_v58 = vpop.eup %8159  ;;  %8179 = vlog2.f32 %v2898_v36  ;;  %v5052_v19 = vmul.f32 0.6931472, %v8158_v24  ;;  %v5490_v31 = vsub.f32 %v12134_v20, %v12959_v38  ;;  %v4028_v62 = vadd.f32 1.0, %v11999_v25 }
 0x60c   : > { %v8162_v35 = vpop.eup %8161  ;;  %8181 = vlog2.f32 %v2949_v2  ;;  %v5102_v17 = vmul.f32 0.6931472, %v8160_v58  ;;  %2813 = vadd.xlane.f32.xlu0 %v12958_v28  ;;  %v12168_v58 = vmul.f32 0.6931472, %v12096_v40 }
 0x60d   : > { %v8164_v27 = vpop.eup %8163  ;;  %8183 = vlog2.f32 %v2945_v12  ;;  %v5060_v63 = vmul.f32 0.6931472, %v8162_v35  ;;  %v12960_v35 = vld [vmem:[#allocation59_spill] sm:$0xff] }
 0x60e   : > { %v8166_v43 = vpop.eup %8165  ;;  %8185 = vlog2.f32 %v2946_v55  ;;  %5608 = vadd.xlane.f32.xlu1 %v5585_v59  ;;  %v5054_v46 = vmul.f32 0.6931472, %v8164_v27  ;;  %v5570_v20 = vmul.f32 %v12010_v8, %v12960_v35  ;;  %v12961_v59 = vld [vmem:[#allocation66_spill] sm:$0xff] }
 0x60f   : > { %v8168_v7 = vpop.eup %8167  ;;  %v5108_v36 = vmul.f32 0.6931472, %v8166_v43  ;;  %8187 = vpow2.f32 %v3990_v18  ;;  %v4076_v18 = vadd.f32 1.0, %v12115_v60  ;;  %v5571_v27 = vmul.f32 %v12016_v34, %v12961_v59  ;;  %v12969_v35 = vld [vmem:[#allocation98_spill] sm:$0xff] }
 0x610   : > { %v12151_v53 = vpop.eup %8169  ;;  %8189 = vlog2.f32 %v4026_v49  ;;  %v5100_v1 = vmul.f32 0.6931472, %v8168_v7  ;;  %v5132_v23 = vadd.f32 %v5102_v17, %v5054_v46  ;;  %4953 = vadd.xlane.f32.xlu0 %v8152_v48  ;;  %v12174_v48 = vmul.f32 0.6931472, %v12102_v21  ;;  %v12965_v46 = vld [vmem:[#allocation109_spill] sm:$0xff] }
 0x611   : > { %v8172_v57 = vpop.eup %8171  ;;  %8191 = vlog2.f32 %v4074_v3  ;;  %v5135_v14 = vadd.f32 %v5108_v36, %v5060_v63  ;;  %v5586_v25 = vmul.f32 %v5570_v20, %v5490_v31  ;;  %v12964_v63 = vld [vmem:[#allocation107_spill] sm:$0xff] }
 0x612   : > { %v12157_v12 = vpop.eup %8173  ;;  %8193 = vlog2.f32 %v2899_v51  ;;  %v5131_v55 = vadd.f32 %v5100_v1, %v5052_v19  ;;  %2893 = vadd.xlane.f32.xlu1 %v11993_v5  ;;  %v5493_v36 = vsub.f32 %v12144_v4, %v12964_v63  ;;  %v5494_v19 = vsub.f32 %v12154_v37, %v12965_v46  ;;  %v12973_v63 = vld [vmem:[#allocation27_spill] sm:$0xff] }
 0x613   : > { %v8176_v24 = vpop.eup %8175  ;;  %8195 = vlog2.f32 %v4027_v30  ;;  %v12962_v30 = vld [vmem:[#allocation103_spill] sm:$0xff]  ;;  %v4041_v37 = vmul.f32 0.6931472, %v12118_v32 }
 0x614   : > { %v8178_v2 = vpop.eup %8177  ;;  %8197 = vlog2.f32 %v4075_v13  ;;  %v5148_v0 = vadd.f32 %v5132_v23, %v5131_v55  ;;  %3942 = vadd.xlane.f32.xlu0 %v8176_v24  ;;  %v5491_v17 = vsub.f32 %v12137_v50, %v12962_v30  ;;  %v4089_v23 = vmul.f32 0.6931472, %v12151_v53  ;;  %v12966_v55 = vld [vmem:[#allocation73_spill] sm:$0xff]  ;;  %v12971_v32 = vld [vmem:[#allocation23_spill] sm:$0xff] }
 0x615   : > { %v12171_v5 = vpop.eup %8179  ;;  %8199 = vlog2.f32 %v2947_v22  ;;  %v4934_v42 = vpop.xlane.xlu0 %4933  ;;  %v2922_v3 = vmul.f32 0.6931472, %v8178_v2  ;;  %v5572_v24 = vmul.f32 %v12033_v29, %v12966_v55  ;;  %v12968_v2 = vld [vmem:[#allocation93_spill] sm:$0xff]  ;;  %v5575_v29 = vmul.f32 %v12052_v6, %v12969_v35 }
 0x616   : > { %v8182_v49 = vpop.eup %8181  ;;  %8201 = vlog2.f32 %v2900_v39  ;;  %v5149_v40 = vadd.f32 %v5148_v0, %v12100_v26  ;;  %5033 = vadd.xlane.f32.xlu1 %v12124_v61  ;;  %v5040_v60 = vadd.f32 1.0, %v4934_v42  ;;  %v12963_v26 = vld [vmem:[#allocation105_spill] sm:$0xff]  ;;  %v4091_v39 = vmul.f32 0.6931472, %v8172_v57 }
 0x617   : > { %v8184_v21 = vpop.eup %8183  ;;  %8203 = vlog2.f32 %v2948_v44  ;;  %v2970_v43 = vmul.f32 0.6931472, %v8182_v49  ;;  %v5492_v61 = vsub.f32 %v12141_v41, %v12963_v26  ;;  %v12967_v44 = vld [vmem:[#allocation89_spill] sm:$0xff]  ;;  %v5587_v31 = vmul.f32 %v5571_v27, %v5491_v17 }
 0x618   : > { %v8186_v51 = vpop.eup %8185  ;;  %8205 = vlog2.f32 %v4076_v18  ;;  %v5150_v8 = vadd.f32 %v5149_v40, %v12113_v56  ;;  %5610 = vadd.xlane.f32.xlu0 %v5586_v25  ;;  %v5573_v4 = vmul.f32 %v12037_v52, %v12967_v44  ;;  %v4043_v18 = vmul.f32 0.6931472, %v12127_v16  ;;  %v12970_v52 = vld [vmem:[#allocation79_spill] sm:$0xff] }
 0x619   : > { %v8188_v28 = vpop.eup %8187  ;;  %8207 = vlog2.f32 %v4028_v62  ;;  %v12188_v7 = vadd.f32 %v2970_v43, %v2922_v3  ;;  %v5014_v34 = vpop.xlane.xlu1 %5013  ;;  %v5588_v53 = vmul.f32 %v5572_v24, %v5492_v61  ;;  %v4120_v27 = vadd.f32 %v4089_v23, %v4041_v37  ;;  %v12972_v3 = vld [vmem:[#allocation111_spill] sm:$0xff] }
 0x61a   : > { %v3923_v13 = vpop.xlane.xlu0 %3922  ;;  %v8190_v1 = vpop.eup %8189  ;;  %8209 = vlog2.f32 %v5040_v60  ;;  %4022 = vadd.xlane.f32.xlu1 %v8188_v28  ;;  %v5088_v56 = vadd.f32 1.0, %v5014_v34  ;;  %v12194_v50 = vadd.f32 %v5150_v8, %v5135_v14  ;;  %v5574_v14 = vmul.f32 %v12048_v45, %v12968_v2 }
 0x61b   : > { %v4029_v41 = vadd.f32 1.0, %v3923_v13  ;;  %v8192_v22 = vpop.eup %8191  ;;  %v5589_v42 = vmul.f32 %v5573_v4, %v5493_v36  ;;  %v4121_v59 = vadd.f32 %v4091_v39, %v4043_v18  ;;  %v2962_v16 = vmul.f32 0.6931472, %v8184_v21 }
 0x61c   : > { %v8194_v38 = vpop.eup %8193  ;;  %8211 = vlog2.f32 %v5088_v56  ;;  %2895 = vadd.xlane.f32.xlu0 %v12971_v32  ;;  %v5590_v60 = vmul.f32 %v5574_v14, %v5494_v19  ;;  %v5495_v43 = vsub.f32 %v12162_v10, %v12972_v3  ;;  %v2964_v8 = vmul.f32 0.6931472, %v8186_v51 }
 0x61d   : > { %v8196_v0 = vpop.eup %8195  ;;  %v4003_v57 = vpop.xlane.xlu1 %4002  ;;  %8213 = vlog2.f32 %v4029_v41  ;;  %v4093_v30 = vmul.f32 0.6931472, %v8192_v22  ;;  %v4045_v6 = vmul.f32 0.6931472, %v8190_v1  ;;  %v2914_v26 = vmul.f32 0.6931472, %v12157_v12 }
 0x61e   : > { %v2796_v62 = vpop.xlane.xlu0 %2795  ;;  %v8198_v20 = vpop.eup %8197  ;;  %2815 = vadd.xlane.f32.xlu1 %v12970_v52  ;;  %v4077_v49 = vadd.f32 1.0, %v4003_v57  ;;  %v4047_v28 = vmul.f32 0.6931472, %v8196_v0  ;;  %v5496_v36 = vsub.f32 %v12168_v58, %v12973_v63  ;;  %v2916_v21 = vmul.f32 0.6931472, %v12171_v5  ;;  %v12974_v12 = vld [vmem:[#allocation101_spill] sm:$0xff] }
 0x61f   : > { %v2902_v40 = vadd.f32 1.0, %v2796_v62  ;;  %v8200_v45 = vpop.eup %8199  ;;  %v4095_v61 = vmul.f32 0.6931472, %v8198_v20  ;;  %v4137_v1 = vadd.f32 %v4121_v59, %v4120_v27  ;;  %v2993_v56 = vadd.f32 %v2962_v16, %v2914_v26  ;;  %v12976_v52 = vld [vmem:[#allocation55_spill] sm:$0xff] }
 0x620   : > { %v8202_v25 = vpop.eup %8201  ;;  %8215 = vlog2.f32 %v4077_v49  ;;  %5614 = vadd.xlane.f32.xlu0 %v5588_v53  ;;  %v5591_v41 = vmul.f32 %v5575_v29, %v5495_v43  ;;  %v5576_v22 = vmul.f32 %v12056_v15, %v12974_v12  ;;  %v2994_v23 = vadd.f32 %v2964_v8, %v2916_v21  ;;  %v12975_v29 = vld [vmem:[#allocation112_spill] sm:$0xff] }
 0x621   : > { %v8204_v17 = vpop.eup %8203  ;;  %v2876_v34 = vpop.xlane.xlu1 %2875  ;;  %8217 = vlog2.f32 %v2902_v40  ;;  %v4122_v55 = vadd.f32 %v4093_v30, %v4045_v6  ;;  %v2918_v24 = vmul.f32 0.6931472, %v8194_v38  ;;  %v2966_v58 = vmul.f32 0.6931472, %v8200_v45 }
 0x622   : > { %v4936_v13 = vpop.xlane.xlu0 %4935  ;;  %v8206_v46 = vpop.eup %8205  ;;  %5612 = vadd.xlane.f32.xlu1 %v5587_v31  ;;  %v2950_v10 = vadd.f32 1.0, %v2876_v34  ;;  %v4123_v44 = vadd.f32 %v4095_v61, %v4047_v28  ;;  %v2920_v5 = vmul.f32 0.6931472, %v8202_v25  ;;  %v2968_v14 = vmul.f32 0.6931472, %v8204_v17 }
 0x623   : > { %v5041_v51 = vadd.f32 1.0, %v4936_v13  ;;  %v8208_v19 = vpop.eup %8207  ;;  %v4097_v4 = vmul.f32 0.6931472, %v8206_v46  ;;  %v5592_v53 = vmul.f32 %v5576_v22, %v5496_v36  ;;  %v4138_v38 = vadd.f32 %v4137_v1, %v4122_v55 }
 0x624   : > { %v8210_v39 = vpop.eup %8209  ;;  %8219 = vlog2.f32 %v2950_v10  ;;  %5618 = vadd.xlane.f32.xlu0 %v5590_v60  ;;  %v4049_v57 = vmul.f32 0.6931472, %v8208_v19  ;;  %v5497_v20 = vsub.f32 %v12174_v48, %v12975_v29  ;;  %v5577_v32 = vmul.f32 %v12104_v9, %v12976_v52 }
 0x625   : > { %v5016_v37 = vpop.xlane.xlu1 %5015  ;;  %8221 = vlog2.f32 %v5041_v51  ;;  %v5062_v15 = vmul.f32 0.6931472, %v8210_v39  ;;  %v3010_v49 = vadd.f32 %v2994_v23, %v2993_v56  ;;  %v2995_v40 = vadd.f32 %v2966_v58, %v2918_v24 }
 0x626   : > { %v3925_v31 = vpop.xlane.xlu0 %3924  ;;  %v8212_v2 = vpop.eup %8211  ;;  %5616 = vadd.xlane.f32.xlu1 %v5589_v42  ;;  %v5089_v0 = vadd.f32 1.0, %v5016_v37  ;;  %v4124_v45 = vadd.f32 %v4097_v4, %v4049_v57  ;;  %v4139_v16 = vadd.f32 %v4138_v38, %v4123_v44  ;;  %v2996_v25 = vadd.f32 %v2968_v14, %v2920_v5 }
 0x627   : > { %v4030_v18 = vadd.f32 1.0, %v3925_v31  ;;  %v5110_v62 = vmul.f32 0.6931472, %v8212_v2  ;;  %v8214_v35 = vpop.eup %8213  ;;  %v5593_v9 = vmul.f32 %v5577_v32, %v5497_v20  ;;  %v3011_v17 = vadd.f32 %v3010_v49, %v2995_v40 }
 0x628   : > { %8223 = vlog2.f32 %v5089_v0  ;;  %5622 = vadd.xlane.f32.xlu0 %v5592_v53  ;;  %v4051_v48 = vmul.f32 0.6931472, %v8214_v35  ;;  %v4140_v26 = vadd.f32 %v4139_v16, %v4124_v45 }
 0x629   : > { %v5136_v42 = vadd.f32 %v5110_v62, %v5062_v15  ;;  %v4005_v60 = vpop.xlane.xlu1 %4004  ;;  %8225 = vlog2.f32 %v4030_v18  ;;  %v3012_v46 = vadd.f32 %v3011_v17, %v2996_v25 }
 0x62a   : > { %v2798_v59 = vpop.xlane.xlu0 %2797  ;;  %v8216_v27 = vpop.eup %8215  ;;  %5620 = vadd.xlane.f32.xlu1 %v5591_v41  ;;  %v4078_v3 = vadd.f32 1.0, %v4005_v60 }
 0x62b   : > { %v2903_v43 = vadd.f32 1.0, %v2798_v59  ;;  %v5152_v8 = vadd.f32 %v12194_v50, %v5136_v42  ;;  %v4099_v30 = vmul.f32 0.6931472, %v8216_v27  ;;  %v8218_v6 = vpop.eup %8217  ;;  %v3013_v19 = vadd.f32 %v3012_v46, %v12188_v7 }
 0x62c   : > { %8227 = vlog2.f32 %v4078_v3  ;;  %v2924_v10 = vmul.f32 0.6931472, %v8218_v6 }
 0x62d   : > { %v4125_v61 = vadd.f32 %v4099_v30, %v4051_v48  ;;  %v2878_v28 = vpop.xlane.xlu1 %2877  ;;  %8229 = vlog2.f32 %v2903_v43 }
 0x62e   : > { %v4938_v34 = vpop.xlane.xlu0 %4937  ;;  %v8220_v13 = vpop.eup %8219  ;;  %5624 = vadd.xlane.f32.xlu1 %v5593_v9  ;;  %v2951_v63 = vadd.f32 1.0, %v2878_v28 }
 0x62f   : > { %v5042_v36 = vadd.f32 1.0, %v4938_v34  ;;  %v4141_v21 = vadd.f32 %v4140_v26, %v4125_v61  ;;  %v2972_v51 = vmul.f32 0.6931472, %v8220_v13  ;;  %v8222_v50 = vpop.eup %8221 }
 0x630   : > { %8231 = vlog2.f32 %v2951_v63  ;;  %v5064_v55 = vmul.f32 0.6931472, %v8222_v50 }
 0x631   : > { %v2998_v1 = vadd.f32 %v2972_v51, %v2924_v10  ;;  %v5018_v56 = vpop.xlane.xlu1 %5017  ;;  %8233 = vlog2.f32 %v5042_v36  ;;  %v12977_v36 = vld [vmem:[#allocation71_spill] sm:$0xff]  ;;  %v12979_v10 = vld [vmem:[#allocation17_spill] sm:$0xff] }
 0x632   : > { %v3927_v41 = vpop.xlane.xlu0 %3926  ;;  %v8224_v12 = vpop.eup %8223  ;;  %v5090_v22 = vadd.f32 1.0, %v5018_v56  ;;  %v12978_v46 = vsub.f32 1.0, %v12977_v36  ;;  %v12980_v51 = vsub.f32 1.0, %v12979_v10 }
 0x633   : > { %v4031_v39 = vadd.f32 1.0, %v3927_v41  ;;  %v3014_v23 = vadd.f32 %v3013_v19, %v2998_v1  ;;  %v5112_v24 = vmul.f32 0.6931472, %v8224_v12  ;;  %v8226_v58 = vpop.eup %8225 }
 0x634   : > { %8235 = vlog2.f32 %v5090_v22  ;;  %v4053_v14 = vmul.f32 0.6931472, %v8226_v58 }
 0x635   : > { %v5137_v44 = vadd.f32 %v5112_v24, %v5064_v55  ;;  %v4007_v5 = vpop.xlane.xlu1 %4006  ;;  %8237 = vlog2.f32 %v4031_v39 }
 0x636   : > { %v2800_v4 = vpop.xlane.xlu0 %2799  ;;  %v8228_v37 = vpop.eup %8227  ;;  %v4079_v31 = vadd.f32 1.0, %v4007_v5 }
 0x637   : > { %v2904_v2 = vadd.f32 1.0, %v2800_v4  ;;  %v5153_v7 = vadd.f32 %v5152_v8, %v5137_v44  ;;  %v4101_v0 = vmul.f32 0.6931472, %v8228_v37  ;;  %v8230_v18 = vpop.eup %8229 }
 0x638   : > { %8239 = vlog2.f32 %v4079_v31  ;;  %v2926_v20 = vmul.f32 0.6931472, %v8230_v18 }
 0x639   : > { %v4126_v57 = vadd.f32 %v4101_v0, %v4053_v14  ;;  %v2880_v15 = vpop.xlane.xlu1 %2879  ;;  %8241 = vlog2.f32 %v2904_v2 }
 0x63a   : > { %v4940_v62 = vpop.xlane.xlu0 %4939  ;;  %v8232_v53 = vpop.eup %8231  ;;  %v2952_v35 = vadd.f32 1.0, %v2880_v15 }
 0x63b   : > { %v5043_v38 = vadd.f32 1.0, %v4940_v62  ;;  %v4142_v29 = vadd.f32 %v4141_v21, %v4126_v57  ;;  %v2974_v52 = vmul.f32 0.6931472, %v8232_v53  ;;  %v8234_v32 = vpop.eup %8233 }
 0x63c   : > { %8243 = vlog2.f32 %v2952_v35  ;;  %v5066_v16 = vmul.f32 0.6931472, %v8234_v32 }
 0x63d   : > { %v2999_v49 = vadd.f32 %v2974_v52, %v2926_v20  ;;  %v5020_v40 = vpop.xlane.xlu1 %5019  ;;  %8245 = vlog2.f32 %v5043_v38  ;;  %v12981_v52 = vld [vmem:[#allocation96_spill] sm:$0xff] }
 0x63e   : > { %v3929_v45 = vpop.xlane.xlu0 %3928  ;;  %v8236_v42 = vpop.eup %8235  ;;  %v5091_v60 = vadd.f32 1.0, %v5020_v40  ;;  %v12982_v32 = vsub.f32 1.0, %v12981_v52 }
 0x63f   : > { %v4032_v59 = vadd.f32 1.0, %v3929_v45  ;;  %v3015_v27 = vadd.f32 %v3014_v23, %v2999_v49  ;;  %v5114_v3 = vmul.f32 0.6931472, %v8236_v42  ;;  %v8238_v43 = vpop.eup %8237 }
 0x640   : > { %8247 = vlog2.f32 %v5091_v60  ;;  %v4055_v17 = vmul.f32 0.6931472, %v8238_v43 }
 0x641   : > { %v5138_v25 = vadd.f32 %v5114_v3, %v5066_v16  ;;  %v4009_v8 = vpop.xlane.xlu1 %4008  ;;  %8249 = vlog2.f32 %v4032_v59 }
 0x642   : > { %v5595_v48 = vpop.xlane.xlu0 %5594  ;;  %v8240_v30 = vpop.eup %8239  ;;  %v4080_v6 = vadd.f32 1.0, %v4009_v8 }
 0x643   : > { %v5154_v9 = vadd.f32 %v5153_v7, %v5138_v25  ;;  %v4103_v26 = vmul.f32 0.6931472, %v8240_v30  ;;  %v8242_v61 = vpop.eup %8241  ;;  %v5691_v21 = vmul.f32 %v12978_v46, %v5595_v48 }
 0x644   : > { %8251 = vlog2.f32 %v4080_v6  ;;  %v2928_v56 = vmul.f32 0.6931472, %v8242_v61 }
 0x645   : > { %v4127_v28 = vadd.f32 %v4103_v26, %v4055_v17  ;;  %v5597_v34 = vpop.xlane.xlu1 %5596 }
 0x646   : > { %v2802_v13 = vpop.xlane.xlu0 %2801  ;;  %v8244_v63 = vpop.eup %8243  ;;  %v5692_v50 = vmul.f32 %v12980_v51, %v5597_v34 }
 0x647   : > { %v2905_v19 = vadd.f32 1.0, %v2802_v13  ;;  %v4143_v1 = vadd.f32 %v4142_v29, %v4127_v28  ;;  %v2976_v41 = vmul.f32 0.6931472, %v8244_v63  ;;  %v8246_v12 = vpop.eup %8245 }
 0x648   : > { %v5707_v22 = vadd.f32 %v5692_v50, %v5691_v21  ;;  %v5068_v4 = vmul.f32 0.6931472, %v8246_v12 }
 0x649   : > { %v3000_v39 = vadd.f32 %v2976_v41, %v2928_v56  ;;  %v2882_v23 = vpop.xlane.xlu1 %2881  ;;  %8253 = vlog2.f32 %v2905_v19  ;;  %v12983_v56 = vld [vmem:[#allocation99_spill] sm:$0xff] }
 0x64a   : > { %v4942_v55 = vpop.xlane.xlu0 %4941  ;;  %v8248_v24 = vpop.eup %8247  ;;  %v2953_v58 = vadd.f32 1.0, %v2882_v23  ;;  %v12984_v41 = vsub.f32 1.0, %v12983_v56 }
 0x64b   : > { %v5044_v44 = vadd.f32 1.0, %v4942_v55  ;;  %v3016_v5 = vadd.f32 %v3015_v27, %v3000_v39  ;;  %v5116_v37 = vmul.f32 0.6931472, %v8248_v24  ;;  %v8250_v31 = vpop.eup %8249 }
 0x64c   : > { %8255 = vlog2.f32 %v2953_v58  ;;  %v4057_v62 = vmul.f32 0.6931472, %v8250_v31 }
 0x64d   : > { %v5139_v2 = vadd.f32 %v5116_v37, %v5068_v4  ;;  %v5022_v7 = vpop.xlane.xlu1 %5021  ;;  %8257 = vlog2.f32 %v5044_v44 }
 0x64e   : > { %v3931_v14 = vpop.xlane.xlu0 %3930  ;;  %v8252_v0 = vpop.eup %8251  ;;  %v5092_v18 = vadd.f32 1.0, %v5022_v7 }
 0x64f   : > { %v4033_v57 = vadd.f32 1.0, %v3931_v14  ;;  %v5155_v15 = vadd.f32 %v5154_v9, %v5139_v2  ;;  %v4105_v53 = vmul.f32 0.6931472, %v8252_v0 }
 0x650   : > { %8259 = vlog2.f32 %v5092_v18 }
 0x651   : > { %v4128_v35 = vadd.f32 %v4105_v53, %v4057_v62  ;;  %v4011_v38 = vpop.xlane.xlu1 %4010  ;;  %8261 = vlog2.f32 %v4033_v57 }
 0x652   : > { %v5599_v29 = vpop.xlane.xlu0 %5598  ;;  %v4081_v20 = vadd.f32 1.0, %v4011_v38 }
 0x653   : > { %v5693_v49 = vmul.f32 %v12982_v32, %v5599_v29  ;;  %v4144_v40 = vadd.f32 %v4143_v1, %v4128_v35  ;;  %v8254_v45 = vpop.eup %8253 }
 0x654   : > { %8263 = vlog2.f32 %v4081_v20  ;;  %v2930_v43 = vmul.f32 0.6931472, %v8254_v45 }
 0x655   : > { %v5708_v42 = vadd.f32 %v5707_v22, %v5693_v49  ;;  %v2804_v60 = vpop.xlane.xlu1 %2803 }
 0x656   : > { %v2884_v59 = vpop.xlane.xlu0 %2883  ;;  %v8256_v27 = vpop.eup %8255  ;;  %v2906_v16 = vadd.f32 1.0, %v2804_v60 }
 0x657   : > { %v2954_v3 = vadd.f32 1.0, %v2884_v59  ;;  %v2978_v25 = vmul.f32 0.6931472, %v8256_v27  ;;  %v8258_v8 = vpop.eup %8257 }
 0x658   : > { %8265 = vlog2.f32 %v2906_v16  ;;  %v5070_v26 = vmul.f32 0.6931472, %v8258_v8 }
 0x659   : > { %v3001_v48 = vadd.f32 %v2978_v25, %v2930_v43  ;;  %8267 = vlog2.f32 %v2954_v3  ;;  %v4944_v30 = vpop.xlane.xlu1 %4943 }
 0x65a   : > { %v5024_v6 = vpop.xlane.xlu0 %5023  ;;  %v8260_v9 = vpop.eup %8259  ;;  %v5045_v20 = vadd.f32 1.0, %v4944_v30 }
 0x65b   : > { %v3017_v17 = vadd.f32 %v3016_v5, %v3001_v48  ;;  %v5118_v61 = vmul.f32 0.6931472, %v8260_v9  ;;  %v8262_v28 = vpop.eup %8261  ;;  %v5093_v52 = vadd.f32 1.0, %v5024_v6 }
 0x65c   : > { %v4059_v21 = vmul.f32 0.6931472, %v8262_v28  ;;  %8269 = vlog2.f32 %v5045_v20 }
 0x65d   : > { %v5140_v34 = vadd.f32 %v5118_v61, %v5070_v26  ;;  %v3933_v13 = vpop.xlane.xlu1 %3932  ;;  %8271 = vlog2.f32 %v5093_v52 }
 0x65e   : > { %v4013_v63 = vpop.xlane.xlu0 %4012  ;;  %v8264_v36 = vpop.eup %8263  ;;  %v4034_v32 = vadd.f32 1.0, %v3933_v13 }
 0x65f   : > { %v12229_v46 = vadd.f32 %v5155_v15, %v5140_v34  ;;  %v4107_v10 = vmul.f32 0.6931472, %v8264_v36  ;;  %v4082_v45 = vadd.f32 1.0, %v4013_v63 }
 0x660   : > { %8273 = vlog2.f32 %v4034_v32 }
 0x661   : > { %v4129_v51 = vadd.f32 %v4107_v10, %v4059_v21  ;;  %v5601_v50 = vpop.xlane.xlu1 %5600  ;;  %8275 = vlog2.f32 %v4082_v45 }
 0x662   : > { %v2806_v19 = vpop.xlane.xlu0 %2805  ;;  %v8266_v1 = vpop.eup %8265  ;;  %v5694_v12 = vmul.f32 %v12984_v41, %v5601_v50 }
 0x663   : > { %v8268_v22 = vpop.eup %8267  ;;  %v12233_v39 = vadd.f32 %v4144_v40, %v4129_v51  ;;  %v2932_v23 = vmul.f32 0.6931472, %v8266_v1 }
 0x664   : > { %v2980_v55 = vmul.f32 0.6931472, %v8268_v22  ;;  %v12235_v24 = vadd.f32 %v5708_v42, %v5694_v12  ;;  %v2907_v42 = vadd.f32 1.0, %v2806_v19 }
 0x665   : > { %v2886_v58 = vpop.xlane.xlu1 %2885 }
 0x666   : > { %v4946_v44 = vpop.xlane.xlu0 %4945  ;;  %v3002_v5 = vadd.f32 %v2980_v55, %v2932_v23  ;;  %v2955_v60 = vadd.f32 1.0, %v2886_v58  ;;  %8277 = vlog2.f32 %v2907_v42  ;;  %v8270_v26 = vpop.eup %8269 }
 0x667   : > { %v5046_v59 = vadd.f32 1.0, %v4946_v44  ;;  %v8272_v13 = vpop.eup %8271  ;;  %v5072_v19 = vmul.f32 0.6931472, %v8270_v26 }
 0x668   : > { %v12237_v4 = vadd.f32 %v3017_v17, %v3002_v5  ;;  %8279 = vlog2.f32 %v2955_v60  ;;  %v5120_v1 = vmul.f32 0.6931472, %v8272_v13 }
 0x669   : > { %v5026_v37 = vpop.xlane.xlu1 %5025  ;;  %8281 = vlog2.f32 %v5046_v59 }
 0x66a   : > { %v3935_v31 = vpop.xlane.xlu0 %3934  ;;  %v5094_v3 = vadd.f32 1.0, %v5026_v37  ;;  %v8274_v36 = vpop.eup %8273 }
 0x66b   : > { %v4035_v43 = vadd.f32 1.0, %v3935_v31  ;;  %v8276_v10 = vpop.eup %8275  ;;  %v5141_v31 = vadd.f32 %v5120_v1, %v5072_v19 }
 0x66c   : > { %8283 = vlog2.f32 %v5094_v3 }
 0x66d   : > { %v4015_v2 = vpop.xlane.xlu1 %4014  ;;  %8285 = vlog2.f32 %v4035_v43  ;;  %v5157_v45 = vadd.f32 %v12229_v46, %v5141_v31 }
 0x66e   : > { %v12239_v7 = vpop.xlane.xlu0 %5602  ;;  %v4083_v25 = vadd.f32 1.0, %v4015_v2 }
 0x670   : > { %8287 = vlog2.f32 %v4083_v25  ;;  %v8278_v50 = vpop.eup %8277 }
 0x671   : > { %v2808_v14 = vpop.xlane.xlu1 %2807 }
 0x672   : > { %v2888_v0 = vpop.xlane.xlu0 %2887  ;;  %v2908_v8 = vadd.f32 1.0, %v2808_v14  ;;  %v8280_v22 = vpop.eup %8279 }
 0x673   : > { %v2956_v6 = vadd.f32 1.0, %v2888_v0  ;;  %v8282_v55 = vpop.eup %8281 }
 0x674   : > { %8289 = vlog2.f32 %v2908_v8  ;;  %v5074_v25 = vmul.f32 0.6931472, %v8282_v55 }
 0x675   : > { %v4948_v18 = vpop.xlane.xlu1 %4947  ;;  %8291 = vlog2.f32 %v2956_v6 }
 0x676   : > { %v5028_v57 = vpop.xlane.xlu0 %5027  ;;  %v5047_v9 = vadd.f32 1.0, %v4948_v18  ;;  %v8284_v44 = vpop.eup %8283 }
 0x677   : > { %v5095_v17 = vadd.f32 1.0, %v5028_v57  ;;  %v8286_v37 = vpop.eup %8285  ;;  %v4061_v57 = vmul.f32 0.6931472, %v8274_v36  ;;  %v5122_v52 = vmul.f32 0.6931472, %v8284_v44  ;;  %v12987_v36 = vld [vmem:[#allocation15_spill] sm:$0xff] }
 0x678   : > { %8293 = vlog2.f32 %v5047_v9  ;;  %v12985_v9 = vld [vmem:[#allocation43_spill] sm:$0xff] }
 0x679   : > { %v3937_v15 = vpop.xlane.xlu1 %3936  ;;  %8295 = vlog2.f32 %v5095_v17  ;;  %v12986_v17 = vsub.f32 1.0, %v12985_v9  ;;  %v12993_v9 = vld [vmem:[#allocation12_spill] sm:$0xff] }
 0x67a   : > { %v4017_v62 = vpop.xlane.xlu0 %4016  ;;  %v4036_v61 = vadd.f32 1.0, %v3937_v15  ;;  %v8288_v18 = vpop.eup %8287  ;;  %v4109_v15 = vmul.f32 0.6931472, %v8276_v10 }
 0x67b   : > { %v4084_v63 = vadd.f32 1.0, %v4017_v62  ;;  %v5695_v26 = vmul.f32 %v12986_v17, %v12239_v7  ;;  %v12994_v17 = vsub.f32 1.0, %v12993_v9 }
 0x67c   : > { %8297 = vlog2.f32 %v4036_v61  ;;  %v4130_v43 = vadd.f32 %v4109_v15, %v4061_v57 }
 0x67d   : > { %v12241_v53 = vpop.xlane.xlu1 %5604  ;;  %8299 = vlog2.f32 %v4084_v63 }
 0x67e   : > { %v2810_v35 = vpop.xlane.xlu0 %2809 }
 0x67f   : > { %v2909_v21 = vadd.f32 1.0, %v2810_v35  ;;  %v8290_v35 = vpop.eup %8289 }
 0x680   : > { %v8292_v20 = vpop.eup %8291  ;;  %v2936_v63 = vmul.f32 0.6931472, %v8290_v35 }
 0x681   : > { %v2890_v38 = vpop.xlane.xlu1 %2889  ;;  %8301 = vlog2.f32 %v2909_v21  ;;  %v12988_v21 = vsub.f32 1.0, %v12987_v36 }
 0x682   : > { %v4950_v29 = vpop.xlane.xlu0 %4949  ;;  %v2957_v51 = vadd.f32 1.0, %v2890_v38  ;;  %v2982_v38 = vmul.f32 0.6931472, %v8280_v22 }
 0x683   : > { %v5048_v56 = vadd.f32 1.0, %v4950_v29  ;;  %v5696_v10 = vmul.f32 %v12988_v21, %v12241_v53  ;;  %v5710_v53 = vadd.f32 %v12235_v24, %v5695_v26 }
 0x684   : > { %8303 = vlog2.f32 %v2957_v51 }
 0x685   : > { %v5030_v49 = vpop.xlane.xlu1 %5029  ;;  %8305 = vlog2.f32 %v5048_v56  ;;  %v5711_v15 = vadd.f32 %v5710_v53, %v5696_v10 }
 0x686   : > { %v3939_v40 = vpop.xlane.xlu0 %3938  ;;  %v5096_v23 = vadd.f32 1.0, %v5030_v49  ;;  %v8294_v49 = vpop.eup %8293 }
 0x687   : > { %v4037_v2 = vadd.f32 1.0, %v3939_v40  ;;  %v2934_v40 = vmul.f32 0.6931472, %v8278_v50  ;;  %v8296_v3 = vpop.eup %8295 }
 0x688   : > { %8307 = vlog2.f32 %v5096_v23  ;;  %v8298_v8 = vpop.eup %8297  ;;  %v5124_v22 = vmul.f32 0.6931472, %v8296_v3 }
 0x689   : > { %v3003_v6 = vadd.f32 %v2982_v38, %v2934_v40  ;;  %v8300_v46 = vpop.eup %8299 }
 0x68a   : > { %v12243_v16 = vpop.xlane.xlu0 %5606 }
 0x68b   : > { %v4019_v27 = vpop.xlane.xlu1 %4018  ;;  %v12254_v13 = vpop.eup %8301 }
 0x68c   : > { %v4085_v62 = vadd.f32 1.0, %v4019_v27 }
 0x68e   : > { %v12245_v30 = vpop.xlane.xlu0 %2891  ;;  %v12259_v7 = vpop.eup %8303 }
 0x68f   : > { %v2812_v48 = vpop.xlane.xlu1 %2811  ;;  %v2958_v61 = vadd.f32 1.0, %v12245_v30  ;;  %v2984_v30 = vmul.f32 0.6931472, %v8292_v20 }
 0x690   : > { %v2910_v42 = vadd.f32 1.0, %v2812_v48  ;;  %v4111_v48 = vmul.f32 0.6931472, %v8288_v18 }
 0x692   : > { %v5032_v34 = vpop.xlane.xlu0 %5031 }
 0x693   : > { %v4952_v28 = vpop.xlane.xlu1 %4951  ;;  %v5097_v5 = vadd.f32 1.0, %v5032_v34  ;;  %v4063_v34 = vmul.f32 0.6931472, %v8286_v37 }
 0x694   : > { %v5049_v58 = vadd.f32 1.0, %v4952_v28  ;;  %v5142_v28 = vadd.f32 %v5122_v52, %v5074_v25 }
 0x695   : > { %v4131_v31 = vadd.f32 %v4111_v48, %v4063_v34 }
 0x696   : > { %v4021_v12 = vpop.xlane.xlu0 %4020  ;;  %8309 = vlog2.f32 %v5049_v58  ;;  %v4146_v58 = vadd.f32 %v12233_v39, %v4130_v43  ;;  %v5158_v37 = vadd.f32 %v5157_v45, %v5142_v28 }
 0x697   : > { %v3941_v41 = vpop.xlane.xlu1 %3940  ;;  %8311 = vlog2.f32 %v5097_v5  ;;  %v4086_v32 = vadd.f32 1.0, %v4021_v12  ;;  %v5076_v12 = vmul.f32 0.6931472, %v8294_v49  ;;  %v3019_v5 = vadd.f32 %v12237_v4, %v3003_v6  ;;  %v12991_v49 = vld [vmem:[#allocation81_spill] sm:$0xff] }
 0x698   : > { %v4038_v29 = vadd.f32 1.0, %v3941_v41  ;;  %8313 = vlog2.f32 %v4037_v2  ;;  %v8306_v41 = vpop.eup %8305  ;;  %v4065_v4 = vmul.f32 0.6931472, %v8298_v8  ;;  %v12992_v45 = vsub.f32 1.0, %v12991_v49 }
 0x699   : > { %8315 = vlog2.f32 %v4085_v62  ;;  %v8308_v55 = vpop.eup %8307  ;;  %v12989_v62 = vld [vmem:[#allocation33_spill] sm:$0xff]  ;;  %v5143_v24 = vadd.f32 %v5124_v22, %v5076_v12  ;;  %v2938_v12 = vmul.f32 0.6931472, %v12254_v13  ;;  %v2986_v22 = vmul.f32 0.6931472, %v12259_v7 }
 0x69a   : > { %v2814_v0 = vpop.xlane.xlu0 %2813  ;;  %8317 = vlog2.f32 %v4038_v29  ;;  %v12990_v35 = vsub.f32 1.0, %v12989_v62  ;;  %v3004_v29 = vadd.f32 %v2984_v30, %v2936_v63  ;;  %v5126_v20 = vmul.f32 0.6931472, %v8308_v55  ;;  %v12995_v55 = vld [vmem:[#allocation84_spill] sm:$0xff] }
 0x69b   : > { %v12247_v14 = vpop.xlane.xlu1 %5608  ;;  %8319 = vlog2.f32 %v4086_v32  ;;  %v2911_v23 = vadd.f32 1.0, %v2814_v0  ;;  %v4113_v32 = vmul.f32 0.6931472, %v8300_v46  ;;  %v5159_v34 = vadd.f32 %v5158_v37, %v5143_v24 }
 0x69c   : > { %8321 = vlog2.f32 %v2910_v42  ;;  %v5697_v0 = vmul.f32 %v12990_v35, %v12243_v16  ;;  %v5698_v40 = vmul.f32 %v12992_v45, %v12247_v14  ;;  %v3020_v28 = vadd.f32 %v3019_v5, %v3004_v29  ;;  %v12997_v35 = vld [vmem:[#allocation83_spill] sm:$0xff] }
 0x69d   : > { %v4132_v36 = vadd.f32 %v4113_v32, %v4065_v4  ;;  %v3005_v32 = vadd.f32 %v2986_v22, %v2938_v12 }
 0x69e   : > { %v4954_v59 = vpop.xlane.xlu0 %4953  ;;  %v5712_v6 = vadd.f32 %v5711_v15, %v5697_v0  ;;  %v12998_v0 = vsub.f32 1.0, %v12997_v35 }
 0x69f   : > { %v2894_v60 = vpop.xlane.xlu1 %2893  ;;  %v5050_v27 = vadd.f32 1.0, %v4954_v59  ;;  %v5078_v59 = vmul.f32 0.6931472, %v8306_v41 }
 0x6a0   : > { %v2959_v51 = vadd.f32 1.0, %v2894_v60  ;;  %v8310_v44 = vpop.eup %8309  ;;  %v4147_v60 = vadd.f32 %v4146_v58, %v4131_v31  ;;  %v5713_v10 = vadd.f32 %v5712_v6, %v5698_v40  ;;  %v12996_v58 = vsub.f32 1.0, %v12995_v55 }
 0x6a1   : > { %8323 = vlog2.f32 %v5050_v27  ;;  %v8312_v57 = vpop.eup %8311  ;;  %v5080_v3 = vmul.f32 0.6931472, %v8310_v44  ;;  %v5144_v48 = vadd.f32 %v5126_v20, %v5078_v59  ;;  %v12999_v40 = vsub.f32 1.0, %v11909_v11 }
 0x6a2   : > { %v3943_v19 = vpop.xlane.xlu0 %3942  ;;  %8325 = vlog2.f32 %v2958_v61  ;;  %v8314_v39 = vpop.eup %8313  ;;  %v5128_v16 = vmul.f32 0.6931472, %v8312_v57  ;;  %v4148_v13 = vadd.f32 %v4147_v60, %v4132_v36  ;;  %v13000_v60 = vsub.f32 1.0, %v11923_v33 }
 0x6a3   : > { %v5034_v50 = vpop.xlane.xlu1 %5033  ;;  %v4039_v56 = vadd.f32 1.0, %v3943_v19  ;;  %v8316_v52 = vpop.eup %8315  ;;  %v4067_v21 = vmul.f32 0.6931472, %v8314_v39  ;;  %v5160_v5 = vadd.f32 %v5159_v34, %v5144_v48  ;;  %v3021_v48 = vadd.f32 %v3020_v28, %v3005_v32 }
 0x6a4   : > { %v5098_v1 = vadd.f32 1.0, %v5034_v50  ;;  %v8318_v42 = vpop.eup %8317  ;;  %v4115_v14 = vmul.f32 0.6931472, %v8316_v52  ;;  %v5145_v50 = vadd.f32 %v5128_v16, %v5080_v3 }
 0x6a5   : > { %v8320_v27 = vpop.eup %8319  ;;  %v4069_v19 = vmul.f32 0.6931472, %v8318_v42 }
 0x6a6   : > { %8327 = vlog2.f32 %v5098_v1  ;;  %v5611_v18 = vpop.xlane.xlu0 %5610  ;;  %v8322_v46 = vpop.eup %8321  ;;  %v4117_v30 = vmul.f32 0.6931472, %v8320_v27  ;;  %v4133_v37 = vadd.f32 %v4115_v14, %v4067_v21  ;;  %v5161_v29 = vadd.f32 %v5160_v5, %v5145_v50 }
 0x6a7   : > { %8329 = vlog2.f32 %v2959_v51  ;;  %v4023_v2 = vpop.xlane.xlu1 %4022  ;;  %v5699_v26 = vmul.f32 %v12994_v17, %v5611_v18  ;;  %v2940_v57 = vmul.f32 0.6931472, %v8322_v46 }
 0x6a8   : > { %8331 = vlog2.f32 %v4039_v56  ;;  %v4087_v38 = vadd.f32 1.0, %v4023_v2  ;;  %v4134_v7 = vadd.f32 %v4117_v30, %v4069_v19  ;;  %v4149_v59 = vadd.f32 %v4148_v13, %v4133_v37 }
 0x6a9   : > { %8333 = vlog2.f32 %v2911_v23  ;;  %v5714_v23 = vadd.f32 %v5713_v10, %v5699_v26 }
 0x6aa   : > { %8335 = vlog2.f32 %v4087_v38  ;;  %v2896_v25 = vpop.xlane.xlu0 %2895  ;;  %v4150_v17 = vadd.f32 %v4149_v59, %v4134_v7  ;;  %v3009_v59 = vld [vmem:[#allocation2] sm:$0x1] }
 0x6ab   : > { %v2816_v43 = vpop.xlane.xlu1 %2815  ;;  %v2960_v8 = vadd.f32 1.0, %v2896_v25  ;;  %v8324_v63 = vpop.eup %8323 }
 0x6ac   : > { %v2912_v61 = vadd.f32 1.0, %v2816_v43  ;;  %v8326_v51 = vpop.eup %8325  ;;  %v5082_v31 = vmul.f32 0.6931472, %v8324_v63  ;;  %v13001_v63 = vsub.f32 1.0, %v11933_v54 }
 0x6ad   : > { %v2988_v15 = vmul.f32 0.6931472, %v8326_v51 }
 0x6ae   : > { %8337 = vlog2.f32 %v2912_v61  ;;  %v5615_v56 = vpop.xlane.xlu0 %5614 }
 0x6af   : > { %8339 = vlog2.f32 %v2960_v8  ;;  %v5613_v1 = vpop.xlane.xlu1 %5612  ;;  %v5701_v38 = vmul.f32 %v12998_v0, %v5615_v56  ;;  %v3006_v25 = vadd.f32 %v2988_v15, %v2940_v57  ;;  %v5147_v57 = vld [vmem:[#allocation4] sm:$0x1] }
 0x6b0   : > { %v8328_v41 = vpop.eup %8327  ;;  %v5700_v53 = vmul.f32 %v12996_v58, %v5613_v1  ;;  %v13002_v1 = vsub.f32 1.0, %v11938_v47  ;;  %v13003_v58 = vld [vmem:[#allocation16_spill] sm:$0xff] }
 0x6b1   : > { %v8330_v44 = vpop.eup %8329  ;;  %v5130_v2 = vmul.f32 0.6931472, %v8328_v41  ;;  %v3022_v19 = vadd.f32 %v3021_v48, %v3006_v25 }
 0x6b2   : > { %v8332_v18 = vpop.eup %8331  ;;  %v5715_v62 = vadd.f32 %v5714_v23, %v5700_v53  ;;  %v5619_v52 = vpop.xlane.xlu0 %5618  ;;  %v2990_v49 = vmul.f32 0.6931472, %v8330_v44  ;;  %v13004_v53 = vsub.f32 1.0, %v13003_v58 }
 0x6b3   : > { %v8334_v39 = vpop.eup %8333  ;;  %v5146_v24 = vadd.f32 %v5130_v2, %v5082_v31  ;;  %v5617_v20 = vpop.xlane.xlu1 %5616  ;;  %v4071_v16 = vmul.f32 0.6931472, %v8332_v18  ;;  %v5703_v9 = vmul.f32 %v13000_v60, %v5619_v52 }
 0x6b4   : > { %v8336_v4 = vpop.eup %8335  ;;  %v5716_v45 = vadd.f32 %v5715_v62, %v5701_v38  ;;  %v5702_v42 = vmul.f32 %v12999_v40, %v5617_v20  ;;  %v2942_v27 = vmul.f32 0.6931472, %v8334_v39  ;;  %v5755_v20 = vld [vmem:[#allocation6] sm:$0x1] }
 0x6b5   : > { %v5162_v3 = vadd.f32 %v5161_v29, %v5146_v24  ;;  %v4119_v43 = vmul.f32 0.6931472, %v8336_v4  ;;  %v4136_v29 = vld [vmem:[#allocation3] sm:$0x1] }
 0x6b6   : > { %v5717_v6 = vadd.f32 %v5716_v45, %v5702_v42  ;;  %v5623_v46 = vpop.xlane.xlu0 %5622  ;;  %v3007_v14 = vadd.f32 %v2990_v49, %v2942_v27  ;;  %v5756_v45 = vmax.f32 %v5755_v20, 1e-06 }
 0x6b7   : > { %v5163_v26 = vrot.slane %v5162_v3, 4  ;;  %v4135_v61 = vadd.f32 %v4119_v43, %v4071_v16  ;;  %v5621_v8 = vpop.xlane.xlu1 %5620  ;;  %v5705_v56 = vmul.f32 %v13002_v1, %v5623_v46 }
 0x6b8   : > { %v8338_v34 = vpop.eup %8337  ;;  %v5718_v11 = vadd.f32 %v5717_v6, %v5703_v9  ;;  %v5704_v36 = vmul.f32 %v13001_v63, %v5621_v8  ;;  %v3023_v23 = vadd.f32 %v3022_v19, %v3007_v14  ;;  %8341 = vrcp.f32 %v5756_v45 }
 0x6b9   : > { %v8340_v21 = vpop.eup %8339  ;;  %v5164_v10 = vadd.f32 %v5163_v26, %v5162_v3  ;;  %v4151_v51 = vadd.f32 %v4150_v17, %v4135_v61  ;;  %v2944_v50 = vmul.f32 0.6931472, %v8338_v34  ;;  %v5690_v3 = vld [vmem:[#allocation5] sm:$0x1]  ;;  %v13005_v14 = vlaneseq }
 0x6ba   : > { %v2992_v30 = vmul.f32 0.6931472, %v8340_v21  ;;  %v5719_v33 = vadd.f32 %v5718_v11, %v5704_v36  ;;  %v13006_v36 = vld [vmem:[#allocation78_spill] sm:$0xff] }
 0x6bb   : > { %v5165_v41 = vrot.slane %v5164_v10, 2  ;;  %v4152_v12 = vrot.slane %v4151_v51, 4  ;;  %v5625_v22 = vpop.xlane.xlu1 %5624  ;;  %v5760_v11 = vand.u32 127, %v13005_v14 }
 0x6bc   : > { %v3008_v28 = vadd.f32 %v2992_v30, %v2944_v50  ;;  %v5720_v55 = vadd.f32 %v5719_v33, %v5705_v56  ;;  %v5706_v54 = vmul.f32 %v13004_v53, %v5625_v22 }
 0x6bd   : > { %v5166_v44 = vadd.f32 %v5165_v41, %v5164_v10  ;;  %v4153_v5 = vadd.f32 %v4152_v12, %v4151_v51  ;;  %vm5767_vm6 = vcmp.eq.s32.totalorder %v5760_v11, 2  ;;  %vm5764_vm7 = vcmp.eq.s32.totalorder %v5760_v11, 1 }
 0x6be   : > { %v3024_v37 = vadd.f32 %v3023_v23, %v3008_v28  ;;  %v5721_v31 = vadd.f32 %v5720_v55, %v5706_v54  ;;  %vm5761_vm10 = vcmp.eq.s32.totalorder %v5760_v11, 0 }
 0x6bf   : > { %v5167_v2 = vrot.slane %v5166_v44, 1  ;;  %v4154_v18 = vrot.slane %v4153_v5, 2 }
 0x6c0   : > { %v3025_v15 = vrot.slane %v3024_v37, 4  ;;  %v5722_v62 = vrot.slane %v5721_v31, 4 }
 0x6c1   : > { %v5168_v47 = vadd.f32 %v5167_v2, %v5166_v44  ;;  %v4155_v35 = vadd.f32 %v4154_v18, %v4153_v5 }
 0x6c2   : > { %v3026_v0 = vadd.f32 %v3025_v15, %v3024_v37  ;;  %v5723_v38 = vadd.f32 %v5722_v62, %v5721_v31  ;;  %v8342_v9 = vpop.eup %8341 }
 0x6c3   : > { %v5169_v39 = vadd.f32 %v5168_v47, %v5147_v57  ;;  %v4156_v13 = vrot.slane %v4155_v35, 1 }
 0x6c4   : > { %v3027_v7 = vrot.slane %v3026_v0, 2  ;;  %v5724_v24 = vrot.slane %v5723_v38, 2 }
 0x6c5   : > { %5170 = vst.msk [vmem:[#allocation4] sm:$0x1] %vm405_vm4, %v5169_v39  ;;  %v4157_v52 = vadd.f32 %v4156_v13, %v4155_v35 }
 0x6c6   : > { %v3028_v4 = vadd.f32 %v3027_v7, %v3026_v0  ;;  %v5725_v32 = vadd.f32 %v5724_v24, %v5723_v38 }
 0x6c7   : > { %v4158_v49 = vadd.f32 %v4157_v52, %v4136_v29 }
 0x6c8   : > { %v3029_v40 = vrot.slane %v3028_v4, 1  ;;  %v5726_v42 = vrot.slane %v5725_v32, 1 }
 0x6c9   : > { %4159 = vst.msk [vmem:[#allocation3] sm:$0x1] %vm405_vm4, %v4158_v49 }
 0x6ca   : > { %v3030_v16 = vadd.f32 %v3029_v40, %v3028_v4  ;;  %v5727_v43 = vadd.f32 %v5726_v42, %v5725_v32 }
 0x6cc   : > { %v3031_v25 = vadd.f32 %v3030_v16, %v3009_v59  ;;  %v5728_v27 = vadd.f32 %v5727_v43, %v5690_v3  ;;  %v5768_v6 = vld [vmem:[#allocation4] sm:$0x1] }
 0x6cd   : > { %v5769_v60 = vmul.f32 0.0078125, %v5768_v6 }
 0x6ce   : > { %3033 = vst.msk [vmem:[#allocation2] sm:$0x1] %vm405_vm4, %v3031_v25  ;;  %5729 = vst.msk [vmem:[#allocation5] sm:$0x1] %vm405_vm4, %v5728_v27 }
 0x6cf   : > { %5772 = vperm.xlu0 %7380, %v5769_v60  }
 0x6d0   : > { %v5765_v46 = vld [vmem:[#allocation3] sm:$0x1] }
 0x6d1   : > { %v5766_v34 = vmul.f32 0.0078125, %v5765_v46 }
 0x6d5   : > { %v5762_v17 = vld [vmem:[#allocation2] sm:$0x1]  ;;  %v5754_v26 = vld [vmem:[#allocation5] sm:$0x1] }
 0x6d6   : > { %v5763_v61 = vmul.f32 0.0078125, %v5762_v17  ;;  %v5758_v8 = vmul.f32 %v8342_v9, %v5754_v26 }
 0x6d8   : > { %5801 = vperm.xlu0 %7380, %v5763_v61   ;;  %5781 = vperm.xlu1 %7379, %v5758_v8  }
 0x6dc   : > { %5791 = vperm.xlu1 %7379, %v5766_v34  }
 0x74e   : > { %v5773_v48 = vpop.permute.xlu0 %5772 }
 0x74f   : > { %v5778_v51 = vrot.slane %v5773_v48, %v13006_v36 }
 0x757   : > { %v5782_v63 = vpop.permute.xlu1 %5781  ;;  %v5802_v10 = vpop.permute.xlu0 %5801 }
 0x758   : > { %v5787_v21 = vrot.slane %v5782_v63, %v13006_v36  ;;  %v5807_v30 = vrot.slane %v5802_v10, %v13006_v36 }
 0x75a   : > { %v5788_v33 = vsel %vm5767_vm6, %v5778_v51, %v5787_v21 }
 0x75b   : > { %v5792_v50 = vpop.permute.xlu1 %5791 }
 0x75c   : > { %v5797_v19 = vrot.slane %v5792_v50, %v13006_v36 }
 0x75e   : > { %v5798_v1 = vsel %vm5764_vm7, %v5797_v19, %v5788_v33 }
 0x75f   : > { %v5808_v56 = vsel %vm5761_vm10, %v5807_v30, %v5798_v1 }
 0x760   : > { %5810 = vst.msk [vmem:[%s372_s14] sm:$0x1] %vm5809_vm11, %v5808_v56 }
 0x761   : > { %8417 = shalt.err (!%p8414_p5)
}
 0x762   : > { %s8418_s24 = scalar_lea.hbm %s12302_s0, 16  ;;  %s8422_s23 = scalar_lea.hbm %s12357_s8, 32 }
 0x763   : > { %p8419_p6 = scmp.ne.s32.totalorder %s12302_s0, %s8418_s24  ;;  %p8423_p10 = scmp.lt.u32.totalorder %s12302_s0, %s12357_s8 }
 0x764   : > { %p8424_p11 = scmp.lt.u32.totalorder %s8422_s23, %s8418_s24  ;;  %p8426_p13 = scmp.lt.u32.totalorder %s8418_s24, %s12302_s0 }
 0x765   : > { %p8420_p7 = pnand %p8419_p6, %p8578_p4 }
 0x766   : > { %p8425_p12 = por %p8424_p11, %p8423_p10 }
 0x767   : > { %p8421_p9 = pneg %p8420_p7 }
 0x768   : > { %p8427_p0 = por %p8426_p13, %p8425_p12 }
 0x76a   : > { %p8428_p1 = pnand %p8427_p0, %p8421_p9 }
 0x76c   : > { %8431 = shalt.err (!%p8428_p1)
}
 0x76d   : > { %7196 = dma.vmem_to_hbm [thread:$0]  (%p8578_p4), %s12304_s16, 16, %s12302_s0, %s5812_s30  }
 0x76e PF: > { %p7202_p2 = scmp.ge.s32.totalorder %s8482_s10, 2  ;;  %s5836_s20 = sand.u32 1, %s8462_s27  }
 0x76f   : > { %s5837_s21 = scalar_lea.sflag [#allocation8], %s5836_s20 }
 0x770   : > { %p7199_p3 = pnand %p7202_p2, %p8585_p8 }
 0x772   : > { %8457 = dma.done.wait (!%p7199_p3), %s5837_s21, 16  }
 0x773   : > { %8459 = vsyncadd (!%p7199_p3), %s5837_s21, 4294967280  ;;  %s21_s10 = sadd.s32 1, %s8482_s10   ;;  %s13007_s27 = smov %s8466_s28 }
 0x774   : > { %p18_p5 = scmp.ge.s32.totalorder %s21_s10, 4   ;;  %s13008_s28 = smov %s8470_s29 }
 0x775   : > { %s13009_s29 = smov %s8591_s18  ;;  %s13010_s30 = smov %s8478_s9 }
 0x776   : > { %s13011_s9 = smov %s13013_s13  ;;  %20 = sbr.rel (!%p18_p5) target bundleno = 7 (0x7), region = 100 }
 0x77d   :  { %5841 = vsyncpa [#allocation8], 1 }
 0x77e   :  { %5843 = vsyncpa [#allocation8 + $0x1], 1 }

</bundles_post_ra>
